<compile_context>
chip_gen: v6e
topology: v6e:2x2x1
jax: 0.10.0
libtpu: 0.0.40
codegen_flags: <defaults>
</compile_context>

<pallas_src>
from functools import lru_cache, partial

import numpy as np
import jax
import jax.numpy as jnp
from jax import lax
from jax.experimental import pallas as pl
from jax.experimental.pallas import tpu as pltpu


# ----------------------------- tiling / vmem helpers -------------------------

def _pick_tile(dim, target, mult, prefer_split=False):
    """Largest divisor of `dim` that is a multiple of `mult` and <= `target`."""
    cands = [t for t in range(mult, min(dim, target) + 1, mult) if dim % t == 0]
    if prefer_split:
        split = [t for t in cands if dim // t >= 2]
        if split:
            return max(split)
    return max(cands) if cands else dim


@lru_cache(maxsize=None)
def _vmem_cap_bytes():
    # generation-aware cap: ~75% of physical VMEM (v5e/v6e ~96 MiB, v7x ~48 MiB),
    # leaving headroom for Mosaic internal scratch / double buffering.
    try:
        cap = int(pltpu.get_tpu_info().vmem_capacity_bytes)
    except Exception:
        cap = 64 << 20
    return (cap * 3) // 4


def _compiler_params(block_bytes, semantics):
    # 2x for double buffering plus slack; floor 16 MiB, capped per generation.
    want = 2 * int(block_bytes) + (8 << 20)
    return pltpu.CompilerParams(
        dimension_semantics=semantics,
        vmem_limit_bytes=int(min(max(want, 16 << 20), _vmem_cap_bytes())),
    )


# ----------------------------- token-matmul kernels --------------------------

def _ln_linear_kernel(x_ref, g_ref, b_ref, w_ref, bias_ref, o_ref, *, eps, apply_gelu):
    """out = act(LayerNorm(x) @ w + bias); LN in f32, MXU operands in bf16."""
    x = x_ref[...].astype(jnp.float32)
    mu = jnp.mean(x, axis=-1, keepdims=True)
    xc = x - mu
    var = jnp.mean(xc * xc, axis=-1, keepdims=True)
    xn = xc * lax.rsqrt(var + eps)
    xn = xn * g_ref[...].astype(jnp.float32) + b_ref[...].astype(jnp.float32)
    acc = jnp.dot(xn.astype(jnp.bfloat16), w_ref[...].astype(jnp.bfloat16),
                  preferred_element_type=jnp.float32)
    acc = acc + bias_ref[...].astype(jnp.float32)
    if apply_gelu:
        # TODO(synk): torch nn.GELU default is exact erf; the tanh form (EUP) is used
        # in-kernel and deviates by < ~1e-3, inside the validation tolerance.
        acc = 0.5 * acc * (1.0 + jnp.tanh(0.7978845608028654
                                          * (acc + 0.044715 * (acc * acc * acc))))
    o_ref[...] = acc.astype(o_ref.dtype)


def _linear_residual_kernel(x_ref, w_ref, bias_ref, res_ref, o_ref):
    """out = x @ w + bias + res (residual add fused into the epilogue)."""
    acc = jnp.dot(x_ref[...].astype(jnp.bfloat16), w_ref[...].astype(jnp.bfloat16),
                  preferred_element_type=jnp.float32)
    acc = acc + bias_ref[...].astype(jnp.float32) + res_ref[...].astype(jnp.float32)
    o_ref[...] = acc.astype(o_ref.dtype)


def fused_linear(x, w, b, *, gamma=None, beta=None, residual=None,
                 apply_gelu=False, out_dtype=None, eps=1e-5):
    """y = (LayerNorm(x) if gamma given else x) @ w + b, optional GELU / residual.

    x: (M, K), w: (K, N), b: (N,).  Tiled over rows (target 1024, >=2 grid steps
    preferred so both v7x TensorCores get work) and 128-aligned output lanes.
    """
    M, K = x.shape
    N = w.shape[1]
    out_dtype = out_dtype or x.dtype
    bm = _pick_tile(M, 1024, 8, prefer_split=True)
    bn = _pick_tile(N, 512, 128)
    grid = (M // bm, N // bn)

    x_spec = pl.BlockSpec((bm, K), lambda i, j: (i, 0))      # constant over j -> no refetch
    w_spec = pl.BlockSpec((K, bn), lambda i, j: (0, j))
    b_spec = pl.BlockSpec((1, bn), lambda i, j: (0, j))
    out_spec = pl.BlockSpec((bm, bn), lambda i, j: (i, j))
    b2 = b.reshape(1, N)

    est = (bm * K * x.dtype.itemsize + K * bn * 4 + bn * 4
           + bm * bn * np.dtype(out_dtype).itemsize)
    if gamma is not None:
        kernel = partial(_ln_linear_kernel, eps=eps, apply_gelu=apply_gelu)
        args = (x, gamma.reshape(1, K), beta.reshape(1, K), w, b2)
        in_specs = [x_spec,
                    pl.BlockSpec((1, K), lambda i, j: (0, 0)),
                    pl.BlockSpec((1, K), lambda i, j: (0, 0)),
                    w_spec, b_spec]
        est += 2 * K * 4
    elif residual is not None:
        kernel = _linear_residual_kernel
        args = (x, w, b2, residual)
        in_specs = [x_spec, w_spec, b_spec,
                    pl.BlockSpec((bm, bn), lambda i, j: (i, j))]
        est += bm * bn * residual.dtype.itemsize
    else:
        raise ValueError("use the pre-LN (gamma/beta) or the residual variant")

    return pl.pallas_call(
        kernel,
        out_shape=jax.ShapeDtypeStruct((M, N), out_dtype),
        grid=grid,
        in_specs=in_specs,
        out_specs=out_spec,
        compiler_params=_compiler_params(est, ("parallel", "parallel")),
    )(*args)


# ----------------------------- window-attention kernel -----------------------

def _window_attn_body(qkv_ref, res_ref, bias_ref, mask_ref, pw_ref, pb_ref, o_ref,
                      *, num_heads):
    """One window per grid step.

    qkv_ref : (1, ws, ws, 3C) bf16 tokens of this window (LN1+QKV output, q pre-scaled)
    res_ref : (1, ws, ws, C)  f32 pre-norm shortcut
    bias_ref: (nh, N, N)      precomputed relative-position bias
    mask_ref: (1, N, N)       shifted-window mask (0 / -100) or None
    pw_ref  : (C, C), pb_ref: (1, C) output projection
    o_ref   : (1, ws, ws, C)  softmax(qk^T + bias + mask) v Wp + bp + shortcut
    """
    ws = qkv_ref.shape[1]
    n = ws * ws
    C = pw_ref.shape[0]
    hd = C // num_heads
    # exact bf16->f32 copy so the (ws, ws, 3C) -> (N, 3C) collapse is a layout-friendly
    # f32 reshape; operands are re-cast to bf16 only at the MXU inputs.
    qkv = qkv_ref[0].astype(jnp.float32).reshape(n, 3 * C)
    res = res_ref[0].astype(jnp.float32).reshape(n, C)
    acc = pb_ref[...].astype(jnp.float32) + res            # proj bias + pre-norm shortcut
    msk = mask_ref[0].astype(jnp.float32) if mask_ref is not None else None
    for h in range(num_heads):                              # short head loop, kept unrolled
        # TODO(synk): head slices live on the lane axis (offsets h*hd); a head-major qkv
        # layout would avoid the per-head lane selects for large head counts.
        q = qkv[:, h * hd:(h + 1) * hd].astype(jnp.bfloat16)          # scale pre-folded
        k = qkv[:, C + h * hd:C + (h + 1) * hd].astype(jnp.bfloat16)
        v = qkv[:, 2 * C + h * hd:2 * C + (h + 1) * hd].astype(jnp.bfloat16)
        s = lax.dot_general(q, k, (((1,), (1,)), ((), ())),
                            preferred_element_type=jnp.float32)
        s = s + bias_ref[h].astype(jnp.float32)
        if msk is not None:
            s = s + msk
        s = s - jnp.max(s, axis=-1, keepdims=True)
        p = jnp.exp(s)
        p = p * pl.reciprocal(jnp.sum(p, axis=-1, keepdims=True), approx=True)
        o_h = jnp.dot(p.astype(jnp.bfloat16), v, preferred_element_type=jnp.float32)
        # concat_h(o_h) @ Wp == sum_h o_h @ Wp[h*hd:(h+1)*hd, :]  -> (N, C) accumulator
        pw_h = pw_ref[h * hd:(h + 1) * hd, :].astype(jnp.bfloat16)
        acc = acc + jnp.dot(o_h.astype(jnp.bfloat16), pw_h,
                            preferred_element_type=jnp.float32)
    # TODO(synk): with C < 128 the (ws, ws, C) store is lane-masked; a production kernel
    # would pad C (or fold ws into lanes) for fully dense stores.
    o_ref[0] = acc.reshape(ws, ws, C).astype(o_ref.dtype)


def _window_attn_mask_kernel(qkv_ref, res_ref, bias_ref, mask_ref, pw_ref, pb_ref, o_ref,
                             *, num_heads):
    _window_attn_body(qkv_ref, res_ref, bias_ref, mask_ref, pw_ref, pb_ref, o_ref,
                      num_heads=num_heads)


def _window_attn_nomask_kernel(qkv_ref, res_ref, bias_ref, pw_ref, pb_ref, o_ref,
                               *, num_heads):
    _window_attn_body(qkv_ref, res_ref, bias_ref, None, pw_ref, pb_ref, o_ref,
                      num_heads=num_heads)


def window_attention(qkv, res, rel_bias, mask, proj_w, proj_b, *, num_heads, window_size):
    """qkv: (B,H,W,3C) bf16; res: (B,H,W,C) f32; mask: (nW,N,N) f32 or None.

    Windows are carved straight out of the (B,H,W,*) layout by the BlockSpecs
    (grid = (B, H/ws, W/ws)), so no XLA window partition / reverse pass is needed.
    """
    B, H, W, C3 = qkv.shape
    C = C3 // 3
    ws = window_size
    N = ws * ws
    nWh, nWw = H // ws, W // ws
    has_mask = mask is not None
    grid = (B, nWh, nWw)

    in_specs = [
        pl.BlockSpec((1, ws, ws, C3), lambda b, i, j: (b, i, j, 0)),
        pl.BlockSpec((1, ws, ws, C), lambda b, i, j: (b, i, j, 0)),
        pl.BlockSpec((num_heads, N, N), lambda b, i, j: (0, 0, 0)),
    ]
    args = [qkv, res, rel_bias]
    if has_mask:
        in_specs.append(pl.BlockSpec((1, N, N), lambda b, i, j: (i * nWw + j, 0, 0)))
        args.append(mask)
        kernel = partial(_window_attn_mask_kernel, num_heads=num_heads)
    else:
        kernel = partial(_window_attn_nomask_kernel, num_heads=num_heads)
    in_specs += [pl.BlockSpec((C, C), lambda b, i, j: (0, 0)),
                 pl.BlockSpec((1, C), lambda b, i, j: (0, 0))]
    args += [proj_w, proj_b.reshape(1, C)]

    est = (N * C3 * qkv.dtype.itemsize + N * C * 4 + num_heads * N * N * 4
           + (N * N * 4 if has_mask else 0) + C * C * 4 + C * 4 + N * C * 4)
    return pl.pallas_call(
        kernel,
        out_shape=jax.ShapeDtypeStruct((B, H, W, C), jnp.float32),
        grid=grid,
        in_specs=in_specs,
        out_specs=pl.BlockSpec((1, ws, ws, C), lambda b, i, j: (b, i, j, 0)),
        compiler_params=_compiler_params(est, ("parallel", "parallel", "parallel")),
    )(*args)


# ----------------------------- plain-JAX glue ---------------------------------

def window_partition(x, ws):
    B, H, W, C = x.shape
    x = x.reshape(B, H // ws, ws, W // ws, ws, C)
    return x.transpose(0, 1, 3, 2, 4, 5).reshape(-1, ws, ws, C)


def window_reverse(windows, ws, H, W):
    B = windows.shape[0] // (H * W // ws // ws)
    x = windows.reshape(B, H // ws, W // ws, ws, ws, -1)
    return x.transpose(0, 1, 3, 2, 4, 5).reshape(B, H, W, -1)


def relative_position_index(ws):
    coords = np.stack(np.meshgrid(np.arange(ws), np.arange(ws), indexing="ij"))
    cf = coords.reshape(2, -1)
    rel = (cf[:, :, None] - cf[:, None, :]).transpose(1, 2, 0).astype(np.int64)
    rel[:, :, 0] += ws - 1
    rel[:, :, 1] += ws - 1
    rel[:, :, 0] *= 2 * ws - 1
    return rel.sum(-1)                               # (N, N)


def calculate_mask(H, W, ws, ss):
    img_mask = np.zeros((1, H, W, 1), np.float32)
    slices = (slice(0, -ws), slice(-ws, -ss), slice(-ss, None))
    cnt = 0
    for hs in slices:
        for wsl in slices:
            img_mask[:, hs, wsl, :] = cnt
            cnt += 1
    mw = img_mask.reshape(1, H // ws, ws, W // ws, ws, 1)
    mw = mw.transpose(0, 1, 3, 2, 4, 5).reshape(-1, ws * ws)
    am = mw[:, None, :] - mw[:, :, None]
    return jnp.asarray(np.where(am != 0, -100.0, 0.0).astype(np.float32))   # (nW, N, N)


# ----------------------------- forward pass -----------------------------------

def swin_block_forward(x, p, *, x_size, window_size, shift_size, num_heads, attn_mask):
    H, W = x_size
    B, L, C = x.shape
    ws = window_size
    scale = float((C // num_heads) ** -0.5)

    xs = x.reshape(B, H, W, C)
    if shift_size > 0:
        # TODO(synk): the cyclic roll wraps across window boundaries and cannot be a
        # rectangular BlockSpec window; it stays in plain JAX.
        xs = jnp.roll(xs, (-shift_size, -shift_size), axis=(1, 2))

    # fold the softmax scale into the q projection (checkpoint-time fold in a real model)
    qkv_w = p["qkv_w"].at[:, :C].multiply(scale)
    qkv_b = p["qkv_b"].at[:C].multiply(scale)

    # fused LayerNorm1 + QKV projection (one HBM pass over the tokens, bf16 intermediate)
    qkv = fused_linear(xs.reshape(B * H * W, C), qkv_w, qkv_b,
                       gamma=p["norm1_g"], beta=p["norm1_b"],
                       out_dtype=jnp.bfloat16).reshape(B, H, W, 3 * C)

    # fused W-MSA / SW-MSA: rel-pos bias + shift mask + softmax + proj + residual,
    # windows carved by BlockSpecs, output written back in (B,H,W,C) layout.
    attn = window_attention(qkv, xs, p["rel_bias"], attn_mask, p["proj_w"], p["proj_b"],
                            num_heads=num_heads, window_size=ws)
    if shift_size > 0:
        attn = jnp.roll(attn, (shift_size, shift_size), axis=(1, 2))
    xt = attn.reshape(B * L, C)                       # = shortcut + attention branch

    # MLP branch: fused LN2 + FC1 + GELU (bf16 out), then fused FC2 + residual.
    hmid = fused_linear(xt, p["fc1_w"], p["fc1_b"], gamma=p["norm2_g"], beta=p["norm2_b"],
                        apply_gelu=True, out_dtype=jnp.bfloat16)
    y = fused_linear(hmid, p["fc2_w"], p["fc2_b"], residual=xt, out_dtype=jnp.float32)
    return y.reshape(B, L, C)


# ----------------------------- params / reference -----------------------------

def init_swin_block_params(key, dim, num_heads, window_size, mlp_ratio):
    hidden = int(dim * mlp_ratio)
    ws = window_size
    N = ws * ws
    ks = jax.random.split(key, 7)
    s = 0.02
    rpb_table = s * jax.random.normal(ks[4], ((2 * ws - 1) ** 2, num_heads), jnp.float32)
    # hoisted: relative-position-bias gather is input independent -> precompute (nh, N, N)
    rpi = relative_position_index(ws).reshape(-1)
    rel_bias = jnp.transpose(rpb_table[rpi].reshape(N, N, num_heads), (2, 0, 1))
    return dict(
        norm1_g=jnp.ones((dim,), jnp.float32),
        norm1_b=jnp.zeros((dim,), jnp.float32),
        qkv_w=s * jax.random.normal(ks[0], (dim, 3 * dim), jnp.float32),
        qkv_b=s * jax.random.normal(ks[1], (3 * dim,), jnp.float32),
        proj_w=s * jax.random.normal(ks[2], (dim, dim), jnp.float32),
        proj_b=s * jax.random.normal(ks[3], (dim,), jnp.float32),
        rel_bias=rel_bias,
        norm2_g=jnp.ones((dim,), jnp.float32),
        norm2_b=jnp.zeros((dim,), jnp.float32),
        fc1_w=s * jax.random.normal(ks[5], (dim, hidden), jnp.float32),
        fc1_b=jnp.zeros((hidden,), jnp.float32),
        fc2_w=s * jax.random.normal(ks[6], (hidden, dim), jnp.float32),
        fc2_b=jnp.zeros((dim,), jnp.float32),
    )


def reference_swin_block(x, p, *, x_size, window_size, shift_size, num_heads, attn_mask):
    """Plain-JAX mirror of the torch forward (exact erf-GELU, f32 matmuls)."""
    H, W = x_size
    B, L, C = x.shape
    ws = window_size
    N = ws * ws
    nh = num_heads
    hd = C // nh

    def ln(t, g, b):
        mu = jnp.mean(t, -1, keepdims=True)
        var = jnp.mean((t - mu) ** 2, -1, keepdims=True)
        return (t - mu) / jnp.sqrt(var + 1e-5) * g + b

    shortcut = x
    h = ln(x, p["norm1_g"], p["norm1_b"]).reshape(B, H, W, C)
    if shift_size > 0:
        h = jnp.roll(h, (-shift_size, -shift_size), axis=(1, 2))
    xw = window_partition(h, ws).reshape(-1, N, C)
    B_ = xw.shape[0]
    qkv = (xw @ p["qkv_w"] + p["qkv_b"]).reshape(B_, N, 3, nh, hd).transpose(2, 0, 3, 1, 4)
    q, k, v = qkv[0] * hd ** -0.5, qkv[1], qkv[2]
    att = q @ jnp.swapaxes(k, -2, -1) + p["rel_bias"][None]
    if attn_mask is not None:
        nW = attn_mask.shape[0]
        att = att.reshape(B_ // nW, nW, nh, N, N) + attn_mask[None, :, None]
        att = att.reshape(B_, nh, N, N)
    att = jax.nn.softmax(att, axis=-1)
    o = jnp.swapaxes(att @ v, 1, 2).reshape(B_, N, C)
    o = o @ p["proj_w"] + p["proj_b"]
    h = window_reverse(o.reshape(-1, ws, ws, C), ws, H, W)
    if shift_size > 0:
        h = jnp.roll(h, (shift_size, shift_size), axis=(1, 2))
    x = shortcut + h.reshape(B, L, C)
    y = ln(x, p["norm2_g"], p["norm2_b"])
    y = jax.nn.gelu(y @ p["fc1_w"] + p["fc1_b"], approximate=False)
    y = y @ p["fc2_w"] + p["fc2_b"]
    return x + y


# ----------------------------- demo -------------------------------------------

if __name__ == "__main__":
    # 16x16 tokens, dim 32, 4 heads, window 8; a regular (shift=0) block followed by a
    # shifted (shift=4) block so the SW-MSA mask path is exercised.
    B, H, W = 2, 16, 16
    dim, num_heads, window_size, mlp_ratio = 32, 4, 8, 4.0
    x_size = (H, W)
    shift_sizes = [0, window_size // 2]
    if min(x_size) <= window_size:       # same auto-adjustment as the torch module
        window_size = min(x_size)
        shift_sizes = [0, 0]

    key = jax.random.PRNGKey(0)
    kx, k0, k1 = jax.random.split(key, 3)
    x = jax.random.normal(kx, (B, H * W, dim), jnp.float32)
    params = [init_swin_block_params(k0, dim, num_heads, window_size, mlp_ratio),
              init_swin_block_params(k1, dim, num_heads, window_size, mlp_ratio)]
    masks = [None if s == 0 else calculate_mask(H, W, window_size, s) for s in shift_sizes]

    @jax.jit
    def forward(x, params):
        for p, s, m in zip(params, shift_sizes, masks):
            x = swin_block_forward(x, p, x_size=x_size, window_size=window_size,
                                   shift_size=s, num_heads=num_heads, attn_mask=m)
        return x

    out = jax.block_until_ready(forward(x, params))
    assert out.shape == (B, H * W, dim) and out.dtype == jnp.float32
    assert bool(jnp.all(jnp.isfinite(out)))

    # correctness check against the exact plain-JAX reference (f32 matmuls, erf-GELU);
    # tolerance covers the bf16 MXU operands / bf16 intermediates / tanh-GELU /
    # approx-reciprocal budget (observed error is ~1e-3).
    with jax.default_matmul_precision("highest"):
        ref = x
        for p, s, m in zip(params, shift_sizes, masks):
            ref = reference_swin_block(ref, p, x_size=x_size, window_size=window_size,
                                       shift_size=s, num_heads=num_heads, attn_mask=m)
        ref = jax.block_until_ready(ref)
    err = float(jnp.max(jnp.abs(out - ref)))
    assert err < 1e-2, f"mismatch vs reference: {err}"
    print("KERNEL_OK")
</pallas_src>

<mosaic_0001>
module attributes {stable_mosaic.version = 11 : i64} {
  func.func @_window_attn_nomask_kernel(%arg0: i32, %arg1: i32, %arg2: i32, %arg3: memref<1x8x8x96xbf16, #tpu.memory_space<vmem>>, %arg4: memref<1x8x8x32xf32, #tpu.memory_space<vmem>>, %arg5: memref<4x64x64xf32, #tpu.memory_space<vmem>>, %arg6: memref<32x32xf32, #tpu.memory_space<vmem>>, %arg7: memref<1x32xf32, #tpu.memory_space<vmem>>, %arg8: memref<1x8x8x32xf32, #tpu.memory_space<vmem>>) attributes {dimension_semantics = [#tpu.dimension_semantics<parallel>, #tpu.dimension_semantics<parallel>, #tpu.dimension_semantics<parallel>], iteration_bounds = array<i64: 2, 2, 2>, scalar_prefetch = 0 : i64, scratch_operands = 0 : i64, tpu.core_type = #tpu.core_type<tc>, window_params = [{transform_indices = @transform_0, window_bounds = array<i64: 1, 8, 8, 96>}, {transform_indices = @transform_1, window_bounds = array<i64: 1, 8, 8, 32>}, {pipeline_mode = #tpu.pipeline_mode<synchronous>, transform_indices = @transform_2, window_bounds = array<i64: 4, 64, 64>}, {pipeline_mode = #tpu.pipeline_mode<synchronous>, transform_indices = @transform_3, window_bounds = array<i64: 32, 32>}, {pipeline_mode = #tpu.pipeline_mode<synchronous>, transform_indices = @transform_4, window_bounds = array<i64: 1, 32>}, {transform_indices = @transform_5, window_bounds = array<i64: 1, 8, 8, 32>}]} {
    %c0 = arith.constant 0 : index
    %c0_0 = arith.constant 0 : index
    %c0_1 = arith.constant 0 : index
    %c0_2 = arith.constant 0 : index
    %0 = vector.load %arg3[%c0, %c0_0, %c0_1, %c0_2] : memref<1x8x8x96xbf16, #tpu.memory_space<vmem>>, vector<1x8x8x96xbf16>
    %1 = vector.shape_cast %0 : vector<1x8x8x96xbf16> to vector<8x8x96xbf16>
    %2 = arith.extf %1 : vector<8x8x96xbf16> to vector<8x8x96xf32>
    %3 = vector.shape_cast %2 : vector<8x8x96xf32> to vector<64x96xf32>
    %c0_3 = arith.constant 0 : index
    %c0_4 = arith.constant 0 : index
    %c0_5 = arith.constant 0 : index
    %c0_6 = arith.constant 0 : index
    %4 = vector.load %arg4[%c0_3, %c0_4, %c0_5, %c0_6] : memref<1x8x8x32xf32, #tpu.memory_space<vmem>>, vector<1x8x8x32xf32>
    %5 = vector.shape_cast %4 : vector<1x8x8x32xf32> to vector<8x8x32xf32>
    %6 = vector.shape_cast %5 : vector<8x8x32xf32> to vector<64x32xf32>
    %c0_7 = arith.constant 0 : index
    %c0_8 = arith.constant 0 : index
    %7 = vector.load %arg7[%c0_7, %c0_8] : memref<1x32xf32, #tpu.memory_space<vmem>>, vector<1x32xf32>
    %8 = vector.broadcast %7 : vector<1x32xf32> to vector<64x32xf32>
    %9 = arith.addf %8, %6 : vector<64x32xf32>
    %10 = vector.extract_strided_slice %3 {offsets = [0, 0], sizes = [64, 8], strides = [1, 1]} : vector<64x96xf32> to vector<64x8xf32>
    %11 = arith.truncf %10 : vector<64x8xf32> to vector<64x8xbf16>
    %12 = vector.extract_strided_slice %3 {offsets = [0, 32], sizes = [64, 8], strides = [1, 1]} : vector<64x96xf32> to vector<64x8xf32>
    %13 = arith.truncf %12 : vector<64x8xf32> to vector<64x8xbf16>
    %14 = vector.extract_strided_slice %3 {offsets = [0, 64], sizes = [64, 8], strides = [1, 1]} : vector<64x96xf32> to vector<64x8xf32>
    %15 = arith.truncf %14 : vector<64x8xf32> to vector<64x8xbf16>
    %cst = arith.constant dense<0.000000e+00> : vector<64x64xf32>
    %16 = tpu.matmul %11, %13, %cst {dimension_numbers = #tpu.dot_dimension_numbers<[1], [1], [0], [0], [0, 0, 1, 0], [], []>} : vector<64x8xbf16>, vector<64x8xbf16>, vector<64x64xf32> -> vector<64x64xf32>
    %c0_9 = arith.constant 0 : index
    %c0_10 = arith.constant 0 : index
    %c0_11 = arith.constant 0 : index
    %17 = vector.load %arg5[%c0_9, %c0_10, %c0_11] : memref<4x64x64xf32, #tpu.memory_space<vmem>>, vector<1x64x64xf32>
    %18 = vector.shape_cast %17 : vector<1x64x64xf32> to vector<64x64xf32>
    %19 = arith.addf %16, %18 : vector<64x64xf32>
    %cst_12 = arith.constant dense<0xFF800000> : vector<64xf32>
    %20 = vector.multi_reduction <maximumf>, %19, %cst_12 [1] : vector<64x64xf32> to vector<64xf32>
    %21 = vector.shape_cast %20 : vector<64xf32> to vector<64x1xf32>
    %22 = vector.broadcast %21 : vector<64x1xf32> to vector<64x64xf32>
    %23 = arith.subf %19, %22 : vector<64x64xf32>
    %24 = math.exp %23 : vector<64x64xf32>
    %cst_13 = arith.constant dense<0.000000e+00> : vector<64xf32>
    %25 = vector.multi_reduction <add>, %24, %cst_13 [1] : vector<64x64xf32> to vector<64xf32>
    %26 = vector.shape_cast %25 : vector<64xf32> to vector<64x1xf32>
    %27 = tpu.reciprocal %26 {approx = true} : vector<64x1xf32> -> vector<64x1xf32>
    %28 = vector.broadcast %27 : vector<64x1xf32> to vector<64x64xf32>
    %29 = arith.mulf %24, %28 : vector<64x64xf32>
    %30 = arith.truncf %29 : vector<64x64xf32> to vector<64x64xbf16>
    %cst_14 = arith.constant dense<0.000000e+00> : vector<64x8xf32>
    %31 = tpu.matmul %30, %15, %cst_14 {dimension_numbers = #tpu.dot_dimension_numbers<[1], [0], [0], [1], [0, 0, 1, 1], [], []>} : vector<64x64xbf16>, vector<64x8xbf16>, vector<64x8xf32> -> vector<64x8xf32>
    %c0_15 = arith.constant 0 : index
    %c0_16 = arith.constant 0 : index
    %32 = vector.load %arg6[%c0_15, %c0_16] : memref<32x32xf32, #tpu.memory_space<vmem>>, vector<8x32xf32>
    %33 = arith.truncf %32 : vector<8x32xf32> to vector<8x32xbf16>
    %34 = arith.truncf %31 : vector<64x8xf32> to vector<64x8xbf16>
    %cst_17 = arith.constant dense<0.000000e+00> : vector<64x32xf32>
    %35 = tpu.matmul %34, %33, %cst_17 {dimension_numbers = #tpu.dot_dimension_numbers<[1], [0], [0], [1], [0, 0, 1, 1], [], []>} : vector<64x8xbf16>, vector<8x32xbf16>, vector<64x32xf32> -> vector<64x32xf32>
    %36 = arith.addf %9, %35 : vector<64x32xf32>
    %37 = vector.extract_strided_slice %3 {offsets = [0, 8], sizes = [64, 8], strides = [1, 1]} : vector<64x96xf32> to vector<64x8xf32>
    %38 = arith.truncf %37 : vector<64x8xf32> to vector<64x8xbf16>
    %39 = vector.extract_strided_slice %3 {offsets = [0, 40], sizes = [64, 8], strides = [1, 1]} : vector<64x96xf32> to vector<64x8xf32>
    %40 = arith.truncf %39 : vector<64x8xf32> to vector<64x8xbf16>
    %41 = vector.extract_strided_slice %3 {offsets = [0, 72], sizes = [64, 8], strides = [1, 1]} : vector<64x96xf32> to vector<64x8xf32>
    %42 = arith.truncf %41 : vector<64x8xf32> to vector<64x8xbf16>
    %cst_18 = arith.constant dense<0.000000e+00> : vector<64x64xf32>
    %43 = tpu.matmul %38, %40, %cst_18 {dimension_numbers = #tpu.dot_dimension_numbers<[1], [1], [0], [0], [0, 0, 1, 0], [], []>} : vector<64x8xbf16>, vector<64x8xbf16>, vector<64x64xf32> -> vector<64x64xf32>
    %c1 = arith.constant 1 : index
    %c0_19 = arith.constant 0 : index
    %c0_20 = arith.constant 0 : index
    %44 = vector.load %arg5[%c1, %c0_19, %c0_20] : memref<4x64x64xf32, #tpu.memory_space<vmem>>, vector<1x64x64xf32>
    %45 = vector.shape_cast %44 : vector<1x64x64xf32> to vector<64x64xf32>
    %46 = arith.addf %43, %45 : vector<64x64xf32>
    %cst_21 = arith.constant dense<0xFF800000> : vector<64xf32>
    %47 = vector.multi_reduction <maximumf>, %46, %cst_21 [1] : vector<64x64xf32> to vector<64xf32>
    %48 = vector.shape_cast %47 : vector<64xf32> to vector<64x1xf32>
    %49 = vector.broadcast %48 : vector<64x1xf32> to vector<64x64xf32>
    %50 = arith.subf %46, %49 : vector<64x64xf32>
    %51 = math.exp %50 : vector<64x64xf32>
    %cst_22 = arith.constant dense<0.000000e+00> : vector<64xf32>
    %52 = vector.multi_reduction <add>, %51, %cst_22 [1] : vector<64x64xf32> to vector<64xf32>
    %53 = vector.shape_cast %52 : vector<64xf32> to vector<64x1xf32>
    %54 = tpu.reciprocal %53 {approx = true} : vector<64x1xf32> -> vector<64x1xf32>
    %55 = vector.broadcast %54 : vector<64x1xf32> to vector<64x64xf32>
    %56 = arith.mulf %51, %55 : vector<64x64xf32>
    %57 = arith.truncf %56 : vector<64x64xf32> to vector<64x64xbf16>
    %cst_23 = arith.constant dense<0.000000e+00> : vector<64x8xf32>
    %58 = tpu.matmul %57, %42, %cst_23 {dimension_numbers = #tpu.dot_dimension_numbers<[1], [0], [0], [1], [0, 0, 1, 1], [], []>} : vector<64x64xbf16>, vector<64x8xbf16>, vector<64x8xf32> -> vector<64x8xf32>
    %c8 = arith.constant 8 : index
    %c0_24 = arith.constant 0 : index
    %59 = vector.load %arg6[%c8, %c0_24] : memref<32x32xf32, #tpu.memory_space<vmem>>, vector<8x32xf32>
    %60 = arith.truncf %59 : vector<8x32xf32> to vector<8x32xbf16>
    %61 = arith.truncf %58 : vector<64x8xf32> to vector<64x8xbf16>
    %cst_25 = arith.constant dense<0.000000e+00> : vector<64x32xf32>
    %62 = tpu.matmul %61, %60, %cst_25 {dimension_numbers = #tpu.dot_dimension_numbers<[1], [0], [0], [1], [0, 0, 1, 1], [], []>} : vector<64x8xbf16>, vector<8x32xbf16>, vector<64x32xf32> -> vector<64x32xf32>
    %63 = arith.addf %36, %62 : vector<64x32xf32>
    %64 = vector.extract_strided_slice %3 {offsets = [0, 16], sizes = [64, 8], strides = [1, 1]} : vector<64x96xf32> to vector<64x8xf32>
    %65 = arith.truncf %64 : vector<64x8xf32> to vector<64x8xbf16>
    %66 = vector.extract_strided_slice %3 {offsets = [0, 48], sizes = [64, 8], strides = [1, 1]} : vector<64x96xf32> to vector<64x8xf32>
    %67 = arith.truncf %66 : vector<64x8xf32> to vector<64x8xbf16>
    %68 = vector.extract_strided_slice %3 {offsets = [0, 80], sizes = [64, 8], strides = [1, 1]} : vector<64x96xf32> to vector<64x8xf32>
    %69 = arith.truncf %68 : vector<64x8xf32> to vector<64x8xbf16>
    %cst_26 = arith.constant dense<0.000000e+00> : vector<64x64xf32>
    %70 = tpu.matmul %65, %67, %cst_26 {dimension_numbers = #tpu.dot_dimension_numbers<[1], [1], [0], [0], [0, 0, 1, 0], [], []>} : vector<64x8xbf16>, vector<64x8xbf16>, vector<64x64xf32> -> vector<64x64xf32>
    %c2 = arith.constant 2 : index
    %c0_27 = arith.constant 0 : index
    %c0_28 = arith.constant 0 : index
    %71 = vector.load %arg5[%c2, %c0_27, %c0_28] : memref<4x64x64xf32, #tpu.memory_space<vmem>>, vector<1x64x64xf32>
    %72 = vector.shape_cast %71 : vector<1x64x64xf32> to vector<64x64xf32>
    %73 = arith.addf %70, %72 : vector<64x64xf32>
    %cst_29 = arith.constant dense<0xFF800000> : vector<64xf32>
    %74 = vector.multi_reduction <maximumf>, %73, %cst_29 [1] : vector<64x64xf32> to vector<64xf32>
    %75 = vector.shape_cast %74 : vector<64xf32> to vector<64x1xf32>
    %76 = vector.broadcast %75 : vector<64x1xf32> to vector<64x64xf32>
    %77 = arith.subf %73, %76 : vector<64x64xf32>
    %78 = math.exp %77 : vector<64x64xf32>
    %cst_30 = arith.constant dense<0.000000e+00> : vector<64xf32>
    %79 = vector.multi_reduction <add>, %78, %cst_30 [1] : vector<64x64xf32> to vector<64xf32>
    %80 = vector.shape_cast %79 : vector<64xf32> to vector<64x1xf32>
    %81 = tpu.reciprocal %80 {approx = true} : vector<64x1xf32> -> vector<64x1xf32>
    %82 = vector.broadcast %81 : vector<64x1xf32> to vector<64x64xf32>
    %83 = arith.mulf %78, %82 : vector<64x64xf32>
    %84 = arith.truncf %83 : vector<64x64xf32> to vector<64x64xbf16>
    %cst_31 = arith.constant dense<0.000000e+00> : vector<64x8xf32>
    %85 = tpu.matmul %84, %69, %cst_31 {dimension_numbers = #tpu.dot_dimension_numbers<[1], [0], [0], [1], [0, 0, 1, 1], [], []>} : vector<64x64xbf16>, vector<64x8xbf16>, vector<64x8xf32> -> vector<64x8xf32>
    %c16 = arith.constant 16 : index
    %c0_32 = arith.constant 0 : index
    %86 = vector.load %arg6[%c16, %c0_32] : memref<32x32xf32, #tpu.memory_space<vmem>>, vector<8x32xf32>
    %87 = arith.truncf %86 : vector<8x32xf32> to vector<8x32xbf16>
    %88 = arith.truncf %85 : vector<64x8xf32> to vector<64x8xbf16>
    %cst_33 = arith.constant dense<0.000000e+00> : vector<64x32xf32>
    %89 = tpu.matmul %88, %87, %cst_33 {dimension_numbers = #tpu.dot_dimension_numbers<[1], [0], [0], [1], [0, 0, 1, 1], [], []>} : vector<64x8xbf16>, vector<8x32xbf16>, vector<64x32xf32> -> vector<64x32xf32>
    %90 = arith.addf %63, %89 : vector<64x32xf32>
    %91 = vector.extract_strided_slice %3 {offsets = [0, 24], sizes = [64, 8], strides = [1, 1]} : vector<64x96xf32> to vector<64x8xf32>
    %92 = arith.truncf %91 : vector<64x8xf32> to vector<64x8xbf16>
    %93 = vector.extract_strided_slice %3 {offsets = [0, 56], sizes = [64, 8], strides = [1, 1]} : vector<64x96xf32> to vector<64x8xf32>
    %94 = arith.truncf %93 : vector<64x8xf32> to vector<64x8xbf16>
    %95 = vector.extract_strided_slice %3 {offsets = [0, 88], sizes = [64, 8], strides = [1, 1]} : vector<64x96xf32> to vector<64x8xf32>
    %96 = arith.truncf %95 : vector<64x8xf32> to vector<64x8xbf16>
    %cst_34 = arith.constant dense<0.000000e+00> : vector<64x64xf32>
    %97 = tpu.matmul %92, %94, %cst_34 {dimension_numbers = #tpu.dot_dimension_numbers<[1], [1], [0], [0], [0, 0, 1, 0], [], []>} : vector<64x8xbf16>, vector<64x8xbf16>, vector<64x64xf32> -> vector<64x64xf32>
    %c3 = arith.constant 3 : index
    %c0_35 = arith.constant 0 : index
    %c0_36 = arith.constant 0 : index
    %98 = vector.load %arg5[%c3, %c0_35, %c0_36] : memref<4x64x64xf32, #tpu.memory_space<vmem>>, vector<1x64x64xf32>
    %99 = vector.shape_cast %98 : vector<1x64x64xf32> to vector<64x64xf32>
    %100 = arith.addf %97, %99 : vector<64x64xf32>
    %cst_37 = arith.constant dense<0xFF800000> : vector<64xf32>
    %101 = vector.multi_reduction <maximumf>, %100, %cst_37 [1] : vector<64x64xf32> to vector<64xf32>
    %102 = vector.shape_cast %101 : vector<64xf32> to vector<64x1xf32>
    %103 = vector.broadcast %102 : vector<64x1xf32> to vector<64x64xf32>
    %104 = arith.subf %100, %103 : vector<64x64xf32>
    %105 = math.exp %104 : vector<64x64xf32>
    %cst_38 = arith.constant dense<0.000000e+00> : vector<64xf32>
    %106 = vector.multi_reduction <add>, %105, %cst_38 [1] : vector<64x64xf32> to vector<64xf32>
    %107 = vector.shape_cast %106 : vector<64xf32> to vector<64x1xf32>
    %108 = tpu.reciprocal %107 {approx = true} : vector<64x1xf32> -> vector<64x1xf32>
    %109 = vector.broadcast %108 : vector<64x1xf32> to vector<64x64xf32>
    %110 = arith.mulf %105, %109 : vector<64x64xf32>
    %111 = arith.truncf %110 : vector<64x64xf32> to vector<64x64xbf16>
    %cst_39 = arith.constant dense<0.000000e+00> : vector<64x8xf32>
    %112 = tpu.matmul %111, %96, %cst_39 {dimension_numbers = #tpu.dot_dimension_numbers<[1], [0], [0], [1], [0, 0, 1, 1], [], []>} : vector<64x64xbf16>, vector<64x8xbf16>, vector<64x8xf32> -> vector<64x8xf32>
    %c24 = arith.constant 24 : index
    %c0_40 = arith.constant 0 : index
    %113 = vector.load %arg6[%c24, %c0_40] : memref<32x32xf32, #tpu.memory_space<vmem>>, vector<8x32xf32>
    %114 = arith.truncf %113 : vector<8x32xf32> to vector<8x32xbf16>
    %115 = arith.truncf %112 : vector<64x8xf32> to vector<64x8xbf16>
    %cst_41 = arith.constant dense<0.000000e+00> : vector<64x32xf32>
    %116 = tpu.matmul %115, %114, %cst_41 {dimension_numbers = #tpu.dot_dimension_numbers<[1], [0], [0], [1], [0, 0, 1, 1], [], []>} : vector<64x8xbf16>, vector<8x32xbf16>, vector<64x32xf32> -> vector<64x32xf32>
    %117 = arith.addf %90, %116 : vector<64x32xf32>
    %118 = vector.shape_cast %117 : vector<64x32xf32> to vector<8x8x32xf32>
    %c0_42 = arith.constant 0 : index
    %c0_43 = arith.constant 0 : index
    %c0_44 = arith.constant 0 : index
    %c0_45 = arith.constant 0 : index
    %119 = vector.load %arg8[%c0_42, %c0_43, %c0_44, %c0_45] : memref<1x8x8x32xf32, #tpu.memory_space<vmem>>, vector<1x8x8x32xf32>
    %120 = vector.shape_cast %119 : vector<1x8x8x32xf32> to vector<8x8x32xf32>
    %121 = vector.shape_cast %118 : vector<8x8x32xf32> to vector<1x8x8x32xf32>
    tpu.vector_store %arg8[%c0_42, %c0_43, %c0_44, %c0_45], %121 {strides = array<i32>} : memref<1x8x8x32xf32, #tpu.memory_space<vmem>>, vector<1x8x8x32xf32>,
    return
  }
  func.func @transform_0(%arg0: i32, %arg1: i32, %arg2: i32) -> (i32, i32, i32, i32) {
    %c0_i32 = arith.constant 0 : i32
    %c0_i32_0 = arith.constant 0 : i32
    return %arg0, %arg1, %arg2, %c0_i32 : i32, i32, i32, i32
  }
  func.func @transform_1(%arg0: i32, %arg1: i32, %arg2: i32) -> (i32, i32, i32, i32) {
    %c0_i32 = arith.constant 0 : i32
    %c0_i32_0 = arith.constant 0 : i32
    return %arg0, %arg1, %arg2, %c0_i32 : i32, i32, i32, i32
  }
  func.func @transform_2(%arg0: i32, %arg1: i32, %arg2: i32) -> (i32, i32, i32) {
    %c0_i32 = arith.constant 0 : i32
    %c0_i32_0 = arith.constant 0 : i32
    %c0_i32_1 = arith.constant 0 : i32
    %c0_i32_2 = arith.constant 0 : i32
    return %c0_i32, %c0_i32_0, %c0_i32_1 : i32, i32, i32
  }
  func.func @transform_3(%arg0: i32, %arg1: i32, %arg2: i32) -> (i32, i32) {
    %c0_i32 = arith.constant 0 : i32
    %c0_i32_0 = arith.constant 0 : i32
    %c0_i32_1 = arith.constant 0 : i32
    return %c0_i32, %c0_i32_0 : i32, i32
  }
  func.func @transform_4(%arg0: i32, %arg1: i32, %arg2: i32) -> (i32, i32) {
    %c0_i32 = arith.constant 0 : i32
    %c0_i32_0 = arith.constant 0 : i32
    %c0_i32_1 = arith.constant 0 : i32
    return %c0_i32, %c0_i32_0 : i32, i32
  }
  func.func @transform_5(%arg0: i32, %arg1: i32, %arg2: i32) -> (i32, i32, i32, i32) {
    %c0_i32 = arith.constant 0 : i32
    %c0_i32_0 = arith.constant 0 : i32
    return %arg0, %arg1, %arg2, %c0_i32 : i32, i32, i32, i32
  }
}

module attributes {stable_mosaic.version = 11 : i64} {
  func.func @_ln_linear_kernel(%arg0: i32, %arg1: i32, %arg2: memref<256x32xf32, #tpu.memory_space<vmem>>, %arg3: memref<1x32xf32, #tpu.memory_space<vmem>>, %arg4: memref<1x32xf32, #tpu.memory_space<vmem>>, %arg5: memref<32x96xf32, #tpu.memory_space<vmem>>, %arg6: memref<1x96xf32, #tpu.memory_space<vmem>>, %arg7: memref<256x96xbf16, #tpu.memory_space<vmem>>) attributes {dimension_semantics = [#tpu.dimension_semantics<parallel>, #tpu.dimension_semantics<parallel>], iteration_bounds = array<i64: 2, 1>, scalar_prefetch = 0 : i64, scratch_operands = 0 : i64, tpu.core_type = #tpu.core_type<tc>, window_params = [{transform_indices = @transform_0, window_bounds = array<i64: 256, 32>}, {pipeline_mode = #tpu.pipeline_mode<synchronous>, transform_indices = @transform_1, window_bounds = array<i64: 1, 32>}, {pipeline_mode = #tpu.pipeline_mode<synchronous>, transform_indices = @transform_2, window_bounds = array<i64: 1, 32>}, {transform_indices = @transform_3, window_bounds = array<i64: 32, 96>}, {transform_indices = @transform_4, window_bounds = array<i64: 1, 96>}, {transform_indices = @transform_5, window_bounds = array<i64: 256, 96>}]} {
    %c0 = arith.constant 0 : index
    %c0_0 = arith.constant 0 : index
    %0 = vector.load %arg2[%c0, %c0_0] : memref<256x32xf32, #tpu.memory_space<vmem>>, vector<256x32xf32>
    %cst = arith.constant dense<0.000000e+00> : vector<256xf32>
    %1 = vector.multi_reduction <add>, %0, %cst [1] : vector<256x32xf32> to vector<256xf32>
    %2 = vector.shape_cast %1 : vector<256xf32> to vector<256x1xf32>
    %cst_1 = arith.constant 3.200000e+01 : f32
    %3 = vector.broadcast %cst_1 : f32 to vector<256x1xf32>
    %4 = arith.divf %2, %3 : vector<256x1xf32>
    %5 = vector.broadcast %4 : vector<256x1xf32> to vector<256x32xf32>
    %6 = arith.subf %0, %5 : vector<256x32xf32>
    %7 = arith.mulf %6, %6 : vector<256x32xf32>
    %cst_2 = arith.constant dense<0.000000e+00> : vector<256xf32>
    %8 = vector.multi_reduction <add>, %7, %cst_2 [1] : vector<256x32xf32> to vector<256xf32>
    %9 = vector.shape_cast %8 : vector<256xf32> to vector<256x1xf32>
    %cst_3 = arith.constant 3.200000e+01 : f32
    %10 = vector.broadcast %cst_3 : f32 to vector<256x1xf32>
    %11 = arith.divf %9, %10 : vector<256x1xf32>
    %cst_4 = arith.constant 9.99999974E-6 : f32
    %12 = vector.broadcast %cst_4 : f32 to vector<256x1xf32>
    %13 = arith.addf %11, %12 : vector<256x1xf32>
    %14 = math.rsqrt %13 : vector<256x1xf32>
    %15 = vector.broadcast %14 : vector<256x1xf32> to vector<256x32xf32>
    %16 = arith.mulf %6, %15 : vector<256x32xf32>
    %c0_5 = arith.constant 0 : index
    %c0_6 = arith.constant 0 : index
    %17 = vector.load %arg3[%c0_5, %c0_6] : memref<1x32xf32, #tpu.memory_space<vmem>>, vector<1x32xf32>
    %18 = vector.broadcast %17 : vector<1x32xf32> to vector<256x32xf32>
    %19 = arith.mulf %16, %18 : vector<256x32xf32>
    %c0_7 = arith.constant 0 : index
    %c0_8 = arith.constant 0 : index
    %20 = vector.load %arg4[%c0_7, %c0_8] : memref<1x32xf32, #tpu.memory_space<vmem>>, vector<1x32xf32>
    %21 = vector.broadcast %20 : vector<1x32xf32> to vector<256x32xf32>
    %22 = arith.addf %19, %21 : vector<256x32xf32>
    %23 = arith.truncf %22 : vector<256x32xf32> to vector<256x32xbf16>
    %c0_9 = arith.constant 0 : index
    %c0_10 = arith.constant 0 : index
    %24 = vector.load %arg5[%c0_9, %c0_10] : memref<32x96xf32, #tpu.memory_space<vmem>>, vector<32x96xf32>
    %25 = arith.truncf %24 : vector<32x96xf32> to vector<32x96xbf16>
    %cst_11 = arith.constant dense<0.000000e+00> : vector<256x96xf32>
    %26 = tpu.matmul %23, %25, %cst_11 {dimension_numbers = #tpu.dot_dimension_numbers<[1], [0], [0], [1], [0, 0, 1, 1], [], []>} : vector<256x32xbf16>, vector<32x96xbf16>, vector<256x96xf32> -> vector<256x96xf32>
    %c0_12 = arith.constant 0 : index
    %c0_13 = arith.constant 0 : index
    %27 = vector.load %arg6[%c0_12, %c0_13] : memref<1x96xf32, #tpu.memory_space<vmem>>, vector<1x96xf32>
    %28 = vector.broadcast %27 : vector<1x96xf32> to vector<256x96xf32>
    %29 = arith.addf %26, %28 : vector<256x96xf32>
    %30 = arith.truncf %29 : vector<256x96xf32> to vector<256x96xbf16>
    %c0_14 = arith.constant 0 : index
    %c0_15 = arith.constant 0 : index
    %31 = vector.load %arg7[%c0_14, %c0_15] : memref<256x96xbf16, #tpu.memory_space<vmem>>, vector<256x96xbf16>
    tpu.vector_store %arg7[%c0_14, %c0_15], %30 {strides = array<i32>} : memref<256x96xbf16, #tpu.memory_space<vmem>>, vector<256x96xbf16>,
    return
  }
  func.func @transform_0(%arg0: i32, %arg1: i32) -> (i32, i32) {
    %c0_i32 = arith.constant 0 : i32
    %c0_i32_0 = arith.constant 0 : i32
    return %arg0, %c0_i32 : i32, i32
  }
  func.func @transform_1(%arg0: i32, %arg1: i32) -> (i32, i32) {
    %c0_i32 = arith.constant 0 : i32
    %c0_i32_0 = arith.constant 0 : i32
    %c0_i32_1 = arith.constant 0 : i32
    return %c0_i32, %c0_i32_0 : i32, i32
  }
  func.func @transform_2(%arg0: i32, %arg1: i32) -> (i32, i32) {
    %c0_i32 = arith.constant 0 : i32
    %c0_i32_0 = arith.constant 0 : i32
    %c0_i32_1 = arith.constant 0 : i32
    return %c0_i32, %c0_i32_0 : i32, i32
  }
  func.func @transform_3(%arg0: i32, %arg1: i32) -> (i32, i32) {
    %c0_i32 = arith.constant 0 : i32
    %c0_i32_0 = arith.constant 0 : i32
    return %c0_i32, %arg1 : i32, i32
  }
  func.func @transform_4(%arg0: i32, %arg1: i32) -> (i32, i32) {
    %c0_i32 = arith.constant 0 : i32
    %c0_i32_0 = arith.constant 0 : i32
    return %c0_i32, %arg1 : i32, i32
  }
  func.func @transform_5(%arg0: i32, %arg1: i32) -> (i32, i32) {
    %c0_i32 = arith.constant 0 : i32
    return %arg0, %arg1 : i32, i32
  }
}

module attributes {stable_mosaic.version = 11 : i64} {
  func.func @_ln_linear_kernel(%arg0: i32, %arg1: i32, %arg2: memref<256x32xf32, #tpu.memory_space<vmem>>, %arg3: memref<1x32xf32, #tpu.memory_space<vmem>>, %arg4: memref<1x32xf32, #tpu.memory_space<vmem>>, %arg5: memref<32x128xf32, #tpu.memory_space<vmem>>, %arg6: memref<1x128xf32, #tpu.memory_space<vmem>>, %arg7: memref<256x128xbf16, #tpu.memory_space<vmem>>) attributes {dimension_semantics = [#tpu.dimension_semantics<parallel>, #tpu.dimension_semantics<parallel>], iteration_bounds = array<i64: 2, 1>, scalar_prefetch = 0 : i64, scratch_operands = 0 : i64, tpu.core_type = #tpu.core_type<tc>, window_params = [{transform_indices = @transform_0, window_bounds = array<i64: 256, 32>}, {pipeline_mode = #tpu.pipeline_mode<synchronous>, transform_indices = @transform_1, window_bounds = array<i64: 1, 32>}, {pipeline_mode = #tpu.pipeline_mode<synchronous>, transform_indices = @transform_2, window_bounds = array<i64: 1, 32>}, {transform_indices = @transform_3, window_bounds = array<i64: 32, 128>}, {transform_indices = @transform_4, window_bounds = array<i64: 1, 128>}, {transform_indices = @transform_5, window_bounds = array<i64: 256, 128>}]} {
    %c0 = arith.constant 0 : index
    %c0_0 = arith.constant 0 : index
    %0 = vector.load %arg2[%c0, %c0_0] : memref<256x32xf32, #tpu.memory_space<vmem>>, vector<256x32xf32>
    %cst = arith.constant dense<0.000000e+00> : vector<256xf32>
    %1 = vector.multi_reduction <add>, %0, %cst [1] : vector<256x32xf32> to vector<256xf32>
    %2 = vector.shape_cast %1 : vector<256xf32> to vector<256x1xf32>
    %cst_1 = arith.constant 3.200000e+01 : f32
    %3 = vector.broadcast %cst_1 : f32 to vector<256x1xf32>
    %4 = arith.divf %2, %3 : vector<256x1xf32>
    %5 = vector.broadcast %4 : vector<256x1xf32> to vector<256x32xf32>
    %6 = arith.subf %0, %5 : vector<256x32xf32>
    %7 = arith.mulf %6, %6 : vector<256x32xf32>
    %cst_2 = arith.constant dense<0.000000e+00> : vector<256xf32>
    %8 = vector.multi_reduction <add>, %7, %cst_2 [1] : vector<256x32xf32> to vector<256xf32>
    %9 = vector.shape_cast %8 : vector<256xf32> to vector<256x1xf32>
    %cst_3 = arith.constant 3.200000e+01 : f32
    %10 = vector.broadcast %cst_3 : f32 to vector<256x1xf32>
    %11 = arith.divf %9, %10 : vector<256x1xf32>
    %cst_4 = arith.constant 9.99999974E-6 : f32
    %12 = vector.broadcast %cst_4 : f32 to vector<256x1xf32>
    %13 = arith.addf %11, %12 : vector<256x1xf32>
    %14 = math.rsqrt %13 : vector<256x1xf32>
    %15 = vector.broadcast %14 : vector<256x1xf32> to vector<256x32xf32>
    %16 = arith.mulf %6, %15 : vector<256x32xf32>
    %c0_5 = arith.constant 0 : index
    %c0_6 = arith.constant 0 : index
    %17 = vector.load %arg3[%c0_5, %c0_6] : memref<1x32xf32, #tpu.memory_space<vmem>>, vector<1x32xf32>
    %18 = vector.broadcast %17 : vector<1x32xf32> to vector<256x32xf32>
    %19 = arith.mulf %16, %18 : vector<256x32xf32>
    %c0_7 = arith.constant 0 : index
    %c0_8 = arith.constant 0 : index
    %20 = vector.load %arg4[%c0_7, %c0_8] : memref<1x32xf32, #tpu.memory_space<vmem>>, vector<1x32xf32>
    %21 = vector.broadcast %20 : vector<1x32xf32> to vector<256x32xf32>
    %22 = arith.addf %19, %21 : vector<256x32xf32>
    %23 = arith.truncf %22 : vector<256x32xf32> to vector<256x32xbf16>
    %c0_9 = arith.constant 0 : index
    %c0_10 = arith.constant 0 : index
    %24 = vector.load %arg5[%c0_9, %c0_10] : memref<32x128xf32, #tpu.memory_space<vmem>>, vector<32x128xf32>
    %25 = arith.truncf %24 : vector<32x128xf32> to vector<32x128xbf16>
    %cst_11 = arith.constant dense<0.000000e+00> : vector<256x128xf32>
    %26 = tpu.matmul %23, %25, %cst_11 {dimension_numbers = #tpu.dot_dimension_numbers<[1], [0], [0], [1], [0, 0, 1, 1], [], []>} : vector<256x32xbf16>, vector<32x128xbf16>, vector<256x128xf32> -> vector<256x128xf32>
    %c0_12 = arith.constant 0 : index
    %c0_13 = arith.constant 0 : index
    %27 = vector.load %arg6[%c0_12, %c0_13] : memref<1x128xf32, #tpu.memory_space<vmem>>, vector<1x128xf32>
    %28 = vector.broadcast %27 : vector<1x128xf32> to vector<256x128xf32>
    %29 = arith.addf %26, %28 : vector<256x128xf32>
    %cst_14 = arith.constant 5.000000e-01 : f32
    %30 = vector.broadcast %cst_14 : f32 to vector<256x128xf32>
    %31 = arith.mulf %30, %29 : vector<256x128xf32>
    %32 = arith.mulf %29, %29 : vector<256x128xf32>
    %33 = arith.mulf %32, %29 : vector<256x128xf32>
    %cst_15 = arith.constant 4.471500e-02 : f32
    %34 = vector.broadcast %cst_15 : f32 to vector<256x128xf32>
    %35 = arith.mulf %34, %33 : vector<256x128xf32>
    %36 = arith.addf %29, %35 : vector<256x128xf32>
    %cst_16 = arith.constant 0.797884583 : f32
    %37 = vector.broadcast %cst_16 : f32 to vector<256x128xf32>
    %38 = arith.mulf %37, %36 : vector<256x128xf32>
    %39 = math.tanh %38 : vector<256x128xf32>
    %cst_17 = arith.constant 1.000000e+00 : f32
    %40 = vector.broadcast %cst_17 : f32 to vector<256x128xf32>
    %41 = arith.addf %40, %39 : vector<256x128xf32>
    %42 = arith.mulf %31, %41 : vector<256x128xf32>
    %43 = arith.truncf %42 : vector<256x128xf32> to vector<256x128xbf16>
    %c0_18 = arith.constant 0 : index
    %c0_19 = arith.constant 0 : index
    %44 = vector.load %arg7[%c0_18, %c0_19] : memref<256x128xbf16, #tpu.memory_space<vmem>>, vector<256x128xbf16>
    tpu.vector_store %arg7[%c0_18, %c0_19], %43 {strides = array<i32>} : memref<256x128xbf16, #tpu.memory_space<vmem>>, vector<256x128xbf16>,
    return
  }
  func.func @transform_0(%arg0: i32, %arg1: i32) -> (i32, i32) {
    %c0_i32 = arith.constant 0 : i32
    %c0_i32_0 = arith.constant 0 : i32
    return %arg0, %c0_i32 : i32, i32
  }
  func.func @transform_1(%arg0: i32, %arg1: i32) -> (i32, i32) {
    %c0_i32 = arith.constant 0 : i32
    %c0_i32_0 = arith.constant 0 : i32
    %c0_i32_1 = arith.constant 0 : i32
    return %c0_i32, %c0_i32_0 : i32, i32
  }
  func.func @transform_2(%arg0: i32, %arg1: i32) -> (i32, i32) {
    %c0_i32 = arith.constant 0 : i32
    %c0_i32_0 = arith.constant 0 : i32
    %c0_i32_1 = arith.constant 0 : i32
    return %c0_i32, %c0_i32_0 : i32, i32
  }
  func.func @transform_3(%arg0: i32, %arg1: i32) -> (i32, i32) {
    %c0_i32 = arith.constant 0 : i32
    %c0_i32_0 = arith.constant 0 : i32
    return %c0_i32, %arg1 : i32, i32
  }
  func.func @transform_4(%arg0: i32, %arg1: i32) -> (i32, i32) {
    %c0_i32 = arith.constant 0 : i32
    %c0_i32_0 = arith.constant 0 : i32
    return %c0_i32, %arg1 : i32, i32
  }
  func.func @transform_5(%arg0: i32, %arg1: i32) -> (i32, i32) {
    %c0_i32 = arith.constant 0 : i32
    return %arg0, %arg1 : i32, i32
  }
}

module attributes {stable_mosaic.version = 11 : i64} {
  func.func @_linear_residual_kernel(%arg0: i32, %arg1: i32, %arg2: memref<256x128xbf16, #tpu.memory_space<vmem>>, %arg3: memref<128x32xf32, #tpu.memory_space<vmem>>, %arg4: memref<1x32xf32, #tpu.memory_space<vmem>>, %arg5: memref<256x32xf32, #tpu.memory_space<vmem>>, %arg6: memref<256x32xf32, #tpu.memory_space<vmem>>) attributes {dimension_semantics = [#tpu.dimension_semantics<parallel>, #tpu.dimension_semantics<parallel>], iteration_bounds = array<i64: 2, 1>, scalar_prefetch = 0 : i64, scratch_operands = 0 : i64, tpu.core_type = #tpu.core_type<tc>, window_params = [{transform_indices = @transform_0, window_bounds = array<i64: 256, 128>}, {transform_indices = @transform_1, window_bounds = array<i64: 128, 32>}, {transform_indices = @transform_2, window_bounds = array<i64: 1, 32>}, {transform_indices = @transform_3, window_bounds = array<i64: 256, 32>}, {transform_indices = @transform_4, window_bounds = array<i64: 256, 32>}]} {
    %c0 = arith.constant 0 : index
    %c0_0 = arith.constant 0 : index
    %0 = vector.load %arg2[%c0, %c0_0] : memref<256x128xbf16, #tpu.memory_space<vmem>>, vector<256x128xbf16>
    %c0_1 = arith.constant 0 : index
    %c0_2 = arith.constant 0 : index
    %1 = vector.load %arg3[%c0_1, %c0_2] : memref<128x32xf32, #tpu.memory_space<vmem>>, vector<128x32xf32>
    %2 = arith.truncf %1 : vector<128x32xf32> to vector<128x32xbf16>
    %cst = arith.constant dense<0.000000e+00> : vector<256x32xf32>
    %3 = tpu.matmul %0, %2, %cst {dimension_numbers = #tpu.dot_dimension_numbers<[1], [0], [0], [1], [0, 0, 1, 1], [], []>} : vector<256x128xbf16>, vector<128x32xbf16>, vector<256x32xf32> -> vector<256x32xf32>
    %c0_3 = arith.constant 0 : index
    %c0_4 = arith.constant 0 : index
    %4 = vector.load %arg4[%c0_3, %c0_4] : memref<1x32xf32, #tpu.memory_space<vmem>>, vector<1x32xf32>
    %5 = vector.broadcast %4 : vector<1x32xf32> to vector<256x32xf32>
    %6 = arith.addf %3, %5 : vector<256x32xf32>
    %c0_5 = arith.constant 0 : index
    %c0_6 = arith.constant 0 : index
    %7 = vector.load %arg5[%c0_5, %c0_6] : memref<256x32xf32, #tpu.memory_space<vmem>>, vector<256x32xf32>
    %8 = arith.addf %6, %7 : vector<256x32xf32>
    %c0_7 = arith.constant 0 : index
    %c0_8 = arith.constant 0 : index
    %9 = vector.load %arg6[%c0_7, %c0_8] : memref<256x32xf32, #tpu.memory_space<vmem>>, vector<256x32xf32>
    tpu.vector_store %arg6[%c0_7, %c0_8], %8 {strides = array<i32>} : memref<256x32xf32, #tpu.memory_space<vmem>>, vector<256x32xf32>,
    return
  }
  func.func @transform_0(%arg0: i32, %arg1: i32) -> (i32, i32) {
    %c0_i32 = arith.constant 0 : i32
    %c0_i32_0 = arith.constant 0 : i32
    return %arg0, %c0_i32 : i32, i32
  }
  func.func @transform_1(%arg0: i32, %arg1: i32) -> (i32, i32) {
    %c0_i32 = arith.constant 0 : i32
    %c0_i32_0 = arith.constant 0 : i32
    return %c0_i32, %arg1 : i32, i32
  }
  func.func @transform_2(%arg0: i32, %arg1: i32) -> (i32, i32) {
    %c0_i32 = arith.constant 0 : i32
    %c0_i32_0 = arith.constant 0 : i32
    return %c0_i32, %arg1 : i32, i32
  }
  func.func @transform_3(%arg0: i32, %arg1: i32) -> (i32, i32) {
    %c0_i32 = arith.constant 0 : i32
    return %arg0, %arg1 : i32, i32
  }
  func.func @transform_4(%arg0: i32, %arg1: i32) -> (i32, i32) {
    %c0_i32 = arith.constant 0 : i32
    return %arg0, %arg1 : i32, i32
  }
}

module attributes {stable_mosaic.version = 11 : i64} {
  func.func @_window_attn_mask_kernel(%arg0: i32, %arg1: i32, %arg2: i32, %arg3: memref<1x8x8x96xbf16, #tpu.memory_space<vmem>>, %arg4: memref<1x8x8x32xf32, #tpu.memory_space<vmem>>, %arg5: memref<4x64x64xf32, #tpu.memory_space<vmem>>, %arg6: memref<1x64x64xf32, #tpu.memory_space<vmem>>, %arg7: memref<32x32xf32, #tpu.memory_space<vmem>>, %arg8: memref<1x32xf32, #tpu.memory_space<vmem>>, %arg9: memref<1x8x8x32xf32, #tpu.memory_space<vmem>>) attributes {dimension_semantics = [#tpu.dimension_semantics<parallel>, #tpu.dimension_semantics<parallel>, #tpu.dimension_semantics<parallel>], iteration_bounds = array<i64: 2, 2, 2>, scalar_prefetch = 0 : i64, scratch_operands = 0 : i64, tpu.core_type = #tpu.core_type<tc>, window_params = [{transform_indices = @transform_0, window_bounds = array<i64: 1, 8, 8, 96>}, {transform_indices = @transform_1, window_bounds = array<i64: 1, 8, 8, 32>}, {pipeline_mode = #tpu.pipeline_mode<synchronous>, transform_indices = @transform_2, window_bounds = array<i64: 4, 64, 64>}, {transform_indices = @transform_3, window_bounds = array<i64: 1, 64, 64>}, {pipeline_mode = #tpu.pipeline_mode<synchronous>, transform_indices = @transform_4, window_bounds = array<i64: 32, 32>}, {pipeline_mode = #tpu.pipeline_mode<synchronous>, transform_indices = @transform_5, window_bounds = array<i64: 1, 32>}, {transform_indices = @transform_6, window_bounds = array<i64: 1, 8, 8, 32>}]} {
    %c0 = arith.constant 0 : index
    %c0_0 = arith.constant 0 : index
    %c0_1 = arith.constant 0 : index
    %c0_2 = arith.constant 0 : index
    %0 = vector.load %arg3[%c0, %c0_0, %c0_1, %c0_2] : memref<1x8x8x96xbf16, #tpu.memory_space<vmem>>, vector<1x8x8x96xbf16>
    %1 = vector.shape_cast %0 : vector<1x8x8x96xbf16> to vector<8x8x96xbf16>
    %2 = arith.extf %1 : vector<8x8x96xbf16> to vector<8x8x96xf32>
    %3 = vector.shape_cast %2 : vector<8x8x96xf32> to vector<64x96xf32>
    %c0_3 = arith.constant 0 : index
    %c0_4 = arith.constant 0 : index
    %c0_5 = arith.constant 0 : index
    %c0_6 = arith.constant 0 : index
    %4 = vector.load %arg4[%c0_3, %c0_4, %c0_5, %c0_6] : memref<1x8x8x32xf32, #tpu.memory_space<vmem>>, vector<1x8x8x32xf32>
    %5 = vector.shape_cast %4 : vector<1x8x8x32xf32> to vector<8x8x32xf32>
    %6 = vector.shape_cast %5 : vector<8x8x32xf32> to vector<64x32xf32>
    %c0_7 = arith.constant 0 : index
    %c0_8 = arith.constant 0 : index
    %7 = vector.load %arg8[%c0_7, %c0_8] : memref<1x32xf32, #tpu.memory_space<vmem>>, vector<1x32xf32>
    %8 = vector.broadcast %7 : vector<1x32xf32> to vector<64x32xf32>
    %9 = arith.addf %8, %6 : vector<64x32xf32>
    %c0_9 = arith.constant 0 : index
    %c0_10 = arith.constant 0 : index
    %c0_11 = arith.constant 0 : index
    %10 = vector.load %arg6[%c0_9, %c0_10, %c0_11] : memref<1x64x64xf32, #tpu.memory_space<vmem>>, vector<1x64x64xf32>
    %11 = vector.shape_cast %10 : vector<1x64x64xf32> to vector<64x64xf32>
    %12 = vector.extract_strided_slice %3 {offsets = [0, 0], sizes = [64, 8], strides = [1, 1]} : vector<64x96xf32> to vector<64x8xf32>
    %13 = arith.truncf %12 : vector<64x8xf32> to vector<64x8xbf16>
    %14 = vector.extract_strided_slice %3 {offsets = [0, 32], sizes = [64, 8], strides = [1, 1]} : vector<64x96xf32> to vector<64x8xf32>
    %15 = arith.truncf %14 : vector<64x8xf32> to vector<64x8xbf16>
    %16 = vector.extract_strided_slice %3 {offsets = [0, 64], sizes = [64, 8], strides = [1, 1]} : vector<64x96xf32> to vector<64x8xf32>
    %17 = arith.truncf %16 : vector<64x8xf32> to vector<64x8xbf16>
    %cst = arith.constant dense<0.000000e+00> : vector<64x64xf32>
    %18 = tpu.matmul %13, %15, %cst {dimension_numbers = #tpu.dot_dimension_numbers<[1], [1], [0], [0], [0, 0, 1, 0], [], []>} : vector<64x8xbf16>, vector<64x8xbf16>, vector<64x64xf32> -> vector<64x64xf32>
    %c0_12 = arith.constant 0 : index
    %c0_13 = arith.constant 0 : index
    %c0_14 = arith.constant 0 : index
    %19 = vector.load %arg5[%c0_12, %c0_13, %c0_14] : memref<4x64x64xf32, #tpu.memory_space<vmem>>, vector<1x64x64xf32>
    %20 = vector.shape_cast %19 : vector<1x64x64xf32> to vector<64x64xf32>
    %21 = arith.addf %18, %20 : vector<64x64xf32>
    %22 = arith.addf %21, %11 : vector<64x64xf32>
    %cst_15 = arith.constant dense<0xFF800000> : vector<64xf32>
    %23 = vector.multi_reduction <maximumf>, %22, %cst_15 [1] : vector<64x64xf32> to vector<64xf32>
    %24 = vector.shape_cast %23 : vector<64xf32> to vector<64x1xf32>
    %25 = vector.broadcast %24 : vector<64x1xf32> to vector<64x64xf32>
    %26 = arith.subf %22, %25 : vector<64x64xf32>
    %27 = math.exp %26 : vector<64x64xf32>
    %cst_16 = arith.constant dense<0.000000e+00> : vector<64xf32>
    %28 = vector.multi_reduction <add>, %27, %cst_16 [1] : vector<64x64xf32> to vector<64xf32>
    %29 = vector.shape_cast %28 : vector<64xf32> to vector<64x1xf32>
    %30 = tpu.reciprocal %29 {approx = true} : vector<64x1xf32> -> vector<64x1xf32>
    %31 = vector.broadcast %30 : vector<64x1xf32> to vector<64x64xf32>
    %32 = arith.mulf %27, %31 : vector<64x64xf32>
    %33 = arith.truncf %32 : vector<64x64xf32> to vector<64x64xbf16>
    %cst_17 = arith.constant dense<0.000000e+00> : vector<64x8xf32>
    %34 = tpu.matmul %33, %17, %cst_17 {dimension_numbers = #tpu.dot_dimension_numbers<[1], [0], [0], [1], [0, 0, 1, 1], [], []>} : vector<64x64xbf16>, vector<64x8xbf16>, vector<64x8xf32> -> vector<64x8xf32>
    %c0_18 = arith.constant 0 : index
    %c0_19 = arith.constant 0 : index
    %35 = vector.load %arg7[%c0_18, %c0_19] : memref<32x32xf32, #tpu.memory_space<vmem>>, vector<8x32xf32>
    %36 = arith.truncf %35 : vector<8x32xf32> to vector<8x32xbf16>
    %37 = arith.truncf %34 : vector<64x8xf32> to vector<64x8xbf16>
    %cst_20 = arith.constant dense<0.000000e+00> : vector<64x32xf32>
    %38 = tpu.matmul %37, %36, %cst_20 {dimension_numbers = #tpu.dot_dimension_numbers<[1], [0], [0], [1], [0, 0, 1, 1], [], []>} : vector<64x8xbf16>, vector<8x32xbf16>, vector<64x32xf32> -> vector<64x32xf32>
    %39 = arith.addf %9, %38 : vector<64x32xf32>
    %40 = vector.extract_strided_slice %3 {offsets = [0, 8], sizes = [64, 8], strides = [1, 1]} : vector<64x96xf32> to vector<64x8xf32>
    %41 = arith.truncf %40 : vector<64x8xf32> to vector<64x8xbf16>
    %42 = vector.extract_strided_slice %3 {offsets = [0, 40], sizes = [64, 8], strides = [1, 1]} : vector<64x96xf32> to vector<64x8xf32>
    %43 = arith.truncf %42 : vector<64x8xf32> to vector<64x8xbf16>
    %44 = vector.extract_strided_slice %3 {offsets = [0, 72], sizes = [64, 8], strides = [1, 1]} : vector<64x96xf32> to vector<64x8xf32>
    %45 = arith.truncf %44 : vector<64x8xf32> to vector<64x8xbf16>
    %cst_21 = arith.constant dense<0.000000e+00> : vector<64x64xf32>
    %46 = tpu.matmul %41, %43, %cst_21 {dimension_numbers = #tpu.dot_dimension_numbers<[1], [1], [0], [0], [0, 0, 1, 0], [], []>} : vector<64x8xbf16>, vector<64x8xbf16>, vector<64x64xf32> -> vector<64x64xf32>
    %c1 = arith.constant 1 : index
    %c0_22 = arith.constant 0 : index
    %c0_23 = arith.constant 0 : index
    %47 = vector.load %arg5[%c1, %c0_22, %c0_23] : memref<4x64x64xf32, #tpu.memory_space<vmem>>, vector<1x64x64xf32>
    %48 = vector.shape_cast %47 : vector<1x64x64xf32> to vector<64x64xf32>
    %49 = arith.addf %46, %48 : vector<64x64xf32>
    %50 = arith.addf %49, %11 : vector<64x64xf32>
    %cst_24 = arith.constant dense<0xFF800000> : vector<64xf32>
    %51 = vector.multi_reduction <maximumf>, %50, %cst_24 [1] : vector<64x64xf32> to vector<64xf32>
    %52 = vector.shape_cast %51 : vector<64xf32> to vector<64x1xf32>
    %53 = vector.broadcast %52 : vector<64x1xf32> to vector<64x64xf32>
    %54 = arith.subf %50, %53 : vector<64x64xf32>
    %55 = math.exp %54 : vector<64x64xf32>
    %cst_25 = arith.constant dense<0.000000e+00> : vector<64xf32>
    %56 = vector.multi_reduction <add>, %55, %cst_25 [1] : vector<64x64xf32> to vector<64xf32>
    %57 = vector.shape_cast %56 : vector<64xf32> to vector<64x1xf32>
    %58 = tpu.reciprocal %57 {approx = true} : vector<64x1xf32> -> vector<64x1xf32>
    %59 = vector.broadcast %58 : vector<64x1xf32> to vector<64x64xf32>
    %60 = arith.mulf %55, %59 : vector<64x64xf32>
    %61 = arith.truncf %60 : vector<64x64xf32> to vector<64x64xbf16>
    %cst_26 = arith.constant dense<0.000000e+00> : vector<64x8xf32>
    %62 = tpu.matmul %61, %45, %cst_26 {dimension_numbers = #tpu.dot_dimension_numbers<[1], [0], [0], [1], [0, 0, 1, 1], [], []>} : vector<64x64xbf16>, vector<64x8xbf16>, vector<64x8xf32> -> vector<64x8xf32>
    %c8 = arith.constant 8 : index
    %c0_27 = arith.constant 0 : index
    %63 = vector.load %arg7[%c8, %c0_27] : memref<32x32xf32, #tpu.memory_space<vmem>>, vector<8x32xf32>
    %64 = arith.truncf %63 : vector<8x32xf32> to vector<8x32xbf16>
    %65 = arith.truncf %62 : vector<64x8xf32> to vector<64x8xbf16>
    %cst_28 = arith.constant dense<0.000000e+00> : vector<64x32xf32>
    %66 = tpu.matmul %65, %64, %cst_28 {dimension_numbers = #tpu.dot_dimension_numbers<[1], [0], [0], [1], [0, 0, 1, 1], [], []>} : vector<64x8xbf16>, vector<8x32xbf16>, vector<64x32xf32> -> vector<64x32xf32>
    %67 = arith.addf %39, %66 : vector<64x32xf32>
    %68 = vector.extract_strided_slice %3 {offsets = [0, 16], sizes = [64, 8], strides = [1, 1]} : vector<64x96xf32> to vector<64x8xf32>
    %69 = arith.truncf %68 : vector<64x8xf32> to vector<64x8xbf16>
    %70 = vector.extract_strided_slice %3 {offsets = [0, 48], sizes = [64, 8], strides = [1, 1]} : vector<64x96xf32> to vector<64x8xf32>
    %71 = arith.truncf %70 : vector<64x8xf32> to vector<64x8xbf16>
    %72 = vector.extract_strided_slice %3 {offsets = [0, 80], sizes = [64, 8], strides = [1, 1]} : vector<64x96xf32> to vector<64x8xf32>
    %73 = arith.truncf %72 : vector<64x8xf32> to vector<64x8xbf16>
    %cst_29 = arith.constant dense<0.000000e+00> : vector<64x64xf32>
    %74 = tpu.matmul %69, %71, %cst_29 {dimension_numbers = #tpu.dot_dimension_numbers<[1], [1], [0], [0], [0, 0, 1, 0], [], []>} : vector<64x8xbf16>, vector<64x8xbf16>, vector<64x64xf32> -> vector<64x64xf32>
    %c2 = arith.constant 2 : index
    %c0_30 = arith.constant 0 : index
    %c0_31 = arith.constant 0 : index
    %75 = vector.load %arg5[%c2, %c0_30, %c0_31] : memref<4x64x64xf32, #tpu.memory_space<vmem>>, vector<1x64x64xf32>
    %76 = vector.shape_cast %75 : vector<1x64x64xf32> to vector<64x64xf32>
    %77 = arith.addf %74, %76 : vector<64x64xf32>
    %78 = arith.addf %77, %11 : vector<64x64xf32>
    %cst_32 = arith.constant dense<0xFF800000> : vector<64xf32>
    %79 = vector.multi_reduction <maximumf>, %78, %cst_32 [1] : vector<64x64xf32> to vector<64xf32>
    %80 = vector.shape_cast %79 : vector<64xf32> to vector<64x1xf32>
    %81 = vector.broadcast %80 : vector<64x1xf32> to vector<64x64xf32>
    %82 = arith.subf %78, %81 : vector<64x64xf32>
    %83 = math.exp %82 : vector<64x64xf32>
    %cst_33 = arith.constant dense<0.000000e+00> : vector<64xf32>
    %84 = vector.multi_reduction <add>, %83, %cst_33 [1] : vector<64x64xf32> to vector<64xf32>
    %85 = vector.shape_cast %84 : vector<64xf32> to vector<64x1xf32>
    %86 = tpu.reciprocal %85 {approx = true} : vector<64x1xf32> -> vector<64x1xf32>
    %87 = vector.broadcast %86 : vector<64x1xf32> to vector<64x64xf32>
    %88 = arith.mulf %83, %87 : vector<64x64xf32>
    %89 = arith.truncf %88 : vector<64x64xf32> to vector<64x64xbf16>
    %cst_34 = arith.constant dense<0.000000e+00> : vector<64x8xf32>
    %90 = tpu.matmul %89, %73, %cst_34 {dimension_numbers = #tpu.dot_dimension_numbers<[1], [0], [0], [1], [0, 0, 1, 1], [], []>} : vector<64x64xbf16>, vector<64x8xbf16>, vector<64x8xf32> -> vector<64x8xf32>
    %c16 = arith.constant 16 : index
    %c0_35 = arith.constant 0 : index
    %91 = vector.load %arg7[%c16, %c0_35] : memref<32x32xf32, #tpu.memory_space<vmem>>, vector<8x32xf32>
    %92 = arith.truncf %91 : vector<8x32xf32> to vector<8x32xbf16>
    %93 = arith.truncf %90 : vector<64x8xf32> to vector<64x8xbf16>
    %cst_36 = arith.constant dense<0.000000e+00> : vector<64x32xf32>
    %94 = tpu.matmul %93, %92, %cst_36 {dimension_numbers = #tpu.dot_dimension_numbers<[1], [0], [0], [1], [0, 0, 1, 1], [], []>} : vector<64x8xbf16>, vector<8x32xbf16>, vector<64x32xf32> -> vector<64x32xf32>
    %95 = arith.addf %67, %94 : vector<64x32xf32>
    %96 = vector.extract_strided_slice %3 {offsets = [0, 24], sizes = [64, 8], strides = [1, 1]} : vector<64x96xf32> to vector<64x8xf32>
    %97 = arith.truncf %96 : vector<64x8xf32> to vector<64x8xbf16>
    %98 = vector.extract_strided_slice %3 {offsets = [0, 56], sizes = [64, 8], strides = [1, 1]} : vector<64x96xf32> to vector<64x8xf32>
    %99 = arith.truncf %98 : vector<64x8xf32> to vector<64x8xbf16>
    %100 = vector.extract_strided_slice %3 {offsets = [0, 88], sizes = [64, 8], strides = [1, 1]} : vector<64x96xf32> to vector<64x8xf32>
    %101 = arith.truncf %100 : vector<64x8xf32> to vector<64x8xbf16>
    %cst_37 = arith.constant dense<0.000000e+00> : vector<64x64xf32>
    %102 = tpu.matmul %97, %99, %cst_37 {dimension_numbers = #tpu.dot_dimension_numbers<[1], [1], [0], [0], [0, 0, 1, 0], [], []>} : vector<64x8xbf16>, vector<64x8xbf16>, vector<64x64xf32> -> vector<64x64xf32>
    %c3 = arith.constant 3 : index
    %c0_38 = arith.constant 0 : index
    %c0_39 = arith.constant 0 : index
    %103 = vector.load %arg5[%c3, %c0_38, %c0_39] : memref<4x64x64xf32, #tpu.memory_space<vmem>>, vector<1x64x64xf32>
    %104 = vector.shape_cast %103 : vector<1x64x64xf32> to vector<64x64xf32>
    %105 = arith.addf %102, %104 : vector<64x64xf32>
    %106 = arith.addf %105, %11 : vector<64x64xf32>
    %cst_40 = arith.constant dense<0xFF800000> : vector<64xf32>
    %107 = vector.multi_reduction <maximumf>, %106, %cst_40 [1] : vector<64x64xf32> to vector<64xf32>
    %108 = vector.shape_cast %107 : vector<64xf32> to vector<64x1xf32>
    %109 = vector.broadcast %108 : vector<64x1xf32> to vector<64x64xf32>
    %110 = arith.subf %106, %109 : vector<64x64xf32>
    %111 = math.exp %110 : vector<64x64xf32>
    %cst_41 = arith.constant dense<0.000000e+00> : vector<64xf32>
    %112 = vector.multi_reduction <add>, %111, %cst_41 [1] : vector<64x64xf32> to vector<64xf32>
    %113 = vector.shape_cast %112 : vector<64xf32> to vector<64x1xf32>
    %114 = tpu.reciprocal %113 {approx = true} : vector<64x1xf32> -> vector<64x1xf32>
    %115 = vector.broadcast %114 : vector<64x1xf32> to vector<64x64xf32>
    %116 = arith.mulf %111, %115 : vector<64x64xf32>
    %117 = arith.truncf %116 : vector<64x64xf32> to vector<64x64xbf16>
    %cst_42 = arith.constant dense<0.000000e+00> : vector<64x8xf32>
    %118 = tpu.matmul %117, %101, %cst_42 {dimension_numbers = #tpu.dot_dimension_numbers<[1], [0], [0], [1], [0, 0, 1, 1], [], []>} : vector<64x64xbf16>, vector<64x8xbf16>, vector<64x8xf32> -> vector<64x8xf32>
    %c24 = arith.constant 24 : index
    %c0_43 = arith.constant 0 : index
    %119 = vector.load %arg7[%c24, %c0_43] : memref<32x32xf32, #tpu.memory_space<vmem>>, vector<8x32xf32>
    %120 = arith.truncf %119 : vector<8x32xf32> to vector<8x32xbf16>
    %121 = arith.truncf %118 : vector<64x8xf32> to vector<64x8xbf16>
    %cst_44 = arith.constant dense<0.000000e+00> : vector<64x32xf32>
    %122 = tpu.matmul %121, %120, %cst_44 {dimension_numbers = #tpu.dot_dimension_numbers<[1], [0], [0], [1], [0, 0, 1, 1], [], []>} : vector<64x8xbf16>, vector<8x32xbf16>, vector<64x32xf32> -> vector<64x32xf32>
    %123 = arith.addf %95, %122 : vector<64x32xf32>
    %124 = vector.shape_cast %123 : vector<64x32xf32> to vector<8x8x32xf32>
    %c0_45 = arith.constant 0 : index
    %c0_46 = arith.constant 0 : index
    %c0_47 = arith.constant 0 : index
    %c0_48 = arith.constant 0 : index
    %125 = vector.load %arg9[%c0_45, %c0_46, %c0_47, %c0_48] : memref<1x8x8x32xf32, #tpu.memory_space<vmem>>, vector<1x8x8x32xf32>
    %126 = vector.shape_cast %125 : vector<1x8x8x32xf32> to vector<8x8x32xf32>
    %127 = vector.shape_cast %124 : vector<8x8x32xf32> to vector<1x8x8x32xf32>
    tpu.vector_store %arg9[%c0_45, %c0_46, %c0_47, %c0_48], %127 {strides = array<i32>} : memref<1x8x8x32xf32, #tpu.memory_space<vmem>>, vector<1x8x8x32xf32>,
    return
  }
  func.func @transform_0(%arg0: i32, %arg1: i32, %arg2: i32) -> (i32, i32, i32, i32) {
    %c0_i32 = arith.constant 0 : i32
    %c0_i32_0 = arith.constant 0 : i32
    return %arg0, %arg1, %arg2, %c0_i32 : i32, i32, i32, i32
  }
  func.func @transform_1(%arg0: i32, %arg1: i32, %arg2: i32) -> (i32, i32, i32, i32) {
    %c0_i32 = arith.constant 0 : i32
    %c0_i32_0 = arith.constant 0 : i32
    return %arg0, %arg1, %arg2, %c0_i32 : i32, i32, i32, i32
  }
  func.func @transform_2(%arg0: i32, %arg1: i32, %arg2: i32) -> (i32, i32, i32) {
    %c0_i32 = arith.constant 0 : i32
    %c0_i32_0 = arith.constant 0 : i32
    %c0_i32_1 = arith.constant 0 : i32
    %c0_i32_2 = arith.constant 0 : i32
    return %c0_i32, %c0_i32_0, %c0_i32_1 : i32, i32, i32
  }
  func.func @transform_3(%arg0: i32, %arg1: i32, %arg2: i32) -> (i32, i32, i32) {
    %c2_i32 = arith.constant 2 : i32
    %0 = arith.muli %arg1, %c2_i32 : i32
    %1 = arith.addi %0, %arg2 : i32
    %c0_i32 = arith.constant 0 : i32
    %c0_i32_0 = arith.constant 0 : i32
    %c0_i32_1 = arith.constant 0 : i32
    return %1, %c0_i32, %c0_i32_0 : i32, i32, i32
  }
  func.func @transform_4(%arg0: i32, %arg1: i32, %arg2: i32) -> (i32, i32) {
    %c0_i32 = arith.constant 0 : i32
    %c0_i32_0 = arith.constant 0 : i32
    %c0_i32_1 = arith.constant 0 : i32
    return %c0_i32, %c0_i32_0 : i32, i32
  }
  func.func @transform_5(%arg0: i32, %arg1: i32, %arg2: i32) -> (i32, i32) {
    %c0_i32 = arith.constant 0 : i32
    %c0_i32_0 = arith.constant 0 : i32
    %c0_i32_1 = arith.constant 0 : i32
    return %c0_i32, %c0_i32_0 : i32, i32
  }
  func.func @transform_6(%arg0: i32, %arg1: i32, %arg2: i32) -> (i32, i32, i32, i32) {
    %c0_i32 = arith.constant 0 : i32
    %c0_i32_0 = arith.constant 0 : i32
    return %arg0, %arg1, %arg2, %c0_i32 : i32, i32, i32, i32
  }
}

</mosaic_0001>

<bundles_post_ra>
// kernel: forward.9
= control target key start
LH: loop header
LB: loop body
LE: loop exit
PB: predicated region body
PF: predicated region fallthrough
CT: control target
= control target key end

     0   :  { %s2912_s18 = smov 0   ;;  %s2914_s19 = smov 0   ;;  %s3727_s0 = inlined_call_operand.vmem [shape: bf16[2,16,16,96], index: 0, kind: input, shape index: {}]   ;;  %s3728_s1 = inlined_call_operand.vmem [shape: f32[2,16,16,32], index: 1, kind: input, shape index: {}]   ;;  %s3729_s2 = inlined_call_operand.vmem [shape: f32[4,64,64], index: 2, kind: input, shape index: {}]   ;;  %s3730_s3 = inlined_call_operand.vmem [shape: f32[32,32], index: 3, kind: input, shape index: {}]   ;;  %s3731_s4 = inlined_call_operand.vmem [shape: f32[1,32], index: 4, kind: input, shape index: {}]   ;;  %s3732_s5 = inlined_call_operand.vmem [shape: f32[2,16,16,32], index: 5, kind: output, shape index: {}]  }
   0x1   :  { %s2916_s20 = smov 0   ;;  %s2918_s21 = smov 0  }
   0x2   :  { %s2920_s22 = smov 0   ;;  %s2922_s23 = smov 0  }
   0x3   :  { %s2924_s24 = smov 0   ;;  %s2926_s25 = smov 0  }
   0x4   :  { %s2928_s26 = smov 0  }
   0x5 LB: > { %s27_s27 = sadd.s32 1, %s2857_s23  ;;  %s30_s28 = sadd.s32 1, %s2861_s24  ;;  %s2869_s26 = sphi %s2928_s26, %s15_s26   ;;  %s2865_s25 = sphi %s2926_s25, %s3745_s25   ;;  %s2861_s24 = sphi %s2924_s24, %s3744_s24   ;;  %s2857_s23 = sphi %s2922_s23, %s3743_s23   ;;  %s2853_s22 = sphi %s2920_s22, %s3742_s22   ;;  %s2849_s21 = sphi %s2918_s21, %s3741_s21   ;;  %s2845_s20 = sphi %s2916_s20, %s3740_s20   ;;  %s2841_s19 = sphi %s2914_s19, %s3739_s19   ;;  %s2837_s18 = sphi %s2912_s18, %s3738_s18  }
   0x6   : > { %p28_p0 = scmp.ge.s32.totalorder %s27_s27, 2  ;;  %s2203_s29 = sadd.s32 4294967295, %s2869_s26  }
   0x7   : > { %s34_s30 = sadd.s32 1, %s2865_s25  ;;  %p52_p1 = scmp.ne.s32.totalorder %s2841_s19, %s2837_s18 }
   0x8   : > { %s3747_s27 = smov (%p28_p0, %s27_s27), 0  ;;  %s3749_s28 = smov (!%p28_p0, %s30_s28), %s2861_s24 }
   0x9   : > { %p32_p2 = scmp.ge.s32.totalorder %s3749_s28, 2  ;;  %p53_p3 = scmp.eq.s32.totalorder %s2869_s26, 0 }
   0xa   : > { %p179_p4 = scmp.eq.s32.totalorder %s2203_s29, 7  ;;  %s41_s9 = ssub.s32 %s2857_s23, %s3747_s27 }
   0xb   : > { %s3751_s28 = smov (%p32_p2, %s3749_s28), 0  ;;  %s3753_s30 = smov (!%p32_p2, %s34_s30), %s2865_s25 }
   0xc   : > { %p2970_p5 = por %p53_p3, %p52_p1  ;;  %p36_p6 = scmp.ge.s32.totalorder %s3753_s30, 2 }
   0xd   : > { %p2974_p7 = por %p179_p4, %p52_p1  ;;  %s39_s8 = ssub.s32 %s2861_s24, %s3751_s28 }
   0xe   : > { %s3755_s30 = smov (%p36_p6, %s3753_s30), 0  ;;  %s45_s13 = sadd.s32 1, %s2841_s19 }
   0xf   : > { %3736 = sst [smem:[#allocation5_spill]] %s3755_s30  ;;  %s38_s10 = ssub.s32 %s2865_s25, %s3755_s30 }
  0x10   : > { %s40_s11 = sor.u32 %s39_s8, %s38_s10  ;;  %p2206_p9 = scmp.ge.s32.totalorder %s2869_s26, 8 }
  0x11   : > { %s42_s12 = sor.u32 %s41_s9, %s40_s11 }
  0x12   : > { %p43_p8 = scmp.eq.s32.totalorder %s42_s12, 0  ;;  %210 = sbr.rel (%p2206_p9) target bundleno = 46 (0x2e), region = 28 }
  0x14   : > { %s2988_s14 = scalar_select %p43_p8, %s2841_s19, %s45_s13  }
  0x17   : > { %213 = sbr.rel (!%p2970_p5) target bundleno = 35 (0x23), region = 32  ;;  %s215_s15 = sand.u32 (%p2970_p5), 1, %s2841_s19  }
  0x18   : > { %s2305_s16 = sshll.u32 (%p2970_p5), %s2861_s24, 4  ;;  %s2207_s17 = sshll.u32 (%p2970_p5), %s215_s15, 5 }
  0x19   : > { %s220_s29 = sadd.s32 (%p2970_p5), %s2857_s23, %s2305_s16  ;;  %s2210_s8 = sshll.u32 (%p2970_p5), %s2865_s25, 5 }
  0x1a   : > { %s222_s9 = sadd.s32 (%p2970_p5), %s2210_s8, %s220_s29  ;;  %s217_s30 = scalar_lea.vmem (%p2970_p5), [#allocation2], %s2207_s17 }
  0x1b   : > { %s2211_s10 = sshll.u32 (%p2970_p5), %s222_s9, 2 }
  0x1c   : > { %s224_s13 = scalar_lea.vmem %s3727_s0, %s2211_s10 }
  0x1d   : > { %v241_v0 = vld [vmem:[%s224_s13] sm:$0xf]  ;;  %v243_v1 = vld [vmem:[%s224_s13 + $0x8] sm:$0xf]  ;;  %v245_v2 = vld [vmem:[%s224_s13 + $0x10] sm:$0xf] }
  0x1e   : > { %242 = vst [vmem:[%s217_s30] sm:$0xf] %v241_v0  ;;  %244 = vst [vmem:[%s217_s30 + $0x4] sm:$0xf] %v243_v1  ;;  %v247_v3 = vld [vmem:[%s224_s13 + $0x18] sm:$0xf] }
  0x1f   : > { %246 = vst [vmem:[%s217_s30 + $0x8] sm:$0xf] %v245_v2  ;;  %v249_v4 = vld [vmem:[%s224_s13 + $0x20] sm:$0xf]  ;;  %v251_v5 = vld [vmem:[%s224_s13 + $0x28] sm:$0xf] }
  0x20   : > { %248 = vst [vmem:[%s217_s30 + $0xc] sm:$0xf] %v247_v3  ;;  %250 = vst [vmem:[%s217_s30 + $0x10] sm:$0xf] %v249_v4  ;;  %v253_v6 = vld [vmem:[%s224_s13 + $0x30] sm:$0xf] }
  0x21   : > { %252 = vst [vmem:[%s217_s30 + $0x14] sm:$0xf] %v251_v5  ;;  %v255_v7 = vld [vmem:[%s224_s13 + $0x38] sm:$0xf]  ;;  %254 = vst [vmem:[%s217_s30 + $0x18] sm:$0xf] %v253_v6 }
  0x22   : > { %256 = vst [vmem:[%s217_s30 + $0x1c] sm:$0xf] %v255_v7 }
  0x23 PF: > { %296 = sbr.rel (!%p2970_p5) target bundleno = 46 (0x2e), region = 73  ;;  %s298_s15 = sand.u32 (%p2970_p5), 1, %s2841_s19  }
  0x24   : > { %s2306_s16 = sshll.u32 (%p2970_p5), %s2861_s24, 4  ;;  %s2212_s17 = sshll.u32 (%p2970_p5), %s298_s15, 6 }
  0x25   : > { %s303_s29 = sadd.s32 (%p2970_p5), %s2857_s23, %s2306_s16  ;;  %s2215_s8 = sshll.u32 (%p2970_p5), %s2865_s25, 5 }
  0x26   : > { %s305_s9 = sadd.s32 (%p2970_p5), %s2215_s8, %s303_s29  ;;  %s300_s30 = scalar_lea.vmem (%p2970_p5), [#allocation3], %s2212_s17 }
  0x27   : > { %s2216_s10 = sshll.u32 (%p2970_p5), %s305_s9, 3 }
  0x28   : > { %s307_s13 = scalar_lea.vmem %s3728_s1, %s2216_s10 }
  0x29   : > { %v350_v8 = vld [vmem:[%s307_s13] sm:$0xff]  ;;  %v352_v9 = vld [vmem:[%s307_s13 + $0x10] sm:$0xff] }
  0x2a   : > { %v354_v10 = vld [vmem:[%s307_s13 + $0x20] sm:$0xff]  ;;  %351 = vst [vmem:[%s300_s30] sm:$0xff] %v350_v8  ;;  %353 = vst [vmem:[%s300_s30 + $0x8] sm:$0xff] %v352_v9  ;;  %v356_v11 = vld [vmem:[%s307_s13 + $0x30] sm:$0xff] }
  0x2b   : > { %355 = vst [vmem:[%s300_s30 + $0x10] sm:$0xff] %v354_v10  ;;  %v358_v12 = vld [vmem:[%s307_s13 + $0x40] sm:$0xff]  ;;  %v360_v13 = vld [vmem:[%s307_s13 + $0x50] sm:$0xff]  ;;  %357 = vst [vmem:[%s300_s30 + $0x18] sm:$0xff] %v356_v11 }
  0x2c   : > { %359 = vst [vmem:[%s300_s30 + $0x20] sm:$0xff] %v358_v12  ;;  %361 = vst [vmem:[%s300_s30 + $0x28] sm:$0xff] %v360_v13  ;;  %v362_v14 = vld [vmem:[%s307_s13 + $0x60] sm:$0xff]  ;;  %v364_v15 = vld [vmem:[%s307_s13 + $0x70] sm:$0xff] }
  0x2d   : > { %363 = vst [vmem:[%s300_s30 + $0x30] sm:$0xff] %v362_v14  ;;  %365 = vst [vmem:[%s300_s30 + $0x38] sm:$0xff] %v364_v15 }
  0x2e PF: > { %p2217_p10 = scmp.ge.s32.totalorder %s2869_s26, 1  ;;  %p370_p11 = scmp.lt.s32.totalorder %s2869_s26, 9 }
  0x30   : > { %p371_p12 = pnand %p2217_p10, %p370_p11 }
  0x31   : > { %s377_s6 = sand.u32 (!%p371_p12), 1, %s2837_s18   ;;  %s2871_s17 = smov (!%p371_p12), 96  }
  0x32   : > { %374 = sbr.rel (%p371_p12) target bundleno = 1951 (0x79f), region = 111  ;;  %s2218_s15 = sshll.u32 (!%p371_p12), %s377_s6, 5 }
  0x33   : > { %s3014_s16 = scalar_lea.vmem (!%p371_p12), [#allocation2], %s2218_s15  ;;  %s2872_s29 = smov (!%p371_p12), 88  }
  0x34   : > { %s2873_s8 = smov (!%p371_p12), 120   ;;  %s2874_s15 = smov (!%p371_p12), 64  }
  0x35   : > { %s2877_s30 = smov (!%p371_p12), 56  }
  0x37   : > { %v3017_v16 = vld [vmem:[%s3014_s16 + $0x18] sm:$0xff]   ;;  %v3020_v17 = vld [vmem:[%s3014_s16 + $0x10] sm:$0xff]   ;;  %v3024_v18 = vld [vmem:[%s3014_s16 + $0x8] sm:$0xff]   ;;  %vm481_vm0 = vcmask 64512   ;;  %vm571_vm1 = vcmask 523264   ;;  %vm771_vm2 = vcmask 1043456  }
  0x38   : > { %479 = vrot.lane.b32.xlu0 %v3017_v16, %s2871_s17  ;;  %v3027_v19 = vld [vmem:[%s3014_s16] sm:$0xff]   ;;  %475 = vrot.lane.b32.xlu1 %v3024_v18, %s2871_s17  ;;  %v463_v42 = vld [vmem:[%s3729_s2 + $0x10] sm:$0xff]  ;;  %vm2015_vm3 = vcmask 261120   ;;  %s2307_s11 = sshll.u32 (%p2974_p7), %s2849_s21, 4  ;;  %s2301_s12 = sshll.u32 (%p2974_p7), %s2853_s22, 5 }
  0x39   : > { %2400 = vmatprep.mubr.msk.bf16.mxu0 %vm481_vm0, %v3027_v19  ;;  %v461_v41 = vld [vmem:[%s3729_s2] sm:$0xff]  ;;  %v462_v46 = vld [vmem:[%s3729_s2 + $0x8] sm:$0xff]  ;;  %v464_v49 = vld [vmem:[%s3729_s2 + $0x18] sm:$0xff]  ;;  %s2033_s13 = sadd.s32 (%p2974_p7), %s2845_s20, %s2307_s11 }
  0x3a   : > { %v465_v53 = vld [vmem:[%s3729_s2 + $0x20] sm:$0xff]  ;;  %v467_v57 = vld [vmem:[%s3729_s2 + $0x30] sm:$0xff]  ;;  %v466_v61 = vld [vmem:[%s3729_s2 + $0x28] sm:$0xff]  ;;  %s2035_s7 = sadd.s32 (%p2974_p7), %s2301_s12, %s2033_s13 }
  0x3b   : > { %v468_v1 = vld [vmem:[%s3729_s2 + $0x38] sm:$0xff] }
  0x3c   : > { %477 = vrot.lane.b32.xlu0 %v3020_v17, %s2871_s17  ;;  %473 = vrot.lane.b32.xlu1 %v3027_v19, %s2871_s17  ;;  %s2875_s17 = smov 80  }
  0x40   : > { %871 = vrot.lane.b32.xlu0 %v3017_v16, %s2872_s29  ;;  %869 = vrot.lane.b32.xlu1 %v3020_v17, %s2872_s29 }
  0x44   : > { %867 = vrot.lane.b32.xlu0 %v3024_v18, %s2872_s29  ;;  %865 = vrot.lane.b32.xlu1 %v3027_v19, %s2872_s29  ;;  %s2876_s29 = smov 112  }
  0x48   : > { %857 = vrot.lane.b32.xlu0 %v3027_v19, %s2873_s8  ;;  %859 = vrot.lane.b32.xlu1 %v3024_v18, %s2873_s8 }
  0x4c   : > { %861 = vrot.lane.b32.xlu0 %v3020_v17, %s2873_s8  ;;  %863 = vrot.lane.b32.xlu1 %v3017_v16, %s2873_s8  ;;  %s2879_s8 = smov 104  }
  0xaa   : > { %v480_v20 = vpop.permute.xlu0 %479  ;;  %v476_v24 = vpop.permute.xlu1 %475 }
  0xab   : > { %2560 = vmatprep.subr.msk.bf16.mxu0 %vm481_vm0, %v480_v20  ;;  %v504_v21 = vsel %vm481_vm0, %v480_v20, 0  ;;  %v498_v25 = vsel %vm481_vm0, %v476_v24, 0 }
  0xac   : > { %2393 = vmatpush3.bf16.xpose.msra.mxu0 %v504_v21 }
  0xae   : > { %v478_v22 = vpop.permute.xlu0 %477  ;;  %v474_v26 = vpop.permute.xlu1 %473 }
  0xaf   : > { %2561 = vmatprep.subr.msk.bf16.mxu0 %vm481_vm0, %v478_v22  ;;  %v501_v23 = vsel %vm481_vm0, %v478_v22, 0  ;;  %v495_v27 = vsel %vm481_vm0, %v474_v26, 0 }
  0xb2   : > { %v872_v28 = vpop.permute.xlu0 %871  ;;  %v870_v30 = vpop.permute.xlu1 %869 }
  0xb3   : > { %v895_v29 = vsel %vm481_vm0, %v872_v28, 0  ;;  %v892_v32 = vsel %vm481_vm0, %v870_v30, 0 }
  0xb4   : > { %2395 = vmatpush3.bf16.xpose.msra.mxu0 %v501_v23 }
  0xb5   : > { %2562 = vmatprep.subr.msk.bf16.mxu0 %vm481_vm0, %v476_v24 }
  0xb6   : > { %v868_v31 = vpop.permute.xlu0 %867  ;;  %v866_v35 = vpop.permute.xlu1 %865 }
  0xb7   : > { %v889_v34 = vsel %vm481_vm0, %v868_v31, 0  ;;  %v886_v36 = vsel %vm481_vm0, %v866_v35, 0 }
  0xba   : > { %v858_v33 = vpop.permute.xlu0 %857  ;;  %v860_v37 = vpop.permute.xlu1 %859 }
  0xbc   : > { %2397 = vmatpush3.bf16.xpose.msra.mxu0 %v498_v25 }
  0xbd   : > { %2563 = vmatprep.subr.msk.bf16.mxu0 %vm481_vm0, %v474_v26 }
  0xbe   : > { %v862_v38 = vpop.permute.xlu0 %861  ;;  %v864_v39 = vpop.permute.xlu1 %863 }
  0xc4   : > { %2399 = vmatpush3.bf16.xpose.msra.mxu0 %v495_v27 }
  0xc5   : > { %2565 = vmatprep.subr.msk.bf16.mxu0 %vm481_vm0, %v872_v28 }
  0xcb   : > { %2401 = vmatmul.mubr.msk.bf16.vlgmr.msra.gmra.mxu0 %vm481_vm0, %v3024_v18 }
  0xcc   : > { %2404 = vmatprep.mubr.msk.bf16.mxu0 %vm481_vm0, %v3020_v17  ;;  %2435 = vmatpush3.bf16.xpose.msra.mxu0 %v895_v29 }
  0xcd   : > { %2566 = vmatprep.subr.msk.bf16.mxu0 %vm481_vm0, %v870_v30 }
  0xd3   : > { %2405 = vmatmul.mubr.msk.bf16.gmra.mxu0 %vm481_vm0, %v3017_v16 }
  0xd4   : > { %2437 = vmatpush3.bf16.xpose.msra.mxu0 %v892_v32  ;;  %2442 = vmatprep.mubr.msk.bf16.mxu0 %vm481_vm0, %v858_v33 }
  0xd5   : > { %2567 = vmatprep.subr.msk.bf16.mxu0 %vm481_vm0, %v868_v31 }
  0xdc   : > { %2439 = vmatpush3.bf16.xpose.msra.mxu0 %v889_v34 }
  0xdd   : > { %2568 = vmatprep.subr.msk.bf16.mxu0 %vm481_vm0, %v866_v35 }
  0xe4   : > { %2441 = vmatpush3.bf16.xpose.msra.mxu0 %v886_v36 }
  0xeb   : > { %2443 = vmatmul.mubr.msk.bf16.vlgmr.msra.gmra.mxu0 %vm481_vm0, %v860_v37 }
  0xec   : > { %2446 = vmatprep.mubr.msk.bf16.mxu0 %vm481_vm0, %v862_v38 }
  0xf3   : > { %2447 = vmatmul.mubr.msk.bf16.gmra.mxu0 %vm481_vm0, %v864_v39 }
 0x18b   : > { %v2402_v40 = vpop.f32.mrf.mxu0 }
 0x18c   : > { %v549_v47 = vadd.f32 %v2402_v40, %v463_v42 }
 0x18d   : > { %v540_v43 = vpop.f32.mrf.mxu0 }
 0x18e   : > { %v541_v44 = vadd.f32 %v540_v43, %v461_v41  ;;  %v578_v56 = vsel %vm571_vm1, %v549_v47, -inf }
 0x18f   : > { %v2403_v45 = vpop.f32.mrf.mxu0 }
 0x190   : > { %v572_v48 = vsel %vm571_vm1, %v541_v44, -inf  ;;  %v552_v54 = vadd.f32 %v2403_v45, %v464_v49 }
 0x191   : > { %v543_v50 = vpop.f32.mrf.mxu0  ;;  %573 = vmax.xlane.f32.xlu0 %v572_v48 }
 0x192   : > { %v544_v51 = vadd.f32 %v543_v50, %v462_v46  ;;  %v581_v0 = vsel %vm571_vm1, %v552_v54, -inf }
 0x193   : > { %v2406_v52 = vpop.f32.mrf.mxu0 }
 0x194   : > { %v575_v55 = vsel %vm571_vm1, %v544_v51, -inf  ;;  %v565_v62 = vadd.f32 %v2406_v52, %v467_v57  ;;  %v2238_v57 = vld [vmem:[%s3729_s2 + $0x40] sm:$0xff] }
 0x195   : > { %v556_v58 = vpop.f32.mrf.mxu0  ;;  %576 = vmax.xlane.f32.xlu1 %v575_v55  ;;  %579 = vmax.xlane.f32.xlu0 %v578_v56 }
 0x196   : > { %v557_v59 = vadd.f32 %v556_v58, %v465_v53  ;;  %v590_v5 = vsel %vm571_vm1, %v565_v62, -inf  ;;  %v2239_v58 = vld [vmem:[%s3729_s2 + $0x48] sm:$0xff] }
 0x197   : > { %v2407_v60 = vpop.f32.mrf.mxu0 }
 0x198   : > { %v584_v63 = vsel %vm571_vm1, %v557_v59, -inf  ;;  %v568_v4 = vadd.f32 %v2407_v60, %v468_v1  ;;  %v2242_v60 = vld [vmem:[%s3729_s2 + $0x60] sm:$0xff] }
 0x199   : > { %v559_v2 = vpop.f32.mrf.mxu0  ;;  %585 = vmax.xlane.f32.xlu1 %v584_v63  ;;  %582 = vmax.xlane.f32.xlu0 %v581_v0  ;;  %v2240_v63 = vld [vmem:[%s3729_s2 + $0x50] sm:$0xff] }
 0x19a   : > { %v560_v3 = vadd.f32 %v559_v2, %v466_v61  ;;  %v593_v7 = vsel %vm571_vm1, %v568_v4, -inf }
 0x19c   : > { %v587_v6 = vsel %vm571_vm1, %v560_v3, -inf }
 0x19d   : > { %591 = vmax.xlane.f32.xlu1 %v590_v5  ;;  %588 = vmax.xlane.f32.xlu0 %v587_v6  ;;  %v2241_v5 = vld [vmem:[%s3729_s2 + $0x58] sm:$0xff]  ;;  %v2244_v6 = vld [vmem:[%s3729_s2 + $0x70] sm:$0xff] }
 0x1a1   : > { %594 = vmax.xlane.f32.xlu0 %v593_v7 }
 0x1ab   : > { %v2444_v53 = vpop.f32.mrf.mxu0 }
 0x1ac   : > { %v3166_v2 = vadd.f32 %v2444_v53, %v2240_v63 }
 0x1ae   : > { %670 = vrot.lane.b32.xlu1 %v3017_v16, %s2874_s15 }
 0x21a   : > { %v574_v8 = vpop.xlane.xlu0 %573 }
 0x21b   : > { %v596_v9 = vsub.f32 %v541_v44, %v574_v8 }
 0x21d   : > { %v604_v14 = vmul.f32 1.442695, %v596_v9 }
 0x21e   : > { %v577_v10 = vpop.xlane.xlu1 %576  ;;  %v580_v11 = vpop.xlane.xlu0 %579 }
 0x21f   : > { %v598_v12 = vsub.f32 %v549_v47, %v580_v11  ;;  %v597_v15 = vsub.f32 %v544_v51, %v577_v10  ;;  %v968_v11 = vsel %vm571_vm1, %v3166_v2, -inf }
 0x221   : > { %v608_v13 = vmul.f32 1.442695, %v598_v12  ;;  %v606_v24 = vmul.f32 1.442695, %v597_v15 }
 0x222   : > { %v586_v20 = vpop.xlane.xlu1 %585  ;;  %v583_v21 = vpop.xlane.xlu0 %582 }
 0x223   : > { %v599_v22 = vsub.f32 %v552_v54, %v583_v21  ;;  %2667 = vpow2.f32 %v608_v13  ;;  %v600_v25 = vsub.f32 %v557_v59, %v586_v20  ;;  %v931_v54 = vpop.f32.mrf.mxu0  ;;  %v2243_v13 = vld [vmem:[%s3729_s2 + $0x68] sm:$0xff]  ;;  %v2245_v21 = vld [vmem:[%s3729_s2 + $0x78] sm:$0xff] }
 0x224   : > { %2669 = vpow2.f32 %v604_v14  ;;  %v3157_v61 = vadd.f32 %v2238_v57, %v931_v54 }
 0x225   : > { %v610_v23 = vmul.f32 1.442695, %v599_v22  ;;  %v612_v30 = vmul.f32 1.442695, %v600_v25  ;;  %v2445_v55 = vpop.f32.mrf.mxu0 }
 0x226   : > { %v592_v26 = vpop.xlane.xlu1 %591  ;;  %v589_v27 = vpop.xlane.xlu0 %588  ;;  %v3180_v9 = vadd.f32 %v2445_v55, %v2241_v5 }
 0x227   : > { %v602_v28 = vsub.f32 %v565_v62, %v592_v26  ;;  %2671 = vpow2.f32 %v610_v23  ;;  %v601_v31 = vsub.f32 %v560_v3, %v589_v27  ;;  %v934_v56 = vpop.f32.mrf.mxu0 }
 0x228   : > { %2673 = vpow2.f32 %v606_v24  ;;  %v3159_v62 = vadd.f32 %v2239_v58, %v934_v56  ;;  %v971_v20 = vsel %vm571_vm1, %v3180_v9, -inf }
 0x229   : > { %v616_v29 = vmul.f32 1.442695, %v602_v28  ;;  %v614_v36 = vmul.f32 1.442695, %v601_v31  ;;  %v2448_v59 = vpop.f32.mrf.mxu0 }
 0x22a   : > { %v595_v32 = vpop.xlane.xlu0 %594  ;;  %v671_v33 = vpop.permute.xlu1 %670  ;;  %v965_v3 = vsel %vm571_vm1, %v3159_v62, -inf  ;;  %v3182_v10 = vadd.f32 %v2448_v59, %v2244_v6 }
 0x22b   : > { %2675 = vpow2.f32 %v616_v29  ;;  %v603_v34 = vsub.f32 %v568_v4, %v595_v32  ;;  %2408 = vmatprep.subr.bf16.mxu1 %v671_v33  ;;  %v947_v0 = vpop.f32.mrf.mxu0  ;;  %v962_v4 = vsel %vm571_vm1, %v3157_v61, -inf }
 0x22c   : > { %2409 = vmatpush3.bf16.msra.mxu1 %v671_v33  ;;  %2677 = vpow2.f32 %v612_v30  ;;  %v3164_v1 = vadd.f32 %v2242_v60, %v947_v0  ;;  %v980_v15 = vsel %vm571_vm1, %v3182_v10, -inf  ;;  %v753_v0 = vld [vmem:[%s3730_s3] sm:$0xff] }
 0x22d   : > { %v618_v35 = vmul.f32 1.442695, %v603_v34  ;;  %v2449_v7 = vpop.f32.mrf.mxu0 }
 0x22e   : > { %v974_v8 = vsel %vm571_vm1, %v3164_v1, -inf  ;;  %v3198_v22 = vadd.f32 %v2449_v7, %v2245_v21 }
 0x22f   : > { %2679 = vpow2.f32 %v618_v35  ;;  %v950_v12 = vpop.f32.mrf.mxu0 }
 0x230   : > { %v3102_v37 = vpop.eup %2667  ;;  %2681 = vpow2.f32 %v614_v36  ;;  %v3189_v14 = vadd.f32 %v2243_v13, %v950_v12  ;;  %v983_v24 = vsel %vm571_vm1, %v3198_v22, -inf }
 0x231   : > { %v626_v38 = vsel %vm571_vm1, %v3102_v37, 0.0  ;;  %v3106_v39 = vpop.eup %2669 }
 0x232   : > { %627 = vadd.xlane.f32.xlu1 %v626_v38  ;;  %v620_v41 = vsel %vm571_vm1, %v3106_v39, 0.0  ;;  %v977_v23 = vsel %vm571_vm1, %v3189_v14, -inf }
 0x234   : > { %v3108_v40 = vpop.eup %2671 }
 0x235   : > { %v629_v42 = vsel %vm571_vm1, %v3108_v40, 0.0  ;;  %v3114_v43 = vpop.eup %2673 }
 0x236   : > { %621 = vadd.xlane.f32.xlu1 %v620_v41  ;;  %630 = vadd.xlane.f32.xlu0 %v629_v42  ;;  %v623_v46 = vsel %vm571_vm1, %v3114_v43, 0.0 }
 0x238   : > { %v3116_v44 = vpop.eup %2675 }
 0x239   : > { %v638_v45 = vsel %vm571_vm1, %v3116_v44, 0.0  ;;  %v3122_v47 = vpop.eup %2677 }
 0x23a   : > { %639 = vadd.xlane.f32.xlu1 %v638_v45  ;;  %624 = vadd.xlane.f32.xlu0 %v623_v46  ;;  %v632_v50 = vsel %vm571_vm1, %v3122_v47, 0.0 }
 0x23c   : > { %v3124_v48 = vpop.eup %2679 }
 0x23d   : > { %v641_v49 = vsel %vm571_vm1, %v3124_v48, 0.0  ;;  %v3130_v51 = vpop.eup %2681 }
 0x23e   : > { %633 = vadd.xlane.f32.xlu1 %v632_v50  ;;  %642 = vadd.xlane.f32.xlu0 %v641_v49  ;;  %v635_v52 = vsel %vm571_vm1, %v3130_v51, 0.0 }
 0x242   : > { %636 = vadd.xlane.f32.xlu0 %v635_v52 }
 0x24f   : > { %666 = vrot.lane.b32.xlu1 %v3024_v18, %s2874_s15 }
 0x253   : > { %664 = vrot.lane.b32.xlu1 %v3027_v19, %s2874_s15 }
 0x257   : > { %1258 = vrot.lane.b32.xlu1 %v3020_v17, %s2875_s17 }
 0x258   : > { %668 = vrot.lane.b32.xlu0 %v3020_v17, %s2874_s15  ;;  %s2880_s15 = smov 48  }
 0x25b   : > { %1254 = vrot.lane.b32.xlu1 %v3027_v19, %s2875_s17 }
 0x25c   : > { %1260 = vrot.lane.b32.xlu0 %v3017_v16, %s2875_s17 }
 0x25f   : > { %1248 = vrot.lane.b32.xlu1 %v3024_v18, %s2876_s29 }
 0x260   : > { %1256 = vrot.lane.b32.xlu0 %v3024_v18, %s2875_s17  ;;  %s3543_s17 = sshll.u32 %s377_s6, 6 }
 0x261   : > { %s3666_s10 = scalar_lea.vmem [#allocation4], %s3543_s17 }
 0x263   : > { %1252 = vrot.lane.b32.xlu1 %v3017_v16, %s2876_s29 }
 0x264   : > { %1246 = vrot.lane.b32.xlu0 %v3027_v19, %s2876_s29 }
 0x268   : > { %1250 = vrot.lane.b32.xlu0 %v3020_v17, %s2876_s29  ;;  %s2878_s29 = smov 72  }
 0x287   : > { %966 = vmax.xlane.f32.xlu1 %v965_v3  ;;  %963 = vmax.xlane.f32.xlu0 %v962_v4  ;;  %v754_v3 = vpack.c.bf16 %v753_v0, %v753_v0 }
 0x28b   : > { %975 = vmax.xlane.f32.xlu1 %v974_v8  ;;  %969 = vmax.xlane.f32.xlu0 %v968_v11 }
 0x28f   : > { %981 = vmax.xlane.f32.xlu1 %v980_v15  ;;  %972 = vmax.xlane.f32.xlu0 %v971_v20 }
 0x293   : > { %978 = vmax.xlane.f32.xlu0 %v977_v23 }
 0x297   : > { %984 = vmax.xlane.f32.xlu0 %v983_v24 }
 0x2a0   : > { %1060 = vrot.lane.b32.xlu1 %v3017_v16, %s2877_s30 }
 0x2bb   : > { %v628_v25 = vpop.xlane.xlu1 %627 }
 0x2bf   : > { %v622_v26 = vpop.xlane.xlu1 %621  ;;  %v631_v27 = vpop.xlane.xlu0 %630 }
 0x2c0   : > { %2683 = vrcp.f32 %v622_v26 }
 0x2c3   : > { %v640_v28 = vpop.xlane.xlu1 %639  ;;  %v625_v29 = vpop.xlane.xlu0 %624 }
 0x2c4   : > { %2685 = vrcp.f32 %v625_v29 }
 0x2c5   : > { %2687 = vrcp.f32 %v631_v27 }
 0x2c6   : > { %2689 = vrcp.f32 %v628_v25 }
 0x2c7   : > { %v634_v30 = vpop.xlane.xlu1 %633  ;;  %v643_v31 = vpop.xlane.xlu0 %642 }
 0x2c8   : > { %2691 = vrcp.f32 %v634_v30 }
 0x2cb   : > { %v637_v32 = vpop.xlane.xlu0 %636  ;;  %v667_v33 = vpop.permute.xlu1 %666 }
 0x2cc   : > { %2693 = vrcp.f32 %v637_v32 }
 0x2cd   : > { %2695 = vrcp.f32 %v643_v31  ;;  %v2684_v36 = vpop.eup %2683 }
 0x2ce   : > { %2697 = vrcp.f32 %v640_v28  ;;  %v652_v46 = vmul.f32 %v2684_v36, %v3106_v39 }
 0x2cf   : > { %v669_v34 = vpop.permute.xlu0 %668  ;;  %v665_v35 = vpop.permute.xlu1 %664 }
 0x2d0   : > { %2410 = vmatprep.subr.bf16.mxu1 %v669_v34 }
 0x2d1   : > { %2411 = vmatpush3.bf16.msra.mxu1 %v669_v34  ;;  %v2686_v38 = vpop.eup %2685 }
 0x2d2   : > { %2412 = vmatprep.subr.bf16.mxu1 %v667_v33  ;;  %v2688_v41 = vpop.eup %2687  ;;  %v653_v49 = vmul.f32 %v2686_v38, %v3114_v43 }
 0x2d3   : > { %v1261_v42 = vpop.permute.xlu0 %1260  ;;  %v1259_v45 = vpop.permute.xlu1 %1258  ;;  %v655_v54 = vmul.f32 %v2688_v41, %v3108_v40 }
 0x2d4   : > { %v1284_v50 = vsel %vm481_vm0, %v1261_v42, 0  ;;  %2570 = vmatprep.subr.msk.bf16.mxu0 %vm481_vm0, %v1261_v42  ;;  %v2690_v52 = vpop.eup %2689  ;;  %v660_v53 = vpack.c.bf16 %v653_v49, %v652_v46  ;;  %v1281_v40 = vsel %vm481_vm0, %v1259_v45, 0 }
 0x2d5   : > { %2413 = vmatpush3.bf16.msra.mxu1 %v667_v33  ;;  %2477 = vmatpush3.bf16.xpose.msra.mxu0 %v1284_v50  ;;  %v2692_v55 = vpop.eup %2691  ;;  %v654_v39 = vmul.f32 %v2690_v52, %v3102_v37 }
 0x2d6   : > { %2414 = vmatprep.subr.bf16.mxu1 %v665_v35  ;;  %2571 = vmatprep.subr.msk.bf16.mxu0 %vm481_vm0, %v1259_v45  ;;  %v656_v58 = vmul.f32 %v2692_v55, %v3122_v47 }
 0x2d7   : > { %2416 = vmatprep.mubr.msk.bf16.mxu1 %vm571_vm1, %v660_v53  ;;  %v1257_v56 = vpop.permute.xlu0 %1256  ;;  %v661_v57 = vpack.c.bf16 %v655_v54, %v654_v39  ;;  %v1255_v8 = vpop.permute.xlu1 %1254 }
 0x2d8   : > { %v1278_v7 = vsel %vm481_vm0, %v1257_v56, 0  ;;  %v1275_v11 = vsel %vm481_vm0, %v1255_v8, 0 }
 0x2d9   : > { %v2694_v43 = vpop.eup %2693  ;;  %2415 = vmatpush3.bf16.msra.mxu1 %v665_v35 }
 0x2da   : > { %v657_v59 = vmul.f32 %v2694_v43, %v3130_v51  ;;  %v2696_v60 = vpop.eup %2695  ;;  %v773_v51 = vsel %vm771_vm2, %v754_v3, 0  ;;  %2564 = vmatprep.subr.msk.bf16.mxu1 %vm771_vm2, %v754_v3 }
 0x2db   : > { %v1247_v63 = vpop.permute.xlu0 %1246  ;;  %v2698_v4 = vpop.eup %2697  ;;  %v659_v47 = vmul.f32 %v2696_v60, %v3124_v48 }
 0x2dc   : > { %2417 = vmatmul.mubr.msk.bf16.vlgmr.msra.gmra.mxu1 %vm571_vm1, %v661_v57  ;;  %2484 = vmatprep.mubr.msk.bf16.mxu0 %vm481_vm0, %v1247_v63  ;;  %v662_v37 = vpack.c.bf16 %v657_v59, %v656_v58  ;;  %v658_v5 = vmul.f32 %v2698_v4, %v3116_v44  ;;  %v1249_v48 = vpop.permute.xlu1 %1248 }
 0x2dd   : > { %2479 = vmatpush3.bf16.xpose.msra.mxu0 %v1281_v40  ;;  %2425 = vmatpush3.bf16.msra.mxu1 %v773_v51 }
 0x2de   : > { %2420 = vmatprep.mubr.msk.bf16.mxu1 %vm571_vm1, %v662_v37  ;;  %2572 = vmatprep.subr.msk.bf16.mxu0 %vm481_vm0, %v1257_v56  ;;  %v663_v6 = vpack.c.bf16 %v659_v47, %v658_v5  ;;  %v2258_v5 = vld [vmem:[%s3729_s2 + $0x80] sm:$0xff] }
 0x2df   : > { %v1251_v12 = vpop.permute.xlu0 %1250 }
 0x2e0   : > { %v1253_v44 = vpop.permute.xlu1 %1252 }
 0x2e4   : > { %2421 = vmatmul.mubr.msk.bf16.gmra.mxu1 %vm571_vm1, %v663_v6 }
 0x2e5   : > { %2481 = vmatpush3.bf16.xpose.msra.mxu0 %v1278_v7 }
 0x2e6   : > { %2573 = vmatprep.subr.msk.bf16.mxu0 %vm481_vm0, %v1255_v8  ;;  %v2260_v8 = vld [vmem:[%s3729_s2 + $0x90] sm:$0xff] }
 0x2ed   : > { %2483 = vmatpush3.bf16.xpose.msra.mxu0 %v1275_v11 }
 0x2f4   : > { %2485 = vmatmul.mubr.msk.bf16.vlgmr.msra.gmra.mxu0 %vm481_vm0, %v1249_v48 }
 0x2f5   : > { %2488 = vmatprep.mubr.msk.bf16.mxu0 %vm481_vm0, %v1251_v12 }
 0x2fc   : > { %2489 = vmatmul.mubr.msk.bf16.gmra.mxu0 %vm481_vm0, %v1253_v44  ;;  %v2259_v44 = vld [vmem:[%s3729_s2 + $0x88] sm:$0xff] }
 0x310   : > { %v967_v13 = vpop.xlane.xlu1 %966  ;;  %v964_v15 = vpop.xlane.xlu0 %963 }
 0x311   : > { %v986_v20 = vsub.f32 %v3157_v61, %v964_v15  ;;  %v987_v25 = vsub.f32 %v3159_v62, %v967_v13 }
 0x313   : > { %v994_v27 = vmul.f32 1.442695, %v986_v20  ;;  %v996_v32 = vmul.f32 1.442695, %v987_v25 }
 0x314   : > { %v976_v21 = vpop.xlane.xlu1 %975  ;;  %v970_v23 = vpop.xlane.xlu0 %969 }
 0x315   : > { %v988_v24 = vsub.f32 %v3166_v2, %v970_v23  ;;  %v990_v61 = vsub.f32 %v3164_v1, %v976_v21  ;;  %v2261_v23 = vld [vmem:[%s3729_s2 + $0x98] sm:$0xff] }
 0x317   : > { %v998_v26 = vmul.f32 1.442695, %v988_v24  ;;  %v1002_v62 = vmul.f32 1.442695, %v990_v61 }
 0x318   : > { %v982_v28 = vpop.xlane.xlu1 %981  ;;  %v973_v29 = vpop.xlane.xlu0 %972 }
 0x319   : > { %v992_v30 = vsub.f32 %v3182_v10, %v982_v28  ;;  %v989_v31 = vsub.f32 %v3180_v9, %v973_v29  ;;  %2699 = vpow2.f32 %v998_v26 }
 0x31a   : > { %2701 = vpow2.f32 %v994_v27  ;;  %v2262_v27 = vld [vmem:[%s3729_s2 + $0xa0] sm:$0xff] }
 0x31b   : > { %v1000_v33 = vmul.f32 1.442695, %v989_v31  ;;  %v1006_v34 = vmul.f32 1.442695, %v992_v30 }
 0x31c   : > { %v979_v35 = vpop.xlane.xlu0 %978  ;;  %v1061_v36 = vpop.permute.xlu1 %1060 }
 0x31d   : > { %2450 = vmatprep.subr.bf16.mxu1 %v1061_v36  ;;  %2703 = vpow2.f32 %v1000_v33  ;;  %v991_v2 = vsub.f32 %v3189_v14, %v979_v35  ;;  %v2264_v33 = vld [vmem:[%s3729_s2 + $0xb0] sm:$0xff] }
 0x31e   : > { %2705 = vpow2.f32 %v996_v32 }
 0x31f   : > { %2707 = vpow2.f32 %v1006_v34  ;;  %v1004_v41 = vmul.f32 1.442695, %v991_v2 }
 0x320   : > { %v985_v38 = vpop.xlane.xlu0 %984  ;;  %2709 = vpow2.f32 %v1002_v62 }
 0x321   : > { %v993_v10 = vsub.f32 %v3198_v22, %v985_v38 }
 0x323   : > { %v1008_v9 = vmul.f32 1.442695, %v993_v10 }
 0x325   : > { %2711 = vpow2.f32 %v1008_v9 }
 0x326   : > { %v3243_v42 = vpop.eup %2699  ;;  %2713 = vpow2.f32 %v1004_v41  ;;  %v2265_v41 = vld [vmem:[%s3729_s2 + $0xb8] sm:$0xff] }
 0x327   : > { %v1016_v1 = vsel %vm571_vm1, %v3243_v42, 0.0  ;;  %v3247_v45 = vpop.eup %2701 }
 0x328   : > { %1017 = vadd.xlane.f32.xlu1 %v1016_v1  ;;  %v1010_v14 = vsel %vm571_vm1, %v3247_v45, 0.0 }
 0x32a   : > { %v3249_v46 = vpop.eup %2703 }
 0x32b   : > { %v3251_v49 = vpop.eup %2705  ;;  %v1019_v22 = vsel %vm571_vm1, %v3249_v46, 0.0 }
 0x32c   : > { %v3257_v50 = vpop.eup %2707  ;;  %1011 = vadd.xlane.f32.xlu1 %v1010_v14  ;;  %1020 = vadd.xlane.f32.xlu0 %v1019_v22  ;;  %v1013_v53 = vsel %vm571_vm1, %v3251_v49, 0.0 }
 0x32d   : > { %v1028_v52 = vsel %vm571_vm1, %v3257_v50, 0.0  ;;  %v3263_v54 = vpop.eup %2709 }
 0x32e   : > { %v1022_v39 = vsel %vm571_vm1, %v3263_v54, 0.0 }
 0x330   : > { %1029 = vadd.xlane.f32.xlu1 %v1028_v52  ;;  %1014 = vadd.xlane.f32.xlu0 %v1013_v53 }
 0x332   : > { %v3265_v55 = vpop.eup %2711 }
 0x333   : > { %v1031_v56 = vsel %vm571_vm1, %v3265_v55, 0.0  ;;  %v3271_v43 = vpop.eup %2713 }
 0x334   : > { %1023 = vadd.xlane.f32.xlu1 %v1022_v39  ;;  %1032 = vadd.xlane.f32.xlu0 %v1031_v56  ;;  %v1025_v57 = vsel %vm571_vm1, %v3271_v43, 0.0 }
 0x338   : > { %1026 = vadd.xlane.f32.xlu0 %v1025_v57 }
 0x345   : > { %1056 = vrot.lane.b32.xlu1 %v3024_v18, %s2877_s30 }
 0x349   : > { %1054 = vrot.lane.b32.xlu1 %v3027_v19, %s2877_s30 }
 0x34d   : > { %1647 = vrot.lane.b32.xlu1 %v3020_v17, %s2878_s29 }
 0x34e   : > { %1058 = vrot.lane.b32.xlu0 %v3020_v17, %s2877_s30  ;;  %s2881_s30 = smov 40  }
 0x351   : > { %1643 = vrot.lane.b32.xlu1 %v3027_v19, %s2878_s29 }
 0x352   : > { %1649 = vrot.lane.b32.xlu0 %v3017_v16, %s2878_s29 }
 0x355   : > { %1637 = vrot.lane.b32.xlu1 %v3024_v18, %s2879_s8 }
 0x356   : > { %1645 = vrot.lane.b32.xlu0 %v3024_v18, %s2878_s29  ;;  %s3554_s29 = scalar_lea.vmem [#allocation3], %s3543_s17 }
 0x359   : > { %1641 = vrot.lane.b32.xlu1 %v3017_v16, %s2879_s8 }
 0x35a   : > { %1635 = vrot.lane.b32.xlu0 %v3027_v19, %s2879_s8 }
 0x35e   : > { %1639 = vrot.lane.b32.xlu0 %v3020_v17, %s2879_s8 }
 0x39c   : > { %v2418_v58 = vpop.f32.mrf.mxu1 }
 0x39e   : > { %v722_v59 = vpop.f32.mrf.mxu1 }
 0x3a0   : > { %v2419_v60 = vpop.f32.mrf.mxu1 }
 0x3a1   : > { %v756_v40 = vpack.c.bf16 %v2419_v60, %v2418_v58 }
 0x3a2   : > { %v725_v63 = vpop.f32.mrf.mxu1 }
 0x3a3   : > { %v755_v0 = vpack.c.bf16 %v725_v63, %v722_v59 }
 0x3a4   : > { %v2422_v37 = vpop.f32.mrf.mxu1 }
 0x3a5   : > { %2426 = vmatprep.mubr.msk.bf16.mxu1 %vm481_vm0, %v755_v0 }
 0x3a6   : > { %v738_v3 = vpop.f32.mrf.mxu1  ;;  %2427 = vmatmul.mubr.msk.bf16.vlgmr.msra.gmra.mxu1 %vm481_vm0, %v756_v40 }
 0x3a7   : > { %2451 = vmatpush3.bf16.msra.mxu1 %v1061_v36  ;;  %v2263_v36 = vld [vmem:[%s3729_s2 + $0xa8] sm:$0xff] }
 0x3a8   : > { %v2423_v18 = vpop.f32.mrf.mxu1 }
 0x3a9   : > { %v758_v51 = vpack.c.bf16 %v2423_v18, %v2422_v37 }
 0x3aa   : > { %v741_v4 = vpop.f32.mrf.mxu1 }
 0x3ab   : > { %v757_v47 = vpack.c.bf16 %v741_v4, %v738_v3 }
 0x3ad   : > { %2430 = vmatprep.mubr.msk.bf16.mxu1 %vm481_vm0, %v757_v47 }
 0x3ae   : > { %2431 = vmatmul.mubr.msk.bf16.gmra.mxu1 %vm481_vm0, %v758_v51 }
 0x3b1   : > { %v1018_v17 = vpop.xlane.xlu1 %1017 }
 0x3b4   : > { %v2486_v19 = vpop.f32.mrf.mxu0 }
 0x3b5   : > { %v1012_v6 = vpop.xlane.xlu1 %1011  ;;  %v1021_v7 = vpop.xlane.xlu0 %1020  ;;  %v3304_v13 = vadd.f32 %v2486_v19, %v2260_v8 }
 0x3b6   : > { %v1320_v11 = vpop.f32.mrf.mxu0  ;;  %2715 = vrcp.f32 %v1012_v6 }
 0x3b7   : > { %v3299_v48 = vadd.f32 %v2258_v5, %v1320_v11  ;;  %v1357_v32 = vsel %vm571_vm1, %v3304_v13, -inf }
 0x3b8   : > { %v2487_v12 = vpop.f32.mrf.mxu0 }
 0x3b9   : > { %v1030_v15 = vpop.xlane.xlu1 %1029  ;;  %v1015_v20 = vpop.xlane.xlu0 %1014  ;;  %v1351_v21 = vsel %vm571_vm1, %v3299_v48, -inf  ;;  %v3316_v28 = vadd.f32 %v2487_v12, %v2261_v23 }
 0x3ba   : > { %v1323_v24 = vpop.f32.mrf.mxu0  ;;  %1352 = vmax.xlane.f32.xlu0 %v1351_v21  ;;  %2717 = vrcp.f32 %v1015_v20 }
 0x3bb   : > { %v3311_v25 = vadd.f32 %v2259_v44, %v1323_v24  ;;  %2719 = vrcp.f32 %v1021_v7  ;;  %v1360_v10 = vsel %vm571_vm1, %v3316_v28, -inf }
 0x3bc   : > { %v2490_v26 = vpop.f32.mrf.mxu0  ;;  %2721 = vrcp.f32 %v1018_v17 }
 0x3bd   : > { %v1024_v29 = vpop.xlane.xlu1 %1023  ;;  %v1033_v30 = vpop.xlane.xlu0 %1032  ;;  %v1354_v31 = vsel %vm571_vm1, %v3311_v25, -inf  ;;  %v3330_v62 = vadd.f32 %v2490_v26, %v2264_v33 }
 0x3be   : > { %v1336_v61 = vpop.f32.mrf.mxu0  ;;  %1355 = vmax.xlane.f32.xlu1 %v1354_v31  ;;  %1358 = vmax.xlane.f32.xlu0 %v1357_v32  ;;  %2723 = vrcp.f32 %v1024_v29 }
 0x3bf   : > { %v3325_v34 = vadd.f32 %v2262_v27, %v1336_v61  ;;  %v1369_v53 = vsel %vm571_vm1, %v3330_v62, -inf }
 0x3c0   : > { %v2491_v35 = vpop.f32.mrf.mxu0 }
 0x3c1   : > { %v1027_v2 = vpop.xlane.xlu0 %1026  ;;  %v1363_v38 = vsel %vm571_vm1, %v3325_v34, -inf  ;;  %v1057_v9 = vpop.permute.xlu1 %1056  ;;  %v3341_v22 = vadd.f32 %v2491_v35, %v2265_v41 }
 0x3c2   : > { %2725 = vrcp.f32 %v1027_v2  ;;  %v1339_v1 = vpop.f32.mrf.mxu0  ;;  %1364 = vmax.xlane.f32.xlu1 %v1363_v38  ;;  %1361 = vmax.xlane.f32.xlu0 %v1360_v10 }
 0x3c3   : > { %v3339_v14 = vadd.f32 %v2263_v36, %v1339_v1  ;;  %2727 = vrcp.f32 %v1033_v30  ;;  %v2716_v57 = vpop.eup %2715  ;;  %v1372_v60 = vsel %vm571_vm1, %v3341_v22, -inf }
 0x3c4   : > { %2729 = vrcp.f32 %v1030_v15  ;;  %v1042_v63 = vmul.f32 %v2716_v57, %v3247_v45 }
 0x3c5   : > { %v1059_v52 = vpop.permute.xlu0 %1058  ;;  %v1366_v56 = vsel %vm571_vm1, %v3339_v14, -inf  ;;  %v1055_v39 = vpop.permute.xlu1 %1054 }
 0x3c6   : > { %1370 = vmax.xlane.f32.xlu1 %v1369_v53  ;;  %1367 = vmax.xlane.f32.xlu0 %v1366_v56 }
 0x3c7   : > { %2452 = vmatprep.subr.bf16.mxu1 %v1059_v52  ;;  %v2718_v58 = vpop.eup %2717 }
 0x3c8   : > { %2453 = vmatpush3.bf16.msra.mxu1 %v1059_v52  ;;  %v1043_v0 = vmul.f32 %v2718_v58, %v3251_v49  ;;  %v2720_v37 = vpop.eup %2719 }
 0x3c9   : > { %v1650_v59 = vpop.permute.xlu0 %1649  ;;  %2454 = vmatprep.subr.bf16.mxu1 %v1057_v9  ;;  %v1648_v40 = vpop.permute.xlu1 %1647  ;;  %v1045_v51 = vmul.f32 %v2720_v37, %v3249_v46 }
 0x3ca   : > { %v1673_v3 = vsel %vm481_vm0, %v1650_v59, 0  ;;  %1373 = vmax.xlane.f32.xlu0 %v1372_v60  ;;  %2575 = vmatprep.subr.msk.bf16.mxu0 %vm481_vm0, %v1650_v59  ;;  %v1050_v18 = vpack.c.bf16 %v1043_v0, %v1042_v63  ;;  %v2722_v4 = vpop.eup %2721  ;;  %v1670_v19 = vsel %vm481_vm0, %v1648_v40, 0 }
 0x3cb   : > { %2519 = vmatpush3.bf16.xpose.msra.mxu0 %v1673_v3  ;;  %v2724_v47 = vpop.eup %2723  ;;  %v1044_v17 = vmul.f32 %v2722_v4, %v3243_v42 }
 0x3cc   : > { %2455 = vmatpush3.bf16.msra.mxu1 %v1057_v9  ;;  %2576 = vmatprep.subr.msk.bf16.mxu0 %vm481_vm0, %v1648_v40  ;;  %v1046_v5 = vmul.f32 %v2724_v47, %v3263_v54 }
 0x3cd   : > { %2458 = vmatprep.mubr.msk.bf16.mxu1 %vm571_vm1, %v1050_v18  ;;  %2456 = vmatprep.subr.bf16.mxu1 %v1055_v39  ;;  %v1646_v45 = vpop.permute.xlu0 %1645  ;;  %v1051_v7 = vpack.c.bf16 %v1045_v51, %v1044_v17  ;;  %v1644_v15 = vpop.permute.xlu1 %1643  ;;  %v3425_v17 = vld [vmem:[%s3014_s16 + $0x8] sm:$0xff]  }
 0x3ce   : > { %v1664_v20 = vsel %vm481_vm0, %v1644_v15, 0 }
 0x3cf   : > { %v2726_v49 = vpop.eup %2725 }
 0x3d0   : > { %2457 = vmatpush3.bf16.msra.mxu1 %v1055_v39  ;;  %v1047_v6 = vmul.f32 %v2726_v49, %v3271_v43  ;;  %v2728_v11 = vpop.eup %2727  ;;  %v1667_v43 = vsel %vm481_vm0, %v1646_v45, 0 }
 0x3d1   : > { %v1636_v8 = vpop.permute.xlu0 %1635  ;;  %v2730_v46 = vpop.eup %2729  ;;  %v1049_v42 = vmul.f32 %v2728_v11, %v3265_v55 }
 0x3d2   : > { %v1052_v12 = vpack.c.bf16 %v1047_v6, %v1046_v5  ;;  %2526 = vmatprep.mubr.msk.bf16.mxu0 %vm481_vm0, %v1636_v8  ;;  %v1048_v54 = vmul.f32 %v2730_v46, %v3257_v50  ;;  %v1638_v21 = vpop.permute.xlu1 %1637  ;;  %v3432_v5 = vld [vmem:[%s3014_s16] sm:$0xff]  }
 0x3d3   : > { %2459 = vmatmul.mubr.msk.bf16.vlgmr.msra.gmra.mxu1 %vm571_vm1, %v1051_v7  ;;  %2521 = vmatpush3.bf16.xpose.msra.mxu0 %v1670_v19  ;;  %v3439_v7 = vld [vmem:[%s3014_s16 + $0x10] sm:$0xff]  }
 0x3d4   : > { %2462 = vmatprep.mubr.msk.bf16.mxu1 %vm571_vm1, %v1052_v12  ;;  %2577 = vmatprep.subr.msk.bf16.mxu0 %vm481_vm0, %v1646_v45  ;;  %v1053_v44 = vpack.c.bf16 %v1049_v42, %v1048_v54 }
 0x3d5   : > { %v1640_v55 = vpop.permute.xlu0 %1639 }
 0x3d6   : > { %v1642_v50 = vpop.permute.xlu1 %1641 }
 0x3d7   : > { %1449 = vrot.lane.b32.xlu1 %v3017_v16, %s2880_s15  ;;  %v1143_v16 = vld [vmem:[%s3730_s3 + $0x8] sm:$0xff] }
 0x3d8   : > { %v1144_v23 = vpack.c.bf16 %v1143_v16, %v1143_v16 }
 0x3da   : > { %2569 = vmatprep.subr.msk.bf16.mxu1 %vm771_vm2, %v1144_v23  ;;  %v1162_v24 = vsel %vm771_vm2, %v1144_v23, 0 }
 0x3db   : > { %2463 = vmatmul.mubr.msk.bf16.gmra.mxu1 %vm571_vm1, %v1053_v44  ;;  %2523 = vmatpush3.bf16.xpose.msra.mxu0 %v1667_v43 }
 0x3dc   : > { %2578 = vmatprep.subr.msk.bf16.mxu0 %vm481_vm0, %v1644_v15  ;;  %2467 = vmatpush3.bf16.msra.mxu1 %v1162_v24 }
 0x3e3   : > { %2525 = vmatpush3.bf16.xpose.msra.mxu0 %v1664_v20 }
 0x3ea   : > { %2527 = vmatmul.mubr.msk.bf16.vlgmr.msra.gmra.mxu0 %vm481_vm0, %v1638_v21 }
 0x3eb   : > { %2530 = vmatprep.mubr.msk.bf16.mxu0 %vm481_vm0, %v1640_v55 }
 0x3f2   : > { %2531 = vmatmul.mubr.msk.bf16.gmra.mxu0 %vm481_vm0, %v1642_v50 }
 0x443   : > { %v1353_v26 = vpop.xlane.xlu0 %1352 }
 0x444   : > { %v1375_v27 = vsub.f32 %v3299_v48, %v1353_v26 }
 0x446   : > { %v1383_v33 = vmul.f32 1.442695, %v1375_v27  ;;  %v2278_v27 = vld [vmem:[%s3729_s2 + $0xc0] sm:$0xff] }
 0x447   : > { %v1356_v29 = vpop.xlane.xlu1 %1355  ;;  %v1359_v30 = vpop.xlane.xlu0 %1358 }
 0x448   : > { %v1377_v31 = vsub.f32 %v3304_v13, %v1359_v30  ;;  %v1376_v61 = vsub.f32 %v3311_v25, %v1356_v29  ;;  %v2280_v29 = vld [vmem:[%s3729_s2 + $0xd0] sm:$0xff] }
 0x44a   : > { %v1387_v32 = vmul.f32 1.442695, %v1377_v31  ;;  %v1385_v10 = vmul.f32 1.442695, %v1376_v61 }
 0x44b   : > { %v1365_v35 = vpop.xlane.xlu1 %1364  ;;  %v1362_v36 = vpop.xlane.xlu0 %1361 }
 0x44c   : > { %v1378_v2 = vsub.f32 %v3316_v28, %v1362_v36  ;;  %2731 = vpow2.f32 %v1387_v32  ;;  %v1379_v9 = vsub.f32 %v3325_v34, %v1365_v35  ;;  %v2281_v36 = vld [vmem:[%s3729_s2 + $0xd8] sm:$0xff] }
 0x44d   : > { %2733 = vpow2.f32 %v1383_v33  ;;  %v2279_v33 = vld [vmem:[%s3729_s2 + $0xc8] sm:$0xff] }
 0x44e   : > { %v1389_v38 = vmul.f32 1.442695, %v1378_v2  ;;  %v1391_v52 = vmul.f32 1.442695, %v1379_v9  ;;  %v2282_v9 = vld [vmem:[%s3729_s2 + $0xe0] sm:$0xff] }
 0x44f   : > { %v1371_v41 = vpop.xlane.xlu1 %1370  ;;  %v1368_v48 = vpop.xlane.xlu0 %1367 }
 0x450   : > { %v1381_v1 = vsub.f32 %v3330_v62, %v1371_v41  ;;  %2735 = vpow2.f32 %v1389_v38  ;;  %v1380_v25 = vsub.f32 %v3339_v14, %v1368_v48 }
 0x451   : > { %2737 = vpow2.f32 %v1385_v10 }
 0x452   : > { %v1395_v13 = vmul.f32 1.442695, %v1381_v1  ;;  %v1393_v57 = vmul.f32 1.442695, %v1380_v25 }
 0x453   : > { %v1374_v53 = vpop.xlane.xlu0 %1373  ;;  %v1450_v56 = vpop.permute.xlu1 %1449 }
 0x454   : > { %2739 = vpow2.f32 %v1395_v13  ;;  %v1382_v28 = vsub.f32 %v3341_v22, %v1374_v53  ;;  %2492 = vmatprep.subr.bf16.mxu1 %v1450_v56  ;;  %v2284_v13 = vld [vmem:[%s3729_s2 + $0xf0] sm:$0xff] }
 0x455   : > { %2741 = vpow2.f32 %v1391_v52 }
 0x456   : > { %v1397_v39 = vmul.f32 1.442695, %v1382_v28 }
 0x458   : > { %2743 = vpow2.f32 %v1397_v39 }
 0x459   : > { %v3388_v34 = vpop.eup %2731  ;;  %2745 = vpow2.f32 %v1393_v57 }
 0x45a   : > { %v1405_v62 = vsel %vm571_vm1, %v3388_v34, 0.0  ;;  %v3392_v58 = vpop.eup %2733 }
 0x45b   : > { %1406 = vadd.xlane.f32.xlu1 %v1405_v62  ;;  %v1399_v59 = vsel %vm571_vm1, %v3392_v58, 0.0  ;;  %v2285_v62 = vld [vmem:[%s3729_s2 + $0xf8] sm:$0xff] }
 0x45d   : > { %v3394_v14 = vpop.eup %2735 }
 0x45e   : > { %v1408_v22 = vsel %vm571_vm1, %v3394_v14, 0.0  ;;  %v3400_v60 = vpop.eup %2737 }
 0x45f   : > { %1400 = vadd.xlane.f32.xlu1 %v1399_v59  ;;  %1409 = vadd.xlane.f32.xlu0 %v1408_v22  ;;  %v1402_v40 = vsel %vm571_vm1, %v3400_v60, 0.0 }
 0x461   : > { %v3402_v63 = vpop.eup %2739 }
 0x462   : > { %v1417_v0 = vsel %vm571_vm1, %v3402_v63, 0.0  ;;  %v3408_v37 = vpop.eup %2741 }
 0x463   : > { %1418 = vadd.xlane.f32.xlu1 %v1417_v0  ;;  %1403 = vadd.xlane.f32.xlu0 %v1402_v40  ;;  %v1411_v4 = vsel %vm571_vm1, %v3408_v37, 0.0 }
 0x465   : > { %v3410_v3 = vpop.eup %2743 }
 0x466   : > { %v1420_v18 = vsel %vm571_vm1, %v3410_v3, 0.0  ;;  %v3416_v47 = vpop.eup %2745  ;;  %v3420_v45 = vpop.f32.mrf.mxu1 }
 0x467   : > { %1412 = vadd.xlane.f32.xlu1 %v1411_v4  ;;  %1421 = vadd.xlane.f32.xlu0 %v1420_v18  ;;  %v1414_v51 = vsel %vm571_vm1, %v3416_v47, 0.0 }
 0x468   : > { %v3422_v49 = vpop.f32.mrf.mxu1 }
 0x46a   : > { %v3429_v19 = vpop.f32.mrf.mxu1 }
 0x46b   : > { %1415 = vadd.xlane.f32.xlu0 %v1414_v51  ;;  %v2798_v51 = vld [vmem:[%s3014_s16 + $0x18] sm:$0xff]  }
 0x46c   : > { %v3436_v6 = vpop.f32.mrf.mxu1 }
 0x46e   : > { %v3443_v8 = vpop.f32.mrf.mxu1 }
 0x470   : > { %v3445_v11 = vpop.f32.mrf.mxu1 }
 0x472   : > { %v3447_v12 = vpop.f32.mrf.mxu1 }
 0x474   : > { %v3449_v46 = vpop.f32.mrf.mxu1 }
 0x478   : > { %1445 = vrot.lane.b32.xlu1 %v3425_v17, %s2880_s15 }
 0x47c   : > { %1443 = vrot.lane.b32.xlu1 %v3432_v5, %s2880_s15 }
 0x481   : > { %1447 = vrot.lane.b32.xlu0 %v3439_v7, %s2880_s15 }
 0x493   : > { %v2460_v42 = vpop.f32.mrf.mxu1 }
 0x495   : > { %v1112_v54 = vpop.f32.mrf.mxu1 }
 0x497   : > { %v2461_v43 = vpop.f32.mrf.mxu1 }
 0x498   : > { %v1146_v20 = vpack.c.bf16 %v2461_v43, %v2460_v42 }
 0x499   : > { %v1115_v44 = vpop.f32.mrf.mxu1 }
 0x49a   : > { %v1145_v15 = vpack.c.bf16 %v1115_v44, %v1112_v54 }
 0x49b   : > { %v2464_v21 = vpop.f32.mrf.mxu1 }
 0x49c   : > { %2468 = vmatprep.mubr.msk.bf16.mxu1 %vm481_vm0, %v1145_v15 }
 0x49d   : > { %v1128_v55 = vpop.f32.mrf.mxu1  ;;  %2469 = vmatmul.mubr.msk.bf16.vlgmr.msra.gmra.mxu1 %vm481_vm0, %v1146_v20 }
 0x49e   : > { %2493 = vmatpush3.bf16.msra.mxu1 %v1450_v56  ;;  %v2283_v56 = vld [vmem:[%s3729_s2 + $0xe8] sm:$0xff] }
 0x49f   : > { %v2465_v50 = vpop.f32.mrf.mxu1 }
 0x4a0   : > { %v1148_v24 = vpack.c.bf16 %v2465_v50, %v2464_v21 }
 0x4a1   : > { %v1131_v16 = vpop.f32.mrf.mxu1 }
 0x4a2   : > { %v1147_v23 = vpack.c.bf16 %v1131_v16, %v1128_v55 }
 0x4a4   : > { %2472 = vmatprep.mubr.msk.bf16.mxu1 %vm481_vm0, %v1147_v23 }
 0x4a5   : > { %2473 = vmatmul.mubr.msk.bf16.gmra.mxu1 %vm481_vm0, %v1148_v24 }
 0x4aa   : > { %v2528_v26 = vpop.f32.mrf.mxu0 }
 0x4ab   : > { %v3466_v61 = vadd.f32 %v2528_v26, %v2280_v29 }
 0x4ac   : > { %v1709_v30 = vpop.f32.mrf.mxu0 }
 0x4ad   : > { %v3461_v31 = vadd.f32 %v2278_v27, %v1709_v30  ;;  %v1746_v1 = vsel %vm571_vm1, %v3466_v61, -inf }
 0x4ae   : > { %v2529_v32 = vpop.f32.mrf.mxu0 }
 0x4af   : > { %v1740_v35 = vsel %vm571_vm1, %v3461_v31, -inf  ;;  %v3478_v41 = vadd.f32 %v2529_v32, %v2281_v36  ;;  %v1532_v32 = vld [vmem:[%s3730_s3 + $0x10] sm:$0xff] }
 0x4b0   : > { %v1712_v2 = vpop.f32.mrf.mxu0  ;;  %1741 = vmax.xlane.f32.xlu0 %v1740_v35 }
 0x4b1   : > { %v3473_v38 = vadd.f32 %v2279_v33, %v1712_v2  ;;  %v1749_v57 = vsel %vm571_vm1, %v3478_v41, -inf  ;;  %v1533_v2 = vpack.c.bf16 %v1532_v32, %v1532_v32  ;;  %v434_v32 = vld [vmem:[%s3554_s29] sm:$0xff] }
 0x4b2   : > { %v2532_v10 = vpop.f32.mrf.mxu0 }
 0x4b3   : > { %v1743_v48 = vsel %vm571_vm1, %v3473_v38, -inf  ;;  %v3492_v28 = vadd.f32 %v2532_v10, %v2284_v13  ;;  %v1551_v13 = vsel %vm771_vm2, %v1533_v2, 0 }
 0x4b4   : > { %v1725_v52 = vpop.f32.mrf.mxu0  ;;  %1744 = vmax.xlane.f32.xlu1 %v1743_v48  ;;  %1747 = vmax.xlane.f32.xlu0 %v1746_v1 }
 0x4b5   : > { %v3487_v25 = vadd.f32 %v2282_v9, %v1725_v52  ;;  %v1758_v40 = vsel %vm571_vm1, %v3492_v28, -inf }
 0x4b6   : > { %v2533_v53 = vpop.f32.mrf.mxu0 }
 0x4b7   : > { %v1752_v39 = vsel %vm571_vm1, %v3487_v25, -inf  ;;  %v3503_v0 = vadd.f32 %v2533_v53, %v2285_v62 }
 0x4b8   : > { %v1728_v59 = vpop.f32.mrf.mxu0  ;;  %1753 = vmax.xlane.f32.xlu1 %v1752_v39  ;;  %1750 = vmax.xlane.f32.xlu0 %v1749_v57 }
 0x4b9   : > { %v3501_v22 = vadd.f32 %v2283_v56, %v1728_v59  ;;  %v1761_v4 = vsel %vm571_vm1, %v3503_v0, -inf }
 0x4bb   : > { %v1755_v18 = vsel %vm571_vm1, %v3501_v22, -inf }
 0x4bc   : > { %1759 = vmax.xlane.f32.xlu1 %v1758_v40  ;;  %1756 = vmax.xlane.f32.xlu0 %v1755_v18 }
 0x4c0   : > { %1762 = vmax.xlane.f32.xlu0 %v1761_v4 }
 0x4cd   : > { %1838 = vrot.lane.b32.xlu1 %v2798_v51, %s2881_s30 }
 0x4e4   : > { %v1407_v42 = vpop.xlane.xlu1 %1406 }
 0x4e8   : > { %v1401_v54 = vpop.xlane.xlu1 %1400  ;;  %v1410_v43 = vpop.xlane.xlu0 %1409 }
 0x4e9   : > { %2747 = vrcp.f32 %v1401_v54 }
 0x4ec   : > { %v1419_v44 = vpop.xlane.xlu1 %1418  ;;  %v1404_v15 = vpop.xlane.xlu0 %1403 }
 0x4ed   : > { %2749 = vrcp.f32 %v1404_v15 }
 0x4ee   : > { %2751 = vrcp.f32 %v1410_v43 }
 0x4ef   : > { %2753 = vrcp.f32 %v1407_v42 }
 0x4f0   : > { %v1413_v20 = vpop.xlane.xlu1 %1412  ;;  %v1422_v21 = vpop.xlane.xlu0 %1421 }
 0x4f1   : > { %2755 = vrcp.f32 %v1413_v20 }
 0x4f4   : > { %v1416_v55 = vpop.xlane.xlu0 %1415  ;;  %v1446_v50 = vpop.permute.xlu1 %1445 }
 0x4f5   : > { %2757 = vrcp.f32 %v1416_v55 }
 0x4f6   : > { %2759 = vrcp.f32 %v1422_v21  ;;  %v2748_v23 = vpop.eup %2747 }
 0x4f7   : > { %2761 = vrcp.f32 %v1419_v44  ;;  %v1431_v27 = vmul.f32 %v2748_v23, %v3392_v58  ;;  %v436_v23 = vld [vmem:[%s3554_s29 + $0x10] sm:$0xff] }
 0x4f8   : > { %v1448_v16 = vpop.permute.xlu0 %1447  ;;  %v1444_v30 = vpop.permute.xlu1 %1443 }
 0x4f9   : > { %2494 = vmatprep.subr.bf16.mxu1 %v1448_v16 }
 0x4fa   : > { %2495 = vmatpush3.bf16.msra.mxu1 %v1448_v16  ;;  %v2750_v24 = vpop.eup %2749 }
 0x4fb   : > { %2496 = vmatprep.subr.bf16.mxu1 %v1446_v50  ;;  %v2752_v26 = vpop.eup %2751  ;;  %v1432_v29 = vmul.f32 %v2750_v24, %v3400_v60  ;;  %v3560_v24 = vld [vmem:[%s3731_s4] ss:$0 sm:$0xff] }
 0x4fc   : > { %v2754_v33 = vpop.eup %2753  ;;  %v1434_v36 = vmul.f32 %v2752_v26, %v3394_v14 }
 0x4fd   : > { %v1439_v35 = vpack.c.bf16 %v1432_v29, %v1431_v27  ;;  %v1433_v9 = vmul.f32 %v2754_v33, %v3388_v34  ;;  %v451_v33 = vadd.f32 %v3560_v24, %v436_v23 }
 0x4fe   : > { %2497 = vmatpush3.bf16.msra.mxu1 %v1446_v50  ;;  %v2756_v10 = vpop.eup %2755 }
 0x4ff   : > { %2498 = vmatprep.subr.bf16.mxu1 %v1444_v30  ;;  %2500 = vmatprep.mubr.msk.bf16.mxu1 %vm571_vm1, %v1439_v35  ;;  %v1440_v60 = vpack.c.bf16 %v1434_v36, %v1433_v9  ;;  %v1435_v48 = vmul.f32 %v2756_v10, %v3408_v37  ;;  %v437_v36 = vld [vmem:[%s3554_s29 + $0x18] sm:$0xff]  ;;  %v449_v9 = vadd.f32 %v3560_v24, %v434_v32 }
 0x502   : > { %v2758_v58 = vpop.eup %2757  ;;  %2499 = vmatpush3.bf16.msra.mxu1 %v1444_v30 }
 0x503   : > { %v1436_v1 = vmul.f32 %v2758_v58, %v3416_v47  ;;  %2574 = vmatprep.subr.msk.bf16.mxu1 %vm771_vm2, %v1533_v2  ;;  %v2760_v52 = vpop.eup %2759 }
 0x504   : > { %v2762_v53 = vpop.eup %2761  ;;  %v1438_v34 = vmul.f32 %v2760_v52, %v3410_v3  ;;  %v440_v52 = vld [vmem:[%s3554_s29 + $0x30] sm:$0xff] }
 0x505   : > { %2501 = vmatmul.mubr.msk.bf16.vlgmr.msra.gmra.mxu1 %vm571_vm1, %v1440_v60  ;;  %v1441_v14 = vpack.c.bf16 %v1436_v1, %v1435_v48  ;;  %v1437_v56 = vmul.f32 %v2762_v53, %v3402_v63  ;;  %v435_v60 = vld [vmem:[%s3554_s29 + $0x8] sm:$0xff]  ;;  %v842_v48 = vadd.f32 %v3420_v45, %v451_v33  ;;  %v452_v1 = vadd.f32 %v3560_v24, %v437_v36  ;;  %v438_v45 = vld [vmem:[%s3554_s29 + $0x20] sm:$0xff] }
 0x506   : > { %2509 = vmatpush3.bf16.msra.mxu1 %v1551_v13 }
 0x507   : > { %2504 = vmatprep.mubr.msk.bf16.mxu1 %vm571_vm1, %v1441_v14  ;;  %v1442_v39 = vpack.c.bf16 %v1438_v34, %v1437_v56  ;;  %v840_v56 = vadd.f32 %v3422_v49, %v449_v9 }
 0x50d   : > { %2505 = vmatmul.mubr.msk.bf16.gmra.mxu1 %vm571_vm1, %v1442_v39  ;;  %v450_v39 = vadd.f32 %v3560_v24, %v435_v60 }
 0x50f   : > { %v841_v49 = vadd.f32 %v3436_v6, %v450_v39 }
 0x539   : > { %v1742_v37 = vpop.xlane.xlu0 %1741 }
 0x53a   : > { %v1764_v47 = vsub.f32 %v3461_v31, %v1742_v37 }
 0x53c   : > { %v1772_v18 = vmul.f32 1.442695, %v1764_v47 }
 0x53d   : > { %v1745_v57 = vpop.xlane.xlu1 %1744  ;;  %v1748_v62 = vpop.xlane.xlu0 %1747 }
 0x53e   : > { %v1766_v59 = vsub.f32 %v3466_v61, %v1748_v62  ;;  %v1765_v4 = vsub.f32 %v3473_v38, %v1745_v57  ;;  %v843_v57 = vadd.f32 %v3429_v19, %v452_v1  ;;  %v455_v62 = vadd.f32 %v3560_v24, %v440_v52 }
 0x540   : > { %v1776_v40 = vmul.f32 1.442695, %v1766_v59  ;;  %v1774_v54 = vmul.f32 1.442695, %v1765_v4 }
 0x541   : > { %v1754_v51 = vpop.xlane.xlu1 %1753  ;;  %v1751_v42 = vpop.xlane.xlu0 %1750 }
 0x542   : > { %v1767_v3 = vsub.f32 %v3478_v41, %v1751_v42  ;;  %2763 = vpow2.f32 %v1776_v40  ;;  %v1768_v43 = vsub.f32 %v3487_v25, %v1754_v51  ;;  %v441_v40 = vld [vmem:[%s3554_s29 + $0x38] sm:$0xff]  ;;  %v453_v51 = vadd.f32 %v3560_v24, %v438_v45 }
 0x543   : > { %2765 = vpow2.f32 %v1772_v18  ;;  %v456_v19 = vadd.f32 %v3560_v24, %v441_v40 }
 0x544   : > { %v1778_v63 = vmul.f32 1.442695, %v1767_v3  ;;  %v1780_v20 = vmul.f32 1.442695, %v1768_v43 }
 0x545   : > { %v1760_v44 = vpop.xlane.xlu1 %1759  ;;  %v1757_v31 = vpop.xlane.xlu0 %1756  ;;  %v847_v6 = vadd.f32 %v3447_v12, %v456_v19 }
 0x546   : > { %v1770_v15 = vsub.f32 %v3492_v28, %v1760_v44  ;;  %2767 = vpow2.f32 %v1778_v63  ;;  %v1769_v38 = vsub.f32 %v3501_v22, %v1757_v31  ;;  %v846_v63 = vadd.f32 %v3443_v8, %v455_v62 }
 0x547   : > { %2769 = vpow2.f32 %v1774_v54  ;;  %v844_v44 = vadd.f32 %v3445_v11, %v453_v51 }
 0x548   : > { %v1784_v61 = vmul.f32 1.442695, %v1770_v15  ;;  %v1782_v50 = vmul.f32 1.442695, %v1769_v38 }
 0x549   : > { %v1763_v21 = vpop.xlane.xlu0 %1762  ;;  %v3537_v55 = vpop.permute.xlu1 %1838 }
 0x54a   : > { %2771 = vpow2.f32 %v1784_v61  ;;  %v1771_v41 = vsub.f32 %v3503_v0, %v1763_v21  ;;  %2534 = vmatprep.subr.bf16.mxu1 %v3537_v55 }
 0x54b   : > { %2773 = vpow2.f32 %v1780_v20 }
 0x54c   : > { %v1786_v25 = vmul.f32 1.442695, %v1771_v41 }
 0x54e   : > { %2775 = vpow2.f32 %v1786_v25 }
 0x54f   : > { %v3545_v28 = vpop.eup %2763  ;;  %2777 = vpow2.f32 %v1782_v50 }
 0x550   : > { %v1794_v22 = vsel %vm571_vm1, %v3545_v28, 0.0  ;;  %v3549_v16 = vpop.eup %2765 }
 0x551   : > { %1795 = vadd.xlane.f32.xlu1 %v1794_v22  ;;  %v1788_v26 = vsel %vm571_vm1, %v3549_v16, 0.0 }
 0x553   : > { %v3551_v0 = vpop.eup %2767 }
 0x554   : > { %v1797_v27 = vsel %vm571_vm1, %v3551_v0, 0.0  ;;  %v3566_v29 = vpop.eup %2769 }
 0x555   : > { %1789 = vadd.xlane.f32.xlu1 %v1788_v26  ;;  %1798 = vadd.xlane.f32.xlu0 %v1797_v27  ;;  %v1791_v2 = vsel %vm571_vm1, %v3566_v29, 0.0 }
 0x557   : > { %v3568_v30 = vpop.eup %2771 }
 0x558   : > { %v1806_v35 = vsel %vm571_vm1, %v3568_v30, 0.0  ;;  %v3577_v10 = vpop.eup %2773 }
 0x559   : > { %1807 = vadd.xlane.f32.xlu1 %v1806_v35  ;;  %1792 = vadd.xlane.f32.xlu0 %v1791_v2  ;;  %v1800_v53 = vsel %vm571_vm1, %v3577_v10, 0.0 }
 0x55b   : > { %v3580_v58 = vpop.eup %2775 }
 0x55c   : > { %v1809_v13 = vsel %vm571_vm1, %v3580_v58, 0.0  ;;  %v3590_v34 = vpop.eup %2777 }
 0x55d   : > { %v2470_v14 = vpop.f32.mrf.mxu1  ;;  %1801 = vadd.xlane.f32.xlu1 %v1800_v53  ;;  %1810 = vadd.xlane.f32.xlu0 %v1809_v13  ;;  %v1803_v4 = vsel %vm571_vm1, %v3590_v34, 0.0 }
 0x55e   : > { %v3594_v37 = vadd.f32 %v2470_v14, %v842_v48 }
 0x55f   : > { %v1198_v47 = vpop.f32.mrf.mxu1 }
 0x560   : > { %v3599_v59 = vadd.f32 %v1198_v47, %v840_v56 }
 0x561   : > { %v2471_v18 = vpop.f32.mrf.mxu1  ;;  %1804 = vadd.xlane.f32.xlu0 %v1803_v4 }
 0x562   : > { %v3606_v42 = vadd.f32 %v2471_v18, %v843_v57 }
 0x563   : > { %v1201_v3 = vpop.f32.mrf.mxu1 }
 0x564   : > { %v3610_v54 = vadd.f32 %v1201_v3, %v841_v49 }
 0x565   : > { %v2474_v43 = vpop.f32.mrf.mxu1 }
 0x566   : > { %v3613_v31 = vadd.f32 %v2474_v43, %v846_v63 }
 0x567   : > { %v1214_v15 = vpop.f32.mrf.mxu1 }
 0x568   : > { %v3616_v61 = vadd.f32 %v1214_v15, %v844_v44 }
 0x569   : > { %v2475_v20 = vpop.f32.mrf.mxu1 }
 0x56a   : > { %v3618_v38 = vadd.f32 %v2475_v20, %v847_v6 }
 0x56b   : > { %v3626_v8 = vpop.f32.mrf.mxu1 }
 0x56e   : > { %1834 = vrot.lane.b32.xlu1 %v3425_v17, %s2881_s30 }
 0x572   : > { %1832 = vrot.lane.b32.xlu1 %v3432_v5, %s2881_s30 }
 0x577   : > { %1836 = vrot.lane.b32.xlu0 %v3439_v7, %s2881_s30  ;;  %s2302_s30 = sshll.u32 (%p2974_p7), %s2035_s7, 3 }
 0x578   : > { %s2037_s17 = scalar_lea.vmem (%p2974_p7), %s3732_s5, %s2302_s30 }
 0x5c5   : > { %v2502_v11 = vpop.f32.mrf.mxu1 }
 0x5c7   : > { %v1501_v21 = vpop.f32.mrf.mxu1 }
 0x5c9   : > { %v2503_v41 = vpop.f32.mrf.mxu1 }
 0x5ca   : > { %v1535_v50 = vpack.c.bf16 %v2503_v41, %v2502_v11 }
 0x5cb   : > { %v1504_v12 = vpop.f32.mrf.mxu1 }
 0x5cc   : > { %v1534_v25 = vpack.c.bf16 %v1504_v12, %v1501_v21 }
 0x5cd   : > { %v2506_v22 = vpop.f32.mrf.mxu1 }
 0x5ce   : > { %2510 = vmatprep.mubr.msk.bf16.mxu1 %vm481_vm0, %v1534_v25 }
 0x5cf   : > { %v1517_v23 = vpop.f32.mrf.mxu1  ;;  %2511 = vmatmul.mubr.msk.bf16.vlgmr.msra.gmra.mxu1 %vm481_vm0, %v1535_v50 }
 0x5d0   : > { %2535 = vmatpush3.bf16.msra.mxu1 %v3537_v55 }
 0x5d1   : > { %v2507_v17 = vpop.f32.mrf.mxu1 }
 0x5d2   : > { %v1537_v7 = vpack.c.bf16 %v2507_v17, %v2506_v22 }
 0x5d3   : > { %v1520_v5 = vpop.f32.mrf.mxu1 }
 0x5d4   : > { %v1536_v26 = vpack.c.bf16 %v1520_v5, %v1517_v23 }
 0x5d6   : > { %2514 = vmatprep.mubr.msk.bf16.mxu1 %vm481_vm0, %v1536_v26 }
 0x5d7   : > { %2515 = vmatmul.mubr.msk.bf16.gmra.mxu1 %vm481_vm0, %v1537_v7 }
 0x5da   : > { %v1796_v27 = vpop.xlane.xlu1 %1795 }
 0x5de   : > { %v1790_v32 = vpop.xlane.xlu1 %1789  ;;  %v1799_v33 = vpop.xlane.xlu0 %1798 }
 0x5df   : > { %2779 = vrcp.f32 %v1790_v32 }
 0x5e2   : > { %v1808_v35 = vpop.xlane.xlu1 %1807  ;;  %v1793_v36 = vpop.xlane.xlu0 %1792 }
 0x5e3   : > { %2781 = vrcp.f32 %v1793_v36 }
 0x5e4   : > { %2783 = vrcp.f32 %v1799_v33 }
 0x5e5   : > { %2785 = vrcp.f32 %v1796_v27 }
 0x5e6   : > { %v1802_v2 = vpop.xlane.xlu1 %1801  ;;  %v1811_v9 = vpop.xlane.xlu0 %1810 }
 0x5e7   : > { %2787 = vrcp.f32 %v1802_v2 }
 0x5ea   : > { %v1805_v55 = vpop.xlane.xlu0 %1804  ;;  %v1835_v60 = vpop.permute.xlu1 %1834 }
 0x5eb   : > { %2789 = vrcp.f32 %v1805_v55 }
 0x5ec   : > { %2791 = vrcp.f32 %v1811_v9  ;;  %v2780_v1 = vpop.eup %2779 }
 0x5ed   : > { %2793 = vrcp.f32 %v1808_v35  ;;  %v1820_v14 = vmul.f32 %v2780_v1, %v3549_v16 }
 0x5ee   : > { %v1837_v48 = vpop.permute.xlu0 %1836  ;;  %v1833_v56 = vpop.permute.xlu1 %1832 }
 0x5ef   : > { %2536 = vmatprep.subr.bf16.mxu1 %v1837_v48 }
 0x5f0   : > { %2537 = vmatpush3.bf16.msra.mxu1 %v1837_v48  ;;  %v2782_v13 = vpop.eup %2781 }
 0x5f1   : > { %2538 = vmatprep.subr.bf16.mxu1 %v1835_v60  ;;  %v2784_v52 = vpop.eup %2783  ;;  %v1821_v53 = vmul.f32 %v2782_v13, %v3566_v29 }
 0x5f2   : > { %v2786_v39 = vpop.eup %2785  ;;  %v1823_v47 = vmul.f32 %v2784_v52, %v3551_v0 }
 0x5f3   : > { %v1828_v45 = vpack.c.bf16 %v1821_v53, %v1820_v14  ;;  %v1822_v62 = vmul.f32 %v2786_v39, %v3545_v28 }
 0x5f4   : > { %2539 = vmatpush3.bf16.msra.mxu1 %v1835_v60  ;;  %v2788_v57 = vpop.eup %2787 }
 0x5f5   : > { %2540 = vmatprep.subr.bf16.mxu1 %v1833_v56  ;;  %2542 = vmatprep.mubr.msk.bf16.mxu1 %vm571_vm1, %v1828_v45  ;;  %v1829_v18 = vpack.c.bf16 %v1823_v47, %v1822_v62  ;;  %v1824_v4 = vmul.f32 %v2788_v57, %v3577_v10  ;;  %v1921_v10 = vld [vmem:[%s3730_s3 + $0x18] sm:$0xff] }
 0x5f8   : > { %v2790_v40 = vpop.eup %2789  ;;  %2541 = vmatpush3.bf16.msra.mxu1 %v1833_v56 }
 0x5f9   : > { %v1825_v16 = vmul.f32 %v2790_v40, %v3590_v34  ;;  %v2792_v29 = vpop.eup %2791  ;;  %v1922_v34 = vpack.c.bf16 %v1921_v10, %v1921_v10 }
 0x5fa   : > { %v2794_v51 = vpop.eup %2793  ;;  %v1827_v0 = vmul.f32 %v2792_v29, %v3580_v58 }
 0x5fb   : > { %2543 = vmatmul.mubr.msk.bf16.vlgmr.msra.gmra.mxu1 %vm571_vm1, %v1829_v18  ;;  %v1830_v49 = vpack.c.bf16 %v1825_v16, %v1824_v4  ;;  %v1826_v3 = vmul.f32 %v2794_v51, %v3568_v30  ;;  %2579 = vmatprep.subr.msk.bf16.mxu1 %vm771_vm2, %v1922_v34  ;;  %v1940_v63 = vsel %vm771_vm2, %v1922_v34, 0  ;;  %v439_v30 = vld [vmem:[%s3554_s29 + $0x28] sm:$0xff] }
 0x5fc   : > { %2551 = vmatpush3.bf16.msra.mxu1 %v1940_v63  ;;  %v454_v11 = vadd.f32 %v3560_v24, %v439_v30 }
 0x5fd   : > { %2546 = vmatprep.mubr.msk.bf16.mxu1 %vm571_vm1, %v1830_v49  ;;  %v1831_v28 = vpack.c.bf16 %v1827_v0, %v1826_v3 }
 0x5fe   : > { %v845_v50 = vadd.f32 %v3449_v46, %v454_v11 }
 0x603   : > { %2547 = vmatmul.mubr.msk.bf16.gmra.mxu1 %vm571_vm1, %v1831_v28 }
 0x68f   : > { %v2512_v19 = vpop.f32.mrf.mxu1 }
 0x690   : > { %v1620_v43 = vadd.f32 %v2512_v19, %v3594_v37 }
 0x691   : > { %v1587_v44 = vpop.f32.mrf.mxu1 }
 0x692   : > { %v1618_v58 = vadd.f32 %v1587_v44, %v3599_v59  ;;  %v1234_v59 = vadd.f32 %v3626_v8, %v845_v50 }
 0x693   : > { %v2513_v15 = vpop.f32.mrf.mxu1 }
 0x694   : > { %v1621_v6 = vadd.f32 %v2513_v15, %v3606_v42 }
 0x695   : > { %v1590_v20 = vpop.f32.mrf.mxu1 }
 0x696   : > { %v1619_v21 = vadd.f32 %v1590_v20, %v3610_v54 }
 0x697   : > { %v2516_v41 = vpop.f32.mrf.mxu1 }
 0x698   : > { %v1624_v12 = vadd.f32 %v2516_v41, %v3613_v31 }
 0x699   : > { %v1603_v25 = vpop.f32.mrf.mxu1 }
 0x69a   : > { %v1622_v37 = vadd.f32 %v1603_v25, %v3616_v61 }
 0x69b   : > { %v2517_v22 = vpop.f32.mrf.mxu1 }
 0x69c   : > { %v1625_v23 = vadd.f32 %v2517_v22, %v3618_v38 }
 0x69d   : > { %v1606_v17 = vpop.f32.mrf.mxu1 }
 0x69e   : > { %v1623_v42 = vadd.f32 %v1606_v17, %v1234_v59 }
 0x6bb   : > { %v2544_v5 = vpop.f32.mrf.mxu1 }
 0x6bd   : > { %v1890_v26 = vpop.f32.mrf.mxu1 }
 0x6bf   : > { %v2545_v24 = vpop.f32.mrf.mxu1 }
 0x6c0   : > { %v1924_v27 = vpack.c.bf16 %v2545_v24, %v2544_v5 }
 0x6c1   : > { %v1893_v7 = vpop.f32.mrf.mxu1 }
 0x6c2   : > { %v1923_v54 = vpack.c.bf16 %v1893_v7, %v1890_v26 }
 0x6c3   : > { %v2548_v31 = vpop.f32.mrf.mxu1 }
 0x6c4   : > { %2552 = vmatprep.mubr.msk.bf16.mxu1 %vm481_vm0, %v1923_v54 }
 0x6c5   : > { %v1906_v46 = vpop.f32.mrf.mxu1  ;;  %2553 = vmatmul.mubr.msk.bf16.vlgmr.msra.gmra.mxu1 %vm481_vm0, %v1924_v27 }
 0x6c7   : > { %v2549_v61 = vpop.f32.mrf.mxu1 }
 0x6c8   : > { %v1926_v33 = vpack.c.bf16 %v2549_v61, %v2548_v31 }
 0x6c9   : > { %v1909_v32 = vpop.f32.mrf.mxu1 }
 0x6ca   : > { %v1925_v8 = vpack.c.bf16 %v1909_v32, %v1906_v46 }
 0x6cc   : > { %2556 = vmatprep.mubr.msk.bf16.mxu1 %vm481_vm0, %v1925_v8 }
 0x6cd   : > { %2557 = vmatmul.mubr.msk.bf16.gmra.mxu1 %vm481_vm0, %v1926_v33 }
 0x785   : > { %v2554_v38 = vpop.f32.mrf.mxu1 }
 0x786   : > { %v2009_v35 = vadd.f32 %v2554_v38, %v1620_v43 }
 0x787   : > { %v1976_v36 = vpop.f32.mrf.mxu1 }
 0x788   : > { %2018 = vst.msk [vmem:[%s3666_s10 + $0x10] sm:$0xff] %vm2015_vm3, %v2009_v35  ;;  %v2007_v2 = vadd.f32 %v1976_v36, %v1618_v58 }
 0x789   : > { %v2555_v9 = vpop.f32.mrf.mxu1 }
 0x78a   : > { %2016 = vst.msk [vmem:[%s3666_s10] sm:$0xff] %vm2015_vm3, %v2007_v2  ;;  %v2010_v55 = vadd.f32 %v2555_v9, %v1621_v6 }
 0x78b   : > { %v1979_v60 = vpop.f32.mrf.mxu1 }
 0x78c   : > { %2019 = vst.msk [vmem:[%s3666_s10 + $0x18] sm:$0xff] %vm2015_vm3, %v2010_v55  ;;  %v2008_v48 = vadd.f32 %v1979_v60, %v1619_v21 }
 0x78d   : > { %v2558_v1 = vpop.f32.mrf.mxu1 }
 0x78e   : > { %2017 = vst.msk [vmem:[%s3666_s10 + $0x8] sm:$0xff] %vm2015_vm3, %v2008_v48  ;;  %v2013_v13 = vadd.f32 %v2558_v1, %v1624_v12 }
 0x78f   : > { %v1992_v52 = vpop.f32.mrf.mxu1  ;;  %v2084_v62 = vld [vmem:[%s3666_s10 + $0x10] sm:$0xff] (%p2974_p7) }
 0x790   : > { %2022 = vst.msk [vmem:[%s3666_s10 + $0x30] sm:$0xff] %vm2015_vm3, %v2013_v13  ;;  %v2011_v14 = vadd.f32 %v1992_v52, %v1622_v37  ;;  %2085 = vst [vmem:[%s2037_s17 + $0x20] sm:$0xff] (%p2974_p7), %v2084_v62 }
 0x791   : > { %v2559_v53 = vpop.f32.mrf.mxu1  ;;  %v2080_v47 = vld [vmem:[%s3666_s10] sm:$0xff] (%p2974_p7) }
 0x792   : > { %2020 = vst.msk [vmem:[%s3666_s10 + $0x20] sm:$0xff] %vm2015_vm3, %v2011_v14  ;;  %v2014_v56 = vadd.f32 %v2559_v53, %v1625_v23  ;;  %2030 = sbr.rel (!%p2974_p7) target bundleno = 1951 (0x79f), region = 123  ;;  %2081 = vst [vmem:[%s2037_s17] sm:$0xff] (%p2974_p7), %v2080_v47 }
 0x793   : > { %v1995_v39 = vpop.f32.mrf.mxu1  ;;  %v2086_v40 = vld [vmem:[%s3666_s10 + $0x18] sm:$0xff] (%p2974_p7) }
 0x794   : > { %2023 = vst.msk [vmem:[%s3666_s10 + $0x38] sm:$0xff] %vm2015_vm3, %v2014_v56  ;;  %v2012_v45 = vadd.f32 %v1995_v39, %v1623_v42  ;;  %2087 = vst [vmem:[%s2037_s17 + $0x30] sm:$0xff] (%p2974_p7), %v2086_v40 }
 0x795   : > { %v2082_v57 = vld [vmem:[%s3666_s10 + $0x8] sm:$0xff] (%p2974_p7) }
 0x796   : > { %2021 = vst.msk [vmem:[%s3666_s10 + $0x28] sm:$0xff] %vm2015_vm3, %v2012_v45  ;;  %2083 = vst [vmem:[%s2037_s17 + $0x10] sm:$0xff] (%p2974_p7), %v2082_v57 }
 0x797   : > { %v2092_v16 = vld [vmem:[%s3666_s10 + $0x30] sm:$0xff] }
 0x798   : > { %2093 = vst [vmem:[%s2037_s17 + $0x60] sm:$0xff] %v2092_v16 }
 0x799   : > { %v2088_v18 = vld [vmem:[%s3666_s10 + $0x20] sm:$0xff] }
 0x79a   : > { %2089 = vst [vmem:[%s2037_s17 + $0x40] sm:$0xff] %v2088_v18 }
 0x79b   : > { %v2094_v29 = vld [vmem:[%s3666_s10 + $0x38] sm:$0xff] }
 0x79c   : > { %2095 = vst [vmem:[%s2037_s17 + $0x70] sm:$0xff] %v2094_v29 }
 0x79d   : > { %v2090_v4 = vld [vmem:[%s3666_s10 + $0x28] sm:$0xff] }
 0x79e   : > { %2091 = vst [vmem:[%s2037_s17 + $0x50] sm:$0xff] %v2090_v4 }
 0x79f PF: > { %s15_s26 = sadd.s32 1, %s2869_s26   ;;  %s3737_s29 = sld [smem:[#allocation5_spill]] }
 0x7a0   : > { %p12_p13 = scmp.ge.s32.totalorder %s15_s26, 10   ;;  %s3738_s18 = smov %s2841_s19 }
 0x7a1   : > { %s3739_s19 = smov %s2988_s14  ;;  %s3740_s20 = smov %s2857_s23 }
 0x7a2   : > { %s3741_s21 = smov %s2861_s24  ;;  %s3742_s22 = smov %s2865_s25 }
 0x7a3   : > { %s3743_s23 = smov %s3747_s27  ;;  %s3744_s24 = smov %s3751_s28 }
 0x7a4   :  { %14 = sbr.rel (!%p12_p13) target bundleno = 5 (0x5), region = 203 }
 0x7a5   : > { %s3745_s25 = smov %s3737_s29 }

// kernel: forward.8
= control target key start
LH: loop header
LB: loop body
LE: loop exit
PB: predicated region body
PF: predicated region fallthrough
CT: control target
= control target key end

     0   :  { %s1605_s18 = smov 0   ;;  %s1607_s19 = smov 0   ;;  %s2233_s0 = inlined_call_operand.vmem [shape: f32[512,32], index: 0, kind: input, shape index: {}]   ;;  %s2234_s1 = inlined_call_operand.vmem [shape: f32[1,32], index: 1, kind: input, shape index: {}]   ;;  %s2235_s2 = inlined_call_operand.vmem [shape: f32[1,32], index: 2, kind: input, shape index: {}]   ;;  %s2236_s3 = inlined_call_operand.vmem [shape: f32[32,96], index: 3, kind: input, shape index: {}]   ;;  %s2237_s4 = inlined_call_operand.vmem [shape: f32[1,96], index: 4, kind: input, shape index: {}]   ;;  %s2238_s5 = inlined_call_operand.vmem [shape: bf16[512,96], index: 5, kind: output, shape index: {}]  }
   0x1   :  { %s1609_s20 = smov 0  }
   0x2 LB: > { %s27_s21 = sadd.s32 1, %s1569_s19  ;;  %p1315_p0 = scmp.ge.s32.totalorder %s1573_s20, 1  ;;  %s1573_s20 = sphi %s1609_s20, %s15_s20   ;;  %s1569_s19 = sphi %s1607_s19, %s2240_s19   ;;  %s1565_s18 = sphi %s1605_s18, %s2239_s18  }
   0x3   : > { %p29_p1 = scmp.ge.s32.totalorder %s27_s21, 2  ;;  %p219_p2 = scmp.lt.s32.totalorder %s1573_s20, 3 }
   0x5   : > { %s2242_s21 = smov (%p29_p1, %s27_s21), 0  ;;  %p220_p3 = pnand %p1315_p0, %p219_p2 }
   0x6   : > { %s1316_s22 = sshll.u32 (!%p220_p3), %s1565_s18, 5 }
   0x7   : > { %223 = sbr.rel (%p220_p3) target bundleno = 594 (0x252), region = 40  ;;  %p258_p4 = scmp.lt.s32.totalorder (!%p220_p3), %s1316_s22, 63 }
   0xc   : > { %s2244_s22 = smov (!%p258_p4, %s1316_s22), 63  ;;  %vm312_vm0 = vcmask 261120   ;;  %vm1174_vm1 = vcmask 781312  }
   0xd   : > { %s1317_s23 = sshll.u32 %s2244_s22, 3  ;;  %s1319_s16 = sshll.u32 %s2244_s22, 2 }
   0xe   : > { %s1629_s26 = scalar_lea.vmem %s2233_s0, %s1317_s23  ;;  %s2127_s23 = scalar_lea.vmem %s2238_s5, %s1319_s16 }
   0xf   : > { %v1632_v0 = vld [vmem:[%s1629_s26] sm:$0xff]  ;;  %v1638_v2 = vld [vmem:[%s1629_s26 + $0x8] sm:$0xff]  ;;  %v1652_v8 = vld [vmem:[%s1629_s26 + $0x10] sm:$0xff] }
  0x10   : > { %v1635_v1 = vld [vmem:[%s1629_s26 + $0x80] sm:$0xff]  ;;  %v313_v3 = vsel %vm312_vm0, %v1632_v0, 0.0  ;;  %v1645_v5 = vld [vmem:[%s1629_s26 + $0x88] sm:$0xff]  ;;  %v316_v6 = vsel %vm312_vm0, %v1638_v2, 0.0  ;;  %v1655_v9 = vld [vmem:[%s1629_s26 + $0x18] sm:$0xff]  ;;  %v319_v10 = vsel %vm312_vm0, %v1652_v8, 0.0 }
  0x11   : > { %v361_v4 = vsel %vm312_vm0, %v1635_v1, 0.0  ;;  %314 = vadd.xlane.f32.xlu0 %v313_v3  ;;  %v364_v7 = vsel %vm312_vm0, %v1645_v5, 0.0  ;;  %v322_v11 = vsel %vm312_vm0, %v1655_v9, 0.0  ;;  %v1662_v12 = vld [vmem:[%s1629_s26 + $0x90] sm:$0xff]  ;;  %v1665_v13 = vld [vmem:[%s1629_s26 + $0x98] sm:$0xff]  ;;  %v1672_v16 = vld [vmem:[%s1629_s26 + $0x20] sm:$0xff] }
  0x12   : > { %362 = vadd.xlane.f32.xlu1 %v361_v4  ;;  %v367_v14 = vsel %vm312_vm0, %v1662_v12, 0.0  ;;  %v370_v15 = vsel %vm312_vm0, %v1665_v13, 0.0  ;;  %v1675_v17 = vld [vmem:[%s1629_s26 + $0x28] sm:$0xff]  ;;  %v325_v18 = vsel %vm312_vm0, %v1672_v16, 0.0  ;;  %v1682_v20 = vld [vmem:[%s1629_s26 + $0xa0] sm:$0xff]  ;;  %v1692_v24 = vld [vmem:[%s1629_s26 + $0x30] sm:$0xff] }
  0x13   : > { %v328_v19 = vsel %vm312_vm0, %v1675_v17, 0.0  ;;  %v1685_v21 = vld [vmem:[%s1629_s26 + $0xa8] sm:$0xff]  ;;  %v373_v22 = vsel %vm312_vm0, %v1682_v20, 0.0  ;;  %v1695_v25 = vld [vmem:[%s1629_s26 + $0x38] sm:$0xff]  ;;  %v331_v26 = vsel %vm312_vm0, %v1692_v24, 0.0  ;;  %v1702_v28 = vld [vmem:[%s1629_s26 + $0xb0] sm:$0xff] }
  0x14   : > { %v376_v23 = vsel %vm312_vm0, %v1685_v21, 0.0  ;;  %v334_v27 = vsel %vm312_vm0, %v1695_v25, 0.0  ;;  %v1705_v29 = vld [vmem:[%s1629_s26 + $0xb8] sm:$0xff]  ;;  %v379_v30 = vsel %vm312_vm0, %v1702_v28, 0.0  ;;  %v1712_v32 = vld [vmem:[%s1629_s26 + $0x40] sm:$0xff]  ;;  %v1715_v33 = vld [vmem:[%s1629_s26 + $0x48] sm:$0xff] }
  0x15   : > { %317 = vadd.xlane.f32.xlu0 %v316_v6  ;;  %v382_v31 = vsel %vm312_vm0, %v1705_v29, 0.0  ;;  %v337_v34 = vsel %vm312_vm0, %v1712_v32, 0.0  ;;  %v340_v35 = vsel %vm312_vm0, %v1715_v33, 0.0  ;;  %v1722_v36 = vld [vmem:[%s1629_s26 + $0xc0] sm:$0xff]  ;;  %v1725_v37 = vld [vmem:[%s1629_s26 + $0xc8] sm:$0xff]  ;;  %v1732_v40 = vld [vmem:[%s1629_s26 + $0x50] sm:$0xff] }
  0x16   : > { %365 = vadd.xlane.f32.xlu1 %v364_v7  ;;  %v385_v38 = vsel %vm312_vm0, %v1722_v36, 0.0  ;;  %v388_v39 = vsel %vm312_vm0, %v1725_v37, 0.0  ;;  %v1735_v41 = vld [vmem:[%s1629_s26 + $0x58] sm:$0xff]  ;;  %v343_v42 = vsel %vm312_vm0, %v1732_v40, 0.0  ;;  %v1742_v44 = vld [vmem:[%s1629_s26 + $0xd0] sm:$0xff]  ;;  %v1752_v48 = vld [vmem:[%s1629_s26 + $0x60] sm:$0xff] }
  0x17   : > { %v346_v43 = vsel %vm312_vm0, %v1735_v41, 0.0  ;;  %v1745_v45 = vld [vmem:[%s1629_s26 + $0xd8] sm:$0xff]  ;;  %v391_v46 = vsel %vm312_vm0, %v1742_v44, 0.0  ;;  %v1755_v49 = vld [vmem:[%s1629_s26 + $0x68] sm:$0xff]  ;;  %v349_v50 = vsel %vm312_vm0, %v1752_v48, 0.0  ;;  %v1762_v52 = vld [vmem:[%s1629_s26 + $0xe0] sm:$0xff] }
  0x18   : > { %v394_v47 = vsel %vm312_vm0, %v1745_v45, 0.0  ;;  %v352_v51 = vsel %vm312_vm0, %v1755_v49, 0.0  ;;  %v1765_v53 = vld [vmem:[%s1629_s26 + $0xe8] sm:$0xff]  ;;  %v397_v54 = vsel %vm312_vm0, %v1762_v52, 0.0  ;;  %v1772_v56 = vld [vmem:[%s1629_s26 + $0x70] sm:$0xff]  ;;  %v1775_v57 = vld [vmem:[%s1629_s26 + $0x78] sm:$0xff] }
  0x19   : > { %320 = vadd.xlane.f32.xlu0 %v319_v10  ;;  %v400_v55 = vsel %vm312_vm0, %v1765_v53, 0.0  ;;  %v355_v58 = vsel %vm312_vm0, %v1772_v56, 0.0  ;;  %v358_v59 = vsel %vm312_vm0, %v1775_v57, 0.0  ;;  %v1782_v60 = vld [vmem:[%s1629_s26 + $0xf0] sm:$0xff]  ;;  %v1785_v61 = vld [vmem:[%s1629_s26 + $0xf8] sm:$0xff] }
  0x1a   : > { %323 = vadd.xlane.f32.xlu1 %v322_v11  ;;  %v403_v62 = vsel %vm312_vm0, %v1782_v60, 0.0  ;;  %v406_v63 = vsel %vm312_vm0, %v1785_v61, 0.0 }
  0x1d   : > { %368 = vadd.xlane.f32.xlu0 %v367_v14 }
  0x1e   : > { %371 = vadd.xlane.f32.xlu1 %v370_v15 }
  0x21   : > { %326 = vadd.xlane.f32.xlu0 %v325_v18 }
  0x22   : > { %329 = vadd.xlane.f32.xlu1 %v328_v19 }
  0x25   : > { %374 = vadd.xlane.f32.xlu0 %v373_v22 }
  0x26   : > { %377 = vadd.xlane.f32.xlu1 %v376_v23 }
  0x29   : > { %332 = vadd.xlane.f32.xlu0 %v331_v26 }
  0x2a   : > { %335 = vadd.xlane.f32.xlu1 %v334_v27 }
  0x2d   : > { %380 = vadd.xlane.f32.xlu0 %v379_v30 }
  0x2e   : > { %383 = vadd.xlane.f32.xlu1 %v382_v31 }
  0x31   : > { %338 = vadd.xlane.f32.xlu0 %v337_v34 }
  0x32   : > { %341 = vadd.xlane.f32.xlu1 %v340_v35 }
  0x35   : > { %386 = vadd.xlane.f32.xlu0 %v385_v38 }
  0x36   : > { %389 = vadd.xlane.f32.xlu1 %v388_v39 }
  0x39   : > { %344 = vadd.xlane.f32.xlu0 %v343_v42 }
  0x3a   : > { %347 = vadd.xlane.f32.xlu1 %v346_v43 }
  0x3d   : > { %392 = vadd.xlane.f32.xlu0 %v391_v46 }
  0x3e   : > { %395 = vadd.xlane.f32.xlu1 %v394_v47 }
  0x41   : > { %350 = vadd.xlane.f32.xlu0 %v349_v50 }
  0x42   : > { %353 = vadd.xlane.f32.xlu1 %v352_v51 }
  0x45   : > { %398 = vadd.xlane.f32.xlu0 %v397_v54 }
  0x46   : > { %401 = vadd.xlane.f32.xlu1 %v400_v55 }
  0x49   : > { %356 = vadd.xlane.f32.xlu0 %v355_v58 }
  0x4a   : > { %359 = vadd.xlane.f32.xlu1 %v358_v59 }
  0x4d   : > { %404 = vadd.xlane.f32.xlu0 %v403_v62 }
  0x4e   : > { %407 = vadd.xlane.f32.xlu1 %v406_v63 }
  0x9a   : > { %v315_v3 = vpop.xlane.xlu0 %314 }
  0x9b   : > { %v363_v4 = vpop.xlane.xlu1 %362  ;;  %v410_v6 = vmul.f32 0.03125, %v315_v3 }
  0x9c   : > { %v426_v7 = vmul.f32 0.03125, %v363_v4 }
  0x9d   : > { %v1792_v10 = vsub.f32 %v1632_v0, %v410_v6 }
  0x9e   : > { %v1795_v11 = vsub.f32 %v1635_v1, %v426_v7  ;;  %v318_v14 = vpop.xlane.xlu0 %317 }
  0x9f   : > { %v366_v15 = vpop.xlane.xlu1 %365  ;;  %v411_v18 = vmul.f32 0.03125, %v318_v14  ;;  %v474_v22 = vmul.f32 %v1792_v10, %v1792_v10 }
  0xa0   : > { %v427_v19 = vmul.f32 0.03125, %v366_v15  ;;  %v490_v23 = vmul.f32 %v1795_v11, %v1795_v11 }
  0xa1   : > { %v1802_v26 = vsub.f32 %v1638_v2, %v411_v18  ;;  %v506_v0 = vsel %vm312_vm0, %v474_v22, 0.0 }
  0xa2   : > { %v1805_v27 = vsub.f32 %v1645_v5, %v427_v19  ;;  %507 = vadd.xlane.f32.xlu0 %v506_v0  ;;  %v321_v1 = vpop.xlane.xlu0 %320  ;;  %v554_v31 = vsel %vm312_vm0, %v490_v23, 0.0 }
  0xa3   : > { %v324_v30 = vpop.xlane.xlu1 %323  ;;  %v412_v34 = vmul.f32 0.03125, %v321_v1  ;;  %v475_v38 = vmul.f32 %v1802_v26, %v1802_v26 }
  0xa4   : > { %v413_v35 = vmul.f32 0.03125, %v324_v30  ;;  %v491_v39 = vmul.f32 %v1805_v27, %v1805_v27 }
  0xa5   : > { %v1814_v2 = vsub.f32 %v1652_v8, %v412_v34  ;;  %v509_v42 = vsel %vm312_vm0, %v475_v38, 0.0 }
  0xa6   : > { %v1817_v5 = vsub.f32 %v1655_v9, %v413_v35  ;;  %555 = vadd.xlane.f32.xlu0 %v554_v31  ;;  %510 = vadd.xlane.f32.xlu1 %v509_v42  ;;  %v369_v43 = vpop.xlane.xlu0 %368  ;;  %v557_v47 = vsel %vm312_vm0, %v491_v39, 0.0 }
  0xa7   : > { %v372_v46 = vpop.xlane.xlu1 %371  ;;  %v428_v50 = vmul.f32 0.03125, %v369_v43  ;;  %v476_v54 = vmul.f32 %v1814_v2, %v1814_v2 }
  0xa8   : > { %v429_v51 = vmul.f32 0.03125, %v372_v46  ;;  %v477_v8 = vmul.f32 %v1817_v5, %v1817_v5 }
  0xa9   : > { %v1826_v55 = vsub.f32 %v1662_v12, %v428_v50  ;;  %v512_v58 = vsel %vm312_vm0, %v476_v54, 0.0 }
  0xaa   : > { %v1829_v9 = vsub.f32 %v1665_v13, %v429_v51  ;;  %558 = vadd.xlane.f32.xlu1 %v557_v47  ;;  %513 = vadd.xlane.f32.xlu0 %v512_v58  ;;  %v327_v59 = vpop.xlane.xlu0 %326  ;;  %v515_v63 = vsel %vm312_vm0, %v477_v8, 0.0 }
  0xab   : > { %v330_v62 = vpop.xlane.xlu1 %329  ;;  %v414_v3 = vmul.f32 0.03125, %v327_v59  ;;  %v492_v6 = vmul.f32 %v1826_v55, %v1826_v55 }
  0xac   : > { %v415_v4 = vmul.f32 0.03125, %v330_v62  ;;  %v493_v12 = vmul.f32 %v1829_v9, %v1829_v9 }
  0xad   : > { %v1838_v7 = vsub.f32 %v1672_v16, %v414_v3  ;;  %v560_v14 = vsel %vm312_vm0, %v492_v6, 0.0 }
  0xae   : > { %v1841_v13 = vsub.f32 %v1675_v17, %v415_v4  ;;  %516 = vadd.xlane.f32.xlu1 %v515_v63  ;;  %561 = vadd.xlane.f32.xlu0 %v560_v14  ;;  %v375_v15 = vpop.xlane.xlu0 %374  ;;  %v563_v19 = vsel %vm312_vm0, %v493_v12, 0.0 }
  0xaf   : > { %v378_v18 = vpop.xlane.xlu1 %377  ;;  %v430_v22 = vmul.f32 0.03125, %v375_v15  ;;  %v478_v0 = vmul.f32 %v1838_v7, %v1838_v7 }
  0xb0   : > { %v431_v23 = vmul.f32 0.03125, %v378_v18  ;;  %v479_v16 = vmul.f32 %v1841_v13, %v1841_v13 }
  0xb1   : > { %v1850_v1 = vsub.f32 %v1682_v20, %v430_v22  ;;  %v518_v30 = vsel %vm312_vm0, %v478_v0, 0.0 }
  0xb2   : > { %v1853_v17 = vsub.f32 %v1685_v21, %v431_v23  ;;  %564 = vadd.xlane.f32.xlu1 %v563_v19  ;;  %519 = vadd.xlane.f32.xlu0 %v518_v30  ;;  %v333_v31 = vpop.xlane.xlu0 %332  ;;  %v521_v35 = vsel %vm312_vm0, %v479_v16, 0.0 }
  0xb3   : > { %v336_v34 = vpop.xlane.xlu1 %335  ;;  %v416_v38 = vmul.f32 0.03125, %v333_v31  ;;  %v494_v42 = vmul.f32 %v1850_v1, %v1850_v1 }
  0xb4   : > { %v417_v39 = vmul.f32 0.03125, %v336_v34  ;;  %v495_v20 = vmul.f32 %v1853_v17, %v1853_v17 }
  0xb5   : > { %v1862_v43 = vsub.f32 %v1692_v24, %v416_v38  ;;  %v566_v46 = vsel %vm312_vm0, %v494_v42, 0.0 }
  0xb6   : > { %v1865_v21 = vsub.f32 %v1695_v25, %v417_v39  ;;  %522 = vadd.xlane.f32.xlu1 %v521_v35  ;;  %567 = vadd.xlane.f32.xlu0 %v566_v46  ;;  %v381_v47 = vpop.xlane.xlu0 %380  ;;  %v569_v51 = vsel %vm312_vm0, %v495_v20, 0.0 }
  0xb7   : > { %v384_v50 = vpop.xlane.xlu1 %383  ;;  %v432_v54 = vmul.f32 0.03125, %v381_v47  ;;  %v480_v58 = vmul.f32 %v1862_v43, %v1862_v43 }
  0xb8   : > { %v433_v8 = vmul.f32 0.03125, %v384_v50  ;;  %v481_v24 = vmul.f32 %v1865_v21, %v1865_v21 }
  0xb9   : > { %v1874_v59 = vsub.f32 %v1702_v28, %v432_v54  ;;  %v524_v62 = vsel %vm312_vm0, %v480_v58, 0.0 }
  0xba   : > { %v1877_v25 = vsub.f32 %v1705_v29, %v433_v8  ;;  %570 = vadd.xlane.f32.xlu1 %v569_v51  ;;  %525 = vadd.xlane.f32.xlu0 %v524_v62  ;;  %v339_v63 = vpop.xlane.xlu0 %338  ;;  %v527_v4 = vsel %vm312_vm0, %v481_v24, 0.0 }
  0xbb   : > { %v342_v3 = vpop.xlane.xlu1 %341  ;;  %v418_v6 = vmul.f32 0.03125, %v339_v63  ;;  %v496_v14 = vmul.f32 %v1874_v59, %v1874_v59  ;;  %v827_v63 = vld [vmem:[%s2236_s3 + $0x18] sm:$0xff] }
  0xbc   : > { %v419_v12 = vmul.f32 0.03125, %v342_v3  ;;  %v497_v28 = vmul.f32 %v1877_v25, %v1877_v25 }
  0xbd   : > { %v1886_v15 = vsub.f32 %v1712_v32, %v418_v6  ;;  %v572_v18 = vsel %vm312_vm0, %v496_v14, 0.0 }
  0xbe   : > { %v1889_v29 = vsub.f32 %v1715_v33, %v419_v12  ;;  %528 = vadd.xlane.f32.xlu1 %v527_v4  ;;  %573 = vadd.xlane.f32.xlu0 %v572_v18  ;;  %v387_v19 = vpop.xlane.xlu0 %386  ;;  %v575_v23 = vsel %vm312_vm0, %v497_v28, 0.0 }
  0xbf   : > { %v390_v22 = vpop.xlane.xlu1 %389  ;;  %v434_v0 = vmul.f32 0.03125, %v387_v19  ;;  %v482_v30 = vmul.f32 %v1886_v15, %v1886_v15 }
  0xc0   : > { %v435_v16 = vmul.f32 0.03125, %v390_v22  ;;  %v483_v32 = vmul.f32 %v1889_v29, %v1889_v29 }
  0xc1   : > { %v1898_v31 = vsub.f32 %v1722_v36, %v434_v0  ;;  %v530_v34 = vsel %vm312_vm0, %v482_v30, 0.0  ;;  %v825_v0 = vld [vmem:[%s2236_s3 + $0x8] sm:$0xff] }
  0xc2   : > { %v1901_v33 = vsub.f32 %v1725_v37, %v435_v16  ;;  %576 = vadd.xlane.f32.xlu1 %v575_v23  ;;  %531 = vadd.xlane.f32.xlu0 %v530_v34  ;;  %v345_v35 = vpop.xlane.xlu0 %344  ;;  %v533_v39 = vsel %vm312_vm0, %v483_v32, 0.0 }
  0xc3   : > { %v348_v38 = vpop.xlane.xlu1 %347  ;;  %v420_v42 = vmul.f32 0.03125, %v345_v35  ;;  %v498_v46 = vmul.f32 %v1898_v31, %v1898_v31 }
  0xc4   : > { %v421_v20 = vmul.f32 0.03125, %v348_v38  ;;  %v499_v36 = vmul.f32 %v1901_v33, %v1901_v33 }
  0xc5   : > { %v1910_v47 = vsub.f32 %v1732_v40, %v420_v42  ;;  %v578_v50 = vsel %vm312_vm0, %v498_v46, 0.0 }
  0xc6   : > { %v1913_v37 = vsub.f32 %v1735_v41, %v421_v20  ;;  %534 = vadd.xlane.f32.xlu1 %v533_v39  ;;  %579 = vadd.xlane.f32.xlu0 %v578_v50  ;;  %v393_v51 = vpop.xlane.xlu0 %392  ;;  %v581_v8 = vsel %vm312_vm0, %v499_v36, 0.0  ;;  %v826_v41 = vld [vmem:[%s2236_s3 + $0x10] sm:$0xff] }
  0xc7   : > { %v396_v54 = vpop.xlane.xlu1 %395  ;;  %v436_v58 = vmul.f32 0.03125, %v393_v51  ;;  %v484_v62 = vmul.f32 %v1910_v47, %v1910_v47  ;;  %v829_v18 = vpack.c.bf16 %v827_v63, %v826_v41 }
  0xc8   : > { %v437_v24 = vmul.f32 0.03125, %v396_v54  ;;  %v485_v40 = vmul.f32 %v1913_v37, %v1913_v37 }
  0xc9   : > { %v1928_v3 = vsub.f32 %v1742_v44, %v436_v58  ;;  %v536_v6 = vsel %vm312_vm0, %v484_v62, 0.0  ;;  %1423 = vmatprep.subr.bf16.mxu0 %v829_v18  ;;  %1459 = vmatprep.subr.bf16.mxu1 %v829_v18 }
  0xca   : > { %v1931_v4 = vsub.f32 %v1745_v45, %v437_v24  ;;  %582 = vadd.xlane.f32.xlu1 %v581_v8  ;;  %537 = vadd.xlane.f32.xlu0 %v536_v6  ;;  %v351_v12 = vpop.xlane.xlu0 %350  ;;  %v539_v28 = vsel %vm312_vm0, %v485_v40, 0.0  ;;  %v824_v45 = vld [vmem:[%s2236_s3] sm:$0xff] }
  0xcb   : > { %v354_v14 = vpop.xlane.xlu1 %353  ;;  %v422_v19 = vmul.f32 0.03125, %v351_v12  ;;  %v500_v23 = vmul.f32 %v1928_v3, %v1928_v3  ;;  %1424 = vmatpush3.bf16.msra.mxu0 %v829_v18  ;;  %1461 = vmatpush3.bf16.msra.mxu1 %v829_v18  ;;  %v828_v39 = vpack.c.bf16 %v825_v0, %v824_v45 }
  0xcc   : > { %v423_v22 = vmul.f32 0.03125, %v354_v14  ;;  %v501_v44 = vmul.f32 %v1931_v4, %v1931_v4 }
  0xcd   : > { %v1946_v16 = vsub.f32 %v1752_v48, %v422_v19  ;;  %v584_v32 = vsel %vm312_vm0, %v500_v23, 0.0  ;;  %1425 = vmatprep.subr.bf16.mxu0 %v828_v39  ;;  %1460 = vmatprep.subr.bf16.mxu1 %v828_v39 }
  0xce   : > { %v1949_v30 = vsub.f32 %v1755_v49, %v423_v22  ;;  %540 = vadd.xlane.f32.xlu1 %v539_v28  ;;  %585 = vadd.xlane.f32.xlu0 %v584_v32  ;;  %v399_v34 = vpop.xlane.xlu0 %398  ;;  %v587_v38 = vsel %vm312_vm0, %v501_v44, 0.0 }
  0xcf   : > { %v402_v35 = vpop.xlane.xlu1 %401  ;;  %v438_v42 = vmul.f32 0.03125, %v399_v34  ;;  %v486_v48 = vmul.f32 %v1946_v16, %v1946_v16  ;;  %1426 = vmatpush3.bf16.msra.mxu0 %v828_v39  ;;  %1462 = vmatpush3.bf16.msra.mxu1 %v828_v39 }
  0xd0   : > { %v439_v20 = vmul.f32 0.03125, %v402_v35  ;;  %v487_v49 = vmul.f32 %v1949_v30, %v1949_v30 }
  0xd1   : > { %v1958_v46 = vsub.f32 %v1762_v52, %v438_v42  ;;  %v542_v50 = vsel %vm312_vm0, %v486_v48, 0.0 }
  0xd2   : > { %v1961_v36 = vsub.f32 %v1765_v53, %v439_v20  ;;  %588 = vadd.xlane.f32.xlu1 %v587_v38  ;;  %543 = vadd.xlane.f32.xlu0 %v542_v50  ;;  %v357_v51 = vpop.xlane.xlu0 %356  ;;  %v545_v8 = vsel %vm312_vm0, %v487_v49, 0.0 }
  0xd3   : > { %v360_v54 = vpop.xlane.xlu1 %359  ;;  %v424_v58 = vmul.f32 0.03125, %v357_v51  ;;  %v502_v62 = vmul.f32 %v1958_v46, %v1958_v46 }
  0xd4   : > { %v425_v24 = vmul.f32 0.03125, %v360_v54  ;;  %v503_v52 = vmul.f32 %v1961_v36, %v1961_v36 }
  0xd5   : > { %v1970_v53 = vsub.f32 %v1772_v56, %v424_v58  ;;  %v590_v41 = vsel %vm312_vm0, %v502_v62, 0.0 }
  0xd6   : > { %v1973_v40 = vsub.f32 %v1775_v57, %v425_v24  ;;  %546 = vadd.xlane.f32.xlu1 %v545_v8  ;;  %591 = vadd.xlane.f32.xlu0 %v590_v41  ;;  %v405_v63 = vpop.xlane.xlu0 %404  ;;  %v593_v12 = vsel %vm312_vm0, %v503_v52, 0.0 }
  0xd7   : > { %v408_v6 = vpop.xlane.xlu1 %407  ;;  %v440_v14 = vmul.f32 0.03125, %v405_v63  ;;  %v488_v18 = vmul.f32 %v1970_v53, %v1970_v53 }
  0xd8   : > { %v441_v28 = vmul.f32 0.03125, %v408_v6  ;;  %v489_v56 = vmul.f32 %v1973_v40, %v1973_v40 }
  0xd9   : > { %v1982_v19 = vsub.f32 %v1782_v60, %v440_v14  ;;  %v548_v22 = vsel %vm312_vm0, %v488_v18, 0.0 }
  0xda   : > { %v1985_v57 = vsub.f32 %v1785_v61, %v441_v28  ;;  %594 = vadd.xlane.f32.xlu1 %v593_v12  ;;  %549 = vadd.xlane.f32.xlu0 %v548_v22  ;;  %v551_v23 = vsel %vm312_vm0, %v489_v56, 0.0 }
  0xdb   : > { %v504_v44 = vmul.f32 %v1982_v19, %v1982_v19 }
  0xdc   : > { %v505_v45 = vmul.f32 %v1985_v57, %v1985_v57 }
  0xdd   : > { %v596_v0 = vsel %vm312_vm0, %v504_v44, 0.0 }
  0xde   : > { %552 = vadd.xlane.f32.xlu1 %v551_v23  ;;  %597 = vadd.xlane.f32.xlu0 %v596_v0  ;;  %v599_v60 = vsel %vm312_vm0, %v505_v45, 0.0  ;;  %v1999_v45 = vld [vmem:[%s2234_s1] ss:$0 sm:$0xff] }
  0xe2   : > { %600 = vadd.xlane.f32.xlu1 %v599_v60 }
 0x12b   : > { %v508_v61 = vpop.xlane.xlu0 %507 }
 0x12c   : > { %v602_v32 = vmul.f32 0.03125, %v508_v61 }
 0x12e   : > { %v634_v34 = vadd.f32 1e-05, %v602_v32 }
 0x12f   : > { %v511_v35 = vpop.xlane.xlu1 %510  ;;  %v556_v38 = vpop.xlane.xlu0 %555 }
 0x130   : > { %1487 = vrsqrt.f32 %v634_v34  ;;  %v603_v39 = vmul.f32 0.03125, %v511_v35  ;;  %v618_v42 = vmul.f32 0.03125, %v556_v38 }
 0x132   : > { %v635_v20 = vadd.f32 1e-05, %v603_v39  ;;  %v650_v48 = vadd.f32 1e-05, %v618_v42 }
 0x133   : > { %v559_v49 = vpop.xlane.xlu1 %558  ;;  %v514_v50 = vpop.xlane.xlu0 %513 }
 0x134   : > { %1489 = vrsqrt.f32 %v635_v20  ;;  %v619_v51 = vmul.f32 0.03125, %v559_v49  ;;  %v604_v54 = vmul.f32 0.03125, %v514_v50 }
 0x135   : > { %1491 = vrsqrt.f32 %v650_v48 }
 0x136   : > { %v651_v8 = vadd.f32 1e-05, %v619_v51  ;;  %v636_v58 = vadd.f32 1e-05, %v604_v54 }
 0x137   : > { %v517_v24 = vpop.xlane.xlu1 %516  ;;  %v562_v62 = vpop.xlane.xlu0 %561 }
 0x138   : > { %1493 = vrsqrt.f32 %v651_v8  ;;  %v605_v52 = vmul.f32 0.03125, %v517_v24  ;;  %v620_v41 = vmul.f32 0.03125, %v562_v62 }
 0x139   : > { %1495 = vrsqrt.f32 %v636_v58 }
 0x13a   : > { %v637_v63 = vadd.f32 1e-05, %v605_v52  ;;  %v652_v6 = vadd.f32 1e-05, %v620_v41 }
 0x13b   : > { %v565_v12 = vpop.xlane.xlu1 %564  ;;  %v520_v14 = vpop.xlane.xlu0 %519 }
 0x13c   : > { %1497 = vrsqrt.f32 %v637_v63  ;;  %v621_v28 = vmul.f32 0.03125, %v565_v12  ;;  %v606_v18 = vmul.f32 0.03125, %v520_v14 }
 0x13d   : > { %v1488_v56 = vpop.eup %1487  ;;  %1499 = vrsqrt.f32 %v652_v6 }
 0x13e   : > { %v653_v22 = vadd.f32 1e-05, %v621_v28  ;;  %v638_v23 = vadd.f32 1e-05, %v606_v18  ;;  %v698_v44 = vmul.f32 %v1488_v56, %v1792_v10  ;;  %v2006_v10 = vld [vmem:[%s2235_s2] ss:$0 sm:$0xff] }
 0x13f   : > { %v523_v0 = vpop.xlane.xlu1 %522  ;;  %v568_v60 = vpop.xlane.xlu0 %567 }
 0x140   : > { %1501 = vrsqrt.f32 %v653_v22  ;;  %v607_v61 = vmul.f32 0.03125, %v523_v0  ;;  %v622_v32 = vmul.f32 0.03125, %v568_v60  ;;  %v737_v35 = vmul.f32 %v1999_v45, %v698_v44 }
 0x141   : > { %v1490_v34 = vpop.eup %1489  ;;  %1503 = vrsqrt.f32 %v638_v23 }
 0x142   : > { %v1492_v38 = vpop.eup %1491  ;;  %v639_v39 = vadd.f32 1e-05, %v607_v61  ;;  %v654_v42 = vadd.f32 1e-05, %v622_v32  ;;  %v699_v20 = vmul.f32 %v1490_v34, %v1802_v26  ;;  %v776_v24 = vadd.f32 %v2006_v10, %v737_v35 }
 0x143   : > { %v571_v48 = vpop.xlane.xlu1 %570  ;;  %v526_v49 = vpop.xlane.xlu0 %525  ;;  %v714_v50 = vmul.f32 %v1492_v38, %v1795_v11 }
 0x144   : > { %1505 = vrsqrt.f32 %v639_v39  ;;  %v623_v51 = vmul.f32 0.03125, %v571_v48  ;;  %v608_v54 = vmul.f32 0.03125, %v526_v49  ;;  %v738_v8 = vmul.f32 %v1999_v45, %v699_v20 }
 0x145   : > { %v1494_v58 = vpop.eup %1493  ;;  %1507 = vrsqrt.f32 %v654_v42  ;;  %v753_v11 = vmul.f32 %v1999_v45, %v714_v50 }
 0x146   : > { %v1496_v62 = vpop.eup %1495  ;;  %v655_v26 = vadd.f32 1e-05, %v623_v51  ;;  %v640_v52 = vadd.f32 1e-05, %v608_v54  ;;  %v777_v41 = vadd.f32 %v2006_v10, %v738_v8  ;;  %v715_v63 = vmul.f32 %v1494_v58, %v1805_v27 }
 0x147   : > { %v529_v6 = vpop.xlane.xlu1 %528  ;;  %v574_v12 = vpop.xlane.xlu0 %573  ;;  %v700_v14 = vmul.f32 %v1496_v62, %v1814_v2  ;;  %v792_v2 = vadd.f32 %v2006_v10, %v753_v11 }
 0x148   : > { %1509 = vrsqrt.f32 %v655_v26  ;;  %v609_v28 = vmul.f32 0.03125, %v529_v6  ;;  %v624_v18 = vmul.f32 0.03125, %v574_v12  ;;  %v808_v56 = vpack.c.bf16 %v777_v41, %v776_v24 }
 0x149   : > { %v1498_v22 = vpop.eup %1497  ;;  %1511 = vrsqrt.f32 %v640_v52  ;;  %v754_v23 = vmul.f32 %v1999_v45, %v715_v63  ;;  %v739_v44 = vmul.f32 %v1999_v45, %v700_v14 }
 0x14a   : > { %v1500_v0 = vpop.eup %1499  ;;  %v641_v60 = vadd.f32 1e-05, %v609_v28  ;;  %v656_v61 = vadd.f32 1e-05, %v624_v18  ;;  %1427 = vmatprep.mubr.msk.bf16.mxu0 %vm312_vm0, %v808_v56  ;;  %v701_v27 = vmul.f32 %v1498_v22, %v1817_v5 }
 0x14b   : > { %v577_v32 = vpop.xlane.xlu1 %576  ;;  %v532_v34 = vpop.xlane.xlu0 %531  ;;  %v793_v35 = vadd.f32 %v2006_v10, %v754_v23  ;;  %v716_v38 = vmul.f32 %v1500_v0, %v1826_v55  ;;  %v778_v50 = vadd.f32 %v2006_v10, %v739_v44 }
 0x14c   : > { %1513 = vrsqrt.f32 %v641_v60  ;;  %v625_v39 = vmul.f32 0.03125, %v577_v32  ;;  %v610_v42 = vmul.f32 0.03125, %v532_v34  ;;  %v740_v20 = vmul.f32 %v1999_v45, %v701_v27 }
 0x14d   : > { %v1502_v48 = vpop.eup %1501  ;;  %1515 = vrsqrt.f32 %v656_v61  ;;  %v816_v49 = vpack.c.bf16 %v793_v35, %v792_v2  ;;  %v755_v62 = vmul.f32 %v1999_v45, %v716_v38 }
 0x14e   : > { %v1504_v51 = vpop.eup %1503  ;;  %v657_v5 = vadd.f32 1e-05, %v625_v39  ;;  %v642_v54 = vadd.f32 1e-05, %v610_v42  ;;  %v779_v8 = vadd.f32 %v2006_v10, %v740_v20  ;;  %v717_v58 = vmul.f32 %v1502_v48, %v1829_v9 }
 0x14f   : > { %1443 = vmatprep.mubr.msk.bf16.mxu1 %vm312_vm0, %v816_v49  ;;  %v535_v55 = vpop.xlane.xlu1 %534  ;;  %v580_v24 = vpop.xlane.xlu0 %579  ;;  %v702_v26 = vmul.f32 %v1504_v51, %v1838_v7  ;;  %v794_v7 = vadd.f32 %v2006_v10, %v755_v62 }
 0x150   : > { %1517 = vrsqrt.f32 %v657_v5  ;;  %v611_v52 = vmul.f32 0.03125, %v535_v55  ;;  %v626_v41 = vmul.f32 0.03125, %v580_v24  ;;  %v809_v63 = vpack.c.bf16 %v779_v8, %v778_v50 }
 0x151   : > { %v1506_v6 = vpop.eup %1505  ;;  %1519 = vrsqrt.f32 %v642_v54  ;;  %v756_v12 = vmul.f32 %v1999_v45, %v717_v58  ;;  %v741_v11 = vmul.f32 %v1999_v45, %v702_v26 }
 0x152   : > { %v1508_v14 = vpop.eup %1507  ;;  %v643_v9 = vadd.f32 1e-05, %v611_v52  ;;  %v658_v28 = vadd.f32 1e-05, %v626_v41  ;;  %1428 = vmatmul.mubr.msk.bf16.vlgmr.msra.gmra.mxu0 %vm312_vm0, %v809_v63  ;;  %v703_v18 = vmul.f32 %v1506_v6, %v1841_v13 }
 0x153   : > { %v583_v56 = vpop.xlane.xlu1 %582  ;;  %v538_v22 = vpop.xlane.xlu0 %537  ;;  %v795_v23 = vadd.f32 %v2006_v10, %v756_v12  ;;  %v718_v44 = vmul.f32 %v1508_v14, %v1850_v1  ;;  %v780_v34 = vadd.f32 %v2006_v10, %v741_v11 }
 0x154   : > { %1521 = vrsqrt.f32 %v643_v9  ;;  %v627_v0 = vmul.f32 0.03125, %v583_v56  ;;  %v612_v60 = vmul.f32 0.03125, %v538_v22  ;;  %v742_v61 = vmul.f32 %v1999_v45, %v703_v18 }
 0x155   : > { %v1510_v27 = vpop.eup %1509  ;;  %1523 = vrsqrt.f32 %v658_v28  ;;  %v817_v32 = vpack.c.bf16 %v795_v23, %v794_v7  ;;  %v757_v20 = vmul.f32 %v1999_v45, %v718_v44 }
 0x156   : > { %v1512_v2 = vpop.eup %1511  ;;  %v659_v13 = vadd.f32 1e-05, %v627_v0  ;;  %v644_v35 = vadd.f32 1e-05, %v612_v60  ;;  %v781_v38 = vadd.f32 %v2006_v10, %v742_v61  ;;  %v719_v39 = vmul.f32 %v1510_v27, %v1853_v17 }
 0x157   : > { %1444 = vmatmul.mubr.msk.bf16.vlgmr.msra.gmra.mxu1 %vm312_vm0, %v817_v32  ;;  %v541_v1 = vpop.xlane.xlu1 %540  ;;  %v586_v42 = vpop.xlane.xlu0 %585  ;;  %v704_v48 = vmul.f32 %v1512_v2, %v1862_v43  ;;  %v796_v43 = vadd.f32 %v2006_v10, %v757_v20 }
 0x158   : > { %1525 = vrsqrt.f32 %v659_v13  ;;  %v613_v49 = vmul.f32 0.03125, %v541_v1  ;;  %v628_v50 = vmul.f32 0.03125, %v586_v42  ;;  %v810_v51 = vpack.c.bf16 %v781_v38, %v780_v34 }
 0x159   : > { %v1514_v5 = vpop.eup %1513  ;;  %1527 = vrsqrt.f32 %v644_v35  ;;  %v758_v54 = vmul.f32 %v1999_v45, %v719_v39  ;;  %v743_v8 = vmul.f32 %v1999_v45, %v704_v48 }
 0x15a   : > { %v1516_v58 = vpop.eup %1515  ;;  %v645_v17 = vadd.f32 1e-05, %v613_v49  ;;  %v660_v55 = vadd.f32 1e-05, %v628_v50  ;;  %1431 = vmatprep.mubr.msk.bf16.mxu0 %vm312_vm0, %v810_v51  ;;  %v705_v24 = vmul.f32 %v1514_v5, %v1865_v21 }
 0x15b   : > { %v589_v62 = vpop.xlane.xlu1 %588  ;;  %v544_v26 = vpop.xlane.xlu0 %543  ;;  %v797_v52 = vadd.f32 %v2006_v10, %v758_v54  ;;  %v720_v41 = vmul.f32 %v1516_v58, %v1874_v59  ;;  %v782_v9 = vadd.f32 %v2006_v10, %v743_v8 }
 0x15c   : > { %1529 = vrsqrt.f32 %v645_v17  ;;  %v629_v63 = vmul.f32 0.03125, %v589_v62  ;;  %v614_v6 = vmul.f32 0.03125, %v544_v26  ;;  %v744_v12 = vmul.f32 %v1999_v45, %v705_v24 }
 0x15d   : > { %v1518_v11 = vpop.eup %1517  ;;  %1531 = vrsqrt.f32 %v660_v55  ;;  %v818_v14 = vpack.c.bf16 %v797_v52, %v796_v43  ;;  %v759_v23 = vmul.f32 %v1999_v45, %v720_v41 }
 0x15e   : > { %v1520_v28 = vpop.eup %1519  ;;  %v661_v21 = vadd.f32 1e-05, %v629_v63  ;;  %v646_v18 = vadd.f32 1e-05, %v614_v6  ;;  %v783_v56 = vadd.f32 %v2006_v10, %v744_v12  ;;  %v721_v22 = vmul.f32 %v1518_v11, %v1877_v25 }
 0x15f   : > { %1447 = vmatprep.mubr.msk.bf16.mxu1 %vm312_vm0, %v818_v14  ;;  %v547_v59 = vpop.xlane.xlu1 %546  ;;  %v592_v7 = vpop.xlane.xlu0 %591  ;;  %v706_v44 = vmul.f32 %v1520_v28, %v1886_v15  ;;  %v798_v15 = vadd.f32 %v2006_v10, %v759_v23 }
 0x160   : > { %1533 = vrsqrt.f32 %v661_v21  ;;  %v615_v0 = vmul.f32 0.03125, %v547_v59  ;;  %v630_v60 = vmul.f32 0.03125, %v592_v7  ;;  %v811_v61 = vpack.c.bf16 %v783_v56, %v782_v9 }
 0x161   : > { %v1522_v27 = vpop.eup %1521  ;;  %1535 = vrsqrt.f32 %v646_v18  ;;  %v760_v32 = vmul.f32 %v1999_v45, %v721_v22  ;;  %v745_v34 = vmul.f32 %v1999_v45, %v706_v44 }
 0x162   : > { %v1524_v2 = vpop.eup %1523  ;;  %v647_v25 = vadd.f32 1e-05, %v615_v0  ;;  %v662_v13 = vadd.f32 1e-05, %v630_v60  ;;  %1432 = vmatmul.mubr.msk.bf16.gmra.mxu0 %vm312_vm0, %v811_v61  ;;  %v707_v35 = vmul.f32 %v1522_v27, %v1889_v29 }
 0x163   : > { %v595_v38 = vpop.xlane.xlu1 %594  ;;  %v550_v39 = vpop.xlane.xlu0 %549  ;;  %v799_v1 = vadd.f32 %v2006_v10, %v760_v32  ;;  %v722_v42 = vmul.f32 %v1524_v2, %v1898_v31  ;;  %v784_v5 = vadd.f32 %v2006_v10, %v745_v34 }
 0x164   : > { %1537 = vrsqrt.f32 %v647_v25  ;;  %v631_v20 = vmul.f32 0.03125, %v595_v38  ;;  %v616_v48 = vmul.f32 0.03125, %v550_v39  ;;  %v746_v49 = vmul.f32 %v1999_v45, %v707_v35 }
 0x165   : > { %v1526_v50 = vpop.eup %1525  ;;  %1539 = vrsqrt.f32 %v662_v13  ;;  %v819_v51 = vpack.c.bf16 %v799_v1, %v798_v15  ;;  %v761_v24 = vmul.f32 %v1999_v45, %v722_v42 }
 0x166   : > { %v1528_v54 = vpop.eup %1527  ;;  %v663_v29 = vadd.f32 1e-05, %v631_v20  ;;  %v648_v8 = vadd.f32 1e-05, %v616_v48  ;;  %v785_v58 = vadd.f32 %v2006_v10, %v746_v49  ;;  %v723_v17 = vmul.f32 %v1526_v50, %v1901_v33 }
 0x167   : > { %1448 = vmatmul.mubr.msk.bf16.gmra.mxu1 %vm312_vm0, %v819_v51  ;;  %v553_v31 = vpop.xlane.xlu1 %552  ;;  %v598_v55 = vpop.xlane.xlu0 %597  ;;  %v708_v62 = vmul.f32 %v1528_v54, %v1910_v47  ;;  %v800_v47 = vadd.f32 %v2006_v10, %v761_v24 }
 0x168   : > { %1541 = vrsqrt.f32 %v663_v29  ;;  %v617_v26 = vmul.f32 0.03125, %v553_v31  ;;  %v632_v43 = vmul.f32 0.03125, %v598_v55  ;;  %v812_v52 = vpack.c.bf16 %v785_v58, %v784_v5 }
 0x169   : > { %v1530_v41 = vpop.eup %1529  ;;  %1543 = vrsqrt.f32 %v648_v8  ;;  %v762_v63 = vmul.f32 %v1999_v45, %v723_v17  ;;  %v747_v6 = vmul.f32 %v1999_v45, %v708_v62 }
 0x16a   : > { %v1532_v12 = vpop.eup %1531  ;;  %v649_v33 = vadd.f32 1e-05, %v617_v26  ;;  %v664_v11 = vadd.f32 1e-05, %v632_v43  ;;  %1435 = vmatprep.mubr.msk.bf16.mxu0 %vm312_vm0, %v812_v52  ;;  %v709_v14 = vmul.f32 %v1530_v41, %v1913_v37  ;;  %v2120_v41 = vld [vmem:[%s2237_s4] ss:$0 sm:$0xff] }
 0x16b   : > { %v601_v9 = vpop.xlane.xlu1 %600  ;;  %v801_v28 = vadd.f32 %v2006_v10, %v762_v63  ;;  %v724_v21 = vmul.f32 %v1532_v12, %v1928_v3  ;;  %v786_v7 = vadd.f32 %v2006_v10, %v747_v6 }
 0x16c   : > { %1545 = vrsqrt.f32 %v649_v33  ;;  %v633_v18 = vmul.f32 0.03125, %v601_v9  ;;  %v748_v56 = vmul.f32 %v1999_v45, %v709_v14 }
 0x16d   : > { %v1534_v22 = vpop.eup %1533  ;;  %1547 = vrsqrt.f32 %v664_v11  ;;  %v820_v59 = vpack.c.bf16 %v801_v28, %v800_v47  ;;  %v763_v60 = vmul.f32 %v1999_v45, %v724_v21 }
 0x16e   : > { %v1536_v23 = vpop.eup %1535  ;;  %v665_v44 = vadd.f32 1e-05, %v633_v18  ;;  %v787_v37 = vadd.f32 %v2006_v10, %v748_v56  ;;  %v725_v0 = vmul.f32 %v1534_v22, %v1931_v4 }
 0x16f   : > { %1451 = vmatprep.mubr.msk.bf16.mxu1 %vm312_vm0, %v820_v59  ;;  %v710_v3 = vmul.f32 %v1536_v23, %v1946_v16  ;;  %v802_v2 = vadd.f32 %v2006_v10, %v763_v60 }
 0x170   : > { %1549 = vrsqrt.f32 %v665_v44  ;;  %v813_v61 = vpack.c.bf16 %v787_v37, %v786_v7  ;;  %v764_v27 = vmul.f32 %v1999_v45, %v725_v0 }
 0x171   : > { %v1538_v32 = vpop.eup %1537  ;;  %v749_v13 = vmul.f32 %v1999_v45, %v710_v3 }
 0x172   : > { %v1540_v34 = vpop.eup %1539  ;;  %1436 = vmatmul.mubr.msk.bf16.gmra.mxu0 %vm312_vm0, %v813_v61  ;;  %v803_v25 = vadd.f32 %v2006_v10, %v764_v27  ;;  %v711_v4 = vmul.f32 %v1538_v32, %v1949_v30 }
 0x173   : > { %v726_v35 = vmul.f32 %v1540_v34, %v1958_v46  ;;  %v788_v1 = vadd.f32 %v2006_v10, %v749_v13 }
 0x174   : > { %v821_v38 = vpack.c.bf16 %v803_v25, %v802_v2  ;;  %v750_v16 = vmul.f32 %v1999_v45, %v711_v4 }
 0x175   : > { %v1542_v39 = vpop.eup %1541  ;;  %v765_v48 = vmul.f32 %v1999_v45, %v726_v35 }
 0x176   : > { %v1544_v15 = vpop.eup %1543  ;;  %1452 = vmatmul.mubr.msk.bf16.gmra.mxu1 %vm312_vm0, %v821_v38  ;;  %v789_v42 = vadd.f32 %v2006_v10, %v750_v16  ;;  %v727_v20 = vmul.f32 %v1542_v39, %v1961_v36 }
 0x177   : > { %v712_v30 = vmul.f32 %v1544_v15, %v1970_v53  ;;  %v804_v5 = vadd.f32 %v2006_v10, %v765_v48 }
 0x178   : > { %v814_v49 = vpack.c.bf16 %v789_v42, %v788_v1  ;;  %v766_v46 = vmul.f32 %v1999_v45, %v727_v20 }
 0x179   : > { %v1546_v50 = vpop.eup %1545  ;;  %v751_v8 = vmul.f32 %v1999_v45, %v712_v30 }
 0x17a   : > { %v1548_v51 = vpop.eup %1547  ;;  %1439 = vmatprep.mubr.msk.bf16.mxu0 %vm312_vm0, %v814_v49  ;;  %v805_v54 = vadd.f32 %v2006_v10, %v766_v46  ;;  %v713_v29 = vmul.f32 %v1546_v50, %v1973_v40 }
 0x17b   : > { %v728_v36 = vmul.f32 %v1548_v51, %v1982_v19  ;;  %v790_v31 = vadd.f32 %v2006_v10, %v751_v8 }
 0x17c   : > { %v822_v58 = vpack.c.bf16 %v805_v54, %v804_v5  ;;  %v752_v53 = vmul.f32 %v1999_v45, %v713_v29 }
 0x17d   : > { %v1550_v17 = vpop.eup %1549  ;;  %v767_v62 = vmul.f32 %v1999_v45, %v728_v36 }
 0x17e   : > { %1455 = vmatprep.mubr.msk.bf16.mxu1 %vm312_vm0, %v822_v58  ;;  %v791_v55 = vadd.f32 %v2006_v10, %v752_v53  ;;  %v729_v24 = vmul.f32 %v1550_v17, %v1985_v57 }
 0x17f   : > { %v806_v19 = vadd.f32 %v2006_v10, %v767_v62 }
 0x180   : > { %v815_v40 = vpack.c.bf16 %v791_v55, %v790_v31  ;;  %v768_v26 = vmul.f32 %v1999_v45, %v729_v24 }
 0x182   : > { %1440 = vmatmul.mubr.msk.bf16.gmra.mxu0 %vm312_vm0, %v815_v40  ;;  %v807_v43 = vadd.f32 %v2006_v10, %v768_v26 }
 0x184   : > { %v823_v52 = vpack.c.bf16 %v807_v43, %v806_v19 }
 0x186   : > { %1456 = vmatmul.mubr.msk.bf16.gmra.mxu1 %vm312_vm0, %v823_v52 }
 0x212   : > { %v1429_v57 = vpop.f32.mrf.mxu0 }
 0x213   : > { %v928_v63 = vadd.f32 %v1429_v57, %v2120_v41 }
 0x214   : > { %v919_v45 = vpop.f32.mrf.mxu0 }
 0x215   : > { %v1375_v10 = vpack.c.bf16 %v928_v63, %v928_v63  ;;  %v920_v6 = vadd.f32 %v2120_v41, %v919_v45 }
 0x216   : > { %v1430_v12 = vpop.f32.mrf.mxu0 }
 0x217   : > { %1177 = vst.msk [vmem:[%s2127_s23 + $0x8] sm:$0xf] %vm1174_vm1, %v1375_v10  ;;  %v1373_v33 = vpack.c.bf16 %v920_v6, %v920_v6  ;;  %v931_v11 = vadd.f32 %v1430_v12, %v2120_v41  ;;  %v1445_v14 = vpop.f32.mrf.mxu1 }
 0x218   : > { %v992_v9 = vadd.f32 %v1445_v14, %v2120_v41  ;;  %v922_v47 = vpop.f32.mrf.mxu0 }
 0x219   : > { %1175 = vst.msk [vmem:[%s2127_s23] sm:$0xf] %vm1174_vm1, %v1373_v33  ;;  %v1376_v28 = vpack.c.bf16 %v931_v11, %v931_v11  ;;  %v923_v21 = vadd.f32 %v2120_v41, %v922_v47  ;;  %v983_v18 = vpop.f32.mrf.mxu1 }
 0x21a   : > { %v1391_v56 = vpack.c.bf16 %v992_v9, %v992_v9  ;;  %v984_v22 = vadd.f32 %v2120_v41, %v983_v18 }
 0x21b   : > { %1178 = vst.msk [vmem:[%s2127_s23 + $0xc] sm:$0xf] %vm1174_vm1, %v1376_v28  ;;  %v1374_v59 = vpack.c.bf16 %v923_v21, %v923_v21  ;;  %v1446_v7 = vpop.f32.mrf.mxu1 }
 0x21c   : > { %1193 = vst.msk [vmem:[%s2127_s23 + $0x48] sm:$0xf] %vm1174_vm1, %v1391_v56  ;;  %v1389_v23 = vpack.c.bf16 %v984_v22, %v984_v22  ;;  %v995_v44 = vadd.f32 %v1446_v7, %v2120_v41 }
 0x21d   : > { %1176 = vst.msk [vmem:[%s2127_s23 + $0x4] sm:$0xf] %vm1174_vm1, %v1374_v59  ;;  %v986_v37 = vpop.f32.mrf.mxu1 }
 0x21e   : > { %1191 = vst.msk [vmem:[%s2127_s23 + $0x40] sm:$0xf] %vm1174_vm1, %v1389_v23  ;;  %v1392_v0 = vpack.c.bf16 %v995_v44, %v995_v44  ;;  %v987_v60 = vadd.f32 %v2120_v41, %v986_v37 }
 0x220   : > { %1194 = vst.msk [vmem:[%s2127_s23 + $0x4c] sm:$0xf] %vm1174_vm1, %v1392_v0  ;;  %v1390_v3 = vpack.c.bf16 %v987_v60, %v987_v60 }
 0x222   : > { %1192 = vst.msk [vmem:[%s2127_s23 + $0x44] sm:$0xf] %vm1174_vm1, %v1390_v3  ;;  %v1433_v61 = vpop.f32.mrf.mxu0 }
 0x223   : > { %v944_v27 = vadd.f32 %v1433_v61, %v2120_v41 }
 0x224   : > { %v935_v32 = vpop.f32.mrf.mxu0 }
 0x225   : > { %v1379_v34 = vpack.c.bf16 %v944_v27, %v944_v27  ;;  %v936_v2 = vadd.f32 %v2120_v41, %v935_v32 }
 0x226   : > { %v1434_v25 = vpop.f32.mrf.mxu0 }
 0x227   : > { %1181 = vst.msk [vmem:[%s2127_s23 + $0x18] sm:$0xf] %vm1174_vm1, %v1379_v34  ;;  %v1377_v4 = vpack.c.bf16 %v936_v2, %v936_v2  ;;  %v947_v13 = vadd.f32 %v1434_v25, %v2120_v41  ;;  %v1449_v35 = vpop.f32.mrf.mxu1 }
 0x228   : > { %v1008_v38 = vadd.f32 %v1449_v35, %v2120_v41  ;;  %v938_v16 = vpop.f32.mrf.mxu0 }
 0x229   : > { %1179 = vst.msk [vmem:[%s2127_s23 + $0x10] sm:$0xf] %vm1174_vm1, %v1377_v4  ;;  %v1380_v39 = vpack.c.bf16 %v947_v13, %v947_v13  ;;  %v939_v15 = vadd.f32 %v2120_v41, %v938_v16  ;;  %v999_v1 = vpop.f32.mrf.mxu1 }
 0x22a   : > { %v1395_v42 = vpack.c.bf16 %v1008_v38, %v1008_v38  ;;  %v1000_v20 = vadd.f32 %v2120_v41, %v999_v1 }
 0x22b   : > { %1182 = vst.msk [vmem:[%s2127_s23 + $0x1c] sm:$0xf] %vm1174_vm1, %v1380_v39  ;;  %v1378_v48 = vpack.c.bf16 %v939_v15, %v939_v15  ;;  %v1450_v30 = vpop.f32.mrf.mxu1 }
 0x22c   : > { %1197 = vst.msk [vmem:[%s2127_s23 + $0x58] sm:$0xf] %vm1174_vm1, %v1395_v42  ;;  %v1393_v49 = vpack.c.bf16 %v1000_v20, %v1000_v20  ;;  %v1011_v46 = vadd.f32 %v1450_v30, %v2120_v41 }
 0x22d   : > { %1180 = vst.msk [vmem:[%s2127_s23 + $0x14] sm:$0xf] %vm1174_vm1, %v1378_v48  ;;  %v1002_v50 = vpop.f32.mrf.mxu1 }
 0x22e   : > { %1195 = vst.msk [vmem:[%s2127_s23 + $0x50] sm:$0xf] %vm1174_vm1, %v1393_v49  ;;  %v1396_v51 = vpack.c.bf16 %v1011_v46, %v1011_v46  ;;  %v1003_v5 = vadd.f32 %v2120_v41, %v1002_v50 }
 0x230   : > { %1198 = vst.msk [vmem:[%s2127_s23 + $0x5c] sm:$0xf] %vm1174_vm1, %v1396_v51  ;;  %v1394_v54 = vpack.c.bf16 %v1003_v5, %v1003_v5 }
 0x232   : > { %1196 = vst.msk [vmem:[%s2127_s23 + $0x54] sm:$0xf] %vm1174_vm1, %v1394_v54  ;;  %v1437_v29 = vpop.f32.mrf.mxu0 }
 0x233   : > { %v960_v8 = vadd.f32 %v1437_v29, %v2120_v41 }
 0x234   : > { %v951_v36 = vpop.f32.mrf.mxu0 }
 0x235   : > { %v1383_v58 = vpack.c.bf16 %v960_v8, %v960_v8  ;;  %v952_v53 = vadd.f32 %v2120_v41, %v951_v36 }
 0x236   : > { %v1438_v17 = vpop.f32.mrf.mxu0  ;;  %v1453_v31 = vpop.f32.mrf.mxu1 }
 0x237   : > { %1185 = vst.msk [vmem:[%s2127_s23 + $0x28] sm:$0xf] %vm1174_vm1, %v1383_v58  ;;  %v1381_v55 = vpack.c.bf16 %v952_v53, %v952_v53  ;;  %v963_v24 = vadd.f32 %v1438_v17, %v2120_v41  ;;  %v1024_v62 = vadd.f32 %v1453_v31, %v2120_v41 }
 0x238   : > { %v954_v40 = vpop.f32.mrf.mxu0  ;;  %v1015_v26 = vpop.f32.mrf.mxu1 }
 0x239   : > { %1183 = vst.msk [vmem:[%s2127_s23 + $0x20] sm:$0xf] %vm1174_vm1, %v1381_v55  ;;  %v1384_v19 = vpack.c.bf16 %v963_v24, %v963_v24  ;;  %v1399_v43 = vpack.c.bf16 %v1024_v62, %v1024_v62  ;;  %v955_v52 = vadd.f32 %v2120_v41, %v954_v40  ;;  %v1016_v57 = vadd.f32 %v2120_v41, %v1015_v26 }
 0x23a   : > { %v1454_v63 = vpop.f32.mrf.mxu1 }
 0x23b   : > { %1186 = vst.msk [vmem:[%s2127_s23 + $0x2c] sm:$0xf] %vm1174_vm1, %v1384_v19  ;;  %1201 = vst.msk [vmem:[%s2127_s23 + $0x68] sm:$0xf] %vm1174_vm1, %v1399_v43  ;;  %v1382_v45 = vpack.c.bf16 %v955_v52, %v955_v52  ;;  %v1397_v10 = vpack.c.bf16 %v1016_v57, %v1016_v57  ;;  %v1027_v6 = vadd.f32 %v1454_v63, %v2120_v41 }
 0x23c   : > { %v1018_v12 = vpop.f32.mrf.mxu1 }
 0x23d   : > { %1184 = vst.msk [vmem:[%s2127_s23 + $0x24] sm:$0xf] %vm1174_vm1, %v1382_v45  ;;  %1199 = vst.msk [vmem:[%s2127_s23 + $0x60] sm:$0xf] %vm1174_vm1, %v1397_v10  ;;  %v1400_v33 = vpack.c.bf16 %v1027_v6, %v1027_v6  ;;  %v1019_v11 = vadd.f32 %v2120_v41, %v1018_v12 }
 0x23f   : > { %1202 = vst.msk [vmem:[%s2127_s23 + $0x6c] sm:$0xf] %vm1174_vm1, %v1400_v33  ;;  %v1398_v14 = vpack.c.bf16 %v1019_v11, %v1019_v11 }
 0x241   : > { %1200 = vst.msk [vmem:[%s2127_s23 + $0x64] sm:$0xf] %vm1174_vm1, %v1398_v14 }
 0x242   : > { %v1441_v9 = vpop.f32.mrf.mxu0 }
 0x243   : > { %v976_v47 = vadd.f32 %v1441_v9, %v2120_v41 }
 0x244   : > { %v967_v28 = vpop.f32.mrf.mxu0 }
 0x245   : > { %v1387_v21 = vpack.c.bf16 %v976_v47, %v976_v47  ;;  %v968_v18 = vadd.f32 %v2120_v41, %v967_v28 }
 0x246   : > { %v1442_v56 = vpop.f32.mrf.mxu0  ;;  %v1457_v22 = vpop.f32.mrf.mxu1 }
 0x247   : > { %1189 = vst.msk [vmem:[%s2127_s23 + $0x38] sm:$0xf] %vm1174_vm1, %v1387_v21  ;;  %v1385_v59 = vpack.c.bf16 %v968_v18, %v968_v18  ;;  %v979_v7 = vadd.f32 %v1442_v56, %v2120_v41  ;;  %v1040_v23 = vadd.f32 %v1457_v22, %v2120_v41 }
 0x248   : > { %v970_v44 = vpop.f32.mrf.mxu0  ;;  %v1031_v37 = vpop.f32.mrf.mxu1 }
 0x249   : > { %1187 = vst.msk [vmem:[%s2127_s23 + $0x30] sm:$0xf] %vm1174_vm1, %v1385_v59  ;;  %v1388_v0 = vpack.c.bf16 %v979_v7, %v979_v7  ;;  %v1403_v60 = vpack.c.bf16 %v1040_v23, %v1040_v23  ;;  %v971_v3 = vadd.f32 %v2120_v41, %v970_v44  ;;  %v1032_v61 = vadd.f32 %v2120_v41, %v1031_v37 }
 0x24a   : > { %v1458_v27 = vpop.f32.mrf.mxu1 }
 0x24b   : > { %1190 = vst.msk [vmem:[%s2127_s23 + $0x3c] sm:$0xf] %vm1174_vm1, %v1388_v0  ;;  %1205 = vst.msk [vmem:[%s2127_s23 + $0x78] sm:$0xf] %vm1174_vm1, %v1403_v60  ;;  %v1386_v32 = vpack.c.bf16 %v971_v3, %v971_v3  ;;  %v1401_v34 = vpack.c.bf16 %v1032_v61, %v1032_v61  ;;  %v1043_v2 = vadd.f32 %v1458_v27, %v2120_v41 }
 0x24c   : > { %v1034_v25 = vpop.f32.mrf.mxu1 }
 0x24d   : > { %1188 = vst.msk [vmem:[%s2127_s23 + $0x34] sm:$0xf] %vm1174_vm1, %v1386_v32  ;;  %1203 = vst.msk [vmem:[%s2127_s23 + $0x70] sm:$0xf] %vm1174_vm1, %v1401_v34  ;;  %v1404_v4 = vpack.c.bf16 %v1043_v2, %v1043_v2  ;;  %v1035_v13 = vadd.f32 %v2120_v41, %v1034_v25 }
 0x24f   : > { %1206 = vst.msk [vmem:[%s2127_s23 + $0x7c] sm:$0xf] %vm1174_vm1, %v1404_v4  ;;  %v1402_v35 = vpack.c.bf16 %v1035_v13, %v1035_v13 }
 0x251   : > { %1204 = vst.msk [vmem:[%s2127_s23 + $0x74] sm:$0xf] %vm1174_vm1, %v1402_v35 }
 0x252 PF: > { %s15_s20 = sadd.s32 1, %s1573_s20   ;;  %s2239_s18 = smov %s1569_s19 }
 0x253   : > { %p12_p5 = scmp.ge.s32.totalorder %s15_s20, 4   ;;  %s2240_s19 = smov %s2242_s21 }
 0x255   :  { %14 = sbr.rel (!%p12_p5) target bundleno = 2 (0x2), region = 76 }

// kernel: forward.11
= control target key start
LH: loop header
LB: loop body
LE: loop exit
PB: predicated region body
PF: predicated region fallthrough
CT: control target
= control target key end

     0   :  { %s1029_s15 = smov 0   ;;  %s1031_s16 = smov 0   ;;  %s1272_s0 = inlined_call_operand.vmem [shape: bf16[512,128], index: 0, kind: input, shape index: {}]   ;;  %s1273_s1 = inlined_call_operand.vmem [shape: f32[128,32], index: 1, kind: input, shape index: {}]   ;;  %s1274_s2 = inlined_call_operand.vmem [shape: f32[1,32], index: 2, kind: input, shape index: {}]   ;;  %s1275_s3 = inlined_call_operand.vmem [shape: f32[512,32], index: 3, kind: input, shape index: {}]   ;;  %s1276_s4 = inlined_call_operand.vmem [shape: f32[512,32], index: 4, kind: output, shape index: {}]  }
   0x1   :  { %s1033_s17 = smov 0  }
   0x2 LB: > { %s26_s18 = sadd.s32 1, %s998_s16  ;;  %p826_p0 = scmp.ge.s32.totalorder %s1002_s17, 1  ;;  %s1002_s17 = sphi %s1033_s17, %s14_s17   ;;  %s998_s16 = sphi %s1031_s16, %s1278_s16   ;;  %s994_s15 = sphi %s1029_s15, %s1277_s15  }
   0x3   : > { %p28_p1 = scmp.ge.s32.totalorder %s26_s18, 2  ;;  %p210_p2 = scmp.lt.s32.totalorder %s1002_s17, 3 }
   0x5   : > { %s1280_s18 = smov (%p28_p1, %s26_s18), 0  ;;  %p211_p3 = pnand %p826_p0, %p210_p2 }
   0x6   : > { %s827_s25 = sshll.u32 (!%p211_p3), %s994_s15, 5 }
   0x7   : > { %214 = sbr.rel (%p211_p3) target bundleno = 275 (0x113), region = 36  ;;  %p255_p4 = scmp.lt.s32.totalorder (!%p211_p3), %s827_s25, 63 }
   0xc   : > { %v332_v0 = vld [vmem:[%s1273_s1 + $0x70] sm:$0xff]  ;;  %v333_v1 = vld [vmem:[%s1273_s1 + $0x78] sm:$0xff]  ;;  %v330_v2 = vld [vmem:[%s1273_s1 + $0x60] sm:$0xff]  ;;  %s1282_s25 = smov (!%p255_p4, %s827_s25), 63  ;;  %vm670_vm0 = vcmask 261120  }
   0xd   : > { %v341_v3 = vpack.c.bf16 %v333_v1, %v332_v0  ;;  %v331_v4 = vld [vmem:[%s1273_s1 + $0x68] sm:$0xff]  ;;  %v328_v6 = vld [vmem:[%s1273_s1 + $0x50] sm:$0xff]  ;;  %v329_v7 = vld [vmem:[%s1273_s1 + $0x58] sm:$0xff]  ;;  %s828_s6 = sshll.u32 %s1282_s25, 2  ;;  %s830_s8 = sshll.u32 %s1282_s25, 3 }
   0xe   : > { %v340_v5 = vpack.c.bf16 %v331_v4, %v330_v2  ;;  %v339_v8 = vpack.c.bf16 %v329_v7, %v328_v6  ;;  %v326_v9 = vld [vmem:[%s1273_s1 + $0x40] sm:$0xff]  ;;  %v327_v10 = vld [vmem:[%s1273_s1 + $0x48] sm:$0xff]  ;;  %s1077_s13 = scalar_lea.vmem %s1272_s0, %s828_s6  ;;  %v324_v14 = vld [vmem:[%s1273_s1 + $0x30] sm:$0xff]  ;;  %s1123_s11 = scalar_lea.vmem %s1275_s3, %s830_s8 }
   0xf   : > { %876 = vmatprep.subr.bf16.mxu0 %v341_v3  ;;  %924 = vmatprep.subr.bf16.mxu1 %v341_v3  ;;  %v964_v11 = vld [vmem:[%s1077_s13] sm:$0xff]   ;;  %v338_v13 = vpack.c.bf16 %v327_v10, %v326_v9  ;;  %v325_v15 = vld [vmem:[%s1273_s1 + $0x38] sm:$0xff]  ;;  %v323_v18 = vld [vmem:[%s1273_s1 + $0x28] sm:$0xff]  ;;  %s1137_s15 = scalar_lea.vmem %s1276_s4, %s830_s8 }
  0x10   : > { %877 = vmatpush3.bf16.msra.mxu0 %v341_v3  ;;  %932 = vmatpush3.bf16.msra.mxu1 %v341_v3  ;;  %v965_v12 = vld [vmem:[%s1077_s13 + $0x40] sm:$0xff]   ;;  %v337_v16 = vpack.c.bf16 %v325_v15, %v324_v14  ;;  %v320_v20 = vld [vmem:[%s1273_s1 + $0x10] sm:$0xff]  ;;  %v321_v21 = vld [vmem:[%s1273_s1 + $0x18] sm:$0xff] }
  0x11   : > { %878 = vmatprep.subr.bf16.mxu0 %v340_v5  ;;  %925 = vmatprep.subr.bf16.mxu1 %v340_v5  ;;  %v322_v17 = vld [vmem:[%s1273_s1 + $0x20] sm:$0xff]  ;;  %v335_v22 = vpack.c.bf16 %v321_v21, %v320_v20  ;;  %v319_v24 = vld [vmem:[%s1273_s1 + $0x8] sm:$0xff]  ;;  %v968_v28 = vld [vmem:[%s1077_s13 + $0x10] sm:$0xff]  }
  0x12   : > { %892 = vmatprep.mubr.bf16.mxu0 %v964_v11  ;;  %908 = vmatprep.mubr.bf16.mxu1 %v965_v12  ;;  %v336_v19 = vpack.c.bf16 %v323_v18, %v322_v17  ;;  %v318_v23 = vld [vmem:[%s1273_s1] sm:$0xff]  ;;  %v966_v26 = vld [vmem:[%s1077_s13 + $0x8] sm:$0xff]   ;;  %v969_v29 = vld [vmem:[%s1077_s13 + $0x50] sm:$0xff]  }
  0x13   : > { %v334_v25 = vpack.c.bf16 %v319_v24, %v318_v23  ;;  %v967_v27 = vld [vmem:[%s1077_s13 + $0x48] sm:$0xff]   ;;  %v970_v30 = vld [vmem:[%s1077_s13 + $0x18] sm:$0xff]   ;;  %v972_v32 = vld [vmem:[%s1077_s13 + $0x20] sm:$0xff]  }
  0x14   : > { %879 = vmatpush3.bf16.msra.mxu0 %v340_v5  ;;  %933 = vmatpush3.bf16.msra.mxu1 %v340_v5  ;;  %v971_v31 = vld [vmem:[%s1077_s13 + $0x58] sm:$0xff]   ;;  %v973_v33 = vld [vmem:[%s1077_s13 + $0x60] sm:$0xff]   ;;  %v974_v34 = vld [vmem:[%s1077_s13 + $0x28] sm:$0xff]  }
  0x15   : > { %880 = vmatprep.subr.bf16.mxu0 %v339_v8  ;;  %926 = vmatprep.subr.bf16.mxu1 %v339_v8  ;;  %v975_v35 = vld [vmem:[%s1077_s13 + $0x68] sm:$0xff]   ;;  %v976_v36 = vld [vmem:[%s1077_s13 + $0x30] sm:$0xff]   ;;  %v978_v38 = vld [vmem:[%s1077_s13 + $0x38] sm:$0xff]  }
  0x16   : > { %v977_v37 = vld [vmem:[%s1077_s13 + $0x70] sm:$0xff]   ;;  %v979_v39 = vld [vmem:[%s1077_s13 + $0x78] sm:$0xff]   ;;  %v1128_v40 = vld [vmem:[%s1274_s2] ss:$0 sm:$0xff] }
  0x17   : > { %v608_v42 = vld [vmem:[%s1123_s11 + $0x10] sm:$0xff]  ;;  %v606_v48 = vld [vmem:[%s1123_s11] sm:$0xff]  ;;  %v609_v56 = vld [vmem:[%s1123_s11 + $0x18] sm:$0xff] }
  0x18   : > { %881 = vmatpush3.bf16.msra.mxu0 %v339_v8  ;;  %934 = vmatpush3.bf16.msra.mxu1 %v339_v8  ;;  %v624_v44 = vld [vmem:[%s1123_s11 + $0x90] sm:$0xff]  ;;  %v622_v50 = vld [vmem:[%s1123_s11 + $0x80] sm:$0xff]  ;;  %v625_v58 = vld [vmem:[%s1123_s11 + $0x98] sm:$0xff] }
  0x19   : > { %882 = vmatprep.subr.bf16.mxu0 %v338_v13  ;;  %927 = vmatprep.subr.bf16.mxu1 %v338_v13  ;;  %v607_v0 = vld [vmem:[%s1123_s11 + $0x8] sm:$0xff]  ;;  %v612_v8 = vld [vmem:[%s1123_s11 + $0x30] sm:$0xff]  ;;  %v626_v18 = vld [vmem:[%s1123_s11 + $0xa0] sm:$0xff] }
  0x1a   : > { %v623_v2 = vld [vmem:[%s1123_s11 + $0x88] sm:$0xff]  ;;  %v628_v10 = vld [vmem:[%s1123_s11 + $0xb0] sm:$0xff]  ;;  %v613_v24 = vld [vmem:[%s1123_s11 + $0x38] sm:$0xff] }
  0x1c   : > { %883 = vmatpush3.bf16.msra.mxu0 %v338_v13  ;;  %935 = vmatpush3.bf16.msra.mxu1 %v338_v13 }
  0x1d   : > { %884 = vmatprep.subr.bf16.mxu0 %v337_v16  ;;  %928 = vmatprep.subr.bf16.mxu1 %v337_v16 }
  0x20   : > { %885 = vmatpush3.bf16.msra.mxu0 %v337_v16  ;;  %936 = vmatpush3.bf16.msra.mxu1 %v337_v16  ;;  %v610_v16 = vld [vmem:[%s1123_s11 + $0x20] sm:$0xff] }
  0x21   : > { %886 = vmatprep.subr.bf16.mxu0 %v336_v19  ;;  %929 = vmatprep.subr.bf16.mxu1 %v336_v19 }
  0x24   : > { %887 = vmatpush3.bf16.msra.mxu0 %v336_v19  ;;  %937 = vmatpush3.bf16.msra.mxu1 %v336_v19 }
  0x25   : > { %888 = vmatprep.subr.bf16.mxu0 %v335_v22  ;;  %930 = vmatprep.subr.bf16.mxu1 %v335_v22 }
  0x28   : > { %889 = vmatpush3.bf16.msra.mxu0 %v335_v22  ;;  %938 = vmatpush3.bf16.msra.mxu1 %v335_v22 }
  0x29   : > { %890 = vmatprep.subr.bf16.mxu0 %v334_v25  ;;  %931 = vmatprep.subr.bf16.mxu1 %v334_v25 }
  0x2c   : > { %891 = vmatpush3.bf16.msra.mxu0 %v334_v25  ;;  %939 = vmatpush3.bf16.msra.mxu1 %v334_v25 }
  0x2f   : > { %893 = vmatmul.mubr.bf16.vlgmr.msra.gmra.mxu0 %v966_v26  ;;  %909 = vmatmul.mubr.bf16.vlgmr.msra.gmra.mxu1 %v967_v27  ;;  %v629_v26 = vld [vmem:[%s1123_s11 + $0xb8] sm:$0xff] }
  0x30   : > { %896 = vmatprep.mubr.bf16.mxu0 %v968_v28  ;;  %912 = vmatprep.mubr.bf16.mxu1 %v969_v29 }
  0x37   : > { %897 = vmatmul.mubr.bf16.gmra.mxu0 %v970_v30  ;;  %913 = vmatmul.mubr.bf16.gmra.mxu1 %v971_v31 }
  0x38   : > { %900 = vmatprep.mubr.bf16.mxu0 %v972_v32  ;;  %916 = vmatprep.mubr.bf16.mxu1 %v973_v33  ;;  %v611_v32 = vld [vmem:[%s1123_s11 + $0x28] sm:$0xff] }
  0x3f   : > { %901 = vmatmul.mubr.bf16.gmra.mxu0 %v974_v34  ;;  %917 = vmatmul.mubr.bf16.gmra.mxu1 %v975_v35  ;;  %v627_v34 = vld [vmem:[%s1123_s11 + $0xa8] sm:$0xff] }
  0x40   : > { %904 = vmatprep.mubr.bf16.mxu0 %v976_v36  ;;  %920 = vmatprep.mubr.bf16.mxu1 %v977_v37 }
  0x47   : > { %905 = vmatmul.mubr.bf16.gmra.mxu0 %v978_v38  ;;  %921 = vmatmul.mubr.bf16.gmra.mxu1 %v979_v39 }
  0xef   : > { %v894_v41 = vpop.f32.mrf.mxu0  ;;  %v910_v43 = vpop.f32.mrf.mxu1 }
  0xf0   : > { %v488_v45 = vadd.f32 %v894_v41, %v1128_v40  ;;  %v552_v46 = vadd.f32 %v910_v43, %v1128_v40  ;;  %v616_v41 = vld [vmem:[%s1123_s11 + $0x50] sm:$0xff] }
  0xf1   : > { %v479_v47 = vpop.f32.mrf.mxu0  ;;  %v543_v49 = vpop.f32.mrf.mxu1  ;;  %v632_v43 = vld [vmem:[%s1123_s11 + $0xd0] sm:$0xff] }
  0xf2   : > { %v640_v51 = vadd.f32 %v608_v42, %v488_v45  ;;  %v656_v52 = vadd.f32 %v624_v44, %v552_v46  ;;  %v480_v53 = vadd.f32 %v1128_v40, %v479_v47  ;;  %v544_v54 = vadd.f32 %v1128_v40, %v543_v49  ;;  %v614_v49 = vld [vmem:[%s1123_s11 + $0x40] sm:$0xff] }
  0xf3   : > { %v895_v55 = vpop.f32.mrf.mxu0  ;;  %v911_v57 = vpop.f32.mrf.mxu1 }
  0xf4   : > { %673 = vst.msk [vmem:[%s1137_s15 + $0x10] sm:$0xff] %vm670_vm0, %v640_v51  ;;  %689 = vst.msk [vmem:[%s1137_s15 + $0x90] sm:$0xff] %vm670_vm0, %v656_v52  ;;  %v638_v59 = vadd.f32 %v606_v48, %v480_v53  ;;  %v654_v60 = vadd.f32 %v622_v50, %v544_v54  ;;  %v491_v61 = vadd.f32 %v895_v55, %v1128_v40  ;;  %v630_v51 = vld [vmem:[%s1123_s11 + $0xc0] sm:$0xff] }
  0xf5   : > { %v555_v62 = vadd.f32 %v911_v57, %v1128_v40  ;;  %v482_v63 = vpop.f32.mrf.mxu0  ;;  %v546_v1 = vpop.f32.mrf.mxu1  ;;  %v617_v57 = vld [vmem:[%s1123_s11 + $0x58] sm:$0xff] }
  0xf6   : > { %671 = vst.msk [vmem:[%s1137_s15] sm:$0xff] %vm670_vm0, %v638_v59  ;;  %687 = vst.msk [vmem:[%s1137_s15 + $0x80] sm:$0xff] %vm670_vm0, %v654_v60  ;;  %v641_v3 = vadd.f32 %v609_v56, %v491_v61  ;;  %v483_v5 = vadd.f32 %v1128_v40, %v482_v63  ;;  %v547_v6 = vadd.f32 %v1128_v40, %v546_v1  ;;  %v633_v59 = vld [vmem:[%s1123_s11 + $0xd8] sm:$0xff]  ;;  %v615_v1 = vld [vmem:[%s1123_s11 + $0x48] sm:$0xff] }
  0xf7   : > { %v657_v4 = vadd.f32 %v625_v58, %v555_v62  ;;  %v898_v7 = vpop.f32.mrf.mxu0  ;;  %v914_v9 = vpop.f32.mrf.mxu1 }
  0xf8   : > { %674 = vst.msk [vmem:[%s1137_s15 + $0x18] sm:$0xff] %vm670_vm0, %v641_v3  ;;  %v639_v11 = vadd.f32 %v607_v0, %v483_v5  ;;  %v655_v12 = vadd.f32 %v623_v2, %v547_v6  ;;  %v504_v13 = vadd.f32 %v898_v7, %v1128_v40  ;;  %v568_v14 = vadd.f32 %v914_v9, %v1128_v40  ;;  %v631_v3 = vld [vmem:[%s1123_s11 + $0xc8] sm:$0xff]  ;;  %v620_v9 = vld [vmem:[%s1123_s11 + $0x70] sm:$0xff] }
  0xf9   : > { %690 = vst.msk [vmem:[%s1137_s15 + $0x98] sm:$0xff] %vm670_vm0, %v657_v4  ;;  %v495_v15 = vpop.f32.mrf.mxu0  ;;  %v559_v17 = vpop.f32.mrf.mxu1 }
  0xfa   : > { %672 = vst.msk [vmem:[%s1137_s15 + $0x8] sm:$0xff] %vm670_vm0, %v639_v11  ;;  %688 = vst.msk [vmem:[%s1137_s15 + $0x88] sm:$0xff] %vm670_vm0, %v655_v12  ;;  %v644_v19 = vadd.f32 %v612_v8, %v504_v13  ;;  %v660_v20 = vadd.f32 %v628_v10, %v568_v14  ;;  %v496_v21 = vadd.f32 %v1128_v40, %v495_v15  ;;  %v636_v11 = vld [vmem:[%s1123_s11 + $0xf0] sm:$0xff] }
  0xfb   : > { %v560_v22 = vadd.f32 %v1128_v40, %v559_v17  ;;  %v899_v23 = vpop.f32.mrf.mxu0  ;;  %v915_v25 = vpop.f32.mrf.mxu1  ;;  %v618_v17 = vld [vmem:[%s1123_s11 + $0x60] sm:$0xff] }
  0xfc   : > { %677 = vst.msk [vmem:[%s1137_s15 + $0x30] sm:$0xff] %vm670_vm0, %v644_v19  ;;  %693 = vst.msk [vmem:[%s1137_s15 + $0xb0] sm:$0xff] %vm670_vm0, %v660_v20  ;;  %v642_v27 = vadd.f32 %v610_v16, %v496_v21  ;;  %v507_v29 = vadd.f32 %v899_v23, %v1128_v40  ;;  %v571_v30 = vadd.f32 %v915_v25, %v1128_v40  ;;  %v634_v19 = vld [vmem:[%s1123_s11 + $0xe0] sm:$0xff]  ;;  %v621_v25 = vld [vmem:[%s1123_s11 + $0x78] sm:$0xff] }
  0xfd   : > { %v658_v28 = vadd.f32 %v626_v18, %v560_v22  ;;  %v498_v31 = vpop.f32.mrf.mxu0  ;;  %v562_v33 = vpop.f32.mrf.mxu1 }
  0xfe   : > { %675 = vst.msk [vmem:[%s1137_s15 + $0x20] sm:$0xff] %vm670_vm0, %v642_v27  ;;  %v645_v35 = vadd.f32 %v613_v24, %v507_v29  ;;  %v661_v36 = vadd.f32 %v629_v26, %v571_v30  ;;  %v499_v37 = vadd.f32 %v1128_v40, %v498_v31  ;;  %v563_v38 = vadd.f32 %v1128_v40, %v562_v33  ;;  %v637_v27 = vld [vmem:[%s1123_s11 + $0xf8] sm:$0xff]  ;;  %v619_v33 = vld [vmem:[%s1123_s11 + $0x68] sm:$0xff] }
  0xff   : > { %691 = vst.msk [vmem:[%s1137_s15 + $0xa0] sm:$0xff] %vm670_vm0, %v658_v28  ;;  %v902_v39 = vpop.f32.mrf.mxu0  ;;  %v918_v42 = vpop.f32.mrf.mxu1 }
 0x100   : > { %678 = vst.msk [vmem:[%s1137_s15 + $0x38] sm:$0xff] %vm670_vm0, %v645_v35  ;;  %694 = vst.msk [vmem:[%s1137_s15 + $0xb8] sm:$0xff] %vm670_vm0, %v661_v36  ;;  %v643_v44 = vadd.f32 %v611_v32, %v499_v37  ;;  %v659_v45 = vadd.f32 %v627_v34, %v563_v38  ;;  %v520_v46 = vadd.f32 %v902_v39, %v1128_v40  ;;  %v635_v35 = vld [vmem:[%s1123_s11 + $0xe8] sm:$0xff] }
 0x101   : > { %v584_v47 = vadd.f32 %v918_v42, %v1128_v40  ;;  %v511_v48 = vpop.f32.mrf.mxu0  ;;  %v575_v50 = vpop.f32.mrf.mxu1 }
 0x102   : > { %676 = vst.msk [vmem:[%s1137_s15 + $0x28] sm:$0xff] %vm670_vm0, %v643_v44  ;;  %692 = vst.msk [vmem:[%s1137_s15 + $0xa8] sm:$0xff] %vm670_vm0, %v659_v45  ;;  %v648_v52 = vadd.f32 %v616_v41, %v520_v46  ;;  %v512_v54 = vadd.f32 %v1128_v40, %v511_v48  ;;  %v576_v55 = vadd.f32 %v1128_v40, %v575_v50 }
 0x103   : > { %v664_v53 = vadd.f32 %v632_v43, %v584_v47  ;;  %v903_v56 = vpop.f32.mrf.mxu0  ;;  %v919_v58 = vpop.f32.mrf.mxu1 }
 0x104   : > { %681 = vst.msk [vmem:[%s1137_s15 + $0x50] sm:$0xff] %vm670_vm0, %v648_v52  ;;  %v646_v60 = vadd.f32 %v614_v49, %v512_v54  ;;  %v662_v61 = vadd.f32 %v630_v51, %v576_v55  ;;  %v523_v62 = vadd.f32 %v903_v56, %v1128_v40  ;;  %v587_v63 = vadd.f32 %v919_v58, %v1128_v40 }
 0x105   : > { %697 = vst.msk [vmem:[%s1137_s15 + $0xd0] sm:$0xff] %vm670_vm0, %v664_v53  ;;  %v514_v0 = vpop.f32.mrf.mxu0  ;;  %v578_v2 = vpop.f32.mrf.mxu1 }
 0x106   : > { %679 = vst.msk [vmem:[%s1137_s15 + $0x40] sm:$0xff] %vm670_vm0, %v646_v60  ;;  %695 = vst.msk [vmem:[%s1137_s15 + $0xc0] sm:$0xff] %vm670_vm0, %v662_v61  ;;  %v649_v4 = vadd.f32 %v617_v57, %v523_v62  ;;  %v665_v5 = vadd.f32 %v633_v59, %v587_v63  ;;  %v515_v6 = vadd.f32 %v1128_v40, %v514_v0 }
 0x107   : > { %v579_v7 = vadd.f32 %v1128_v40, %v578_v2  ;;  %v906_v8 = vpop.f32.mrf.mxu0  ;;  %v922_v10 = vpop.f32.mrf.mxu1 }
 0x108   : > { %682 = vst.msk [vmem:[%s1137_s15 + $0x58] sm:$0xff] %vm670_vm0, %v649_v4  ;;  %698 = vst.msk [vmem:[%s1137_s15 + $0xd8] sm:$0xff] %vm670_vm0, %v665_v5  ;;  %v647_v12 = vadd.f32 %v615_v1, %v515_v6  ;;  %v536_v14 = vadd.f32 %v906_v8, %v1128_v40  ;;  %v600_v15 = vadd.f32 %v922_v10, %v1128_v40 }
 0x109   : > { %v663_v13 = vadd.f32 %v631_v3, %v579_v7  ;;  %v527_v16 = vpop.f32.mrf.mxu0  ;;  %v591_v18 = vpop.f32.mrf.mxu1 }
 0x10a   : > { %680 = vst.msk [vmem:[%s1137_s15 + $0x48] sm:$0xff] %vm670_vm0, %v647_v12  ;;  %v652_v20 = vadd.f32 %v620_v9, %v536_v14  ;;  %v668_v21 = vadd.f32 %v636_v11, %v600_v15  ;;  %v528_v22 = vadd.f32 %v1128_v40, %v527_v16  ;;  %v592_v23 = vadd.f32 %v1128_v40, %v591_v18 }
 0x10b   : > { %696 = vst.msk [vmem:[%s1137_s15 + $0xc8] sm:$0xff] %vm670_vm0, %v663_v13  ;;  %v907_v24 = vpop.f32.mrf.mxu0  ;;  %v923_v26 = vpop.f32.mrf.mxu1 }
 0x10c   : > { %685 = vst.msk [vmem:[%s1137_s15 + $0x70] sm:$0xff] %vm670_vm0, %v652_v20  ;;  %701 = vst.msk [vmem:[%s1137_s15 + $0xf0] sm:$0xff] %vm670_vm0, %v668_v21  ;;  %v650_v28 = vadd.f32 %v618_v17, %v528_v22  ;;  %v666_v29 = vadd.f32 %v634_v19, %v592_v23  ;;  %v539_v30 = vadd.f32 %v907_v24, %v1128_v40 }
 0x10d   : > { %v603_v31 = vadd.f32 %v923_v26, %v1128_v40  ;;  %v530_v32 = vpop.f32.mrf.mxu0  ;;  %v594_v34 = vpop.f32.mrf.mxu1 }
 0x10e   : > { %683 = vst.msk [vmem:[%s1137_s15 + $0x60] sm:$0xff] %vm670_vm0, %v650_v28  ;;  %699 = vst.msk [vmem:[%s1137_s15 + $0xe0] sm:$0xff] %vm670_vm0, %v666_v29  ;;  %v653_v36 = vadd.f32 %v621_v25, %v539_v30  ;;  %v531_v38 = vadd.f32 %v1128_v40, %v530_v32  ;;  %v595_v39 = vadd.f32 %v1128_v40, %v594_v34 }
 0x10f   : > { %v669_v37 = vadd.f32 %v637_v27, %v603_v31 }
 0x110   : > { %686 = vst.msk [vmem:[%s1137_s15 + $0x78] sm:$0xff] %vm670_vm0, %v653_v36  ;;  %v651_v41 = vadd.f32 %v619_v33, %v531_v38  ;;  %v667_v42 = vadd.f32 %v635_v35, %v595_v39 }
 0x111   : > { %702 = vst.msk [vmem:[%s1137_s15 + $0xf8] sm:$0xff] %vm670_vm0, %v669_v37 }
 0x112   : > { %684 = vst.msk [vmem:[%s1137_s15 + $0x68] sm:$0xff] %vm670_vm0, %v651_v41  ;;  %700 = vst.msk [vmem:[%s1137_s15 + $0xe8] sm:$0xff] %vm670_vm0, %v667_v42 }
 0x113 PF: > { %s14_s17 = sadd.s32 1, %s1002_s17   ;;  %s1277_s15 = smov %s998_s16 }
 0x114   : > { %p11_p5 = scmp.ge.s32.totalorder %s14_s17, 4   ;;  %s1278_s16 = smov %s1280_s18 }
 0x116   :  { %13 = sbr.rel (!%p11_p5) target bundleno = 2 (0x2), region = 75 }

// kernel: forward.10
= control target key start
LH: loop header
LB: loop body
LE: loop exit
PB: predicated region body
PF: predicated region fallthrough
CT: control target
= control target key end

     0   :  { %s2051_s18 = smov 0   ;;  %s2053_s19 = smov 0   ;;  %s2855_s0 = inlined_call_operand.vmem [shape: f32[512,32], index: 0, kind: input, shape index: {}]   ;;  %s2856_s1 = inlined_call_operand.vmem [shape: f32[1,32], index: 1, kind: input, shape index: {}]   ;;  %s2857_s2 = inlined_call_operand.vmem [shape: f32[1,32], index: 2, kind: input, shape index: {}]   ;;  %s2858_s3 = inlined_call_operand.vmem [shape: f32[32,128], index: 3, kind: input, shape index: {}]   ;;  %s2859_s4 = inlined_call_operand.vmem [shape: f32[1,128], index: 4, kind: input, shape index: {}]   ;;  %s2860_s5 = inlined_call_operand.vmem [shape: bf16[512,128], index: 5, kind: output, shape index: {}]  }
   0x1   :  { %s2055_s20 = smov 0  }
   0x2 LB: > { %s27_s21 = sadd.s32 1, %s2015_s19  ;;  %p1602_p0 = scmp.ge.s32.totalorder %s2019_s20, 1  ;;  %s2019_s20 = sphi %s2055_s20, %s15_s20   ;;  %s2015_s19 = sphi %s2053_s19, %s2862_s19   ;;  %s2011_s18 = sphi %s2051_s18, %s2861_s18  }
   0x3   : > { %p29_p1 = scmp.ge.s32.totalorder %s27_s21, 2  ;;  %p219_p2 = scmp.lt.s32.totalorder %s2019_s20, 3 }
   0x5   : > { %s2864_s21 = smov (%p29_p1, %s27_s21), 0  ;;  %p220_p3 = pnand %p1602_p0, %p219_p2 }
   0x6   : > { %s1603_s22 = sshll.u32 (!%p220_p3), %s2011_s18, 5 }
   0x7   : > { %223 = sbr.rel (%p220_p3) target bundleno = 637 (0x27d), region = 40  ;;  %p258_p4 = scmp.lt.s32.totalorder (!%p220_p3), %s1603_s22, 63 }
   0xc   : > { %s2866_s22 = smov (!%p258_p4, %s1603_s22), 63  ;;  %vm312_vm0 = vcmask 261120  }
   0xd   : > { %s1604_s23 = sshll.u32 %s2866_s22, 3  ;;  %s1606_s16 = sshll.u32 %s2866_s22, 2 }
   0xe   : > { %s2075_s26 = scalar_lea.vmem %s2855_s0, %s1604_s23  ;;  %s2680_s22 = scalar_lea.vmem %s2860_s5, %s1606_s16 }
   0xf   : > { %v2078_v0 = vld [vmem:[%s2075_s26] sm:$0xff]  ;;  %v2084_v2 = vld [vmem:[%s2075_s26 + $0x8] sm:$0xff]  ;;  %v2098_v8 = vld [vmem:[%s2075_s26 + $0x10] sm:$0xff] }
  0x10   : > { %v2081_v1 = vld [vmem:[%s2075_s26 + $0x80] sm:$0xff]  ;;  %v313_v3 = vsel %vm312_vm0, %v2078_v0, 0.0  ;;  %v2091_v5 = vld [vmem:[%s2075_s26 + $0x88] sm:$0xff]  ;;  %v316_v6 = vsel %vm312_vm0, %v2084_v2, 0.0  ;;  %v2101_v9 = vld [vmem:[%s2075_s26 + $0x18] sm:$0xff]  ;;  %v319_v10 = vsel %vm312_vm0, %v2098_v8, 0.0 }
  0x11   : > { %v361_v4 = vsel %vm312_vm0, %v2081_v1, 0.0  ;;  %314 = vadd.xlane.f32.xlu0 %v313_v3  ;;  %v364_v7 = vsel %vm312_vm0, %v2091_v5, 0.0  ;;  %v322_v11 = vsel %vm312_vm0, %v2101_v9, 0.0  ;;  %v2108_v12 = vld [vmem:[%s2075_s26 + $0x90] sm:$0xff]  ;;  %v2111_v13 = vld [vmem:[%s2075_s26 + $0x98] sm:$0xff]  ;;  %v2118_v16 = vld [vmem:[%s2075_s26 + $0x20] sm:$0xff] }
  0x12   : > { %362 = vadd.xlane.f32.xlu1 %v361_v4  ;;  %v367_v14 = vsel %vm312_vm0, %v2108_v12, 0.0  ;;  %v370_v15 = vsel %vm312_vm0, %v2111_v13, 0.0  ;;  %v2121_v17 = vld [vmem:[%s2075_s26 + $0x28] sm:$0xff]  ;;  %v325_v18 = vsel %vm312_vm0, %v2118_v16, 0.0  ;;  %v2128_v20 = vld [vmem:[%s2075_s26 + $0xa0] sm:$0xff]  ;;  %v2138_v24 = vld [vmem:[%s2075_s26 + $0x30] sm:$0xff] }
  0x13   : > { %v328_v19 = vsel %vm312_vm0, %v2121_v17, 0.0  ;;  %v2131_v21 = vld [vmem:[%s2075_s26 + $0xa8] sm:$0xff]  ;;  %v373_v22 = vsel %vm312_vm0, %v2128_v20, 0.0  ;;  %v2141_v25 = vld [vmem:[%s2075_s26 + $0x38] sm:$0xff]  ;;  %v331_v26 = vsel %vm312_vm0, %v2138_v24, 0.0  ;;  %v2148_v28 = vld [vmem:[%s2075_s26 + $0xb0] sm:$0xff] }
  0x14   : > { %v376_v23 = vsel %vm312_vm0, %v2131_v21, 0.0  ;;  %v334_v27 = vsel %vm312_vm0, %v2141_v25, 0.0  ;;  %v2151_v29 = vld [vmem:[%s2075_s26 + $0xb8] sm:$0xff]  ;;  %v379_v30 = vsel %vm312_vm0, %v2148_v28, 0.0  ;;  %v2158_v32 = vld [vmem:[%s2075_s26 + $0x40] sm:$0xff]  ;;  %v2161_v33 = vld [vmem:[%s2075_s26 + $0x48] sm:$0xff] }
  0x15   : > { %317 = vadd.xlane.f32.xlu0 %v316_v6  ;;  %v382_v31 = vsel %vm312_vm0, %v2151_v29, 0.0  ;;  %v337_v34 = vsel %vm312_vm0, %v2158_v32, 0.0  ;;  %v340_v35 = vsel %vm312_vm0, %v2161_v33, 0.0  ;;  %v2168_v36 = vld [vmem:[%s2075_s26 + $0xc0] sm:$0xff]  ;;  %v2171_v37 = vld [vmem:[%s2075_s26 + $0xc8] sm:$0xff]  ;;  %v2178_v40 = vld [vmem:[%s2075_s26 + $0x50] sm:$0xff] }
  0x16   : > { %365 = vadd.xlane.f32.xlu1 %v364_v7  ;;  %v385_v38 = vsel %vm312_vm0, %v2168_v36, 0.0  ;;  %v388_v39 = vsel %vm312_vm0, %v2171_v37, 0.0  ;;  %v2181_v41 = vld [vmem:[%s2075_s26 + $0x58] sm:$0xff]  ;;  %v343_v42 = vsel %vm312_vm0, %v2178_v40, 0.0  ;;  %v2188_v44 = vld [vmem:[%s2075_s26 + $0xd0] sm:$0xff]  ;;  %v2198_v48 = vld [vmem:[%s2075_s26 + $0x60] sm:$0xff] }
  0x17   : > { %v346_v43 = vsel %vm312_vm0, %v2181_v41, 0.0  ;;  %v2191_v45 = vld [vmem:[%s2075_s26 + $0xd8] sm:$0xff]  ;;  %v391_v46 = vsel %vm312_vm0, %v2188_v44, 0.0  ;;  %v2201_v49 = vld [vmem:[%s2075_s26 + $0x68] sm:$0xff]  ;;  %v349_v50 = vsel %vm312_vm0, %v2198_v48, 0.0  ;;  %v2208_v52 = vld [vmem:[%s2075_s26 + $0xe0] sm:$0xff] }
  0x18   : > { %v394_v47 = vsel %vm312_vm0, %v2191_v45, 0.0  ;;  %v352_v51 = vsel %vm312_vm0, %v2201_v49, 0.0  ;;  %v2211_v53 = vld [vmem:[%s2075_s26 + $0xe8] sm:$0xff]  ;;  %v397_v54 = vsel %vm312_vm0, %v2208_v52, 0.0  ;;  %v2218_v56 = vld [vmem:[%s2075_s26 + $0x70] sm:$0xff]  ;;  %v2221_v57 = vld [vmem:[%s2075_s26 + $0x78] sm:$0xff] }
  0x19   : > { %320 = vadd.xlane.f32.xlu0 %v319_v10  ;;  %v400_v55 = vsel %vm312_vm0, %v2211_v53, 0.0  ;;  %v355_v58 = vsel %vm312_vm0, %v2218_v56, 0.0  ;;  %v358_v59 = vsel %vm312_vm0, %v2221_v57, 0.0  ;;  %v2228_v60 = vld [vmem:[%s2075_s26 + $0xf0] sm:$0xff]  ;;  %v2231_v61 = vld [vmem:[%s2075_s26 + $0xf8] sm:$0xff] }
  0x1a   : > { %323 = vadd.xlane.f32.xlu1 %v322_v11  ;;  %v403_v62 = vsel %vm312_vm0, %v2228_v60, 0.0  ;;  %v406_v63 = vsel %vm312_vm0, %v2231_v61, 0.0 }
  0x1d   : > { %368 = vadd.xlane.f32.xlu0 %v367_v14 }
  0x1e   : > { %371 = vadd.xlane.f32.xlu1 %v370_v15 }
  0x21   : > { %326 = vadd.xlane.f32.xlu0 %v325_v18 }
  0x22   : > { %329 = vadd.xlane.f32.xlu1 %v328_v19 }
  0x25   : > { %374 = vadd.xlane.f32.xlu0 %v373_v22 }
  0x26   : > { %377 = vadd.xlane.f32.xlu1 %v376_v23 }
  0x29   : > { %332 = vadd.xlane.f32.xlu0 %v331_v26 }
  0x2a   : > { %335 = vadd.xlane.f32.xlu1 %v334_v27 }
  0x2d   : > { %380 = vadd.xlane.f32.xlu0 %v379_v30 }
  0x2e   : > { %383 = vadd.xlane.f32.xlu1 %v382_v31 }
  0x31   : > { %338 = vadd.xlane.f32.xlu0 %v337_v34 }
  0x32   : > { %341 = vadd.xlane.f32.xlu1 %v340_v35 }
  0x35   : > { %386 = vadd.xlane.f32.xlu0 %v385_v38 }
  0x36   : > { %389 = vadd.xlane.f32.xlu1 %v388_v39 }
  0x39   : > { %344 = vadd.xlane.f32.xlu0 %v343_v42 }
  0x3a   : > { %347 = vadd.xlane.f32.xlu1 %v346_v43 }
  0x3d   : > { %392 = vadd.xlane.f32.xlu0 %v391_v46 }
  0x3e   : > { %395 = vadd.xlane.f32.xlu1 %v394_v47 }
  0x41   : > { %350 = vadd.xlane.f32.xlu0 %v349_v50 }
  0x42   : > { %353 = vadd.xlane.f32.xlu1 %v352_v51 }
  0x45   : > { %398 = vadd.xlane.f32.xlu0 %v397_v54 }
  0x46   : > { %401 = vadd.xlane.f32.xlu1 %v400_v55 }
  0x49   : > { %356 = vadd.xlane.f32.xlu0 %v355_v58 }
  0x4a   : > { %359 = vadd.xlane.f32.xlu1 %v358_v59 }
  0x4d   : > { %404 = vadd.xlane.f32.xlu0 %v403_v62 }
  0x4e   : > { %407 = vadd.xlane.f32.xlu1 %v406_v63 }
  0x9a   : > { %v315_v3 = vpop.xlane.xlu0 %314 }
  0x9b   : > { %v363_v4 = vpop.xlane.xlu1 %362  ;;  %v410_v6 = vmul.f32 0.03125, %v315_v3 }
  0x9c   : > { %v426_v7 = vmul.f32 0.03125, %v363_v4 }
  0x9d   : > { %v2238_v10 = vsub.f32 %v2078_v0, %v410_v6 }
  0x9e   : > { %v2241_v11 = vsub.f32 %v2081_v1, %v426_v7  ;;  %v318_v14 = vpop.xlane.xlu0 %317 }
  0x9f   : > { %v366_v15 = vpop.xlane.xlu1 %365  ;;  %v411_v18 = vmul.f32 0.03125, %v318_v14  ;;  %v474_v22 = vmul.f32 %v2238_v10, %v2238_v10 }
  0xa0   : > { %v427_v19 = vmul.f32 0.03125, %v366_v15  ;;  %v490_v23 = vmul.f32 %v2241_v11, %v2241_v11 }
  0xa1   : > { %v2248_v26 = vsub.f32 %v2084_v2, %v411_v18  ;;  %v506_v0 = vsel %vm312_vm0, %v474_v22, 0.0 }
  0xa2   : > { %v2251_v27 = vsub.f32 %v2091_v5, %v427_v19  ;;  %507 = vadd.xlane.f32.xlu0 %v506_v0  ;;  %v321_v1 = vpop.xlane.xlu0 %320  ;;  %v554_v31 = vsel %vm312_vm0, %v490_v23, 0.0 }
  0xa3   : > { %v324_v30 = vpop.xlane.xlu1 %323  ;;  %v412_v34 = vmul.f32 0.03125, %v321_v1  ;;  %v475_v38 = vmul.f32 %v2248_v26, %v2248_v26 }
  0xa4   : > { %v413_v35 = vmul.f32 0.03125, %v324_v30  ;;  %v491_v39 = vmul.f32 %v2251_v27, %v2251_v27 }
  0xa5   : > { %v2260_v2 = vsub.f32 %v2098_v8, %v412_v34  ;;  %v509_v42 = vsel %vm312_vm0, %v475_v38, 0.0 }
  0xa6   : > { %v2263_v5 = vsub.f32 %v2101_v9, %v413_v35  ;;  %555 = vadd.xlane.f32.xlu0 %v554_v31  ;;  %510 = vadd.xlane.f32.xlu1 %v509_v42  ;;  %v369_v43 = vpop.xlane.xlu0 %368  ;;  %v557_v47 = vsel %vm312_vm0, %v491_v39, 0.0 }
  0xa7   : > { %v372_v46 = vpop.xlane.xlu1 %371  ;;  %v428_v50 = vmul.f32 0.03125, %v369_v43  ;;  %v476_v54 = vmul.f32 %v2260_v2, %v2260_v2 }
  0xa8   : > { %v429_v51 = vmul.f32 0.03125, %v372_v46  ;;  %v477_v8 = vmul.f32 %v2263_v5, %v2263_v5 }
  0xa9   : > { %v2272_v55 = vsub.f32 %v2108_v12, %v428_v50  ;;  %v512_v58 = vsel %vm312_vm0, %v476_v54, 0.0 }
  0xaa   : > { %v2275_v9 = vsub.f32 %v2111_v13, %v429_v51  ;;  %558 = vadd.xlane.f32.xlu1 %v557_v47  ;;  %513 = vadd.xlane.f32.xlu0 %v512_v58  ;;  %v327_v59 = vpop.xlane.xlu0 %326  ;;  %v515_v63 = vsel %vm312_vm0, %v477_v8, 0.0 }
  0xab   : > { %v330_v62 = vpop.xlane.xlu1 %329  ;;  %v414_v3 = vmul.f32 0.03125, %v327_v59  ;;  %v492_v6 = vmul.f32 %v2272_v55, %v2272_v55 }
  0xac   : > { %v415_v4 = vmul.f32 0.03125, %v330_v62  ;;  %v493_v12 = vmul.f32 %v2275_v9, %v2275_v9 }
  0xad   : > { %v2284_v7 = vsub.f32 %v2118_v16, %v414_v3  ;;  %v560_v14 = vsel %vm312_vm0, %v492_v6, 0.0 }
  0xae   : > { %v2287_v13 = vsub.f32 %v2121_v17, %v415_v4  ;;  %516 = vadd.xlane.f32.xlu1 %v515_v63  ;;  %561 = vadd.xlane.f32.xlu0 %v560_v14  ;;  %v375_v15 = vpop.xlane.xlu0 %374  ;;  %v563_v19 = vsel %vm312_vm0, %v493_v12, 0.0 }
  0xaf   : > { %v378_v18 = vpop.xlane.xlu1 %377  ;;  %v430_v22 = vmul.f32 0.03125, %v375_v15  ;;  %v478_v0 = vmul.f32 %v2284_v7, %v2284_v7 }
  0xb0   : > { %v431_v23 = vmul.f32 0.03125, %v378_v18  ;;  %v479_v16 = vmul.f32 %v2287_v13, %v2287_v13 }
  0xb1   : > { %v2296_v1 = vsub.f32 %v2128_v20, %v430_v22  ;;  %v518_v30 = vsel %vm312_vm0, %v478_v0, 0.0 }
  0xb2   : > { %v2299_v17 = vsub.f32 %v2131_v21, %v431_v23  ;;  %564 = vadd.xlane.f32.xlu1 %v563_v19  ;;  %519 = vadd.xlane.f32.xlu0 %v518_v30  ;;  %v333_v31 = vpop.xlane.xlu0 %332  ;;  %v521_v35 = vsel %vm312_vm0, %v479_v16, 0.0 }
  0xb3   : > { %v336_v34 = vpop.xlane.xlu1 %335  ;;  %v416_v38 = vmul.f32 0.03125, %v333_v31  ;;  %v494_v42 = vmul.f32 %v2296_v1, %v2296_v1 }
  0xb4   : > { %v417_v39 = vmul.f32 0.03125, %v336_v34  ;;  %v495_v20 = vmul.f32 %v2299_v17, %v2299_v17 }
  0xb5   : > { %v2308_v43 = vsub.f32 %v2138_v24, %v416_v38  ;;  %v566_v46 = vsel %vm312_vm0, %v494_v42, 0.0 }
  0xb6   : > { %v2311_v21 = vsub.f32 %v2141_v25, %v417_v39  ;;  %522 = vadd.xlane.f32.xlu1 %v521_v35  ;;  %567 = vadd.xlane.f32.xlu0 %v566_v46  ;;  %v381_v47 = vpop.xlane.xlu0 %380  ;;  %v569_v51 = vsel %vm312_vm0, %v495_v20, 0.0 }
  0xb7   : > { %v384_v50 = vpop.xlane.xlu1 %383  ;;  %v432_v54 = vmul.f32 0.03125, %v381_v47  ;;  %v480_v58 = vmul.f32 %v2308_v43, %v2308_v43 }
  0xb8   : > { %v433_v8 = vmul.f32 0.03125, %v384_v50  ;;  %v481_v24 = vmul.f32 %v2311_v21, %v2311_v21 }
  0xb9   : > { %v2320_v59 = vsub.f32 %v2148_v28, %v432_v54  ;;  %v524_v62 = vsel %vm312_vm0, %v480_v58, 0.0 }
  0xba   : > { %v2323_v25 = vsub.f32 %v2151_v29, %v433_v8  ;;  %570 = vadd.xlane.f32.xlu1 %v569_v51  ;;  %525 = vadd.xlane.f32.xlu0 %v524_v62  ;;  %v339_v63 = vpop.xlane.xlu0 %338  ;;  %v527_v4 = vsel %vm312_vm0, %v481_v24, 0.0 }
  0xbb   : > { %v342_v3 = vpop.xlane.xlu1 %341  ;;  %v418_v6 = vmul.f32 0.03125, %v339_v63  ;;  %v496_v14 = vmul.f32 %v2320_v59, %v2320_v59  ;;  %v827_v63 = vld [vmem:[%s2858_s3 + $0x18] sm:$0xff] }
  0xbc   : > { %v419_v12 = vmul.f32 0.03125, %v342_v3  ;;  %v497_v28 = vmul.f32 %v2323_v25, %v2323_v25 }
  0xbd   : > { %v2332_v15 = vsub.f32 %v2158_v32, %v418_v6  ;;  %v572_v18 = vsel %vm312_vm0, %v496_v14, 0.0 }
  0xbe   : > { %v2335_v29 = vsub.f32 %v2161_v33, %v419_v12  ;;  %528 = vadd.xlane.f32.xlu1 %v527_v4  ;;  %573 = vadd.xlane.f32.xlu0 %v572_v18  ;;  %v387_v19 = vpop.xlane.xlu0 %386  ;;  %v575_v23 = vsel %vm312_vm0, %v497_v28, 0.0 }
  0xbf   : > { %v390_v22 = vpop.xlane.xlu1 %389  ;;  %v434_v0 = vmul.f32 0.03125, %v387_v19  ;;  %v482_v30 = vmul.f32 %v2332_v15, %v2332_v15 }
  0xc0   : > { %v435_v16 = vmul.f32 0.03125, %v390_v22  ;;  %v483_v32 = vmul.f32 %v2335_v29, %v2335_v29 }
  0xc1   : > { %v2344_v31 = vsub.f32 %v2168_v36, %v434_v0  ;;  %v530_v34 = vsel %vm312_vm0, %v482_v30, 0.0  ;;  %v825_v0 = vld [vmem:[%s2858_s3 + $0x8] sm:$0xff] }
  0xc2   : > { %v2347_v33 = vsub.f32 %v2171_v37, %v435_v16  ;;  %576 = vadd.xlane.f32.xlu1 %v575_v23  ;;  %531 = vadd.xlane.f32.xlu0 %v530_v34  ;;  %v345_v35 = vpop.xlane.xlu0 %344  ;;  %v533_v39 = vsel %vm312_vm0, %v483_v32, 0.0 }
  0xc3   : > { %v348_v38 = vpop.xlane.xlu1 %347  ;;  %v420_v42 = vmul.f32 0.03125, %v345_v35  ;;  %v498_v46 = vmul.f32 %v2344_v31, %v2344_v31 }
  0xc4   : > { %v421_v20 = vmul.f32 0.03125, %v348_v38  ;;  %v499_v36 = vmul.f32 %v2347_v33, %v2347_v33 }
  0xc5   : > { %v2356_v47 = vsub.f32 %v2178_v40, %v420_v42  ;;  %v578_v50 = vsel %vm312_vm0, %v498_v46, 0.0 }
  0xc6   : > { %v2359_v37 = vsub.f32 %v2181_v41, %v421_v20  ;;  %534 = vadd.xlane.f32.xlu1 %v533_v39  ;;  %579 = vadd.xlane.f32.xlu0 %v578_v50  ;;  %v393_v51 = vpop.xlane.xlu0 %392  ;;  %v581_v8 = vsel %vm312_vm0, %v499_v36, 0.0  ;;  %v826_v41 = vld [vmem:[%s2858_s3 + $0x10] sm:$0xff] }
  0xc7   : > { %v396_v54 = vpop.xlane.xlu1 %395  ;;  %v436_v58 = vmul.f32 0.03125, %v393_v51  ;;  %v484_v62 = vmul.f32 %v2356_v47, %v2356_v47  ;;  %v829_v18 = vpack.c.bf16 %v827_v63, %v826_v41 }
  0xc8   : > { %v437_v24 = vmul.f32 0.03125, %v396_v54  ;;  %v485_v40 = vmul.f32 %v2359_v37, %v2359_v37 }
  0xc9   : > { %v2374_v3 = vsub.f32 %v2188_v44, %v436_v58  ;;  %v536_v6 = vsel %vm312_vm0, %v484_v62, 0.0  ;;  %1805 = vmatprep.subr.bf16.mxu0 %v829_v18  ;;  %1841 = vmatprep.subr.bf16.mxu1 %v829_v18 }
  0xca   : > { %v2377_v4 = vsub.f32 %v2191_v45, %v437_v24  ;;  %582 = vadd.xlane.f32.xlu1 %v581_v8  ;;  %537 = vadd.xlane.f32.xlu0 %v536_v6  ;;  %v351_v12 = vpop.xlane.xlu0 %350  ;;  %v539_v28 = vsel %vm312_vm0, %v485_v40, 0.0  ;;  %v824_v45 = vld [vmem:[%s2858_s3] sm:$0xff] }
  0xcb   : > { %v354_v14 = vpop.xlane.xlu1 %353  ;;  %v422_v19 = vmul.f32 0.03125, %v351_v12  ;;  %v500_v23 = vmul.f32 %v2374_v3, %v2374_v3  ;;  %1806 = vmatpush3.bf16.msra.mxu0 %v829_v18  ;;  %1843 = vmatpush3.bf16.msra.mxu1 %v829_v18  ;;  %v828_v39 = vpack.c.bf16 %v825_v0, %v824_v45 }
  0xcc   : > { %v423_v22 = vmul.f32 0.03125, %v354_v14  ;;  %v501_v44 = vmul.f32 %v2377_v4, %v2377_v4 }
  0xcd   : > { %v2392_v16 = vsub.f32 %v2198_v48, %v422_v19  ;;  %v584_v32 = vsel %vm312_vm0, %v500_v23, 0.0  ;;  %1807 = vmatprep.subr.bf16.mxu0 %v828_v39  ;;  %1842 = vmatprep.subr.bf16.mxu1 %v828_v39 }
  0xce   : > { %v2395_v30 = vsub.f32 %v2201_v49, %v423_v22  ;;  %540 = vadd.xlane.f32.xlu1 %v539_v28  ;;  %585 = vadd.xlane.f32.xlu0 %v584_v32  ;;  %v399_v34 = vpop.xlane.xlu0 %398  ;;  %v587_v38 = vsel %vm312_vm0, %v501_v44, 0.0 }
  0xcf   : > { %v402_v35 = vpop.xlane.xlu1 %401  ;;  %v438_v42 = vmul.f32 0.03125, %v399_v34  ;;  %v486_v48 = vmul.f32 %v2392_v16, %v2392_v16  ;;  %1808 = vmatpush3.bf16.msra.mxu0 %v828_v39  ;;  %1844 = vmatpush3.bf16.msra.mxu1 %v828_v39 }
  0xd0   : > { %v439_v20 = vmul.f32 0.03125, %v402_v35  ;;  %v487_v49 = vmul.f32 %v2395_v30, %v2395_v30 }
  0xd1   : > { %v2404_v46 = vsub.f32 %v2208_v52, %v438_v42  ;;  %v542_v50 = vsel %vm312_vm0, %v486_v48, 0.0 }
  0xd2   : > { %v2407_v36 = vsub.f32 %v2211_v53, %v439_v20  ;;  %588 = vadd.xlane.f32.xlu1 %v587_v38  ;;  %543 = vadd.xlane.f32.xlu0 %v542_v50  ;;  %v357_v51 = vpop.xlane.xlu0 %356  ;;  %v545_v8 = vsel %vm312_vm0, %v487_v49, 0.0 }
  0xd3   : > { %v360_v54 = vpop.xlane.xlu1 %359  ;;  %v424_v58 = vmul.f32 0.03125, %v357_v51  ;;  %v502_v62 = vmul.f32 %v2404_v46, %v2404_v46 }
  0xd4   : > { %v425_v24 = vmul.f32 0.03125, %v360_v54  ;;  %v503_v52 = vmul.f32 %v2407_v36, %v2407_v36 }
  0xd5   : > { %v2416_v53 = vsub.f32 %v2218_v56, %v424_v58  ;;  %v590_v41 = vsel %vm312_vm0, %v502_v62, 0.0 }
  0xd6   : > { %v2419_v40 = vsub.f32 %v2221_v57, %v425_v24  ;;  %546 = vadd.xlane.f32.xlu1 %v545_v8  ;;  %591 = vadd.xlane.f32.xlu0 %v590_v41  ;;  %v405_v63 = vpop.xlane.xlu0 %404  ;;  %v593_v12 = vsel %vm312_vm0, %v503_v52, 0.0 }
  0xd7   : > { %v408_v6 = vpop.xlane.xlu1 %407  ;;  %v440_v14 = vmul.f32 0.03125, %v405_v63  ;;  %v488_v18 = vmul.f32 %v2416_v53, %v2416_v53 }
  0xd8   : > { %v441_v28 = vmul.f32 0.03125, %v408_v6  ;;  %v489_v56 = vmul.f32 %v2419_v40, %v2419_v40 }
  0xd9   : > { %v2428_v19 = vsub.f32 %v2228_v60, %v440_v14  ;;  %v548_v22 = vsel %vm312_vm0, %v488_v18, 0.0 }
  0xda   : > { %v2431_v57 = vsub.f32 %v2231_v61, %v441_v28  ;;  %594 = vadd.xlane.f32.xlu1 %v593_v12  ;;  %549 = vadd.xlane.f32.xlu0 %v548_v22  ;;  %v551_v23 = vsel %vm312_vm0, %v489_v56, 0.0 }
  0xdb   : > { %v504_v44 = vmul.f32 %v2428_v19, %v2428_v19 }
  0xdc   : > { %v505_v45 = vmul.f32 %v2431_v57, %v2431_v57 }
  0xdd   : > { %v596_v0 = vsel %vm312_vm0, %v504_v44, 0.0 }
  0xde   : > { %552 = vadd.xlane.f32.xlu1 %v551_v23  ;;  %597 = vadd.xlane.f32.xlu0 %v596_v0  ;;  %v599_v60 = vsel %vm312_vm0, %v505_v45, 0.0  ;;  %v2445_v45 = vld [vmem:[%s2856_s1] ss:$0 sm:$0xff] }
  0xe2   : > { %600 = vadd.xlane.f32.xlu1 %v599_v60 }
 0x12b   : > { %v508_v61 = vpop.xlane.xlu0 %507 }
 0x12c   : > { %v602_v32 = vmul.f32 0.03125, %v508_v61 }
 0x12e   : > { %v634_v34 = vadd.f32 1e-05, %v602_v32 }
 0x12f   : > { %v511_v35 = vpop.xlane.xlu1 %510  ;;  %v556_v38 = vpop.xlane.xlu0 %555 }
 0x130   : > { %1869 = vrsqrt.f32 %v634_v34  ;;  %v603_v39 = vmul.f32 0.03125, %v511_v35  ;;  %v618_v42 = vmul.f32 0.03125, %v556_v38 }
 0x132   : > { %v635_v20 = vadd.f32 1e-05, %v603_v39  ;;  %v650_v48 = vadd.f32 1e-05, %v618_v42 }
 0x133   : > { %v559_v49 = vpop.xlane.xlu1 %558  ;;  %v514_v50 = vpop.xlane.xlu0 %513 }
 0x134   : > { %1871 = vrsqrt.f32 %v635_v20  ;;  %v619_v51 = vmul.f32 0.03125, %v559_v49  ;;  %v604_v54 = vmul.f32 0.03125, %v514_v50 }
 0x135   : > { %1873 = vrsqrt.f32 %v650_v48 }
 0x136   : > { %v651_v8 = vadd.f32 1e-05, %v619_v51  ;;  %v636_v58 = vadd.f32 1e-05, %v604_v54 }
 0x137   : > { %v517_v24 = vpop.xlane.xlu1 %516  ;;  %v562_v62 = vpop.xlane.xlu0 %561 }
 0x138   : > { %1875 = vrsqrt.f32 %v651_v8  ;;  %v605_v52 = vmul.f32 0.03125, %v517_v24  ;;  %v620_v41 = vmul.f32 0.03125, %v562_v62 }
 0x139   : > { %1877 = vrsqrt.f32 %v636_v58 }
 0x13a   : > { %v637_v63 = vadd.f32 1e-05, %v605_v52  ;;  %v652_v6 = vadd.f32 1e-05, %v620_v41 }
 0x13b   : > { %v565_v12 = vpop.xlane.xlu1 %564  ;;  %v520_v14 = vpop.xlane.xlu0 %519 }
 0x13c   : > { %1879 = vrsqrt.f32 %v637_v63  ;;  %v621_v28 = vmul.f32 0.03125, %v565_v12  ;;  %v606_v18 = vmul.f32 0.03125, %v520_v14 }
 0x13d   : > { %v1870_v56 = vpop.eup %1869  ;;  %1881 = vrsqrt.f32 %v652_v6 }
 0x13e   : > { %v653_v22 = vadd.f32 1e-05, %v621_v28  ;;  %v638_v23 = vadd.f32 1e-05, %v606_v18  ;;  %v698_v44 = vmul.f32 %v1870_v56, %v2238_v10  ;;  %v2452_v10 = vld [vmem:[%s2857_s2] ss:$0 sm:$0xff] }
 0x13f   : > { %v523_v0 = vpop.xlane.xlu1 %522  ;;  %v568_v60 = vpop.xlane.xlu0 %567 }
 0x140   : > { %1883 = vrsqrt.f32 %v653_v22  ;;  %v607_v61 = vmul.f32 0.03125, %v523_v0  ;;  %v622_v32 = vmul.f32 0.03125, %v568_v60  ;;  %v737_v35 = vmul.f32 %v2445_v45, %v698_v44 }
 0x141   : > { %v1872_v34 = vpop.eup %1871  ;;  %1885 = vrsqrt.f32 %v638_v23 }
 0x142   : > { %v1874_v38 = vpop.eup %1873  ;;  %v639_v39 = vadd.f32 1e-05, %v607_v61  ;;  %v654_v42 = vadd.f32 1e-05, %v622_v32  ;;  %v699_v20 = vmul.f32 %v1872_v34, %v2248_v26  ;;  %v776_v24 = vadd.f32 %v2452_v10, %v737_v35 }
 0x143   : > { %v571_v48 = vpop.xlane.xlu1 %570  ;;  %v526_v49 = vpop.xlane.xlu0 %525  ;;  %v714_v50 = vmul.f32 %v1874_v38, %v2241_v11 }
 0x144   : > { %1887 = vrsqrt.f32 %v639_v39  ;;  %v623_v51 = vmul.f32 0.03125, %v571_v48  ;;  %v608_v54 = vmul.f32 0.03125, %v526_v49  ;;  %v738_v8 = vmul.f32 %v2445_v45, %v699_v20 }
 0x145   : > { %v1876_v58 = vpop.eup %1875  ;;  %1889 = vrsqrt.f32 %v654_v42  ;;  %v753_v11 = vmul.f32 %v2445_v45, %v714_v50 }
 0x146   : > { %v1878_v62 = vpop.eup %1877  ;;  %v655_v26 = vadd.f32 1e-05, %v623_v51  ;;  %v640_v52 = vadd.f32 1e-05, %v608_v54  ;;  %v777_v41 = vadd.f32 %v2452_v10, %v738_v8  ;;  %v715_v63 = vmul.f32 %v1876_v58, %v2251_v27 }
 0x147   : > { %v529_v6 = vpop.xlane.xlu1 %528  ;;  %v574_v12 = vpop.xlane.xlu0 %573  ;;  %v700_v14 = vmul.f32 %v1878_v62, %v2260_v2  ;;  %v792_v2 = vadd.f32 %v2452_v10, %v753_v11 }
 0x148   : > { %1891 = vrsqrt.f32 %v655_v26  ;;  %v609_v28 = vmul.f32 0.03125, %v529_v6  ;;  %v624_v18 = vmul.f32 0.03125, %v574_v12  ;;  %v808_v56 = vpack.c.bf16 %v777_v41, %v776_v24 }
 0x149   : > { %v1880_v22 = vpop.eup %1879  ;;  %1893 = vrsqrt.f32 %v640_v52  ;;  %v754_v23 = vmul.f32 %v2445_v45, %v715_v63  ;;  %v739_v44 = vmul.f32 %v2445_v45, %v700_v14 }
 0x14a   : > { %v1882_v0 = vpop.eup %1881  ;;  %v641_v60 = vadd.f32 1e-05, %v609_v28  ;;  %v656_v61 = vadd.f32 1e-05, %v624_v18  ;;  %1809 = vmatprep.mubr.msk.bf16.mxu0 %vm312_vm0, %v808_v56  ;;  %v701_v27 = vmul.f32 %v1880_v22, %v2263_v5 }
 0x14b   : > { %v577_v32 = vpop.xlane.xlu1 %576  ;;  %v532_v34 = vpop.xlane.xlu0 %531  ;;  %v793_v35 = vadd.f32 %v2452_v10, %v754_v23  ;;  %v716_v38 = vmul.f32 %v1882_v0, %v2272_v55  ;;  %v778_v50 = vadd.f32 %v2452_v10, %v739_v44 }
 0x14c   : > { %1895 = vrsqrt.f32 %v641_v60  ;;  %v625_v39 = vmul.f32 0.03125, %v577_v32  ;;  %v610_v42 = vmul.f32 0.03125, %v532_v34  ;;  %v740_v20 = vmul.f32 %v2445_v45, %v701_v27 }
 0x14d   : > { %v1884_v48 = vpop.eup %1883  ;;  %1897 = vrsqrt.f32 %v656_v61  ;;  %v816_v49 = vpack.c.bf16 %v793_v35, %v792_v2  ;;  %v755_v62 = vmul.f32 %v2445_v45, %v716_v38 }
 0x14e   : > { %v1886_v51 = vpop.eup %1885  ;;  %v657_v5 = vadd.f32 1e-05, %v625_v39  ;;  %v642_v54 = vadd.f32 1e-05, %v610_v42  ;;  %v779_v8 = vadd.f32 %v2452_v10, %v740_v20  ;;  %v717_v58 = vmul.f32 %v1884_v48, %v2275_v9 }
 0x14f   : > { %1825 = vmatprep.mubr.msk.bf16.mxu1 %vm312_vm0, %v816_v49  ;;  %v535_v55 = vpop.xlane.xlu1 %534  ;;  %v580_v24 = vpop.xlane.xlu0 %579  ;;  %v702_v26 = vmul.f32 %v1886_v51, %v2284_v7  ;;  %v794_v7 = vadd.f32 %v2452_v10, %v755_v62 }
 0x150   : > { %1899 = vrsqrt.f32 %v657_v5  ;;  %v611_v52 = vmul.f32 0.03125, %v535_v55  ;;  %v626_v41 = vmul.f32 0.03125, %v580_v24  ;;  %v809_v63 = vpack.c.bf16 %v779_v8, %v778_v50 }
 0x151   : > { %v1888_v6 = vpop.eup %1887  ;;  %1901 = vrsqrt.f32 %v642_v54  ;;  %v756_v12 = vmul.f32 %v2445_v45, %v717_v58  ;;  %v741_v11 = vmul.f32 %v2445_v45, %v702_v26 }
 0x152   : > { %v1890_v14 = vpop.eup %1889  ;;  %v643_v9 = vadd.f32 1e-05, %v611_v52  ;;  %v658_v28 = vadd.f32 1e-05, %v626_v41  ;;  %1810 = vmatmul.mubr.msk.bf16.vlgmr.msra.gmra.mxu0 %vm312_vm0, %v809_v63  ;;  %v703_v18 = vmul.f32 %v1888_v6, %v2287_v13 }
 0x153   : > { %v583_v56 = vpop.xlane.xlu1 %582  ;;  %v538_v22 = vpop.xlane.xlu0 %537  ;;  %v795_v23 = vadd.f32 %v2452_v10, %v756_v12  ;;  %v718_v44 = vmul.f32 %v1890_v14, %v2296_v1  ;;  %v780_v34 = vadd.f32 %v2452_v10, %v741_v11 }
 0x154   : > { %1903 = vrsqrt.f32 %v643_v9  ;;  %v627_v0 = vmul.f32 0.03125, %v583_v56  ;;  %v612_v60 = vmul.f32 0.03125, %v538_v22  ;;  %v742_v61 = vmul.f32 %v2445_v45, %v703_v18 }
 0x155   : > { %v1892_v27 = vpop.eup %1891  ;;  %1905 = vrsqrt.f32 %v658_v28  ;;  %v817_v32 = vpack.c.bf16 %v795_v23, %v794_v7  ;;  %v757_v20 = vmul.f32 %v2445_v45, %v718_v44 }
 0x156   : > { %v1894_v2 = vpop.eup %1893  ;;  %v659_v13 = vadd.f32 1e-05, %v627_v0  ;;  %v644_v35 = vadd.f32 1e-05, %v612_v60  ;;  %v781_v38 = vadd.f32 %v2452_v10, %v742_v61  ;;  %v719_v39 = vmul.f32 %v1892_v27, %v2299_v17 }
 0x157   : > { %1826 = vmatmul.mubr.msk.bf16.vlgmr.msra.gmra.mxu1 %vm312_vm0, %v817_v32  ;;  %v541_v1 = vpop.xlane.xlu1 %540  ;;  %v586_v42 = vpop.xlane.xlu0 %585  ;;  %v704_v48 = vmul.f32 %v1894_v2, %v2308_v43  ;;  %v796_v43 = vadd.f32 %v2452_v10, %v757_v20 }
 0x158   : > { %1907 = vrsqrt.f32 %v659_v13  ;;  %v613_v49 = vmul.f32 0.03125, %v541_v1  ;;  %v628_v50 = vmul.f32 0.03125, %v586_v42  ;;  %v810_v51 = vpack.c.bf16 %v781_v38, %v780_v34 }
 0x159   : > { %v1896_v5 = vpop.eup %1895  ;;  %1909 = vrsqrt.f32 %v644_v35  ;;  %v758_v54 = vmul.f32 %v2445_v45, %v719_v39  ;;  %v743_v8 = vmul.f32 %v2445_v45, %v704_v48 }
 0x15a   : > { %v1898_v58 = vpop.eup %1897  ;;  %v645_v17 = vadd.f32 1e-05, %v613_v49  ;;  %v660_v55 = vadd.f32 1e-05, %v628_v50  ;;  %1813 = vmatprep.mubr.msk.bf16.mxu0 %vm312_vm0, %v810_v51  ;;  %v705_v24 = vmul.f32 %v1896_v5, %v2311_v21 }
 0x15b   : > { %v589_v62 = vpop.xlane.xlu1 %588  ;;  %v544_v26 = vpop.xlane.xlu0 %543  ;;  %v797_v52 = vadd.f32 %v2452_v10, %v758_v54  ;;  %v720_v41 = vmul.f32 %v1898_v58, %v2320_v59  ;;  %v782_v9 = vadd.f32 %v2452_v10, %v743_v8 }
 0x15c   : > { %1911 = vrsqrt.f32 %v645_v17  ;;  %v629_v63 = vmul.f32 0.03125, %v589_v62  ;;  %v614_v6 = vmul.f32 0.03125, %v544_v26  ;;  %v744_v12 = vmul.f32 %v2445_v45, %v705_v24 }
 0x15d   : > { %v1900_v11 = vpop.eup %1899  ;;  %1913 = vrsqrt.f32 %v660_v55  ;;  %v818_v14 = vpack.c.bf16 %v797_v52, %v796_v43  ;;  %v759_v23 = vmul.f32 %v2445_v45, %v720_v41 }
 0x15e   : > { %v1902_v28 = vpop.eup %1901  ;;  %v661_v21 = vadd.f32 1e-05, %v629_v63  ;;  %v646_v18 = vadd.f32 1e-05, %v614_v6  ;;  %v783_v56 = vadd.f32 %v2452_v10, %v744_v12  ;;  %v721_v22 = vmul.f32 %v1900_v11, %v2323_v25 }
 0x15f   : > { %1829 = vmatprep.mubr.msk.bf16.mxu1 %vm312_vm0, %v818_v14  ;;  %v547_v59 = vpop.xlane.xlu1 %546  ;;  %v592_v7 = vpop.xlane.xlu0 %591  ;;  %v706_v44 = vmul.f32 %v1902_v28, %v2332_v15  ;;  %v798_v15 = vadd.f32 %v2452_v10, %v759_v23 }
 0x160   : > { %1915 = vrsqrt.f32 %v661_v21  ;;  %v615_v0 = vmul.f32 0.03125, %v547_v59  ;;  %v630_v60 = vmul.f32 0.03125, %v592_v7  ;;  %v811_v61 = vpack.c.bf16 %v783_v56, %v782_v9 }
 0x161   : > { %v1904_v27 = vpop.eup %1903  ;;  %1917 = vrsqrt.f32 %v646_v18  ;;  %v760_v32 = vmul.f32 %v2445_v45, %v721_v22  ;;  %v745_v34 = vmul.f32 %v2445_v45, %v706_v44 }
 0x162   : > { %v1906_v2 = vpop.eup %1905  ;;  %v647_v25 = vadd.f32 1e-05, %v615_v0  ;;  %v662_v13 = vadd.f32 1e-05, %v630_v60  ;;  %1814 = vmatmul.mubr.msk.bf16.gmra.mxu0 %vm312_vm0, %v811_v61  ;;  %v707_v35 = vmul.f32 %v1904_v27, %v2335_v29 }
 0x163   : > { %v595_v38 = vpop.xlane.xlu1 %594  ;;  %v550_v39 = vpop.xlane.xlu0 %549  ;;  %v799_v1 = vadd.f32 %v2452_v10, %v760_v32  ;;  %v722_v42 = vmul.f32 %v1906_v2, %v2344_v31  ;;  %v784_v5 = vadd.f32 %v2452_v10, %v745_v34 }
 0x164   : > { %1919 = vrsqrt.f32 %v647_v25  ;;  %v631_v20 = vmul.f32 0.03125, %v595_v38  ;;  %v616_v48 = vmul.f32 0.03125, %v550_v39  ;;  %v746_v49 = vmul.f32 %v2445_v45, %v707_v35 }
 0x165   : > { %v1908_v50 = vpop.eup %1907  ;;  %1921 = vrsqrt.f32 %v662_v13  ;;  %v819_v51 = vpack.c.bf16 %v799_v1, %v798_v15  ;;  %v761_v24 = vmul.f32 %v2445_v45, %v722_v42 }
 0x166   : > { %v1910_v54 = vpop.eup %1909  ;;  %v663_v29 = vadd.f32 1e-05, %v631_v20  ;;  %v648_v8 = vadd.f32 1e-05, %v616_v48  ;;  %v785_v58 = vadd.f32 %v2452_v10, %v746_v49  ;;  %v723_v17 = vmul.f32 %v1908_v50, %v2347_v33 }
 0x167   : > { %1830 = vmatmul.mubr.msk.bf16.gmra.mxu1 %vm312_vm0, %v819_v51  ;;  %v553_v31 = vpop.xlane.xlu1 %552  ;;  %v598_v55 = vpop.xlane.xlu0 %597  ;;  %v708_v62 = vmul.f32 %v1910_v54, %v2356_v47  ;;  %v800_v47 = vadd.f32 %v2452_v10, %v761_v24 }
 0x168   : > { %1923 = vrsqrt.f32 %v663_v29  ;;  %v617_v26 = vmul.f32 0.03125, %v553_v31  ;;  %v632_v43 = vmul.f32 0.03125, %v598_v55  ;;  %v812_v52 = vpack.c.bf16 %v785_v58, %v784_v5 }
 0x169   : > { %v1912_v41 = vpop.eup %1911  ;;  %1925 = vrsqrt.f32 %v648_v8  ;;  %v762_v63 = vmul.f32 %v2445_v45, %v723_v17  ;;  %v747_v6 = vmul.f32 %v2445_v45, %v708_v62 }
 0x16a   : > { %v1914_v12 = vpop.eup %1913  ;;  %v649_v33 = vadd.f32 1e-05, %v617_v26  ;;  %v664_v11 = vadd.f32 1e-05, %v632_v43  ;;  %1817 = vmatprep.mubr.msk.bf16.mxu0 %vm312_vm0, %v812_v52  ;;  %v709_v14 = vmul.f32 %v1912_v41, %v2359_v37  ;;  %v2566_v41 = vld [vmem:[%s2859_s4] ss:$0 sm:$0xff] }
 0x16b   : > { %v601_v9 = vpop.xlane.xlu1 %600  ;;  %v801_v28 = vadd.f32 %v2452_v10, %v762_v63  ;;  %v724_v21 = vmul.f32 %v1914_v12, %v2374_v3  ;;  %v786_v7 = vadd.f32 %v2452_v10, %v747_v6 }
 0x16c   : > { %1927 = vrsqrt.f32 %v649_v33  ;;  %v633_v18 = vmul.f32 0.03125, %v601_v9  ;;  %v748_v56 = vmul.f32 %v2445_v45, %v709_v14 }
 0x16d   : > { %v1916_v22 = vpop.eup %1915  ;;  %1929 = vrsqrt.f32 %v664_v11  ;;  %v820_v59 = vpack.c.bf16 %v801_v28, %v800_v47  ;;  %v763_v60 = vmul.f32 %v2445_v45, %v724_v21 }
 0x16e   : > { %v1918_v23 = vpop.eup %1917  ;;  %v665_v44 = vadd.f32 1e-05, %v633_v18  ;;  %v787_v37 = vadd.f32 %v2452_v10, %v748_v56  ;;  %v725_v0 = vmul.f32 %v1916_v22, %v2377_v4 }
 0x16f   : > { %1833 = vmatprep.mubr.msk.bf16.mxu1 %vm312_vm0, %v820_v59  ;;  %v710_v3 = vmul.f32 %v1918_v23, %v2392_v16  ;;  %v802_v2 = vadd.f32 %v2452_v10, %v763_v60 }
 0x170   : > { %1931 = vrsqrt.f32 %v665_v44  ;;  %v813_v61 = vpack.c.bf16 %v787_v37, %v786_v7  ;;  %v764_v27 = vmul.f32 %v2445_v45, %v725_v0 }
 0x171   : > { %v1920_v32 = vpop.eup %1919  ;;  %v749_v13 = vmul.f32 %v2445_v45, %v710_v3 }
 0x172   : > { %v1922_v34 = vpop.eup %1921  ;;  %1818 = vmatmul.mubr.msk.bf16.gmra.mxu0 %vm312_vm0, %v813_v61  ;;  %v803_v25 = vadd.f32 %v2452_v10, %v764_v27  ;;  %v711_v4 = vmul.f32 %v1920_v32, %v2395_v30 }
 0x173   : > { %v726_v35 = vmul.f32 %v1922_v34, %v2404_v46  ;;  %v788_v1 = vadd.f32 %v2452_v10, %v749_v13 }
 0x174   : > { %v821_v38 = vpack.c.bf16 %v803_v25, %v802_v2  ;;  %v750_v16 = vmul.f32 %v2445_v45, %v711_v4 }
 0x175   : > { %v1924_v39 = vpop.eup %1923  ;;  %v765_v48 = vmul.f32 %v2445_v45, %v726_v35 }
 0x176   : > { %v1926_v15 = vpop.eup %1925  ;;  %1834 = vmatmul.mubr.msk.bf16.gmra.mxu1 %vm312_vm0, %v821_v38  ;;  %v789_v42 = vadd.f32 %v2452_v10, %v750_v16  ;;  %v727_v20 = vmul.f32 %v1924_v39, %v2407_v36 }
 0x177   : > { %v712_v30 = vmul.f32 %v1926_v15, %v2416_v53  ;;  %v804_v5 = vadd.f32 %v2452_v10, %v765_v48 }
 0x178   : > { %v814_v49 = vpack.c.bf16 %v789_v42, %v788_v1  ;;  %v766_v46 = vmul.f32 %v2445_v45, %v727_v20 }
 0x179   : > { %v1928_v50 = vpop.eup %1927  ;;  %v751_v8 = vmul.f32 %v2445_v45, %v712_v30 }
 0x17a   : > { %v1930_v51 = vpop.eup %1929  ;;  %1821 = vmatprep.mubr.msk.bf16.mxu0 %vm312_vm0, %v814_v49  ;;  %v805_v54 = vadd.f32 %v2452_v10, %v766_v46  ;;  %v713_v29 = vmul.f32 %v1928_v50, %v2419_v40 }
 0x17b   : > { %v728_v36 = vmul.f32 %v1930_v51, %v2428_v19  ;;  %v790_v31 = vadd.f32 %v2452_v10, %v751_v8 }
 0x17c   : > { %v822_v58 = vpack.c.bf16 %v805_v54, %v804_v5  ;;  %v752_v53 = vmul.f32 %v2445_v45, %v713_v29 }
 0x17d   : > { %v1932_v17 = vpop.eup %1931  ;;  %v767_v62 = vmul.f32 %v2445_v45, %v728_v36 }
 0x17e   : > { %1837 = vmatprep.mubr.msk.bf16.mxu1 %vm312_vm0, %v822_v58  ;;  %v791_v55 = vadd.f32 %v2452_v10, %v752_v53  ;;  %v729_v24 = vmul.f32 %v1932_v17, %v2431_v57 }
 0x17f   : > { %v806_v19 = vadd.f32 %v2452_v10, %v767_v62 }
 0x180   : > { %v815_v26 = vpack.c.bf16 %v791_v55, %v790_v31  ;;  %v768_v40 = vmul.f32 %v2445_v45, %v729_v24 }
 0x182   : > { %1822 = vmatmul.mubr.msk.bf16.gmra.mxu0 %vm312_vm0, %v815_v26  ;;  %v807_v43 = vadd.f32 %v2452_v10, %v768_v40 }
 0x184   : > { %v823_v52 = vpack.c.bf16 %v807_v43, %v806_v19 }
 0x186   : > { %1838 = vmatmul.mubr.msk.bf16.gmra.mxu1 %vm312_vm0, %v823_v52 }
 0x212   : > { %v1811_v57 = vpop.f32.mrf.mxu0 }
 0x213   : > { %v2569_v63 = vadd.f32 %v1811_v57, %v2566_v41 }
 0x214   : > { %v919_v6 = vpop.f32.mrf.mxu0 }
 0x215   : > { %v1080_v45 = vmul.f32 %v2569_v63, %v2569_v63  ;;  %v2574_v12 = vadd.f32 %v2566_v41, %v919_v6 }
 0x216   : > { %v1812_v10 = vpop.f32.mrf.mxu0 }
 0x217   : > { %v1112_v33 = vmul.f32 %v1080_v45, %v2569_v63  ;;  %v1078_v11 = vmul.f32 %v2574_v12, %v2574_v12  ;;  %v2580_v14 = vadd.f32 %v1812_v10, %v2566_v41  ;;  %v1827_v9 = vpop.f32.mrf.mxu1 }
 0x218   : > { %v2583_v47 = vadd.f32 %v1827_v9, %v2566_v41  ;;  %v922_v28 = vpop.f32.mrf.mxu0 }
 0x219   : > { %v1144_v21 = vmul.f32 0.044715, %v1112_v33  ;;  %v1110_v18 = vmul.f32 %v1078_v11, %v2574_v12  ;;  %v1081_v56 = vmul.f32 %v2580_v14, %v2580_v14  ;;  %v983_v22 = vpop.f32.mrf.mxu1  ;;  %v2591_v7 = vadd.f32 %v2566_v41, %v922_v28 }
 0x21a   : > { %v1096_v59 = vmul.f32 %v2583_v47, %v2583_v47  ;;  %v2594_v23 = vadd.f32 %v2566_v41, %v983_v22 }
 0x21b   : > { %v1176_v44 = vadd.f32 %v1144_v21, %v2569_v63  ;;  %v1142_v37 = vmul.f32 0.044715, %v1110_v18  ;;  %v1113_v0 = vmul.f32 %v1081_v56, %v2580_v14  ;;  %v1828_v60 = vpop.f32.mrf.mxu1  ;;  %v1079_v61 = vmul.f32 %v2591_v7, %v2591_v7 }
 0x21c   : > { %v1128_v3 = vmul.f32 %v1096_v59, %v2583_v47  ;;  %v1094_v2 = vmul.f32 %v2594_v23, %v2594_v23  ;;  %v2606_v35 = vadd.f32 %v1828_v60, %v2566_v41  ;;  %v1048_v56 = vmul.f32 0.5, %v2569_v63 }
 0x21d   : > { %v1208_v27 = vmul.f32 0.7978846, %v1176_v44  ;;  %v1174_v32 = vadd.f32 %v1142_v37, %v2574_v12  ;;  %v1145_v34 = vmul.f32 0.044715, %v1113_v0  ;;  %v986_v25 = vpop.f32.mrf.mxu1  ;;  %v1111_v13 = vmul.f32 %v1079_v61, %v2591_v7 }
 0x21e   : > { %v1160_v4 = vmul.f32 0.044715, %v1128_v3  ;;  %v2609_v38 = vadd.f32 %v2566_v41, %v986_v25  ;;  %v1126_v15 = vmul.f32 %v1094_v2, %v2594_v23  ;;  %v1097_v20 = vmul.f32 %v2606_v35, %v2606_v35 }
 0x21f   : > { %1933 = vtanh.f32 %v1208_v27  ;;  %v1206_v16 = vmul.f32 0.7978846, %v1174_v32  ;;  %v1177_v39 = vadd.f32 %v1145_v34, %v2580_v14  ;;  %v1143_v42 = vmul.f32 0.044715, %v1111_v13 }
 0x220   : > { %v1192_v1 = vadd.f32 %v1160_v4, %v2583_v47  ;;  %v1158_v30 = vmul.f32 0.044715, %v1126_v15  ;;  %v1129_v50 = vmul.f32 %v1097_v20, %v2606_v35  ;;  %v1095_v51 = vmul.f32 %v2609_v38, %v2609_v38 }
 0x221   : > { %1935 = vtanh.f32 %v1206_v16  ;;  %v1209_v48 = vmul.f32 0.7978846, %v1177_v39  ;;  %v1175_v46 = vadd.f32 %v1143_v42, %v2591_v7  ;;  %v1046_v0 = vmul.f32 0.5, %v2574_v12 }
 0x222   : > { %v1224_v49 = vmul.f32 0.7978846, %v1192_v1  ;;  %v1815_v5 = vpop.f32.mrf.mxu0  ;;  %v1190_v54 = vadd.f32 %v1158_v30, %v2594_v23  ;;  %v1161_v36 = vmul.f32 0.044715, %v1129_v50  ;;  %v1127_v58 = vmul.f32 %v1095_v51, %v2609_v38 }
 0x223   : > { %1937 = vtanh.f32 %v1209_v48  ;;  %v2622_v29 = vadd.f32 %v1815_v5, %v2566_v41  ;;  %v1207_v8 = vmul.f32 0.7978846, %v1175_v46  ;;  %v1049_v27 = vmul.f32 0.5, %v2580_v14 }
 0x224   : > { %1939 = vtanh.f32 %v1224_v49  ;;  %v935_v53 = vpop.f32.mrf.mxu0  ;;  %v1222_v17 = vmul.f32 0.7978846, %v1190_v54  ;;  %v1193_v24 = vadd.f32 %v1161_v36, %v2606_v35  ;;  %v1159_v62 = vmul.f32 0.044715, %v1127_v58 }
 0x225   : > { %v1084_v31 = vmul.f32 %v2622_v29, %v2622_v29  ;;  %v2628_v55 = vadd.f32 %v2566_v41, %v935_v53  ;;  %1941 = vtanh.f32 %v1207_v8  ;;  %v1064_v25 = vmul.f32 0.5, %v2583_v47 }
 0x226   : > { %v1816_v26 = vpop.f32.mrf.mxu0  ;;  %1943 = vtanh.f32 %v1222_v17  ;;  %v1225_v52 = vmul.f32 0.7978846, %v1193_v24  ;;  %v1191_v57 = vadd.f32 %v1159_v62, %v2609_v38  ;;  %v1047_v1 = vmul.f32 0.5, %v2591_v7 }
 0x227   : > { %v1116_v40 = vmul.f32 %v1084_v31, %v2622_v29  ;;  %v1082_v19 = vmul.f32 %v2628_v55, %v2628_v55  ;;  %v1831_v43 = vpop.f32.mrf.mxu1  ;;  %v2636_v6 = vadd.f32 %v1816_v26, %v2566_v41  ;;  %v1062_v46 = vmul.f32 0.5, %v2594_v23 }
 0x228   : > { %v2639_v45 = vadd.f32 %v1831_v43, %v2566_v41  ;;  %v938_v10 = vpop.f32.mrf.mxu0  ;;  %1945 = vtanh.f32 %v1225_v52  ;;  %v1223_v21 = vmul.f32 0.7978846, %v1191_v57  ;;  %v1065_v26 = vmul.f32 0.5, %v2606_v35 }
 0x229   : > { %v1148_v33 = vmul.f32 0.044715, %v1116_v40  ;;  %v1114_v11 = vmul.f32 %v1082_v19, %v2628_v55  ;;  %v2643_v9 = vadd.f32 %v2566_v41, %v938_v10  ;;  %v999_v28 = vpop.f32.mrf.mxu1  ;;  %v1085_v18 = vmul.f32 %v2636_v6, %v2636_v6 }
 0x22a   : > { %v1100_v44 = vmul.f32 %v2639_v45, %v2639_v45  ;;  %1947 = vtanh.f32 %v1223_v21  ;;  %v2661_v13 = vadd.f32 %v2566_v41, %v999_v28 }
 0x22b   : > { %v1180_v22 = vadd.f32 %v1148_v33, %v2622_v29  ;;  %v1146_v59 = vmul.f32 0.044715, %v1114_v11  ;;  %v1117_v60 = vmul.f32 %v1085_v18, %v2636_v6  ;;  %v1083_v3 = vmul.f32 %v2643_v9, %v2643_v9  ;;  %v1832_v61 = vpop.f32.mrf.mxu1 }
 0x22c   : > { %v1934_v37 = vpop.eup %1933  ;;  %v1132_v34 = vmul.f32 %v1100_v44, %v2639_v45  ;;  %v2664_v14 = vadd.f32 %v1832_v61, %v2566_v41  ;;  %v1098_v50 = vmul.f32 %v2661_v13, %v2661_v13  ;;  %v1063_v18 = vmul.f32 0.5, %v2609_v38 }
 0x22d   : > { %v1212_v32 = vmul.f32 0.7978846, %v1180_v22  ;;  %v1178_v63 = vadd.f32 %v1146_v59, %v2628_v55  ;;  %v1149_v4 = vmul.f32 0.044715, %v1117_v60  ;;  %v1115_v12 = vmul.f32 %v1083_v3, %v2643_v9  ;;  %v1002_v31 = vpop.f32.mrf.mxu1 }
 0x22e   : > { %v1936_v2 = vpop.eup %1935  ;;  %v1272_v16 = vadd.f32 1.0, %v1934_v37  ;;  %v1164_v20 = vmul.f32 0.044715, %v1132_v34  ;;  %v1130_v53 = vmul.f32 %v1098_v50, %v2661_v13  ;;  %v1101_v17 = vmul.f32 %v2664_v14, %v2664_v14 }
 0x22f   : > { %1949 = vtanh.f32 %v1212_v32  ;;  %v1210_v39 = vmul.f32 0.7978846, %v1178_v63  ;;  %v1181_v42 = vadd.f32 %v1149_v4, %v2636_v6  ;;  %v1147_v48 = vmul.f32 0.044715, %v1115_v12 }
 0x230   : > { %v1938_v15 = vpop.eup %1937  ;;  %v1270_v30 = vadd.f32 1.0, %v1936_v2  ;;  %v1196_v5 = vadd.f32 %v1164_v20, %v2639_v45  ;;  %v1304_v36 = vmul.f32 %v1272_v16, %v1048_v56  ;;  %v1162_v57 = vmul.f32 0.044715, %v1130_v53 }
 0x231   : > { %v1940_v47 = vpop.eup %1939  ;;  %v1273_v49 = vadd.f32 1.0, %v1938_v15  ;;  %1951 = vtanh.f32 %v1210_v39  ;;  %v1213_v51 = vmul.f32 0.7978846, %v1181_v42  ;;  %v1179_v54 = vadd.f32 %v1147_v48, %v2643_v9 }
 0x232   : > { %v1819_v7 = vpop.f32.mrf.mxu0  ;;  %v1942_v8 = vpop.eup %1941  ;;  %v1288_v24 = vadd.f32 1.0, %v1940_v47  ;;  %v1228_v43 = vmul.f32 0.7978846, %v1196_v5  ;;  %v1302_v10 = vmul.f32 %v1270_v30, %v1046_v0  ;;  %v1133_v11 = vmul.f32 %v1101_v17, %v2664_v14 }
 0x233   : > { %v1305_v58 = vmul.f32 %v1273_v49, %v1049_v27  ;;  %v1944_v23 = vpop.eup %1943  ;;  %v1271_v62 = vadd.f32 1.0, %v1942_v8  ;;  %1953 = vtanh.f32 %v1213_v51  ;;  %v1211_v52 = vmul.f32 0.7978846, %v1179_v54 }
 0x234   : > { %v951_v40 = vpop.f32.mrf.mxu0  ;;  %v2685_v28 = vadd.f32 %v2566_v41, %v1002_v31  ;;  %v1194_v35 = vadd.f32 %v1162_v57, %v2661_v13  ;;  %v2691_v56 = vadd.f32 %v1819_v7, %v2566_v41  ;;  %v1286_v59 = vadd.f32 1.0, %v1944_v23 }
 0x235   : > { %v1700_v19 = vpack.c.bf16 %v1305_v58, %v1304_v36  ;;  %v1303_v33 = vmul.f32 %v1271_v62, %v1047_v1  ;;  %v1946_v21 = vpop.eup %1945  ;;  %1955 = vtanh.f32 %v1211_v52  ;;  %v1165_v37 = vmul.f32 0.044715, %v1133_v11 }
 0x236   : > { %v1289_v44 = vadd.f32 1.0, %v1946_v21  ;;  %v1820_v0 = vpop.f32.mrf.mxu0  ;;  %v1320_v3 = vmul.f32 %v1288_v24, %v1064_v25  ;;  %1957 = vtanh.f32 %v1228_v43  ;;  %v1099_v61 = vmul.f32 %v2685_v28, %v2685_v28  ;;  %v1835_v27 = vpop.f32.mrf.mxu1 }
 0x237   : > { %1772 = vst [vmem:[%s2680_s22 + $0x8] sm:$0xff] %v1700_v19   ;;  %v1695_v22 = vpack.c.bf16 %v1303_v33, %v1302_v10  ;;  %v1948_v60 = vpop.eup %1947  ;;  %v1088_v38 = vmul.f32 %v2691_v56, %v2691_v56  ;;  %v1197_v34 = vadd.f32 %v1165_v37, %v2664_v14  ;;  %v2700_v2 = vadd.f32 %v2566_v41, %v951_v40 }
 0x238   : > { %v1321_v32 = vmul.f32 %v1289_v44, %v1065_v26  ;;  %v1287_v63 = vadd.f32 1.0, %v1948_v60  ;;  %v1226_v4 = vmul.f32 0.7978846, %v1194_v35  ;;  %v1131_v25 = vmul.f32 %v1099_v61, %v2685_v28  ;;  %v954_v50 = vpop.f32.mrf.mxu0  ;;  %v1015_v51 = vpop.f32.mrf.mxu1 }
 0x239   : > { %1696 = vst [vmem:[%s2680_s22] sm:$0xff] %v1695_v22   ;;  %v1120_v12 = vmul.f32 %v1088_v38, %v2691_v56  ;;  %v2705_v16 = vadd.f32 %v1820_v0, %v2566_v41  ;;  %v1318_v15 = vmul.f32 %v1286_v59, %v1062_v46  ;;  %v1229_v20 = vmul.f32 0.7978846, %v1197_v34 }
 0x23a   : > { %v1740_v1 = vpack.c.bf16 %v1321_v32, %v1320_v3  ;;  %v1319_v42 = vmul.f32 %v1287_v63, %v1063_v18  ;;  %v1052_v48 = vmul.f32 0.5, %v2622_v29  ;;  %v1163_v47 = vmul.f32 0.044715, %v1131_v25  ;;  %v1836_v40 = vpop.f32.mrf.mxu1 }
 0x23b   : > { %v1152_v30 = vmul.f32 0.044715, %v1120_v12  ;;  %v1086_v49 = vmul.f32 %v2700_v2, %v2700_v2  ;;  %v1050_v54 = vmul.f32 0.5, %v2628_v55  ;;  %1959 = vtanh.f32 %v1229_v20 }
 0x23c   : > { %v1950_v39 = vpop.eup %1949  ;;  %1780 = vst [vmem:[%s2680_s22 + $0x48] sm:$0xff] %v1740_v1   ;;  %v1735_v5 = vpack.c.bf16 %v1319_v42, %v1318_v15  ;;  %v1089_v46 = vmul.f32 %v2705_v16, %v2705_v16  ;;  %1961 = vtanh.f32 %v1226_v4  ;;  %v1195_v29 = vadd.f32 %v1163_v47, %v2685_v28  ;;  %v1018_v37 = vpop.f32.mrf.mxu1 }
 0x23d   : > { %v1276_v8 = vadd.f32 1.0, %v1950_v39  ;;  %v1184_v36 = vadd.f32 %v1152_v30, %v2691_v56  ;;  %v1118_v58 = vmul.f32 %v1086_v49, %v2700_v2  ;;  %v2720_v17 = vadd.f32 %v1835_v27, %v2566_v41 }
 0x23e   : > { %v1952_v7 = vpop.eup %1951  ;;  %1779 = vst [vmem:[%s2680_s22 + $0x40] sm:$0xff] %v1735_v5   ;;  %v1121_v53 = vmul.f32 %v1089_v46, %v2705_v16  ;;  %v2723_v55 = vadd.f32 %v2566_v41, %v954_v50  ;;  %v1053_v23 = vmul.f32 0.5, %v2636_v6  ;;  %v1051_v24 = vmul.f32 0.5, %v2643_v9 }
 0x23f   : > { %v1227_v62 = vmul.f32 0.7978846, %v1195_v29  ;;  %v1216_v26 = vmul.f32 0.7978846, %v1184_v36  ;;  %v1274_v19 = vadd.f32 1.0, %v1952_v7  ;;  %v1308_v10 = vmul.f32 %v1276_v8, %v1052_v48 }
 0x240   : > { %v1954_v31 = vpop.eup %1953  ;;  %v1150_v52 = vmul.f32 0.044715, %v1118_v58  ;;  %v1153_v57 = vmul.f32 0.044715, %v1121_v53  ;;  %v1104_v33 = vmul.f32 %v2720_v17, %v2720_v17  ;;  %v1087_v11 = vmul.f32 %v2723_v55, %v2723_v55 }
 0x241   : > { %v1277_v43 = vadd.f32 1.0, %v1954_v31  ;;  %1963 = vtanh.f32 %v1227_v62  ;;  %v2733_v9 = vadd.f32 %v2566_v41, %v1015_v51  ;;  %v1306_v60 = vmul.f32 %v1274_v19, %v1050_v54 }
 0x242   : > { %v1956_v21 = vpop.eup %1955  ;;  %1965 = vtanh.f32 %v1216_v26  ;;  %v1182_v6 = vadd.f32 %v1150_v52, %v2700_v2  ;;  %v1185_v22 = vadd.f32 %v1153_v57, %v2705_v16  ;;  %v1136_v59 = vmul.f32 %v1104_v33, %v2720_v17  ;;  %v1823_v27 = vpop.f32.mrf.mxu0 }
 0x243   : > { %v1309_v18 = vmul.f32 %v1277_v43, %v1053_v23  ;;  %v1275_v35 = vadd.f32 1.0, %v1956_v21  ;;  %v1119_v44 = vmul.f32 %v1087_v11, %v2723_v55  ;;  %v1958_v0 = vpop.eup %1957  ;;  %v1068_v61 = vmul.f32 0.5, %v2639_v45 }
 0x244   : > { %v1214_v38 = vmul.f32 0.7978846, %v1182_v6  ;;  %v1217_v63 = vmul.f32 0.7978846, %v1185_v22  ;;  %v1168_v34 = vmul.f32 0.044715, %v1136_v59  ;;  %v1102_v25 = vmul.f32 %v2733_v9, %v2733_v9  ;;  %v967_v30 = vpop.f32.mrf.mxu0 }
 0x245   : > { %v1710_v3 = vpack.c.bf16 %v1309_v18, %v1308_v10  ;;  %v1307_v32 = vmul.f32 %v1275_v35, %v1051_v24  ;;  %v1151_v4 = vmul.f32 0.044715, %v1119_v44  ;;  %v2743_v12 = vadd.f32 %v1836_v40, %v2566_v41 }
 0x246   : > { %1967 = vtanh.f32 %v1214_v38  ;;  %v2746_v39 = vadd.f32 %v2566_v41, %v1018_v37  ;;  %v1292_v15 = vadd.f32 1.0, %v1958_v0  ;;  %v1200_v1 = vadd.f32 %v1168_v34, %v2720_v17  ;;  %v1824_v24 = vpop.f32.mrf.mxu0  ;;  %v1839_v19 = vpop.f32.mrf.mxu1 }
 0x247   : > { %1774 = vst [vmem:[%s2680_s22 + $0x18] sm:$0xff] %v1710_v3   ;;  %v1705_v45 = vpack.c.bf16 %v1307_v32, %v1306_v60  ;;  %1969 = vtanh.f32 %v1217_v63  ;;  %v1066_v42 = vmul.f32 0.5, %v2661_v13  ;;  %v1183_v20 = vadd.f32 %v1151_v4, %v2723_v55 }
 0x248   : > { %v1134_v48 = vmul.f32 %v1102_v25, %v2733_v9  ;;  %v1105_v47 = vmul.f32 %v2743_v12, %v2743_v12  ;;  %v1960_v49 = vpop.eup %1959  ;;  %v1069_v50 = vmul.f32 0.5, %v2664_v14  ;;  %v1067_v51 = vmul.f32 0.5, %v2685_v28  ;;  %v970_v3 = vpop.f32.mrf.mxu0 }
 0x249   : > { %1773 = vst [vmem:[%s2680_s22 + $0x10] sm:$0xff] %v1705_v45   ;;  %v1232_v5 = vmul.f32 0.7978846, %v1200_v1  ;;  %v1103_v54 = vmul.f32 %v2746_v39, %v2746_v39  ;;  %v1962_v46 = vpop.eup %1961  ;;  %v1293_v13 = vadd.f32 1.0, %v1960_v49  ;;  %v1215_v7 = vmul.f32 0.7978846, %v1183_v20 }
 0x24a   : > { %v1166_v8 = vmul.f32 0.044715, %v1134_v48  ;;  %v1137_v29 = vmul.f32 %v1105_v47, %v2743_v12  ;;  %v1324_v36 = vmul.f32 %v1292_v15, %v1068_v61  ;;  %v2762_v53 = vadd.f32 %v1823_v27, %v2566_v41  ;;  %v1031_v61 = vpop.f32.mrf.mxu1 }
 0x24b   : > { %v1135_v58 = vmul.f32 %v1103_v54, %v2746_v39  ;;  %v2765_v14 = vadd.f32 %v2566_v41, %v967_v30  ;;  %v1325_v28 = vmul.f32 %v1293_v13, %v1069_v50  ;;  %1971 = vtanh.f32 %v1215_v7 }
 0x24c   : > { %v1198_v31 = vadd.f32 %v1166_v8, %v2733_v9  ;;  %v1169_v23 = vmul.f32 0.044715, %v1137_v29  ;;  %v1290_v62 = vadd.f32 1.0, %v1962_v46  ;;  %1973 = vtanh.f32 %v1232_v5  ;;  %v1840_v50 = vpop.f32.mrf.mxu1 }
 0x24d   : > { %v1167_v26 = vmul.f32 0.044715, %v1135_v58  ;;  %v1092_v40 = vmul.f32 %v2762_v53, %v2762_v53  ;;  %v1750_v52 = vpack.c.bf16 %v1325_v28, %v1324_v36  ;;  %v1090_v33 = vmul.f32 %v2765_v14, %v2765_v14 }
 0x24e   : > { %v1964_v43 = vpop.eup %1963  ;;  %v1230_v57 = vmul.f32 0.7978846, %v1198_v31  ;;  %v1201_v10 = vadd.f32 %v1169_v23, %v2743_v12  ;;  %v2776_v35 = vadd.f32 %v1824_v24, %v2566_v41  ;;  %v1322_v44 = vmul.f32 %v1290_v62, %v1066_v42 }
 0x24f   : > { %v1966_v11 = vpop.eup %1965  ;;  %v1291_v21 = vadd.f32 1.0, %v1964_v43  ;;  %v1199_v18 = vadd.f32 %v1167_v26, %v2746_v39  ;;  %v1124_v6 = vmul.f32 %v1092_v40, %v2762_v53  ;;  %1782 = vst [vmem:[%s2680_s22 + $0x58] sm:$0xff] %v1750_v52   ;;  %v1122_v59 = vmul.f32 %v1090_v33, %v2765_v14 }
 0x250   : > { %1975 = vtanh.f32 %v1230_v57  ;;  %v1233_v22 = vmul.f32 0.7978846, %v1201_v10  ;;  %v1280_v38 = vadd.f32 1.0, %v1966_v11  ;;  %v1093_v32 = vmul.f32 %v2776_v35, %v2776_v35 }
 0x251   : > { %v1323_v37 = vmul.f32 %v1291_v21, %v1067_v51  ;;  %v1231_v0 = vmul.f32 0.7978846, %v1199_v18  ;;  %v1156_v60 = vmul.f32 0.044715, %v1124_v6  ;;  %v1154_v27 = vmul.f32 0.044715, %v1122_v59 }
 0x252   : > { %1977 = vtanh.f32 %v1233_v22  ;;  %v2784_v25 = vadd.f32 %v1839_v19, %v2566_v41  ;;  %v1056_v45 = vmul.f32 0.5, %v2691_v56  ;;  %v1057_v1 = vmul.f32 0.5, %v2705_v16  ;;  %v1034_v19 = vpop.f32.mrf.mxu1 }
 0x253   : > { %v1968_v63 = vpop.eup %1967  ;;  %v1745_v34 = vpack.c.bf16 %v1323_v37, %v1322_v44  ;;  %1979 = vtanh.f32 %v1231_v0  ;;  %v1188_v4 = vadd.f32 %v1156_v60, %v2762_v53  ;;  %v1125_v42 = vmul.f32 %v1093_v32, %v2776_v35 }
 0x254   : > { %v1970_v15 = vpop.eup %1969  ;;  %v2790_v20 = vadd.f32 %v2566_v41, %v970_v3  ;;  %v1186_v30 = vadd.f32 %v1154_v27, %v2765_v14  ;;  %v1108_v49 = vmul.f32 %v2784_v25, %v2784_v25  ;;  %v1312_v51 = vmul.f32 %v1280_v38, %v1056_v45 }
 0x255   : > { %1781 = vst [vmem:[%s2680_s22 + $0x50] sm:$0xff] %v1745_v34   ;;  %v1281_v48 = vadd.f32 1.0, %v1970_v15  ;;  %v1220_v47 = vmul.f32 0.7978846, %v1188_v4  ;;  %v1054_v5 = vmul.f32 0.5, %v2700_v2  ;;  %v1072_v56 = vmul.f32 0.5, %v2720_v17 }
 0x256   : > { %v1157_v16 = vmul.f32 0.044715, %v1125_v42  ;;  %v1278_v54 = vadd.f32 1.0, %v1968_v63  ;;  %v1140_v13 = vmul.f32 %v1108_v49, %v2784_v25  ;;  %v1091_v7 = vmul.f32 %v2790_v20, %v2790_v20 }
 0x257   : > { %v1313_v46 = vmul.f32 %v1281_v48, %v1057_v1  ;;  %1981 = vtanh.f32 %v1220_v47  ;;  %v2803_v29 = vadd.f32 %v2566_v41, %v1031_v61  ;;  %v2806_v36 = vadd.f32 %v1840_v50, %v2566_v41 }
 0x258   : > { %v1189_v8 = vadd.f32 %v1157_v16, %v2776_v35  ;;  %v1972_v2 = vpop.eup %1971  ;;  %v1218_v58 = vmul.f32 0.7978846, %v1186_v30  ;;  %v1172_v28 = vmul.f32 0.044715, %v1140_v13  ;;  %v1123_v31 = vmul.f32 %v1091_v7, %v2790_v20 }
 0x259   : > { %v1720_v17 = vpack.c.bf16 %v1313_v46, %v1312_v51  ;;  %v1974_v23 = vpop.eup %1973  ;;  %v1055_v24 = vmul.f32 0.5, %v2723_v55  ;;  %v1279_v62 = vadd.f32 1.0, %v1972_v2  ;;  %v1106_v40 = vmul.f32 %v2803_v29, %v2803_v29 }
 0x25a   : > { %v1221_v26 = vmul.f32 0.7978846, %v1189_v8  ;;  %v1310_v43 = vmul.f32 %v1278_v54, %v1054_v5  ;;  %v1070_v52 = vmul.f32 0.5, %v2733_v9  ;;  %v1204_v57 = vadd.f32 %v1172_v28, %v2784_v25 }
 0x25b   : > { %1776 = vst [vmem:[%s2680_s22 + $0x28] sm:$0xff] %v1720_v17   ;;  %v1155_v10 = vmul.f32 0.044715, %v1123_v31  ;;  %v1311_v33 = vmul.f32 %v1279_v62, %v1055_v24  ;;  %v1138_v11 = vmul.f32 %v1106_v40, %v2803_v29  ;;  %v1109_v55 = vmul.f32 %v2806_v36, %v2806_v36 }
 0x25c   : > { %1983 = vtanh.f32 %v1221_v26  ;;  %v1296_v18 = vadd.f32 1.0, %v1974_v23  ;;  %v2820_v22 = vadd.f32 %v2566_v41, %v1034_v19  ;;  %v1236_v59 = vmul.f32 0.7978846, %v1204_v57 }
 0x25d   : > { %v1976_v21 = vpop.eup %1975  ;;  %1985 = vtanh.f32 %v1218_v58  ;;  %v1187_v6 = vadd.f32 %v1155_v10, %v2790_v20  ;;  %v1715_v9 = vpack.c.bf16 %v1311_v33, %v1310_v43  ;;  %v1170_v44 = vmul.f32 0.044715, %v1138_v11 }
 0x25e   : > { %v1141_v37 = vmul.f32 %v1109_v55, %v2806_v36  ;;  %v1294_v60 = vadd.f32 1.0, %v1976_v21  ;;  %v1073_v3 = vmul.f32 0.5, %v2743_v12  ;;  %v1107_v38 = vmul.f32 %v2820_v22, %v2820_v22 }
 0x25f   : > { %v1978_v0 = vpop.eup %1977  ;;  %v1219_v61 = vmul.f32 0.7978846, %v1187_v6  ;;  %1775 = vst [vmem:[%s2680_s22 + $0x20] sm:$0xff] %v1715_v9   ;;  %v1071_v63 = vmul.f32 0.5, %v2746_v39  ;;  %v1202_v41 = vadd.f32 %v1170_v44, %v2803_v29  ;;  %v1328_v4 = vmul.f32 %v1296_v18, %v1072_v56 }
 0x260   : > { %v1980_v27 = vpop.eup %1979  ;;  %v1297_v32 = vadd.f32 1.0, %v1978_v0  ;;  %v1173_v34 = vmul.f32 0.044715, %v1141_v37  ;;  %v1139_v45 = vmul.f32 %v1107_v38, %v2820_v22  ;;  %v1326_v48 = vmul.f32 %v1294_v60, %v1070_v52 }
 0x261   : > { %v1295_v15 = vadd.f32 1.0, %v1980_v27  ;;  %1987 = vtanh.f32 %v1219_v61  ;;  %v1234_v1 = vmul.f32 0.7978846, %v1202_v41  ;;  %v1060_v13 = vmul.f32 0.5, %v2762_v53 }
 0x262   : > { %v1329_v12 = vmul.f32 %v1297_v32, %v1073_v3  ;;  %1989 = vtanh.f32 %v1236_v59  ;;  %v1205_v42 = vadd.f32 %v1173_v34, %v2806_v36  ;;  %v1171_v30 = vmul.f32 0.044715, %v1139_v45 }
 0x263   : > { %v1327_v47 = vmul.f32 %v1295_v15, %v1071_v63  ;;  %1991 = vtanh.f32 %v1234_v1  ;;  %v1061_v7 = vmul.f32 0.5, %v2776_v35  ;;  %v1058_v24 = vmul.f32 0.5, %v2765_v14 }
 0x264   : > { %v1760_v49 = vpack.c.bf16 %v1329_v12, %v1328_v4  ;;  %v1237_v39 = vmul.f32 0.7978846, %v1205_v42  ;;  %v1982_v50 = vpop.eup %1981  ;;  %v1203_v5 = vadd.f32 %v1171_v30, %v2820_v22  ;;  %v1059_v62 = vmul.f32 0.5, %v2790_v20 }
 0x265   : > { %v1755_v51 = vpack.c.bf16 %v1327_v47, %v1326_v48  ;;  %v1284_v16 = vadd.f32 1.0, %v1982_v50  ;;  %v1076_v57 = vmul.f32 0.5, %v2784_v25  ;;  %v1077_v10 = vmul.f32 0.5, %v2806_v36 }
 0x266   : > { %1784 = vst [vmem:[%s2680_s22 + $0x68] sm:$0xff] %v1760_v49   ;;  %1993 = vtanh.f32 %v1237_v39  ;;  %v1235_v56 = vmul.f32 0.7978846, %v1203_v5  ;;  %v1074_v21 = vmul.f32 0.5, %v2803_v29  ;;  %v1075_v18 = vmul.f32 0.5, %v2820_v22 }
 0x267   : > { %1783 = vst [vmem:[%s2680_s22 + $0x60] sm:$0xff] %v1755_v51   ;;  %v1316_v2 = vmul.f32 %v1284_v16, %v1060_v13 }
 0x268   : > { %1995 = vtanh.f32 %v1235_v56 }
 0x269   : > { %v1984_v54 = vpop.eup %1983 }
 0x26a   : > { %v1986_v46 = vpop.eup %1985  ;;  %v1285_v8 = vadd.f32 1.0, %v1984_v54 }
 0x26b   : > { %v1282_v58 = vadd.f32 1.0, %v1986_v46 }
 0x26c   : > { %v1317_v17 = vmul.f32 %v1285_v8, %v1061_v7 }
 0x26d   : > { %v1314_v40 = vmul.f32 %v1282_v58, %v1058_v24 }
 0x26e   : > { %v1988_v28 = vpop.eup %1987  ;;  %v1730_v31 = vpack.c.bf16 %v1317_v17, %v1316_v2 }
 0x26f   : > { %v1990_v23 = vpop.eup %1989  ;;  %v1283_v26 = vadd.f32 1.0, %v1988_v28 }
 0x270   : > { %1778 = vst [vmem:[%s2680_s22 + $0x38] sm:$0xff] %v1730_v31   ;;  %v1992_v43 = vpop.eup %1991  ;;  %v1300_v53 = vadd.f32 1.0, %v1990_v23 }
 0x271   : > { %v1315_v19 = vmul.f32 %v1283_v26, %v1059_v62  ;;  %v1298_v11 = vadd.f32 1.0, %v1992_v43 }
 0x272   : > { %v1332_v55 = vmul.f32 %v1300_v53, %v1076_v57 }
 0x273   : > { %v1994_v52 = vpop.eup %1993  ;;  %v1725_v35 = vpack.c.bf16 %v1315_v19, %v1314_v40  ;;  %v1330_v59 = vmul.f32 %v1298_v11, %v1074_v21 }
 0x274   : > { %v1301_v33 = vadd.f32 1.0, %v1994_v52 }
 0x275   : > { %1777 = vst [vmem:[%s2680_s22 + $0x30] sm:$0xff] %v1725_v35   ;;  %v1996_v14 = vpop.eup %1995 }
 0x276   : > { %v1333_v20 = vmul.f32 %v1301_v33, %v1077_v10  ;;  %v1299_v6 = vadd.f32 1.0, %v1996_v14 }
 0x278   : > { %v1770_v9 = vpack.c.bf16 %v1333_v20, %v1332_v55  ;;  %v1331_v44 = vmul.f32 %v1299_v6, %v1075_v18 }
 0x27a   : > { %1786 = vst [vmem:[%s2680_s22 + $0x78] sm:$0xff] %v1770_v9   ;;  %v1765_v37 = vpack.c.bf16 %v1331_v44, %v1330_v59 }
 0x27c   : > { %1785 = vst [vmem:[%s2680_s22 + $0x70] sm:$0xff] %v1765_v37  }
 0x27d PF: > { %s15_s20 = sadd.s32 1, %s2019_s20   ;;  %s2861_s18 = smov %s2015_s19 }
 0x27e   : > { %p12_p5 = scmp.ge.s32.totalorder %s15_s20, 4   ;;  %s2862_s19 = smov %s2864_s21 }
 0x280   :  { %14 = sbr.rel (!%p12_p5) target bundleno = 2 (0x2), region = 76 }

// kernel: forward.13
= control target key start
LH: loop header
LB: loop body
LE: loop exit
PB: predicated region body
PF: predicated region fallthrough
CT: control target
= control target key end

     0   :  { %s3044_s21 = smov 0   ;;  %s3046_s22 = smov 0   ;;  %s3925_s0 = inlined_call_operand.vmem [shape: bf16[2,16,16,96], index: 0, kind: input, shape index: {}]   ;;  %s3926_s1 = inlined_call_operand.vmem [shape: f32[2,16,16,32], index: 1, kind: input, shape index: {}]   ;;  %s3927_s2 = inlined_call_operand.vmem [shape: f32[4,64,64], index: 2, kind: input, shape index: {}]   ;;  %s3928_s3 = inlined_call_operand.vmem [shape: f32[4,64,64], index: 3, kind: input, shape index: {}]   ;;  %s3929_s4 = inlined_call_operand.vmem [shape: f32[32,32], index: 4, kind: input, shape index: {}]   ;;  %s3930_s5 = inlined_call_operand.vmem [shape: f32[1,32], index: 5, kind: input, shape index: {}]   ;;  %s3931_s6 = inlined_call_operand.vmem [shape: f32[2,16,16,32], index: 6, kind: output, shape index: {}]  }
   0x1   :  { %s3048_s23 = smov 0   ;;  %s3050_s24 = smov 0  }
   0x2   :  { %s3052_s25 = smov 0   ;;  %s3054_s26 = smov 0  }
   0x3   :  { %s3056_s27 = smov 0   ;;  %s3058_s28 = smov 0  }
   0x4   :  { %s3060_s29 = smov 0  }
   0x5 LB: > { %s28_s30 = sadd.s32 1, %s2984_s26  ;;  %s31_s7 = sadd.s32 1, %s2988_s27  ;;  %s2996_s29 = sphi %s3060_s29, %s16_s29   ;;  %s2992_s28 = sphi %s3058_s28, %s3947_s28   ;;  %s2988_s27 = sphi %s3056_s27, %s3946_s27   ;;  %s2984_s26 = sphi %s3054_s26, %s3945_s26   ;;  %s2980_s25 = sphi %s3052_s25, %s3944_s25   ;;  %s2976_s24 = sphi %s3050_s24, %s3943_s24   ;;  %s2972_s23 = sphi %s3048_s23, %s3942_s23   ;;  %s2968_s22 = sphi %s3046_s22, %s3941_s22   ;;  %s2964_s21 = sphi %s3044_s21, %s3940_s21  }
   0x6   : > { %p29_p0 = scmp.ge.s32.totalorder %s28_s30, 2  ;;  %s2316_s8 = sadd.s32 4294967295, %s2996_s29  }
   0x7   : > { %s35_s9 = sadd.s32 1, %s2992_s28  ;;  %p53_p1 = scmp.ne.s32.totalorder %s2968_s22, %s2964_s21 }
   0x8   : > { %s3949_s30 = smov (%p29_p0, %s28_s30), 0  ;;  %s3951_s7 = smov (!%p29_p0, %s31_s7), %s2988_s27 }
   0x9   : > { %p33_p2 = scmp.ge.s32.totalorder %s3951_s7, 2  ;;  %p54_p3 = scmp.eq.s32.totalorder %s2996_s29, 0 }
   0xa   : > { %p210_p4 = scmp.eq.s32.totalorder %s2316_s8, 7  ;;  %s42_s13 = ssub.s32 %s2984_s26, %s3949_s30 }
   0xb   : > { %s3953_s7 = smov (%p33_p2, %s3951_s7), 0  ;;  %s3955_s9 = smov (!%p33_p2, %s35_s9), %s2992_s28 }
   0xc   : > { %3934 = sst [smem:[#allocation5_spill]] %s3953_s7  ;;  %p3102_p5 = por %p54_p3, %p53_p1 }
   0xd   : > { %p37_p6 = scmp.ge.s32.totalorder %s3955_s9, 2  ;;  %p3106_p7 = por %p210_p4, %p53_p1 }
   0xe   : > { %s40_s12 = ssub.s32 %s2988_s27, %s3953_s7  ;;  %s46_s17 = sadd.s32 1, %s2968_s22 }
   0xf   : > { %s3957_s9 = smov (%p37_p6, %s3955_s9), 0  ;;  %p2321_p9 = scmp.ge.s32.totalorder %s2996_s29, 8 }
  0x10   : > { %3937 = sst [smem:[#allocation6_spill]] %s3957_s9  ;;  %s39_s14 = ssub.s32 %s2992_s28, %s3957_s9 }
  0x11   : > { %s41_s15 = sor.u32 %s40_s12, %s39_s14  ;;  %241 = sbr.rel (%p2321_p9) target bundleno = 45 (0x2d), region = 28 }
  0x12   : > { %s43_s16 = sor.u32 %s42_s13, %s41_s15 }
  0x13   : > { %p44_p8 = scmp.eq.s32.totalorder %s43_s16, 0 }
  0x15   : > { %s3120_s18 = scalar_select %p44_p8, %s2968_s22, %s46_s17  }
  0x16   : > { %244 = sbr.rel (!%p3102_p5) target bundleno = 34 (0x22), region = 32  ;;  %s246_s19 = sand.u32 (%p3102_p5), 1, %s2968_s22  }
  0x17   : > { %s2423_s20 = sshll.u32 (%p3102_p5), %s2988_s27, 4  ;;  %s2322_s8 = sshll.u32 (%p3102_p5), %s246_s19, 5 }
  0x18   : > { %s251_s9 = sadd.s32 (%p3102_p5), %s2984_s26, %s2423_s20  ;;  %s2325_s12 = sshll.u32 (%p3102_p5), %s2992_s28, 5 }
  0x19   : > { %s253_s13 = sadd.s32 (%p3102_p5), %s2325_s12, %s251_s9  ;;  %s248_s7 = scalar_lea.vmem (%p3102_p5), [#allocation2], %s2322_s8 }
  0x1a   : > { %s2326_s14 = sshll.u32 (%p3102_p5), %s253_s13, 2 }
  0x1b   : > { %s255_s17 = scalar_lea.vmem %s3925_s0, %s2326_s14 }
  0x1c   : > { %v272_v0 = vld [vmem:[%s255_s17] sm:$0xf]  ;;  %v274_v1 = vld [vmem:[%s255_s17 + $0x8] sm:$0xf]  ;;  %v276_v2 = vld [vmem:[%s255_s17 + $0x10] sm:$0xf] }
  0x1d   : > { %273 = vst [vmem:[%s248_s7] sm:$0xf] %v272_v0  ;;  %275 = vst [vmem:[%s248_s7 + $0x4] sm:$0xf] %v274_v1  ;;  %v278_v3 = vld [vmem:[%s255_s17 + $0x18] sm:$0xf] }
  0x1e   : > { %277 = vst [vmem:[%s248_s7 + $0x8] sm:$0xf] %v276_v2  ;;  %v280_v4 = vld [vmem:[%s255_s17 + $0x20] sm:$0xf]  ;;  %v282_v5 = vld [vmem:[%s255_s17 + $0x28] sm:$0xf] }
  0x1f   : > { %279 = vst [vmem:[%s248_s7 + $0xc] sm:$0xf] %v278_v3  ;;  %281 = vst [vmem:[%s248_s7 + $0x10] sm:$0xf] %v280_v4  ;;  %v284_v6 = vld [vmem:[%s255_s17 + $0x30] sm:$0xf] }
  0x20   : > { %283 = vst [vmem:[%s248_s7 + $0x14] sm:$0xf] %v282_v5  ;;  %v286_v7 = vld [vmem:[%s255_s17 + $0x38] sm:$0xf]  ;;  %285 = vst [vmem:[%s248_s7 + $0x18] sm:$0xf] %v284_v6 }
  0x21   : > { %287 = vst [vmem:[%s248_s7 + $0x1c] sm:$0xf] %v286_v7 }
  0x22 PF: > { %327 = sbr.rel (!%p3102_p5) target bundleno = 45 (0x2d), region = 73  ;;  %s329_s9 = sand.u32 (%p3102_p5), 1, %s2968_s22  }
  0x23   : > { %s2424_s19 = sshll.u32 (%p3102_p5), %s2988_s27, 4  ;;  %s2327_s20 = sshll.u32 (%p3102_p5), %s329_s9, 6 }
  0x24   : > { %s334_s8 = sadd.s32 (%p3102_p5), %s2984_s26, %s2424_s19  ;;  %s2330_s12 = sshll.u32 (%p3102_p5), %s2992_s28, 5 }
  0x25   : > { %s336_s13 = sadd.s32 (%p3102_p5), %s2330_s12, %s334_s8  ;;  %s331_s7 = scalar_lea.vmem (%p3102_p5), [#allocation3], %s2327_s20 }
  0x26   : > { %s2331_s14 = sshll.u32 (%p3102_p5), %s336_s13, 3 }
  0x27   : > { %s338_s17 = scalar_lea.vmem %s3926_s1, %s2331_s14 }
  0x28   : > { %v381_v8 = vld [vmem:[%s338_s17] sm:$0xff]  ;;  %v383_v9 = vld [vmem:[%s338_s17 + $0x10] sm:$0xff] }
  0x29   : > { %v385_v10 = vld [vmem:[%s338_s17 + $0x20] sm:$0xff]  ;;  %382 = vst [vmem:[%s331_s7] sm:$0xff] %v381_v8  ;;  %384 = vst [vmem:[%s331_s7 + $0x8] sm:$0xff] %v383_v9  ;;  %v387_v11 = vld [vmem:[%s338_s17 + $0x30] sm:$0xff] }
  0x2a   : > { %386 = vst [vmem:[%s331_s7 + $0x10] sm:$0xff] %v385_v10  ;;  %v389_v12 = vld [vmem:[%s338_s17 + $0x40] sm:$0xff]  ;;  %v391_v13 = vld [vmem:[%s338_s17 + $0x50] sm:$0xff]  ;;  %388 = vst [vmem:[%s331_s7 + $0x18] sm:$0xff] %v387_v11 }
  0x2b   : > { %390 = vst [vmem:[%s331_s7 + $0x20] sm:$0xff] %v389_v12  ;;  %392 = vst [vmem:[%s331_s7 + $0x28] sm:$0xff] %v391_v13  ;;  %v393_v14 = vld [vmem:[%s338_s17 + $0x60] sm:$0xff]  ;;  %v395_v15 = vld [vmem:[%s338_s17 + $0x70] sm:$0xff] }
  0x2c   : > { %394 = vst [vmem:[%s331_s7 + $0x30] sm:$0xff] %v393_v14  ;;  %396 = vst [vmem:[%s331_s7 + $0x38] sm:$0xff] %v395_v15 }
  0x2d PF: > { %p2332_p10 = scmp.ge.s32.totalorder %s2996_s29, 1  ;;  %p413_p11 = scmp.lt.s32.totalorder %s2996_s29, 9 }
  0x2f   : > { %p414_p12 = pnand %p2332_p10, %p413_p11 }
  0x30   : > { %s420_s10 = sand.u32 (!%p414_p12), 1, %s2964_s21   ;;  %s2998_s20 = smov (!%p414_p12), 96  }
  0x31   : > { %417 = sbr.rel (%p414_p12) target bundleno = 1954 (0x7a2), region = 115  ;;  %s2333_s9 = sshll.u32 (!%p414_p12), %s420_s10, 5 }
  0x32   : > { %s3146_s19 = scalar_lea.vmem (!%p414_p12), [#allocation2], %s2333_s9  ;;  %s2999_s8 = smov (!%p414_p12), 88  }
  0x33   : > { %s3000_s12 = smov (!%p414_p12), 120   ;;  %s2336_s13 = sshll.u32 (!%p414_p12), %s2976_s24, 1 }
  0x34   : > { %s469_s14 = sadd.s32 (!%p414_p12), %s2972_s23, %s2336_s13  ;;  %s3001_s17 = smov (!%p414_p12), 64  }
  0x35   : > { %p470_p13 = scmp.lt.s32.totalorder (!%p414_p12), %s469_s14, 3  ;;  %s3003_s7 = smov (!%p414_p12), 112  }
  0x36   : > { %v3149_v16 = vld [vmem:[%s3146_s19 + $0x18] sm:$0xff]   ;;  %v3152_v17 = vld [vmem:[%s3146_s19 + $0x10] sm:$0xff]   ;;  %v3156_v18 = vld [vmem:[%s3146_s19 + $0x8] sm:$0xff]   ;;  %vm550_vm0 = vcmask 64512   ;;  %vm648_vm1 = vcmask 523264   ;;  %vm848_vm2 = vcmask 1043456  }
  0x37   : > { %548 = vrot.lane.b32.xlu0 %v3149_v16, %s2998_s20  ;;  %v3159_v19 = vld [vmem:[%s3146_s19] sm:$0xff]   ;;  %544 = vrot.lane.b32.xlu1 %v3156_v18, %s2998_s20  ;;  %s3959_s14 = smov (!%p470_p13, %s469_s14), 3  ;;  %v532_v40 = vld [vmem:[%s3927_s2 + $0x10] sm:$0xff]  ;;  %s3008_s9 = smov 40   ;;  %vm2116_vm3 = vcmask 261120  }
  0x38   : > { %2519 = vmatprep.mubr.msk.bf16.mxu0 %vm550_vm0, %v3159_v19  ;;  %s2425_s15 = sshll.u32 %s3959_s14, 6  ;;  %v530_v42 = vld [vmem:[%s3927_s2] sm:$0xff]  ;;  %v533_v47 = vld [vmem:[%s3927_s2 + $0x18] sm:$0xff]  ;;  %v531_v49 = vld [vmem:[%s3927_s2 + $0x8] sm:$0xff] }
  0x39   : > { %v536_v59 = vld [vmem:[%s3927_s2 + $0x30] sm:$0xff]  ;;  %v534_v61 = vld [vmem:[%s3927_s2 + $0x20] sm:$0xff]  ;;  %v537_v6 = vld [vmem:[%s3927_s2 + $0x38] sm:$0xff] }
  0x3a   : > { %v535_v8 = vld [vmem:[%s3927_s2 + $0x28] sm:$0xff] }
  0x3b   : > { %546 = vrot.lane.b32.xlu0 %v3152_v17, %s2998_s20  ;;  %542 = vrot.lane.b32.xlu1 %v3159_v19, %s2998_s20  ;;  %s3005_s20 = smov 72  }
  0x3f   : > { %948 = vrot.lane.b32.xlu0 %v3149_v16, %s2999_s8  ;;  %946 = vrot.lane.b32.xlu1 %v3152_v17, %s2999_s8 }
  0x43   : > { %944 = vrot.lane.b32.xlu0 %v3156_v18, %s2999_s8  ;;  %942 = vrot.lane.b32.xlu1 %v3159_v19, %s2999_s8  ;;  %s3006_s8 = smov 104  }
  0x47   : > { %934 = vrot.lane.b32.xlu0 %v3159_v19, %s3000_s12  ;;  %936 = vrot.lane.b32.xlu1 %v3156_v18, %s3000_s12 }
  0x4b   : > { %938 = vrot.lane.b32.xlu0 %v3152_v17, %s3000_s12  ;;  %940 = vrot.lane.b32.xlu1 %v3149_v16, %s3000_s12  ;;  %s3211_s12 = scalar_lea.vmem %s3928_s3, %s2425_s15  ;;  %s3002_s15 = smov 80  }
  0x4c   : > { %v3214_v44 = vld [vmem:[%s3211_s12] sm:$0xff]  ;;  %v3223_v50 = vld [vmem:[%s3211_s12 + $0x10] sm:$0xff]  ;;  %v3227_v54 = vld [vmem:[%s3211_s12 + $0x8] sm:$0xff] }
  0x4d   : > { %v3232_v58 = vld [vmem:[%s3211_s12 + $0x18] sm:$0xff]  ;;  %v3242_v0 = vld [vmem:[%s3211_s12 + $0x20] sm:$0xff]  ;;  %v3254_v9 = vld [vmem:[%s3211_s12 + $0x30] sm:$0xff] }
  0x4e   : > { %v3259_v13 = vld [vmem:[%s3211_s12 + $0x28] sm:$0xff] }
  0xa9   : > { %v549_v20 = vpop.permute.xlu0 %548  ;;  %v545_v24 = vpop.permute.xlu1 %544 }
  0xaa   : > { %2679 = vmatprep.subr.msk.bf16.mxu0 %vm550_vm0, %v549_v20  ;;  %v573_v21 = vsel %vm550_vm0, %v549_v20, 0  ;;  %v567_v25 = vsel %vm550_vm0, %v545_v24, 0 }
  0xab   : > { %2512 = vmatpush3.bf16.xpose.msra.mxu0 %v573_v21 }
  0xad   : > { %v547_v22 = vpop.permute.xlu0 %546  ;;  %v543_v26 = vpop.permute.xlu1 %542 }
  0xae   : > { %2680 = vmatprep.subr.msk.bf16.mxu0 %vm550_vm0, %v547_v22  ;;  %v570_v23 = vsel %vm550_vm0, %v547_v22, 0  ;;  %v564_v27 = vsel %vm550_vm0, %v543_v26, 0  ;;  %v3264_v22 = vld [vmem:[%s3211_s12 + $0x38] sm:$0xff] }
  0xb1   : > { %v949_v28 = vpop.permute.xlu0 %948  ;;  %v947_v30 = vpop.permute.xlu1 %946 }
  0xb2   : > { %v972_v29 = vsel %vm550_vm0, %v949_v28, 0  ;;  %v969_v31 = vsel %vm550_vm0, %v947_v30, 0 }
  0xb3   : > { %2514 = vmatpush3.bf16.xpose.msra.mxu0 %v570_v23 }
  0xb4   : > { %2681 = vmatprep.subr.msk.bf16.mxu0 %vm550_vm0, %v545_v24 }
  0xb5   : > { %v945_v32 = vpop.permute.xlu0 %944  ;;  %v943_v35 = vpop.permute.xlu1 %942 }
  0xb6   : > { %v966_v34 = vsel %vm550_vm0, %v945_v32, 0  ;;  %v963_v36 = vsel %vm550_vm0, %v943_v35, 0 }
  0xb9   : > { %v935_v33 = vpop.permute.xlu0 %934  ;;  %v937_v37 = vpop.permute.xlu1 %936 }
  0xbb   : > { %2516 = vmatpush3.bf16.xpose.msra.mxu0 %v567_v25 }
  0xbc   : > { %2682 = vmatprep.subr.msk.bf16.mxu0 %vm550_vm0, %v543_v26 }
  0xbd   : > { %v939_v38 = vpop.permute.xlu0 %938  ;;  %v941_v39 = vpop.permute.xlu1 %940 }
  0xc3   : > { %2518 = vmatpush3.bf16.xpose.msra.mxu0 %v564_v27 }
  0xc4   : > { %2684 = vmatprep.subr.msk.bf16.mxu0 %vm550_vm0, %v949_v28 }
  0xca   : > { %2520 = vmatmul.mubr.msk.bf16.vlgmr.msra.gmra.mxu0 %vm550_vm0, %v3156_v18 }
  0xcb   : > { %2523 = vmatprep.mubr.msk.bf16.mxu0 %vm550_vm0, %v3152_v17  ;;  %2554 = vmatpush3.bf16.xpose.msra.mxu0 %v972_v29 }
  0xcc   : > { %2685 = vmatprep.subr.msk.bf16.mxu0 %vm550_vm0, %v947_v30 }
  0xd2   : > { %2524 = vmatmul.mubr.msk.bf16.gmra.mxu0 %vm550_vm0, %v3149_v16 }
  0xd3   : > { %2556 = vmatpush3.bf16.xpose.msra.mxu0 %v969_v31  ;;  %2561 = vmatprep.mubr.msk.bf16.mxu0 %vm550_vm0, %v935_v33 }
  0xd4   : > { %2686 = vmatprep.subr.msk.bf16.mxu0 %vm550_vm0, %v945_v32 }
  0xdb   : > { %2558 = vmatpush3.bf16.xpose.msra.mxu0 %v966_v34 }
  0xdc   : > { %2687 = vmatprep.subr.msk.bf16.mxu0 %vm550_vm0, %v943_v35 }
  0xe3   : > { %2560 = vmatpush3.bf16.xpose.msra.mxu0 %v963_v36 }
  0xea   : > { %2562 = vmatmul.mubr.msk.bf16.vlgmr.msra.gmra.mxu0 %vm550_vm0, %v937_v37 }
  0xeb   : > { %2565 = vmatprep.mubr.msk.bf16.mxu0 %vm550_vm0, %v939_v38 }
  0xf2   : > { %2566 = vmatmul.mubr.msk.bf16.gmra.mxu0 %vm550_vm0, %v941_v39 }
 0x18a   : > { %v2521_v41 = vpop.f32.mrf.mxu0 }
 0x18b   : > { %v618_v45 = vadd.f32 %v2521_v41, %v532_v40 }
 0x18c   : > { %v609_v43 = vpop.f32.mrf.mxu0 }
 0x18d   : > { %v610_v46 = vadd.f32 %v609_v43, %v530_v42  ;;  %v642_v57 = vadd.f32 %v618_v45, %v3223_v50 }
 0x18e   : > { %v2522_v48 = vpop.f32.mrf.mxu0 }
 0x18f   : > { %v640_v51 = vadd.f32 %v610_v46, %v3214_v44  ;;  %v621_v52 = vadd.f32 %v2522_v48, %v533_v47  ;;  %v655_v5 = vsel %vm648_vm1, %v642_v57, -inf }
 0x190   : > { %v612_v53 = vpop.f32.mrf.mxu0 }
 0x191   : > { %v613_v55 = vadd.f32 %v612_v53, %v531_v49  ;;  %v649_v56 = vsel %vm648_vm1, %v640_v51, -inf  ;;  %v643_v1 = vadd.f32 %v621_v52, %v3232_v58 }
 0x192   : > { %v2525_v60 = vpop.f32.mrf.mxu0  ;;  %650 = vmax.xlane.f32.xlu0 %v649_v56 }
 0x193   : > { %v641_v62 = vadd.f32 %v613_v55, %v3227_v54  ;;  %v634_v2 = vadd.f32 %v2525_v60, %v536_v59  ;;  %v658_v12 = vsel %vm648_vm1, %v643_v1, -inf }
 0x194   : > { %v625_v63 = vpop.f32.mrf.mxu0 }
 0x195   : > { %v626_v3 = vadd.f32 %v625_v63, %v534_v61  ;;  %v652_v4 = vsel %vm648_vm1, %v641_v62, -inf  ;;  %v646_v21 = vadd.f32 %v634_v2, %v3254_v9 }
 0x196   : > { %v2526_v7 = vpop.f32.mrf.mxu0  ;;  %653 = vmax.xlane.f32.xlu1 %v652_v4  ;;  %656 = vmax.xlane.f32.xlu0 %v655_v5 }
 0x197   : > { %v644_v10 = vadd.f32 %v626_v3, %v3242_v0  ;;  %v637_v14 = vadd.f32 %v2526_v7, %v537_v6  ;;  %v667_v24 = vsel %vm648_vm1, %v646_v21, -inf }
 0x198   : > { %v628_v11 = vpop.f32.mrf.mxu0 }
 0x199   : > { %v629_v15 = vadd.f32 %v628_v11, %v535_v8  ;;  %v661_v20 = vsel %vm648_vm1, %v644_v10, -inf  ;;  %v647_v26 = vadd.f32 %v637_v14, %v3264_v22 }
 0x19a   : > { %662 = vmax.xlane.f32.xlu1 %v661_v20  ;;  %659 = vmax.xlane.f32.xlu0 %v658_v12  ;;  %v2356_v20 = vld [vmem:[%s3927_s2 + $0x40] sm:$0xff] }
 0x19b   : > { %v645_v23 = vadd.f32 %v629_v15, %v3259_v13  ;;  %v670_v27 = vsel %vm648_vm1, %v647_v26, -inf }
 0x19d   : > { %v664_v25 = vsel %vm648_vm1, %v645_v23, -inf }
 0x19e   : > { %668 = vmax.xlane.f32.xlu1 %v667_v24  ;;  %665 = vmax.xlane.f32.xlu0 %v664_v25  ;;  %v2360_v24 = vld [vmem:[%s3927_s2 + $0x60] sm:$0xff] }
 0x1a2   : > { %671 = vmax.xlane.f32.xlu0 %v670_v27  ;;  %v2358_v27 = vld [vmem:[%s3927_s2 + $0x50] sm:$0xff] }
 0x1aa   : > { %v2563_v11 = vpop.f32.mrf.mxu0 }
 0x1ac   : > { %v1008_v12 = vpop.f32.mrf.mxu0 }
 0x1ad   : > { %v1009_v25 = vadd.f32 %v2356_v20, %v1008_v12 }
 0x1ae   : > { %v2564_v14 = vpop.f32.mrf.mxu0 }
 0x1af   : > { %747 = vrot.lane.b32.xlu1 %v3149_v16, %s3001_s17 }
 0x1b0   : > { %v1011_v15 = vpop.f32.mrf.mxu0 }
 0x21b   : > { %v651_v28 = vpop.xlane.xlu0 %650 }
 0x21c   : > { %v673_v29 = vsub.f32 %v640_v51, %v651_v28 }
 0x21e   : > { %v681_v34 = vmul.f32 1.442695, %v673_v29 }
 0x21f   : > { %v654_v30 = vpop.xlane.xlu1 %653  ;;  %v657_v31 = vpop.xlane.xlu0 %656 }
 0x220   : > { %v675_v32 = vsub.f32 %v642_v57, %v657_v31  ;;  %v674_v35 = vsub.f32 %v641_v62, %v654_v30  ;;  %v1017_v30 = vadd.f32 %v2563_v11, %v2358_v27  ;;  %v2359_v31 = vld [vmem:[%s3927_s2 + $0x58] sm:$0xff] }
 0x222   : > { %v685_v33 = vmul.f32 1.442695, %v675_v32  ;;  %v683_v40 = vmul.f32 1.442695, %v674_v35 }
 0x223   : > { %v663_v36 = vpop.xlane.xlu1 %662  ;;  %v660_v37 = vpop.xlane.xlu0 %659 }
 0x224   : > { %v676_v38 = vsub.f32 %v643_v1, %v660_v37  ;;  %2786 = vpow2.f32 %v685_v33  ;;  %v677_v41 = vsub.f32 %v644_v10, %v663_v36  ;;  %v3338_v33 = vadd.f32 %v1009_v25, %v3214_v44 }
 0x225   : > { %2788 = vpow2.f32 %v681_v34  ;;  %v2362_v34 = vld [vmem:[%s3927_s2 + $0x70] sm:$0xff]  ;;  %v1020_v37 = vadd.f32 %v2564_v14, %v2359_v31 }
 0x226   : > { %v687_v39 = vmul.f32 1.442695, %v676_v38  ;;  %v689_v47 = vmul.f32 1.442695, %v677_v41  ;;  %v3351_v41 = vadd.f32 %v1017_v30, %v3223_v50 }
 0x227   : > { %v669_v42 = vpop.xlane.xlu1 %668  ;;  %v666_v43 = vpop.xlane.xlu0 %665 }
 0x228   : > { %v679_v45 = vsub.f32 %v646_v21, %v669_v42  ;;  %2790 = vpow2.f32 %v687_v39  ;;  %v678_v48 = vsub.f32 %v645_v23, %v666_v43  ;;  %v2357_v21 = vld [vmem:[%s3927_s2 + $0x48] sm:$0xff]  ;;  %v2567_v23 = vpop.f32.mrf.mxu0 }
 0x229   : > { %2792 = vpow2.f32 %v683_v40  ;;  %v1033_v38 = vadd.f32 %v2567_v23, %v2362_v34  ;;  %v1047_v40 = vsel %vm648_vm1, %v3338_v33, -inf  ;;  %v2361_v43 = vld [vmem:[%s3927_s2 + $0x68] sm:$0xff] }
 0x22a   : > { %v693_v46 = vmul.f32 1.442695, %v679_v45  ;;  %v691_v55 = vmul.f32 1.442695, %v678_v48  ;;  %v1024_v28 = vpop.f32.mrf.mxu0 }
 0x22b   : > { %v672_v49 = vpop.xlane.xlu0 %671  ;;  %v748_v51 = vpop.permute.xlu1 %747  ;;  %v1025_v29 = vadd.f32 %v2360_v24, %v1024_v28  ;;  %v3361_v48 = vadd.f32 %v1033_v38, %v3254_v9 }
 0x22c   : > { %2794 = vpow2.f32 %v693_v46  ;;  %v680_v52 = vsub.f32 %v647_v26, %v672_v49  ;;  %2527 = vmatprep.subr.bf16.mxu1 %v748_v51  ;;  %v1012_v26 = vadd.f32 %v2357_v21, %v1011_v15  ;;  %v2568_v35 = vpop.f32.mrf.mxu0  ;;  %v3364_v49 = vadd.f32 %v1020_v37, %v3232_v58 }
 0x22d   : > { %2528 = vmatpush3.bf16.msra.mxu1 %v748_v51  ;;  %2796 = vpow2.f32 %v689_v47  ;;  %v3344_v36 = vadd.f32 %v1025_v29, %v3242_v0  ;;  %v1053_v47 = vsel %vm648_vm1, %v3351_v41, -inf  ;;  %v2363_v51 = vld [vmem:[%s3927_s2 + $0x78] sm:$0xff] }
 0x22e   : > { %v695_v53 = vmul.f32 1.442695, %v680_v52  ;;  %v3335_v32 = vadd.f32 %v1012_v26, %v3227_v54  ;;  %v1027_v42 = vpop.f32.mrf.mxu0  ;;  %v1036_v52 = vadd.f32 %v2568_v35, %v2363_v51 }
 0x22f   : > { %v1059_v45 = vsel %vm648_vm1, %v3344_v36, -inf  ;;  %v1028_v46 = vadd.f32 %v2361_v43, %v1027_v42 }
 0x230   : > { %2798 = vpow2.f32 %v695_v53  ;;  %v1050_v39 = vsel %vm648_vm1, %v3335_v32, -inf  ;;  %v1065_v53 = vsel %vm648_vm1, %v3361_v48, -inf }
 0x231   : > { %v3273_v56 = vpop.eup %2786  ;;  %2800 = vpow2.f32 %v691_v55  ;;  %v1056_v55 = vsel %vm648_vm1, %v3364_v49, -inf }
 0x232   : > { %v703_v57 = vsel %vm648_vm1, %v3273_v56, 0.0  ;;  %v3277_v59 = vpop.eup %2788 }
 0x233   : > { %704 = vadd.xlane.f32.xlu1 %v703_v57  ;;  %v697_v61 = vsel %vm648_vm1, %v3277_v59, 0.0  ;;  %v3374_v57 = vadd.f32 %v1028_v46, %v3259_v13 }
 0x235   : > { %v3279_v60 = vpop.eup %2790 }
 0x236   : > { %v706_v62 = vsel %vm648_vm1, %v3279_v60, 0.0  ;;  %v3285_v63 = vpop.eup %2792 }
 0x237   : > { %698 = vadd.xlane.f32.xlu1 %v697_v61  ;;  %707 = vadd.xlane.f32.xlu0 %v706_v62  ;;  %v700_v3 = vsel %vm648_vm1, %v3285_v63, 0.0  ;;  %v1062_v61 = vsel %vm648_vm1, %v3374_v57, -inf  ;;  %v3379_v62 = vadd.f32 %v1036_v52, %v3264_v22 }
 0x239   : > { %v3287_v1 = vpop.eup %2794 }
 0x23a   : > { %v715_v2 = vsel %vm648_vm1, %v3287_v1, 0.0  ;;  %v3293_v4 = vpop.eup %2796 }
 0x23b   : > { %716 = vadd.xlane.f32.xlu1 %v715_v2  ;;  %701 = vadd.xlane.f32.xlu0 %v700_v3  ;;  %v709_v7 = vsel %vm648_vm1, %v3293_v4, 0.0  ;;  %v1068_v2 = vsel %vm648_vm1, %v3379_v62, -inf }
 0x23d   : > { %v3295_v5 = vpop.eup %2798 }
 0x23e   : > { %v718_v6 = vsel %vm648_vm1, %v3295_v5, 0.0  ;;  %v3301_v8 = vpop.eup %2800 }
 0x23f   : > { %710 = vadd.xlane.f32.xlu1 %v709_v7  ;;  %719 = vadd.xlane.f32.xlu0 %v718_v6  ;;  %v712_v10 = vsel %vm648_vm1, %v3301_v8, 0.0 }
 0x243   : > { %713 = vadd.xlane.f32.xlu0 %v712_v10 }
 0x250   : > { %743 = vrot.lane.b32.xlu1 %v3156_v18, %s3001_s17 }
 0x254   : > { %741 = vrot.lane.b32.xlu1 %v3159_v19, %s3001_s17 }
 0x258   : > { %1343 = vrot.lane.b32.xlu1 %v3152_v17, %s3002_s15 }
 0x259   : > { %745 = vrot.lane.b32.xlu0 %v3152_v17, %s3001_s17  ;;  %s2426_s17 = sshll.u32 (%p3106_p7), %s2976_s24, 4 }
 0x25c   : > { %1339 = vrot.lane.b32.xlu1 %v3159_v19, %s3002_s15 }
 0x25d   : > { %1345 = vrot.lane.b32.xlu0 %v3149_v16, %s3002_s15 }
 0x260   : > { %1333 = vrot.lane.b32.xlu1 %v3156_v18, %s3003_s7 }
 0x261   : > { %1341 = vrot.lane.b32.xlu0 %v3156_v18, %s3002_s15  ;;  %s3004_s15 = smov 56  }
 0x264   : > { %1337 = vrot.lane.b32.xlu1 %v3149_v16, %s3003_s7 }
 0x265   : > { %1331 = vrot.lane.b32.xlu0 %v3159_v19, %s3003_s7 }
 0x269   : > { %1335 = vrot.lane.b32.xlu0 %v3152_v17, %s3003_s7  ;;  %s2134_s7 = sadd.s32 (%p3106_p7), %s2972_s23, %s2426_s17 }
 0x288   : > { %1051 = vmax.xlane.f32.xlu1 %v1050_v39  ;;  %1048 = vmax.xlane.f32.xlu0 %v1047_v40 }
 0x28c   : > { %1060 = vmax.xlane.f32.xlu1 %v1059_v45  ;;  %1054 = vmax.xlane.f32.xlu0 %v1053_v47  ;;  %v830_v47 = vld [vmem:[%s3929_s4] sm:$0xff] }
 0x28d   : > { %v831_v51 = vpack.c.bf16 %v830_v47, %v830_v47 }
 0x290   : > { %1066 = vmax.xlane.f32.xlu1 %v1065_v53  ;;  %1057 = vmax.xlane.f32.xlu0 %v1056_v55 }
 0x294   : > { %1063 = vmax.xlane.f32.xlu0 %v1062_v61 }
 0x298   : > { %1069 = vmax.xlane.f32.xlu0 %v1068_v2 }
 0x2a1   : > { %1145 = vrot.lane.b32.xlu1 %v3149_v16, %s3004_s15 }
 0x2bc   : > { %v705_v3 = vpop.xlane.xlu1 %704 }
 0x2c0   : > { %v699_v6 = vpop.xlane.xlu1 %698  ;;  %v708_v7 = vpop.xlane.xlu0 %707 }
 0x2c1   : > { %2802 = vrcp.f32 %v699_v6 }
 0x2c4   : > { %v717_v10 = vpop.xlane.xlu1 %716  ;;  %v702_v11 = vpop.xlane.xlu0 %701 }
 0x2c5   : > { %2804 = vrcp.f32 %v702_v11 }
 0x2c6   : > { %2806 = vrcp.f32 %v708_v7 }
 0x2c7   : > { %2808 = vrcp.f32 %v705_v3 }
 0x2c8   : > { %v711_v12 = vpop.xlane.xlu1 %710  ;;  %v720_v14 = vpop.xlane.xlu0 %719 }
 0x2c9   : > { %2810 = vrcp.f32 %v711_v12 }
 0x2cc   : > { %v714_v15 = vpop.xlane.xlu0 %713  ;;  %v744_v20 = vpop.permute.xlu1 %743 }
 0x2cd   : > { %2812 = vrcp.f32 %v714_v15 }
 0x2ce   : > { %2814 = vrcp.f32 %v720_v14  ;;  %v2803_v24 = vpop.eup %2802 }
 0x2cf   : > { %2816 = vrcp.f32 %v717_v10  ;;  %v729_v29 = vmul.f32 %v2803_v24, %v3277_v59 }
 0x2d0   : > { %v746_v21 = vpop.permute.xlu0 %745  ;;  %v742_v23 = vpop.permute.xlu1 %741 }
 0x2d1   : > { %2529 = vmatprep.subr.bf16.mxu1 %v746_v21 }
 0x2d2   : > { %2530 = vmatpush3.bf16.msra.mxu1 %v746_v21  ;;  %v2805_v25 = vpop.eup %2804 }
 0x2d3   : > { %2531 = vmatprep.subr.bf16.mxu1 %v744_v20  ;;  %v2807_v26 = vpop.eup %2806  ;;  %v730_v30 = vmul.f32 %v2805_v25, %v3285_v63 }
 0x2d4   : > { %v1346_v27 = vpop.permute.xlu0 %1345  ;;  %v1344_v28 = vpop.permute.xlu1 %1343  ;;  %v732_v37 = vmul.f32 %v2807_v26, %v3279_v60 }
 0x2d5   : > { %v1369_v31 = vsel %vm550_vm0, %v1346_v27, 0  ;;  %2689 = vmatprep.subr.msk.bf16.mxu0 %vm550_vm0, %v1346_v27  ;;  %v2809_v34 = vpop.eup %2808  ;;  %v737_v35 = vpack.c.bf16 %v730_v30, %v729_v29  ;;  %v1366_v60 = vsel %vm550_vm0, %v1344_v28, 0 }
 0x2d6   : > { %2532 = vmatpush3.bf16.msra.mxu1 %v744_v20  ;;  %2596 = vmatpush3.bf16.xpose.msra.mxu0 %v1369_v31  ;;  %v2811_v38 = vpop.eup %2810  ;;  %v731_v59 = vmul.f32 %v2809_v34, %v3273_v56 }
 0x2d7   : > { %2533 = vmatprep.subr.bf16.mxu1 %v742_v23  ;;  %2690 = vmatprep.subr.msk.bf16.mxu0 %vm550_vm0, %v1344_v28  ;;  %v733_v42 = vmul.f32 %v2811_v38, %v3293_v4 }
 0x2d8   : > { %2535 = vmatprep.mubr.msk.bf16.mxu1 %vm648_vm1, %v737_v35  ;;  %v1342_v39 = vpop.permute.xlu0 %1341  ;;  %v738_v40 = vpack.c.bf16 %v732_v37, %v731_v59  ;;  %v1340_v2 = vpop.permute.xlu1 %1339 }
 0x2d9   : > { %v1363_v61 = vsel %vm550_vm0, %v1342_v39, 0  ;;  %v1360_v3 = vsel %vm550_vm0, %v1340_v2, 0 }
 0x2da   : > { %v2813_v63 = vpop.eup %2812  ;;  %2534 = vmatpush3.bf16.msra.mxu1 %v742_v23 }
 0x2db   : > { %v734_v43 = vmul.f32 %v2813_v63, %v3301_v8  ;;  %v2815_v45 = vpop.eup %2814  ;;  %v850_v8 = vsel %vm848_vm2, %v831_v51, 0  ;;  %2683 = vmatprep.subr.msk.bf16.mxu1 %vm848_vm2, %v831_v51 }
 0x2dc   : > { %v1332_v46 = vpop.permute.xlu0 %1331  ;;  %v2817_v52 = vpop.eup %2816  ;;  %v736_v4 = vmul.f32 %v2815_v45, %v3295_v5 }
 0x2dd   : > { %2536 = vmatmul.mubr.msk.bf16.vlgmr.msra.gmra.mxu1 %vm648_vm1, %v738_v40  ;;  %2603 = vmatprep.mubr.msk.bf16.mxu0 %vm550_vm0, %v1332_v46  ;;  %v739_v56 = vpack.c.bf16 %v734_v43, %v733_v42  ;;  %v735_v53 = vmul.f32 %v2817_v52, %v3287_v1  ;;  %v1334_v5 = vpop.permute.xlu1 %1333 }
 0x2de   : > { %2598 = vmatpush3.bf16.xpose.msra.mxu0 %v1366_v60  ;;  %2544 = vmatpush3.bf16.msra.mxu1 %v850_v8 }
 0x2df   : > { %2539 = vmatprep.mubr.msk.bf16.mxu1 %vm648_vm1, %v739_v56  ;;  %2691 = vmatprep.subr.msk.bf16.mxu0 %vm550_vm0, %v1342_v39  ;;  %v740_v55 = vpack.c.bf16 %v736_v4, %v735_v53 }
 0x2e0   : > { %v1336_v6 = vpop.permute.xlu0 %1335 }
 0x2e1   : > { %v1338_v1 = vpop.permute.xlu1 %1337 }
 0x2e5   : > { %2540 = vmatmul.mubr.msk.bf16.gmra.mxu1 %vm648_vm1, %v740_v55 }
 0x2e6   : > { %2600 = vmatpush3.bf16.xpose.msra.mxu0 %v1363_v61 }
 0x2e7   : > { %2692 = vmatprep.subr.msk.bf16.mxu0 %vm550_vm0, %v1340_v2 }
 0x2ee   : > { %2602 = vmatpush3.bf16.xpose.msra.mxu0 %v1360_v3 }
 0x2f5   : > { %2604 = vmatmul.mubr.msk.bf16.vlgmr.msra.gmra.mxu0 %vm550_vm0, %v1334_v5 }
 0x2f6   : > { %2607 = vmatprep.mubr.msk.bf16.mxu0 %vm550_vm0, %v1336_v6 }
 0x2fd   : > { %2608 = vmatmul.mubr.msk.bf16.gmra.mxu0 %vm550_vm0, %v1338_v1  ;;  %v2378_v1 = vld [vmem:[%s3927_s2 + $0x90] sm:$0xff] }
 0x311   : > { %v1052_v7 = vpop.xlane.xlu1 %1051  ;;  %v1049_v10 = vpop.xlane.xlu0 %1048 }
 0x312   : > { %v1071_v11 = vsub.f32 %v3338_v33, %v1049_v10  ;;  %v1072_v20 = vsub.f32 %v3335_v32, %v1052_v7  ;;  %v2376_v7 = vld [vmem:[%s3927_s2 + $0x80] sm:$0xff] }
 0x314   : > { %v1079_v23 = vmul.f32 1.442695, %v1071_v11  ;;  %v1081_v28 = vmul.f32 1.442695, %v1072_v20  ;;  %v2379_v20 = vld [vmem:[%s3927_s2 + $0x98] sm:$0xff] }
 0x315   : > { %v1061_v12 = vpop.xlane.xlu1 %1060  ;;  %v1055_v14 = vpop.xlane.xlu0 %1054 }
 0x316   : > { %v1073_v15 = vsub.f32 %v3351_v41, %v1055_v14  ;;  %v1075_v33 = vsub.f32 %v3344_v36, %v1061_v12 }
 0x318   : > { %v1083_v21 = vmul.f32 1.442695, %v1073_v15  ;;  %v1087_v32 = vmul.f32 1.442695, %v1075_v33 }
 0x319   : > { %v1067_v24 = vpop.xlane.xlu1 %1066  ;;  %v1058_v25 = vpop.xlane.xlu0 %1057 }
 0x31a   : > { %v1077_v26 = vsub.f32 %v3361_v48, %v1067_v24  ;;  %v1074_v27 = vsub.f32 %v3364_v49, %v1058_v25  ;;  %2818 = vpow2.f32 %v1083_v21 }
 0x31b   : > { %2820 = vpow2.f32 %v1079_v23  ;;  %v2377_v23 = vld [vmem:[%s3927_s2 + $0x88] sm:$0xff] }
 0x31c   : > { %v1085_v29 = vmul.f32 1.442695, %v1074_v27  ;;  %v1091_v30 = vmul.f32 1.442695, %v1077_v26 }
 0x31d   : > { %v1064_v31 = vpop.xlane.xlu0 %1063  ;;  %v1146_v34 = vpop.permute.xlu1 %1145 }
 0x31e   : > { %2569 = vmatprep.subr.bf16.mxu1 %v1146_v34  ;;  %2822 = vpow2.f32 %v1085_v29  ;;  %v1076_v41 = vsub.f32 %v3374_v57, %v1064_v31  ;;  %v2382_v31 = vld [vmem:[%s3927_s2 + $0xb0] sm:$0xff] }
 0x31f   : > { %2824 = vpow2.f32 %v1081_v28 }
 0x320   : > { %2826 = vpow2.f32 %v1091_v30  ;;  %v1089_v37 = vmul.f32 1.442695, %v1076_v41 }
 0x321   : > { %v1070_v35 = vpop.xlane.xlu0 %1069  ;;  %2828 = vpow2.f32 %v1087_v32 }
 0x322   : > { %v1078_v48 = vsub.f32 %v3379_v62, %v1070_v35 }
 0x324   : > { %v1093_v49 = vmul.f32 1.442695, %v1078_v48 }
 0x326   : > { %2830 = vpow2.f32 %v1093_v49 }
 0x327   : > { %v3422_v38 = vpop.eup %2818  ;;  %2832 = vpow2.f32 %v1089_v37 }
 0x328   : > { %v1101_v36 = vsel %vm648_vm1, %v3422_v38, 0.0  ;;  %v3426_v39 = vpop.eup %2820 }
 0x329   : > { %1102 = vadd.xlane.f32.xlu1 %v1101_v36  ;;  %v1095_v57 = vsel %vm648_vm1, %v3426_v39, 0.0 }
 0x32b   : > { %v3428_v59 = vpop.eup %2822 }
 0x32c   : > { %v3430_v63 = vpop.eup %2824  ;;  %v1104_v62 = vsel %vm648_vm1, %v3428_v59, 0.0 }
 0x32d   : > { %v3436_v40 = vpop.eup %2826  ;;  %1096 = vadd.xlane.f32.xlu1 %v1095_v57  ;;  %1105 = vadd.xlane.f32.xlu0 %v1104_v62  ;;  %v1098_v43 = vsel %vm648_vm1, %v3430_v63, 0.0  ;;  %v2383_v62 = vld [vmem:[%s3927_s2 + $0xb8] sm:$0xff] }
 0x32e   : > { %v1113_v42 = vsel %vm648_vm1, %v3436_v40, 0.0  ;;  %v3442_v45 = vpop.eup %2828 }
 0x32f   : > { %v1107_v60 = vsel %vm648_vm1, %v3442_v45, 0.0 }
 0x331   : > { %1114 = vadd.xlane.f32.xlu1 %v1113_v42  ;;  %1099 = vadd.xlane.f32.xlu0 %v1098_v43 }
 0x333   : > { %v3444_v46 = vpop.eup %2830 }
 0x334   : > { %v1116_v47 = vsel %vm648_vm1, %v3444_v46, 0.0  ;;  %v3450_v56 = vpop.eup %2832 }
 0x335   : > { %1108 = vadd.xlane.f32.xlu1 %v1107_v60  ;;  %1117 = vadd.xlane.f32.xlu0 %v1116_v47  ;;  %v1110_v51 = vsel %vm648_vm1, %v3450_v56, 0.0 }
 0x339   : > { %1111 = vadd.xlane.f32.xlu0 %v1110_v51 }
 0x346   : > { %1141 = vrot.lane.b32.xlu1 %v3156_v18, %s3004_s15 }
 0x34a   : > { %1139 = vrot.lane.b32.xlu1 %v3159_v19, %s3004_s15 }
 0x34e   : > { %1740 = vrot.lane.b32.xlu1 %v3152_v17, %s3005_s20 }
 0x34f   : > { %1143 = vrot.lane.b32.xlu0 %v3152_v17, %s3004_s15  ;;  %s2419_s15 = sshll.u32 (%p3106_p7), %s2980_s25, 5 }
 0x350   : > { %s2136_s11 = sadd.s32 (%p3106_p7), %s2419_s15, %s2134_s7 }
 0x352   : > { %1736 = vrot.lane.b32.xlu1 %v3159_v19, %s3005_s20 }
 0x353   : > { %1742 = vrot.lane.b32.xlu0 %v3149_v16, %s3005_s20 }
 0x356   : > { %1730 = vrot.lane.b32.xlu1 %v3156_v18, %s3006_s8 }
 0x357   : > { %1738 = vrot.lane.b32.xlu0 %v3156_v18, %s3005_s20  ;;  %s3007_s20 = smov 48  }
 0x35a   : > { %1734 = vrot.lane.b32.xlu1 %v3149_v16, %s3006_s8 }
 0x35b   : > { %1728 = vrot.lane.b32.xlu0 %v3159_v19, %s3006_s8 }
 0x35f   : > { %1732 = vrot.lane.b32.xlu0 %v3152_v17, %s3006_s8  ;;  %s3741_s8 = sshll.u32 %s420_s10, 6 }
 0x360   : > { %s3750_s13 = scalar_lea.vmem [#allocation3], %s3741_s8  ;;  %s3864_s16 = scalar_lea.vmem [#allocation4], %s3741_s8 }
 0x39d   : > { %v2537_v52 = vpop.f32.mrf.mxu1 }
 0x39f   : > { %v799_v4 = vpop.f32.mrf.mxu1 }
 0x3a1   : > { %v2538_v8 = vpop.f32.mrf.mxu1 }
 0x3a2   : > { %v833_v61 = vpack.c.bf16 %v2538_v8, %v2537_v52 }
 0x3a3   : > { %v802_v53 = vpop.f32.mrf.mxu1 }
 0x3a4   : > { %v832_v55 = vpack.c.bf16 %v802_v53, %v799_v4 }
 0x3a5   : > { %v2541_v2 = vpop.f32.mrf.mxu1 }
 0x3a6   : > { %2545 = vmatprep.mubr.msk.bf16.mxu1 %vm550_vm0, %v832_v55 }
 0x3a7   : > { %v815_v3 = vpop.f32.mrf.mxu1  ;;  %2546 = vmatmul.mubr.msk.bf16.vlgmr.msra.gmra.mxu1 %vm550_vm0, %v833_v61 }
 0x3a8   : > { %2570 = vmatpush3.bf16.msra.mxu1 %v1146_v34 }
 0x3a9   : > { %v2542_v18 = vpop.f32.mrf.mxu1 }
 0x3aa   : > { %v835_v6 = vpack.c.bf16 %v2542_v18, %v2541_v2 }
 0x3ab   : > { %v818_v5 = vpop.f32.mrf.mxu1 }
 0x3ac   : > { %v834_v16 = vpack.c.bf16 %v818_v5, %v815_v3 }
 0x3ae   : > { %2549 = vmatprep.mubr.msk.bf16.mxu1 %vm550_vm0, %v834_v16 }
 0x3af   : > { %2550 = vmatmul.mubr.msk.bf16.gmra.mxu1 %vm550_vm0, %v835_v6 }
 0x3b2   : > { %v1103_v17 = vpop.xlane.xlu1 %1102 }
 0x3b5   : > { %v2605_v19 = vpop.f32.mrf.mxu0 }
 0x3b6   : > { %v1097_v10 = vpop.xlane.xlu1 %1096  ;;  %v1106_v11 = vpop.xlane.xlu0 %1105  ;;  %v1414_v14 = vadd.f32 %v2605_v19, %v2378_v1 }
 0x3b7   : > { %v1405_v12 = vpop.f32.mrf.mxu0  ;;  %2834 = vrcp.f32 %v1097_v10 }
 0x3b8   : > { %v1406_v15 = vadd.f32 %v2376_v7, %v1405_v12  ;;  %v3490_v30 = vadd.f32 %v1414_v14, %v3223_v50 }
 0x3b9   : > { %v2606_v21 = vpop.f32.mrf.mxu0 }
 0x3ba   : > { %v1115_v24 = vpop.xlane.xlu1 %1114  ;;  %v1100_v25 = vpop.xlane.xlu0 %1099  ;;  %v3485_v26 = vadd.f32 %v1406_v15, %v3214_v44  ;;  %v1417_v27 = vadd.f32 %v2606_v21, %v2379_v20  ;;  %v2380_v44 = vld [vmem:[%s3927_s2 + $0xa0] sm:$0xff]  ;;  %v1450_v57 = vsel %vm648_vm1, %v3490_v30, -inf }
 0x3bb   : > { %v1408_v28 = vpop.f32.mrf.mxu0  ;;  %2836 = vrcp.f32 %v1100_v25 }
 0x3bc   : > { %v1409_v29 = vadd.f32 %v2377_v23, %v1408_v28  ;;  %v1444_v33 = vsel %vm648_vm1, %v3485_v26, -inf  ;;  %2838 = vrcp.f32 %v1106_v11  ;;  %v3502_v50 = vadd.f32 %v1417_v27, %v3232_v58  ;;  %v2381_v58 = vld [vmem:[%s3927_s2 + $0xa8] sm:$0xff] }
 0x3bd   : > { %v2609_v34 = vpop.f32.mrf.mxu0  ;;  %1445 = vmax.xlane.f32.xlu0 %v1444_v33  ;;  %2840 = vrcp.f32 %v1103_v17  ;;  %v3555_v33 = vld [vmem:[%s3146_s19 + $0x18] sm:$0xff]  }
 0x3be   : > { %v1109_v32 = vpop.xlane.xlu1 %1108  ;;  %v1118_v41 = vpop.xlane.xlu0 %1117  ;;  %v3499_v35 = vadd.f32 %v1409_v29, %v3227_v54  ;;  %v1430_v49 = vadd.f32 %v2609_v34, %v2382_v31  ;;  %v1453_v51 = vsel %vm648_vm1, %v3502_v50, -inf }
 0x3bf   : > { %v1421_v48 = vpop.f32.mrf.mxu0  ;;  %2842 = vrcp.f32 %v1109_v32 }
 0x3c0   : > { %v1422_v37 = vadd.f32 %v2380_v44, %v1421_v48  ;;  %v1447_v36 = vsel %vm648_vm1, %v3499_v35, -inf  ;;  %v3522_v53 = vadd.f32 %v1430_v49, %v3254_v9  ;;  %v1228_v44 = vld [vmem:[%s3929_s4 + $0x8] sm:$0xff] }
 0x3c1   : > { %v2610_v54 = vpop.f32.mrf.mxu0  ;;  %1448 = vmax.xlane.f32.xlu1 %v1447_v36  ;;  %1451 = vmax.xlane.f32.xlu0 %v1450_v57  ;;  %v1229_v32 = vpack.c.bf16 %v1228_v44, %v1228_v44 }
 0x3c2   : > { %v1112_v42 = vpop.xlane.xlu0 %1111  ;;  %v3515_v43 = vadd.f32 %v1422_v37, %v3242_v0  ;;  %v1142_v47 = vpop.permute.xlu1 %1141  ;;  %v1433_v52 = vadd.f32 %v2610_v54, %v2383_v62  ;;  %v1462_v3 = vsel %vm648_vm1, %v3522_v53, -inf }
 0x3c3   : > { %2844 = vrcp.f32 %v1112_v42  ;;  %v1424_v60 = vpop.f32.mrf.mxu0 }
 0x3c4   : > { %v1425_v4 = vadd.f32 %v2381_v58, %v1424_v60  ;;  %v1456_v8 = vsel %vm648_vm1, %v3515_v43, -inf  ;;  %2846 = vrcp.f32 %v1118_v41  ;;  %v2835_v2 = vpop.eup %2834  ;;  %v3532_v9 = vadd.f32 %v1433_v52, %v3264_v22 }
 0x3c5   : > { %1457 = vmax.xlane.f32.xlu1 %v1456_v8  ;;  %1454 = vmax.xlane.f32.xlu0 %v1453_v51  ;;  %2848 = vrcp.f32 %v1115_v24  ;;  %v1127_v6 = vmul.f32 %v2835_v2, %v3426_v39  ;;  %v1247_v41 = vsel %vm848_vm2, %v1229_v32, 0 }
 0x3c6   : > { %v1144_v55 = vpop.permute.xlu0 %1143  ;;  %v3525_v0 = vadd.f32 %v1425_v4, %v3259_v13  ;;  %v1140_v61 = vpop.permute.xlu1 %1139  ;;  %v1465_v22 = vsel %vm648_vm1, %v3532_v9, -inf }
 0x3c7   : > { %2571 = vmatprep.subr.bf16.mxu1 %v1144_v55 }
 0x3c8   : > { %2572 = vmatpush3.bf16.msra.mxu1 %v1144_v55  ;;  %v1459_v18 = vsel %vm648_vm1, %v3525_v0, -inf  ;;  %v2837_v5 = vpop.eup %2836 }
 0x3c9   : > { %1463 = vmax.xlane.f32.xlu1 %v1462_v3  ;;  %1460 = vmax.xlane.f32.xlu0 %v1459_v18  ;;  %v2839_v16 = vpop.eup %2838  ;;  %v1128_v17 = vmul.f32 %v2837_v5, %v3430_v63 }
 0x3ca   : > { %v1743_v13 = vpop.permute.xlu0 %1742  ;;  %2573 = vmatprep.subr.bf16.mxu1 %v1142_v47  ;;  %v1741_v1 = vpop.permute.xlu1 %1740  ;;  %v1130_v11 = vmul.f32 %v2839_v16, %v3428_v59 }
 0x3cb   : > { %v1766_v19 = vsel %vm550_vm0, %v1743_v13, 0  ;;  %2694 = vmatprep.subr.msk.bf16.mxu0 %vm550_vm0, %v1743_v13  ;;  %v2841_v7 = vpop.eup %2840  ;;  %v1135_v10 = vpack.c.bf16 %v1128_v17, %v1127_v6  ;;  %v1763_v20 = vsel %vm550_vm0, %v1741_v1, 0 }
 0x3cc   : > { %2574 = vmatpush3.bf16.msra.mxu1 %v1142_v47  ;;  %2638 = vmatpush3.bf16.xpose.msra.mxu0 %v1766_v19  ;;  %v2843_v12 = vpop.eup %2842  ;;  %v1129_v63 = vmul.f32 %v2841_v7, %v3422_v38 }
 0x3cd   : > { %1466 = vmax.xlane.f32.xlu0 %v1465_v22  ;;  %2575 = vmatprep.subr.bf16.mxu1 %v1140_v61  ;;  %v1131_v21 = vmul.f32 %v2843_v12, %v3442_v45 }
 0x3ce   : > { %2577 = vmatprep.mubr.msk.bf16.mxu1 %vm648_vm1, %v1135_v10  ;;  %2695 = vmatprep.subr.msk.bf16.mxu0 %vm550_vm0, %v1741_v1  ;;  %v1739_v39 = vpop.permute.xlu0 %1738  ;;  %v1136_v15 = vpack.c.bf16 %v1130_v11, %v1129_v63  ;;  %v1737_v29 = vpop.permute.xlu1 %1736 }
 0x3cf   : > { %v1760_v28 = vsel %vm550_vm0, %v1739_v39, 0 }
 0x3d0   : > { %v2845_v14 = vpop.eup %2844  ;;  %2576 = vmatpush3.bf16.msra.mxu1 %v1140_v61 }
 0x3d1   : > { %v1132_v59 = vmul.f32 %v2845_v14, %v3450_v56  ;;  %v2847_v23 = vpop.eup %2846  ;;  %2688 = vmatprep.subr.msk.bf16.mxu1 %vm848_vm2, %v1229_v32 }
 0x3d2   : > { %v1729_v24 = vpop.permute.xlu0 %1728  ;;  %v2849_v27 = vpop.eup %2848  ;;  %v1134_v38 = vmul.f32 %v2847_v23, %v3444_v46  ;;  %v1757_v46 = vsel %vm550_vm0, %v1737_v29, 0 }
 0x3d3   : > { %2578 = vmatmul.mubr.msk.bf16.vlgmr.msra.gmra.mxu1 %vm648_vm1, %v1136_v15  ;;  %v1137_v25 = vpack.c.bf16 %v1132_v59, %v1131_v21  ;;  %2645 = vmatprep.mubr.msk.bf16.mxu0 %vm550_vm0, %v1729_v24  ;;  %v1133_v45 = vmul.f32 %v2849_v27, %v3436_v40  ;;  %v1731_v31 = vpop.permute.xlu1 %1730  ;;  %v3615_v15 = vld [vmem:[%s3146_s19 + $0x8] sm:$0xff]   ;;  %v3622_v21 = vld [vmem:[%s3146_s19] sm:$0xff]   ;;  %v3631_v24 = vld [vmem:[%s3146_s19 + $0x10] sm:$0xff]  }
 0x3d4   : > { %2640 = vmatpush3.bf16.xpose.msra.mxu0 %v1763_v20  ;;  %2586 = vmatpush3.bf16.msra.mxu1 %v1247_v41 }
 0x3d5   : > { %2581 = vmatprep.mubr.msk.bf16.mxu1 %vm648_vm1, %v1137_v25  ;;  %2696 = vmatprep.subr.msk.bf16.mxu0 %vm550_vm0, %v1739_v39  ;;  %v1138_v56 = vpack.c.bf16 %v1134_v38, %v1133_v45 }
 0x3d6   : > { %v1733_v40 = vpop.permute.xlu0 %1732 }
 0x3d7   : > { %v1735_v34 = vpop.permute.xlu1 %1734 }
 0x3da   : > { %1542 = vrot.lane.b32.xlu1 %v3555_v33, %s3007_s20 }
 0x3db   : > { %2582 = vmatmul.mubr.msk.bf16.gmra.mxu1 %vm648_vm1, %v1138_v56 }
 0x3dc   : > { %2642 = vmatpush3.bf16.xpose.msra.mxu0 %v1760_v28 }
 0x3dd   : > { %2697 = vmatprep.subr.msk.bf16.mxu0 %vm550_vm0, %v1737_v29 }
 0x3e4   : > { %2644 = vmatpush3.bf16.xpose.msra.mxu0 %v1757_v46 }
 0x3eb   : > { %2646 = vmatmul.mubr.msk.bf16.vlgmr.msra.gmra.mxu0 %vm550_vm0, %v1731_v31 }
 0x3ec   : > { %2649 = vmatprep.mubr.msk.bf16.mxu0 %vm550_vm0, %v1733_v40 }
 0x3f3   : > { %2650 = vmatmul.mubr.msk.bf16.gmra.mxu0 %vm550_vm0, %v1735_v34 }
 0x446   : > { %v1446_v48 = vpop.xlane.xlu0 %1445 }
 0x447   : > { %v1468_v49 = vsub.f32 %v3485_v26, %v1446_v48 }
 0x449   : > { %v1476_v54 = vmul.f32 1.442695, %v1468_v49  ;;  %v2398_v49 = vld [vmem:[%s3927_s2 + $0xd0] sm:$0xff] }
 0x44a   : > { %v1449_v37 = vpop.xlane.xlu1 %1448  ;;  %v1452_v36 = vpop.xlane.xlu0 %1451 }
 0x44b   : > { %v1470_v57 = vsub.f32 %v3490_v30, %v1452_v36  ;;  %v1469_v58 = vsub.f32 %v3499_v35, %v1449_v37  ;;  %v2396_v36 = vld [vmem:[%s3927_s2 + $0xc0] sm:$0xff] }
 0x44d   : > { %v1480_v62 = vmul.f32 1.442695, %v1470_v57  ;;  %v1478_v52 = vmul.f32 1.442695, %v1469_v58  ;;  %v2399_v58 = vld [vmem:[%s3927_s2 + $0xd8] sm:$0xff] }
 0x44e   : > { %v1458_v42 = vpop.xlane.xlu1 %1457  ;;  %v1455_v47 = vpop.xlane.xlu0 %1454 }
 0x44f   : > { %v1471_v60 = vsub.f32 %v3502_v50, %v1455_v47  ;;  %2850 = vpow2.f32 %v1480_v62  ;;  %v1472_v4 = vsub.f32 %v3515_v43, %v1458_v42  ;;  %v2397_v47 = vld [vmem:[%s3927_s2 + $0xc8] sm:$0xff] }
 0x450   : > { %2852 = vpow2.f32 %v1476_v54 }
 0x451   : > { %v1482_v51 = vmul.f32 1.442695, %v1471_v60  ;;  %v1484_v61 = vmul.f32 1.442695, %v1472_v4  ;;  %v2918_v60 = vld [vmem:[%s3211_s12] sm:$0xff] }
 0x452   : > { %v1464_v8 = vpop.xlane.xlu1 %1463  ;;  %v1461_v26 = vpop.xlane.xlu0 %1460 }
 0x453   : > { %v1474_v55 = vsub.f32 %v3522_v53, %v1464_v8  ;;  %2854 = vpow2.f32 %v1482_v51  ;;  %v1473_v35 = vsub.f32 %v3525_v0, %v1461_v26 }
 0x454   : > { %2856 = vpow2.f32 %v1478_v52 }
 0x455   : > { %v1488_v30 = vmul.f32 1.442695, %v1474_v55  ;;  %v1486_v5 = vmul.f32 1.442695, %v1473_v35  ;;  %v2919_v55 = vld [vmem:[%s3211_s12 + $0x10] sm:$0xff] }
 0x456   : > { %v1467_v2 = vpop.xlane.xlu0 %1466  ;;  %v1543_v3 = vpop.permute.xlu1 %1542 }
 0x457   : > { %2858 = vpow2.f32 %v1488_v30  ;;  %v1475_v50 = vsub.f32 %v3532_v9, %v1467_v2  ;;  %2611 = vmatprep.subr.bf16.mxu1 %v1543_v3  ;;  %v2400_v2 = vld [vmem:[%s3927_s2 + $0xe0] sm:$0xff] }
 0x458   : > { %2860 = vpow2.f32 %v1484_v61  ;;  %v2402_v61 = vld [vmem:[%s3927_s2 + $0xf0] sm:$0xff] }
 0x459   : > { %v1490_v18 = vmul.f32 1.442695, %v1475_v50 }
 0x45b   : > { %2862 = vpow2.f32 %v1490_v18 }
 0x45c   : > { %v3578_v43 = vpop.eup %2850  ;;  %2864 = vpow2.f32 %v1486_v5  ;;  %v2921_v5 = vld [vmem:[%s3211_s12 + $0x18] sm:$0xff] }
 0x45d   : > { %v1498_v53 = vsel %vm648_vm1, %v3578_v43, 0.0  ;;  %v3582_v16 = vpop.eup %2852 }
 0x45e   : > { %1499 = vadd.xlane.f32.xlu1 %v1498_v53  ;;  %v1492_v13 = vsel %vm648_vm1, %v3582_v16, 0.0 }
 0x460   : > { %v3584_v0 = vpop.eup %2854 }
 0x461   : > { %v1501_v9 = vsel %vm648_vm1, %v3584_v0, 0.0  ;;  %v3590_v6 = vpop.eup %2856 }
 0x462   : > { %1493 = vadd.xlane.f32.xlu1 %v1492_v13  ;;  %1502 = vadd.xlane.f32.xlu0 %v1501_v9  ;;  %v1495_v1 = vsel %vm648_vm1, %v3590_v6, 0.0 }
 0x464   : > { %v3592_v17 = vpop.eup %2858 }
 0x465   : > { %v1510_v19 = vsel %vm648_vm1, %v3592_v17, 0.0  ;;  %v3598_v7 = vpop.eup %2860 }
 0x466   : > { %1511 = vadd.xlane.f32.xlu1 %v1510_v19  ;;  %1496 = vadd.xlane.f32.xlu0 %v1495_v1  ;;  %v1504_v11 = vsel %vm648_vm1, %v3598_v7, 0.0 }
 0x467   : > { %v3610_v63 = vpop.f32.mrf.mxu1 }
 0x468   : > { %v3600_v22 = vpop.eup %2862 }
 0x469   : > { %v1513_v10 = vsel %vm648_vm1, %v3600_v22, 0.0  ;;  %v3606_v12 = vpop.eup %2864  ;;  %v3612_v14 = vpop.f32.mrf.mxu1 }
 0x46a   : > { %1505 = vadd.xlane.f32.xlu1 %v1504_v11  ;;  %1514 = vadd.xlane.f32.xlu0 %v1513_v10  ;;  %v1507_v39 = vsel %vm648_vm1, %v3606_v12, 0.0  ;;  %v2403_v10 = vld [vmem:[%s3927_s2 + $0xf8] sm:$0xff] }
 0x46b   : > { %v3619_v20 = vpop.f32.mrf.mxu1 }
 0x46d   : > { %v3626_v59 = vpop.f32.mrf.mxu1 }
 0x46e   : > { %1508 = vadd.xlane.f32.xlu0 %v1507_v39  ;;  %v2401_v39 = vld [vmem:[%s3927_s2 + $0xe8] sm:$0xff] }
 0x46f   : > { %v3628_v23 = vpop.f32.mrf.mxu1 }
 0x471   : > { %v3635_v25 = vpop.f32.mrf.mxu1 }
 0x473   : > { %v3637_v27 = vpop.f32.mrf.mxu1 }
 0x475   : > { %v3639_v38 = vpop.f32.mrf.mxu1 }
 0x47b   : > { %1538 = vrot.lane.b32.xlu1 %v3615_v15, %s3007_s20 }
 0x47f   : > { %1536 = vrot.lane.b32.xlu1 %v3622_v21, %s3007_s20 }
 0x484   : > { %1540 = vrot.lane.b32.xlu0 %v3631_v24, %s3007_s20 }
 0x493   : > { %v2579_v45 = vpop.f32.mrf.mxu1 }
 0x495   : > { %v1197_v28 = vpop.f32.mrf.mxu1 }
 0x497   : > { %v2580_v56 = vpop.f32.mrf.mxu1 }
 0x498   : > { %v1231_v31 = vpack.c.bf16 %v2580_v56, %v2579_v45  ;;  %v2922_v45 = vld [vmem:[%s3211_s12 + $0x20] sm:$0xff] }
 0x499   : > { %v1200_v29 = vpop.f32.mrf.mxu1 }
 0x49a   : > { %v1230_v46 = vpack.c.bf16 %v1200_v29, %v1197_v28 }
 0x49b   : > { %v2583_v40 = vpop.f32.mrf.mxu1 }
 0x49c   : > { %2587 = vmatprep.mubr.msk.bf16.mxu1 %vm550_vm0, %v1230_v46 }
 0x49d   : > { %v1213_v34 = vpop.f32.mrf.mxu1  ;;  %2588 = vmatmul.mubr.msk.bf16.vlgmr.msra.gmra.mxu1 %vm550_vm0, %v1231_v31 }
 0x49e   : > { %2612 = vmatpush3.bf16.msra.mxu1 %v1543_v3  ;;  %v2920_v3 = vld [vmem:[%s3211_s12 + $0x8] sm:$0xff] }
 0x49f   : > { %v2584_v44 = vpop.f32.mrf.mxu1 }
 0x4a0   : > { %v1233_v48 = vpack.c.bf16 %v2584_v44, %v2583_v40 }
 0x4a1   : > { %v1216_v32 = vpop.f32.mrf.mxu1 }
 0x4a2   : > { %v1232_v41 = vpack.c.bf16 %v1216_v32, %v1213_v34  ;;  %v2923_v34 = vld [vmem:[%s3211_s12 + $0x30] sm:$0xff]  ;;  %v2924_v32 = vld [vmem:[%s3211_s12 + $0x28] sm:$0xff] }
 0x4a4   : > { %2591 = vmatprep.mubr.msk.bf16.mxu1 %vm550_vm0, %v1232_v41 }
 0x4a5   : > { %2592 = vmatmul.mubr.msk.bf16.gmra.mxu1 %vm550_vm0, %v1233_v48 }
 0x4ab   : > { %v2647_v37 = vpop.f32.mrf.mxu0 }
 0x4ac   : > { %v1811_v62 = vadd.f32 %v2647_v37, %v2398_v49  ;;  %v2925_v37 = vld [vmem:[%s3211_s12 + $0x38] sm:$0xff] }
 0x4ad   : > { %v1802_v57 = vpop.f32.mrf.mxu0 }
 0x4ae   : > { %v1803_v54 = vadd.f32 %v2396_v36, %v1802_v57  ;;  %v3663_v30 = vadd.f32 %v2919_v55, %v1811_v62 }
 0x4af   : > { %v2648_v42 = vpop.f32.mrf.mxu0 }
 0x4b0   : > { %v3658_v51 = vadd.f32 %v2918_v60, %v1803_v54  ;;  %v1814_v52 = vadd.f32 %v2648_v42, %v2399_v58  ;;  %v1847_v1 = vsel %vm648_vm1, %v3663_v30, -inf }
 0x4b1   : > { %v1805_v4 = vpop.f32.mrf.mxu0 }
 0x4b2   : > { %v1806_v8 = vadd.f32 %v2397_v47, %v1805_v4  ;;  %v1841_v26 = vsel %vm648_vm1, %v3658_v51, -inf  ;;  %v3675_v53 = vadd.f32 %v2921_v5, %v1814_v52 }
 0x4b3   : > { %v2651_v35 = vpop.f32.mrf.mxu0  ;;  %1842 = vmax.xlane.f32.xlu0 %v1841_v26 }
 0x4b4   : > { %v3672_v50 = vadd.f32 %v2920_v3, %v1806_v8  ;;  %v1827_v13 = vadd.f32 %v2651_v35, %v2402_v61  ;;  %v1850_v29 = vsel %vm648_vm1, %v3675_v53, -inf }
 0x4b5   : > { %v1818_v18 = vpop.f32.mrf.mxu0 }
 0x4b6   : > { %v1819_v9 = vadd.f32 %v2400_v2, %v1818_v18  ;;  %v1844_v19 = vsel %vm648_vm1, %v3672_v50, -inf  ;;  %v3695_v44 = vadd.f32 %v2923_v34, %v1827_v13  ;;  %v1625_v18 = vld [vmem:[%s3929_s4 + $0x10] sm:$0xff] }
 0x4b7   : > { %v2652_v11 = vpop.f32.mrf.mxu0  ;;  %1845 = vmax.xlane.f32.xlu1 %v1844_v19  ;;  %1848 = vmax.xlane.f32.xlu0 %v1847_v1  ;;  %v1626_v19 = vpack.c.bf16 %v1625_v18, %v1625_v18 }
 0x4b8   : > { %v3688_v28 = vadd.f32 %v2922_v45, %v1819_v9  ;;  %v1830_v46 = vadd.f32 %v2652_v11, %v2403_v10  ;;  %v1859_v48 = vsel %vm648_vm1, %v3695_v44, -inf }
 0x4b9   : > { %v1821_v56 = vpop.f32.mrf.mxu0  ;;  %v1644_v45 = vsel %vm848_vm2, %v1626_v19, 0 }
 0x4ba   : > { %v1822_v31 = vadd.f32 %v2401_v39, %v1821_v56  ;;  %v1853_v40 = vsel %vm648_vm1, %v3688_v28, -inf  ;;  %v3705_v36 = vadd.f32 %v2925_v37, %v1830_v46 }
 0x4bb   : > { %1854 = vmax.xlane.f32.xlu1 %v1853_v40  ;;  %1851 = vmax.xlane.f32.xlu0 %v1850_v29 }
 0x4bc   : > { %v3698_v41 = vadd.f32 %v2924_v32, %v1822_v31  ;;  %v1862_v57 = vsel %vm648_vm1, %v3705_v36, -inf }
 0x4be   : > { %v1856_v49 = vsel %vm648_vm1, %v3698_v41, -inf }
 0x4bf   : > { %1860 = vmax.xlane.f32.xlu1 %v1859_v48  ;;  %1857 = vmax.xlane.f32.xlu0 %v1856_v49 }
 0x4c3   : > { %1863 = vmax.xlane.f32.xlu0 %v1862_v57 }
 0x4d0   : > { %1939 = vrot.lane.b32.xlu1 %v3555_v33, %s3008_s9 }
 0x4e7   : > { %v1500_v62 = vpop.xlane.xlu1 %1499 }
 0x4eb   : > { %v1494_v54 = vpop.xlane.xlu1 %1493  ;;  %v1503_v58 = vpop.xlane.xlu0 %1502 }
 0x4ec   : > { %2866 = vrcp.f32 %v1494_v54 }
 0x4ef   : > { %v1512_v42 = vpop.xlane.xlu1 %1511  ;;  %v1497_v47 = vpop.xlane.xlu0 %1496 }
 0x4f0   : > { %2868 = vrcp.f32 %v1497_v47 }
 0x4f1   : > { %2870 = vrcp.f32 %v1503_v58 }
 0x4f2   : > { %2872 = vrcp.f32 %v1500_v62 }
 0x4f3   : > { %v1506_v60 = vpop.xlane.xlu1 %1505  ;;  %v1515_v52 = vpop.xlane.xlu0 %1514 }
 0x4f4   : > { %2874 = vrcp.f32 %v1506_v60 }
 0x4f7   : > { %v1509_v4 = vpop.xlane.xlu0 %1508  ;;  %v1539_v8 = vpop.permute.xlu1 %1538 }
 0x4f8   : > { %2876 = vrcp.f32 %v1509_v4 }
 0x4f9   : > { %2878 = vrcp.f32 %v1515_v52  ;;  %v2867_v55 = vpop.eup %2866 }
 0x4fa   : > { %2880 = vrcp.f32 %v1512_v42  ;;  %v1524_v35 = vmul.f32 %v2867_v55, %v3582_v16  ;;  %v3756_v55 = vld [vmem:[%s3930_s5] ss:$0 sm:$0xff] }
 0x4fb   : > { %v1541_v26 = vpop.permute.xlu0 %1540  ;;  %v1537_v3 = vpop.permute.xlu1 %1536 }
 0x4fc   : > { %2613 = vmatprep.subr.bf16.mxu1 %v1541_v26 }
 0x4fd   : > { %2614 = vmatpush3.bf16.msra.mxu1 %v1541_v26  ;;  %v2869_v33 = vpop.eup %2868 }
 0x4fe   : > { %2615 = vmatprep.subr.bf16.mxu1 %v1539_v8  ;;  %v2871_v61 = vpop.eup %2870  ;;  %v1525_v2 = vmul.f32 %v2869_v33, %v3590_v6 }
 0x4ff   : > { %v2873_v5 = vpop.eup %2872  ;;  %v1527_v9 = vmul.f32 %v2871_v61, %v3584_v0  ;;  %v495_v61 = vld [vmem:[%s3750_s13] sm:$0xff] }
 0x500   : > { %v1532_v13 = vpack.c.bf16 %v1525_v2, %v1524_v35  ;;  %v1526_v10 = vmul.f32 %v2873_v5, %v3578_v43  ;;  %v498_v5 = vld [vmem:[%s3750_s13 + $0x18] sm:$0xff] }
 0x501   : > { %2616 = vmatpush3.bf16.msra.mxu1 %v1539_v8  ;;  %v2875_v1 = vpop.eup %2874 }
 0x502   : > { %2617 = vmatprep.subr.bf16.mxu1 %v1537_v3  ;;  %2619 = vmatprep.mubr.msk.bf16.mxu1 %vm648_vm1, %v1532_v13  ;;  %v1533_v6 = vpack.c.bf16 %v1527_v9, %v1526_v10  ;;  %v1528_v11 = vmul.f32 %v2875_v1, %v3598_v7  ;;  %v510_v9 = vadd.f32 %v3756_v55, %v495_v61 }
 0x505   : > { %v2877_v16 = vpop.eup %2876  ;;  %2618 = vmatpush3.bf16.msra.mxu1 %v1537_v3 }
 0x506   : > { %v1529_v39 = vmul.f32 %v2877_v16, %v3606_v12  ;;  %2693 = vmatprep.subr.msk.bf16.mxu1 %vm848_vm2, %v1626_v19  ;;  %v2879_v56 = vpop.eup %2878  ;;  %v496_v19 = vld [vmem:[%s3750_s13 + $0x8] sm:$0xff]  ;;  %v513_v16 = vadd.f32 %v3756_v55, %v498_v5 }
 0x507   : > { %v2881_v29 = vpop.eup %2880  ;;  %v1531_v43 = vmul.f32 %v2879_v56, %v3600_v22 }
 0x508   : > { %2620 = vmatmul.mubr.msk.bf16.vlgmr.msra.gmra.mxu1 %vm648_vm1, %v1533_v6  ;;  %v1534_v0 = vpack.c.bf16 %v1529_v39, %v1528_v11  ;;  %v1530_v46 = vmul.f32 %v2881_v29, %v3592_v17  ;;  %v501_v39 = vld [vmem:[%s3750_s13 + $0x30] sm:$0xff]  ;;  %v511_v29 = vadd.f32 %v3756_v55, %v496_v19 }
 0x509   : > { %2628 = vmatpush3.bf16.msra.mxu1 %v1644_v45 }
 0x50a   : > { %2623 = vmatprep.mubr.msk.bf16.mxu1 %vm648_vm1, %v1534_v0  ;;  %v1535_v31 = vpack.c.bf16 %v1531_v43, %v1530_v46  ;;  %v917_v0 = vadd.f32 %v3612_v14, %v510_v9  ;;  %v502_v14 = vld [vmem:[%s3750_s13 + $0x38] sm:$0xff] }
 0x510   : > { %2624 = vmatmul.mubr.msk.bf16.gmra.mxu1 %vm648_vm1, %v1535_v31 }
 0x53c   : > { %v1843_v7 = vpop.xlane.xlu0 %1842 }
 0x53d   : > { %v1865_v12 = vsub.f32 %v3658_v51, %v1843_v7  ;;  %v920_v7 = vadd.f32 %v3619_v20, %v513_v16 }
 0x53f   : > { %v1873_v49 = vmul.f32 1.442695, %v1865_v12  ;;  %v516_v12 = vadd.f32 %v3756_v55, %v501_v39 }
 0x540   : > { %v1846_v40 = vpop.xlane.xlu1 %1845  ;;  %v1849_v34 = vpop.xlane.xlu0 %1848 }
 0x541   : > { %v1867_v32 = vsub.f32 %v3663_v30, %v1849_v34  ;;  %v1866_v37 = vsub.f32 %v3672_v50, %v1846_v40 }
 0x543   : > { %v1877_v48 = vmul.f32 1.442695, %v1867_v32  ;;  %v1875_v54 = vmul.f32 1.442695, %v1866_v37 }
 0x544   : > { %v1855_v57 = vpop.xlane.xlu1 %1854  ;;  %v1852_v62 = vpop.xlane.xlu0 %1851 }
 0x545   : > { %v1868_v22 = vsub.f32 %v3675_v53, %v1852_v62  ;;  %2882 = vpow2.f32 %v1877_v48  ;;  %v1869_v58 = vsub.f32 %v3688_v28, %v1855_v57  ;;  %v923_v62 = vadd.f32 %v3628_v23, %v516_v12 }
 0x546   : > { %2884 = vpow2.f32 %v1873_v49  ;;  %v918_v49 = vadd.f32 %v3626_v59, %v511_v29 }
 0x547   : > { %v1879_v17 = vmul.f32 1.442695, %v1868_v22  ;;  %v1881_v60 = vmul.f32 1.442695, %v1869_v58  ;;  %v517_v22 = vadd.f32 %v3756_v55, %v502_v14 }
 0x548   : > { %v1861_v51 = vpop.xlane.xlu1 %1860  ;;  %v1858_v42 = vpop.xlane.xlu0 %1857 }
 0x549   : > { %v1871_v47 = vsub.f32 %v3695_v44, %v1861_v51  ;;  %2886 = vpow2.f32 %v1879_v17  ;;  %v1870_v50 = vsub.f32 %v3698_v41, %v1858_v42 }
 0x54a   : > { %2888 = vpow2.f32 %v1875_v54 }
 0x54b   : > { %v1885_v30 = vmul.f32 1.442695, %v1871_v47  ;;  %v1883_v44 = vmul.f32 1.442695, %v1870_v50  ;;  %v924_v47 = vadd.f32 %v3637_v27, %v517_v22 }
 0x54c   : > { %v1864_v52 = vpop.xlane.xlu0 %1863  ;;  %v3735_v4 = vpop.permute.xlu1 %1939 }
 0x54d   : > { %2890 = vpow2.f32 %v1885_v30  ;;  %v1872_v53 = vsub.f32 %v3705_v36, %v1864_v52  ;;  %2653 = vmatprep.subr.bf16.mxu1 %v3735_v4  ;;  %v497_v36 = vld [vmem:[%s3750_s13 + $0x10] sm:$0xff] }
 0x54e   : > { %2892 = vpow2.f32 %v1881_v60  ;;  %v512_v35 = vadd.f32 %v3756_v55, %v497_v36 }
 0x54f   : > { %v1887_v28 = vmul.f32 1.442695, %v1872_v53 }
 0x550   : > { %v919_v10 = vadd.f32 %v3610_v63, %v512_v35  ;;  %v499_v63 = vld [vmem:[%s3750_s13 + $0x20] sm:$0xff] }
 0x551   : > { %2894 = vpow2.f32 %v1887_v28  ;;  %v514_v37 = vadd.f32 %v3756_v55, %v499_v63 }
 0x552   : > { %v3743_v8 = vpop.eup %2882  ;;  %2896 = vpow2.f32 %v1883_v44 }
 0x553   : > { %v1895_v41 = vsel %vm648_vm1, %v3743_v8, 0.0  ;;  %v3747_v26 = vpop.eup %2884  ;;  %v921_v51 = vadd.f32 %v3635_v25, %v514_v37 }
 0x554   : > { %1896 = vadd.xlane.f32.xlu1 %v1895_v41  ;;  %v1889_v2 = vsel %vm648_vm1, %v3747_v26, 0.0 }
 0x556   : > { %v3758_v33 = vpop.eup %2886 }
 0x557   : > { %v1898_v3 = vsel %vm648_vm1, %v3758_v33, 0.0  ;;  %v3766_v18 = vpop.eup %2888 }
 0x558   : > { %1890 = vadd.xlane.f32.xlu1 %v1889_v2  ;;  %1899 = vadd.xlane.f32.xlu0 %v1898_v3  ;;  %v1892_v6 = vsel %vm648_vm1, %v3766_v18, 0.0 }
 0x55a   : > { %v3769_v13 = vpop.eup %2890 }
 0x55b   : > { %v1907_v1 = vsel %vm648_vm1, %v3769_v13, 0.0  ;;  %v3779_v11 = vpop.eup %2892 }
 0x55c   : > { %1908 = vadd.xlane.f32.xlu1 %v1907_v1  ;;  %1893 = vadd.xlane.f32.xlu0 %v1892_v6  ;;  %v1901_v34 = vsel %vm648_vm1, %v3779_v11, 0.0 }
 0x55d   : > { %v2589_v45 = vpop.f32.mrf.mxu1 }
 0x55e   : > { %v3782_v56 = vpop.eup %2894  ;;  %v3786_v43 = vadd.f32 %v2589_v45, %v919_v10 }
 0x55f   : > { %v1283_v46 = vpop.f32.mrf.mxu1  ;;  %v1910_v31 = vsel %vm648_vm1, %v3782_v56, 0.0  ;;  %v3797_v32 = vpop.eup %2896 }
 0x560   : > { %v3793_v40 = vadd.f32 %v1283_v46, %v917_v0  ;;  %1902 = vadd.xlane.f32.xlu1 %v1901_v34  ;;  %1911 = vadd.xlane.f32.xlu0 %v1910_v31  ;;  %v1904_v54 = vsel %vm648_vm1, %v3797_v32, 0.0 }
 0x561   : > { %v2590_v48 = vpop.f32.mrf.mxu1 }
 0x562   : > { %v3802_v57 = vadd.f32 %v2590_v48, %v920_v7 }
 0x563   : > { %v1286_v20 = vpop.f32.mrf.mxu1 }
 0x564   : > { %v3806_v17 = vadd.f32 %v1286_v20, %v918_v49  ;;  %1905 = vadd.xlane.f32.xlu0 %v1904_v54 }
 0x565   : > { %v2593_v58 = vpop.f32.mrf.mxu1 }
 0x566   : > { %v3811_v42 = vadd.f32 %v2593_v58, %v923_v62 }
 0x567   : > { %v1299_v59 = vpop.f32.mrf.mxu1 }
 0x568   : > { %v3814_v30 = vadd.f32 %v1299_v59, %v921_v51 }
 0x569   : > { %v2594_v60 = vpop.f32.mrf.mxu1 }
 0x56a   : > { %v3816_v23 = vadd.f32 %v2594_v60, %v924_v47 }
 0x56b   : > { %v3824_v25 = vpop.f32.mrf.mxu1 }
 0x571   : > { %1935 = vrot.lane.b32.xlu1 %v3615_v15, %s3008_s9 }
 0x575   : > { %1933 = vrot.lane.b32.xlu1 %v3622_v21, %s3008_s9 }
 0x57a   : > { %1937 = vrot.lane.b32.xlu0 %v3631_v24, %s3008_s9  ;;  %s2420_s9 = sshll.u32 (%p3106_p7), %s2136_s11, 3 }
 0x57b   : > { %s2138_s8 = scalar_lea.vmem (%p3106_p7), %s3931_s6, %s2420_s9 }
 0x5c8   : > { %v2621_v50 = vpop.f32.mrf.mxu1 }
 0x5ca   : > { %v1594_v52 = vpop.f32.mrf.mxu1 }
 0x5cc   : > { %v2622_v53 = vpop.f32.mrf.mxu1 }
 0x5cd   : > { %v1628_v44 = vpack.c.bf16 %v2622_v53, %v2621_v50 }
 0x5ce   : > { %v1597_v27 = vpop.f32.mrf.mxu1 }
 0x5cf   : > { %v1627_v28 = vpack.c.bf16 %v1597_v27, %v1594_v52 }
 0x5d0   : > { %v2625_v41 = vpop.f32.mrf.mxu1 }
 0x5d1   : > { %2629 = vmatprep.mubr.msk.bf16.mxu1 %vm550_vm0, %v1627_v28 }
 0x5d2   : > { %v1610_v36 = vpop.f32.mrf.mxu1  ;;  %2630 = vmatmul.mubr.msk.bf16.vlgmr.msra.gmra.mxu1 %vm550_vm0, %v1628_v44 }
 0x5d3   : > { %2654 = vmatpush3.bf16.msra.mxu1 %v3735_v4 }
 0x5d4   : > { %v2626_v15 = vpop.f32.mrf.mxu1 }
 0x5d5   : > { %v1630_v24 = vpack.c.bf16 %v2626_v15, %v2625_v41 }
 0x5d6   : > { %v1613_v21 = vpop.f32.mrf.mxu1 }
 0x5d7   : > { %v1629_v61 = vpack.c.bf16 %v1613_v21, %v1610_v36 }
 0x5d9   : > { %2633 = vmatprep.mubr.msk.bf16.mxu1 %vm550_vm0, %v1629_v61 }
 0x5da   : > { %2634 = vmatmul.mubr.msk.bf16.gmra.mxu1 %vm550_vm0, %v1630_v24 }
 0x5dd   : > { %v1897_v35 = vpop.xlane.xlu1 %1896 }
 0x5e1   : > { %v1891_v2 = vpop.xlane.xlu1 %1890  ;;  %v1900_v3 = vpop.xlane.xlu0 %1899 }
 0x5e2   : > { %2898 = vrcp.f32 %v1891_v2 }
 0x5e5   : > { %v1909_v5 = vpop.xlane.xlu1 %1908  ;;  %v1894_v9 = vpop.xlane.xlu0 %1893 }
 0x5e6   : > { %2900 = vrcp.f32 %v1894_v9 }
 0x5e7   : > { %2902 = vrcp.f32 %v1900_v3 }
 0x5e8   : > { %2904 = vrcp.f32 %v1897_v35 }
 0x5e9   : > { %v1903_v19 = vpop.xlane.xlu1 %1902  ;;  %v1912_v1 = vpop.xlane.xlu0 %1911 }
 0x5ea   : > { %2906 = vrcp.f32 %v1903_v19 }
 0x5ed   : > { %v1906_v4 = vpop.xlane.xlu0 %1905  ;;  %v1936_v10 = vpop.permute.xlu1 %1935 }
 0x5ee   : > { %2908 = vrcp.f32 %v1906_v4 }
 0x5ef   : > { %2910 = vrcp.f32 %v1912_v1  ;;  %v2899_v6 = vpop.eup %2898 }
 0x5f0   : > { %2912 = vrcp.f32 %v1909_v5  ;;  %v1921_v0 = vmul.f32 %v2899_v6, %v3747_v26 }
 0x5f1   : > { %v1938_v16 = vpop.permute.xlu0 %1937  ;;  %v1934_v63 = vpop.permute.xlu1 %1933 }
 0x5f2   : > { %2655 = vmatprep.subr.bf16.mxu1 %v1938_v16 }
 0x5f3   : > { %2656 = vmatpush3.bf16.msra.mxu1 %v1938_v16  ;;  %v2901_v39 = vpop.eup %2900 }
 0x5f4   : > { %2657 = vmatprep.subr.bf16.mxu1 %v1936_v10  ;;  %v2903_v45 = vpop.eup %2902  ;;  %v1922_v29 = vmul.f32 %v2901_v39, %v3766_v18 }
 0x5f5   : > { %v2905_v46 = vpop.eup %2904  ;;  %v1924_v7 = vmul.f32 %v2903_v45, %v3758_v33 }
 0x5f6   : > { %v1929_v31 = vpack.c.bf16 %v1922_v29, %v1921_v0  ;;  %v1923_v34 = vmul.f32 %v2905_v46, %v3743_v8 }
 0x5f7   : > { %2658 = vmatpush3.bf16.msra.mxu1 %v1936_v10  ;;  %v2907_v12 = vpop.eup %2906 }
 0x5f8   : > { %2659 = vmatprep.subr.bf16.mxu1 %v1934_v63  ;;  %2661 = vmatprep.mubr.msk.bf16.mxu1 %vm648_vm1, %v1929_v31  ;;  %v1930_v48 = vpack.c.bf16 %v1924_v7, %v1923_v34  ;;  %v1925_v49 = vmul.f32 %v2907_v12, %v3779_v11  ;;  %v2022_v11 = vld [vmem:[%s3929_s4 + $0x18] sm:$0xff] }
 0x5fb   : > { %v2909_v14 = vpop.eup %2908  ;;  %2660 = vmatpush3.bf16.msra.mxu1 %v1934_v63 }
 0x5fc   : > { %v1926_v26 = vmul.f32 %v2909_v14, %v3797_v32  ;;  %v2911_v18 = vpop.eup %2910  ;;  %v2023_v32 = vpack.c.bf16 %v2022_v11, %v2022_v11 }
 0x5fd   : > { %v2913_v20 = vpop.eup %2912  ;;  %v1928_v33 = vmul.f32 %v2911_v18, %v3782_v56 }
 0x5fe   : > { %2662 = vmatmul.mubr.msk.bf16.vlgmr.msra.gmra.mxu1 %vm648_vm1, %v1930_v48  ;;  %v1931_v37 = vpack.c.bf16 %v1926_v26, %v1925_v49  ;;  %v1927_v62 = vmul.f32 %v2913_v20, %v3769_v13  ;;  %2698 = vmatprep.subr.msk.bf16.mxu1 %vm848_vm2, %v2023_v32  ;;  %v2041_v22 = vsel %vm848_vm2, %v2023_v32, 0  ;;  %v500_v13 = vld [vmem:[%s3750_s13 + $0x28] sm:$0xff] }
 0x5ff   : > { %2670 = vmatpush3.bf16.msra.mxu1 %v2041_v22  ;;  %v515_v50 = vadd.f32 %v3756_v55, %v500_v13 }
 0x600   : > { %2665 = vmatprep.mubr.msk.bf16.mxu1 %vm648_vm1, %v1931_v37  ;;  %v1932_v8 = vpack.c.bf16 %v1928_v33, %v1927_v62 }
 0x601   : > { %v922_v44 = vadd.f32 %v3639_v38, %v515_v50 }
 0x606   : > { %2666 = vmatmul.mubr.msk.bf16.gmra.mxu1 %vm648_vm1, %v1932_v8 }
 0x692   : > { %v2631_v54 = vpop.f32.mrf.mxu1 }
 0x693   : > { %v1713_v58 = vadd.f32 %v2631_v54, %v3786_v43 }
 0x694   : > { %v1680_v51 = vpop.f32.mrf.mxu1 }
 0x695   : > { %v1711_v56 = vadd.f32 %v1680_v51, %v3793_v40  ;;  %v1319_v40 = vadd.f32 %v3824_v25, %v922_v44 }
 0x696   : > { %v2632_v59 = vpop.f32.mrf.mxu1 }
 0x697   : > { %v1714_v47 = vadd.f32 %v2632_v59, %v3802_v57 }
 0x698   : > { %v1683_v60 = vpop.f32.mrf.mxu1 }
 0x699   : > { %v1712_v52 = vadd.f32 %v1683_v60, %v3806_v17 }
 0x69a   : > { %v2635_v53 = vpop.f32.mrf.mxu1 }
 0x69b   : > { %v1717_v27 = vadd.f32 %v2635_v53, %v3811_v42 }
 0x69c   : > { %v1696_v28 = vpop.f32.mrf.mxu1 }
 0x69d   : > { %v1715_v43 = vadd.f32 %v1696_v28, %v3814_v30 }
 0x69e   : > { %v2636_v41 = vpop.f32.mrf.mxu1 }
 0x69f   : > { %v1718_v36 = vadd.f32 %v2636_v41, %v3816_v23 }
 0x6a0   : > { %v1699_v15 = vpop.f32.mrf.mxu1 }
 0x6a1   : > { %v1716_v57 = vadd.f32 %v1699_v15, %v1319_v40 }
 0x6be   : > { %v2663_v21 = vpop.f32.mrf.mxu1 }
 0x6c0   : > { %v1991_v61 = vpop.f32.mrf.mxu1 }
 0x6c2   : > { %v2664_v55 = vpop.f32.mrf.mxu1 }
 0x6c3   : > { %v2025_v35 = vpack.c.bf16 %v2664_v55, %v2663_v21 }
 0x6c4   : > { %v1994_v24 = vpop.f32.mrf.mxu1 }
 0x6c5   : > { %v2024_v17 = vpack.c.bf16 %v1994_v24, %v1991_v61 }
 0x6c6   : > { %v2667_v42 = vpop.f32.mrf.mxu1 }
 0x6c7   : > { %2671 = vmatprep.mubr.msk.bf16.mxu1 %vm550_vm0, %v2024_v17 }
 0x6c8   : > { %v2007_v38 = vpop.f32.mrf.mxu1  ;;  %2672 = vmatmul.mubr.msk.bf16.vlgmr.msra.gmra.mxu1 %vm550_vm0, %v2025_v35 }
 0x6ca   : > { %v2668_v30 = vpop.f32.mrf.mxu1 }
 0x6cb   : > { %v2027_v3 = vpack.c.bf16 %v2668_v30, %v2667_v42 }
 0x6cc   : > { %v2010_v2 = vpop.f32.mrf.mxu1 }
 0x6cd   : > { %v2026_v25 = vpack.c.bf16 %v2010_v2, %v2007_v38 }
 0x6cf   : > { %2675 = vmatprep.mubr.msk.bf16.mxu1 %vm550_vm0, %v2026_v25 }
 0x6d0   : > { %2676 = vmatmul.mubr.msk.bf16.gmra.mxu1 %vm550_vm0, %v2027_v3 }
 0x788   : > { %v2673_v23 = vpop.f32.mrf.mxu1 }
 0x789   : > { %v2110_v5 = vadd.f32 %v2673_v23, %v1713_v58 }
 0x78a   : > { %v2077_v9 = vpop.f32.mrf.mxu1 }
 0x78b   : > { %2119 = vst.msk [vmem:[%s3864_s16 + $0x10] sm:$0xff] %vm2116_vm3, %v2110_v5  ;;  %v2108_v19 = vadd.f32 %v2077_v9, %v1711_v56 }
 0x78c   : > { %v2674_v1 = vpop.f32.mrf.mxu1 }
 0x78d   : > { %2117 = vst.msk [vmem:[%s3864_s16] sm:$0xff] %vm2116_vm3, %v2108_v19  ;;  %v2111_v4 = vadd.f32 %v2674_v1, %v1714_v47 }
 0x78e   : > { %v2080_v10 = vpop.f32.mrf.mxu1 }
 0x78f   : > { %2120 = vst.msk [vmem:[%s3864_s16 + $0x18] sm:$0xff] %vm2116_vm3, %v2111_v4  ;;  %v2109_v16 = vadd.f32 %v2080_v10, %v1712_v52 }
 0x790   : > { %v2677_v6 = vpop.f32.mrf.mxu1 }
 0x791   : > { %2118 = vst.msk [vmem:[%s3864_s16 + $0x8] sm:$0xff] %vm2116_vm3, %v2109_v16  ;;  %v2114_v39 = vadd.f32 %v2677_v6, %v1717_v27 }
 0x792   : > { %v2093_v45 = vpop.f32.mrf.mxu1  ;;  %v2185_v34 = vld [vmem:[%s3864_s16 + $0x10] sm:$0xff] (%p3106_p7) }
 0x793   : > { %2123 = vst.msk [vmem:[%s3864_s16 + $0x30] sm:$0xff] %vm2116_vm3, %v2114_v39  ;;  %v2112_v0 = vadd.f32 %v2093_v45, %v1715_v43  ;;  %2186 = vst [vmem:[%s2138_s8 + $0x20] sm:$0xff] (%p3106_p7), %v2185_v34 }
 0x794   : > { %v2678_v29 = vpop.f32.mrf.mxu1  ;;  %v2181_v7 = vld [vmem:[%s3864_s16] sm:$0xff] (%p3106_p7) }
 0x795   : > { %2121 = vst.msk [vmem:[%s3864_s16 + $0x20] sm:$0xff] %vm2116_vm3, %v2112_v0  ;;  %v2115_v63 = vadd.f32 %v2678_v29, %v1718_v36  ;;  %2131 = sbr.rel (!%p3106_p7) target bundleno = 1954 (0x7a2), region = 127  ;;  %2182 = vst [vmem:[%s2138_s8] sm:$0xff] (%p3106_p7), %v2181_v7 }
 0x796   : > { %v2096_v46 = vpop.f32.mrf.mxu1  ;;  %v2187_v14 = vld [vmem:[%s3864_s16 + $0x18] sm:$0xff] (%p3106_p7) }
 0x797   : > { %2124 = vst.msk [vmem:[%s3864_s16 + $0x38] sm:$0xff] %vm2116_vm3, %v2115_v63  ;;  %v2113_v31 = vadd.f32 %v2096_v46, %v1716_v57  ;;  %2188 = vst [vmem:[%s2138_s8 + $0x30] sm:$0xff] (%p3106_p7), %v2187_v14 }
 0x798   : > { %v2183_v12 = vld [vmem:[%s3864_s16 + $0x8] sm:$0xff] (%p3106_p7) }
 0x799   : > { %2122 = vst.msk [vmem:[%s3864_s16 + $0x28] sm:$0xff] %vm2116_vm3, %v2113_v31  ;;  %2184 = vst [vmem:[%s2138_s8 + $0x10] sm:$0xff] (%p3106_p7), %v2183_v12 }
 0x79a   : > { %v2193_v26 = vld [vmem:[%s3864_s16 + $0x30] sm:$0xff] }
 0x79b   : > { %2194 = vst [vmem:[%s2138_s8 + $0x60] sm:$0xff] %v2193_v26 }
 0x79c   : > { %v2189_v48 = vld [vmem:[%s3864_s16 + $0x20] sm:$0xff] }
 0x79d   : > { %2190 = vst [vmem:[%s2138_s8 + $0x40] sm:$0xff] %v2189_v48 }
 0x79e   : > { %v2195_v18 = vld [vmem:[%s3864_s16 + $0x38] sm:$0xff] }
 0x79f   : > { %2196 = vst [vmem:[%s2138_s8 + $0x70] sm:$0xff] %v2195_v18 }
 0x7a0   : > { %v2191_v49 = vld [vmem:[%s3864_s16 + $0x28] sm:$0xff] }
 0x7a1   : > { %2192 = vst [vmem:[%s2138_s8 + $0x50] sm:$0xff] %v2191_v49 }
 0x7a2 PF: > { %s16_s29 = sadd.s32 1, %s2996_s29   ;;  %s3938_s13 = sld [smem:[#allocation5_spill]] }
 0x7a3   : > { %p13_p0 = scmp.ge.s32.totalorder %s16_s29, 10   ;;  %s3939_s10 = sld [smem:[#allocation6_spill]] }
 0x7a4   : > { %s3940_s21 = smov %s2968_s22  ;;  %s3941_s22 = smov %s3120_s18 }
 0x7a5   : > { %s3942_s23 = smov %s2984_s26  ;;  %s3943_s24 = smov %s2988_s27 }
 0x7a6   : > { %s3944_s25 = smov %s2992_s28  ;;  %s3945_s26 = smov %s3949_s30 }
 0x7a7   :  { %15 = sbr.rel (!%p13_p0) target bundleno = 5 (0x5), region = 210 }
 0x7a8   : > { %s3946_s27 = smov %s3938_s13 }
 0x7a9   : > { %s3947_s28 = smov %s3939_s10 }

</bundles_post_ra>
